<compile_context>
chip_gen: v6e
topology: v6e:2x2x1
jax: 0.10.0
libtpu: 0.0.40
codegen_flags: <defaults>
</compile_context>

<pallas_src>
import functools

import jax
import jax.numpy as jnp
from jax import lax
from jax.experimental import pallas as pl
from jax.experimental.pallas import tpu as pltpu

HIDDEN = 64
PHYSIO_FEATURES = 4
PERF_FEATURES = 3
PSYCH_FEATURES = 3

FEAT_PAD = 8                    # per-stream feature pad (lane axis)
FW = 3 * FEAT_PAD               # 24  : concatenated x-slab lane width
SW = 256                        # fused hidden-state width: 3*64 padded to 2 vregs
GW = 4 * SW                     # 1024: packed gate lanes [I | F | O | G]
REC_ROWS = FW + SW + 8          # 288 : wih rows + whh rows + bias row (8-row padded)
HEAD_W = 128                    # lane-dense head width (hid and output)
BC_ROW = SW + HEAD_W            # 384 : fc_common bias row
BH_ROW = SW + HEAD_W + 8        # 392 : heads bias row
HEAD_ROWS = SW + HEAD_W + 16    # 400

_VMEM = pl.BlockSpec(memory_space=pltpu.MemorySpace.VMEM)
_GATE_SRC = (0, 1, 3, 2)        # packed group order [I,F,O,G] <- PyTorch chunks [i,f,g,o]


# ----------------------------- Pallas kernel --------------------------------


def fused_kernel(x_ref, rec_ref, head_ref, out_ref, xw_ref, *, seq_len, bp):
    """Fused block-diagonal 3-LSTM recurrence -> relu FC -> 2 heads."""
    wih = rec_ref[0:FW, :]                       # (24, 1024)  block-diag input proj
    whh = rec_ref[FW:FW + SW, :]                 # (256, 1024) block-diag recurrence
    b = rec_ref[FW + SW:FW + SW + 1, :]          # (1, 1024)   fused bias

    # Hoisted input projection for all three streams: one lane-dense MXU dot,
    # staged in VMEM scratch so the unrolled loop reads bounded slices.
    xw_ref[...] = jnp.dot(x_ref[...], wih, preferred_element_type=jnp.float32) + b

    h = jnp.zeros((bp, SW), jnp.float32)
    c = jnp.zeros((bp, SW), jnp.float32)
    # Statically unrolled serial recurrence: one (Bp,256)@(256,1024) dot per step;
    # every gate slice below starts on a 256-lane (vreg) boundary and is aligned
    # with h/c, so no cross-lane work is needed.
    for t in range(seq_len):
        gates = (jnp.dot(h, whh, preferred_element_type=jnp.float32)
                 + xw_ref[pl.ds(t * bp, bp), :])                     # (Bp, 1024)
        i = jax.nn.sigmoid(gates[:, 0 * SW:1 * SW])
        f = jax.nn.sigmoid(gates[:, 1 * SW:2 * SW])
        o = jax.nn.sigmoid(gates[:, 2 * SW:3 * SW])
        g = jnp.tanh(gates[:, 3 * SW:4 * SW])
        c = f * c + i * g
        h = o * jnp.tanh(c)
    # Pad lanes (192..255) of h/c stay exactly zero: their wih/whh columns and
    # bias lanes are zero, and the corresponding wc rows are zero below.

    wc = head_ref[0:SW, :]                       # (256, 128) fc_common (padded)
    wh = head_ref[SW:SW + HEAD_W, :]             # (128, 128) both heads (padded)
    bc = head_ref[BC_ROW:BC_ROW + 1, :]          # (1, 128)
    bh = head_ref[BH_ROW:BH_ROW + 1, :]          # (1, 128)

    hid = jnp.maximum(jnp.dot(h, wc, preferred_element_type=jnp.float32) + bc, 0.0)
    y = jnp.dot(hid, wh, preferred_element_type=jnp.float32) + bh    # (Bp, 128)
    # lane 0 = raw performance score, lane 1 = sigmoid(injury logit); rest is pad.
    lane = lax.broadcasted_iota(jnp.int32, y.shape, 1)
    out_ref[...] = jnp.where(lane == 1, jax.nn.sigmoid(y), y)


# --------------------------- weight packing (once) ----------------------------


def _pad_to(n, m):
    return ((n + m - 1) // m) * m


def pack_params(params):
    """One-time packing into two lane-dense weight slabs.

    rec slab  (288, 1024): rows [0:24)   = block-diag wih   (per-stream 8-row blocks)
                           rows [24:280) = block-diag whh   (per-stream 64-row blocks)
                           row  280      = fused bias (b_ih + b_hh)
      Lanes: four 256-wide gate groups [I|F|O|G]; inside each group stream s
      occupies lanes [s*64, s*64+64), lanes [192,256) are zero padding.

    head slab (400, 128): rows [0:256)   = wc (fc_common.w.T, rows 192.. zero, cols 32.. zero)
                          rows [256:384) = wh (col0 = performance, col1 = injury)
                          row  384       = fc_common bias, row 392 = head biases.
    """
    rec = jnp.zeros((REC_ROWS, GW), jnp.float32)
    for s, name in enumerate(("physio", "perf", "psych")):
        p = params[f"lstm_{name}"]
        w_ih = p["w_ih"].astype(jnp.float32)          # (4H, F)  PyTorch gate order i,f,g,o
        w_hh = p["w_hh"].astype(jnp.float32)          # (4H, H)
        bias = (p["b_ih"] + p["b_hh"]).astype(jnp.float32)
        feat = w_ih.shape[1]
        for tg, pg in enumerate(_GATE_SRC):
            col0 = tg * SW + s * HIDDEN
            gih = w_ih[pg * HIDDEN:(pg + 1) * HIDDEN, :].T      # (F, 64)
            ghh = w_hh[pg * HIDDEN:(pg + 1) * HIDDEN, :].T      # (64, 64)
            gb = bias[pg * HIDDEN:(pg + 1) * HIDDEN]            # (64,)
            rec = rec.at[s * FEAT_PAD:s * FEAT_PAD + feat, col0:col0 + HIDDEN].set(gih)
            rec = rec.at[FW + s * HIDDEN:FW + (s + 1) * HIDDEN, col0:col0 + HIDDEN].set(ghh)
            rec = rec.at[FW + SW, col0:col0 + HIDDEN].set(gb)

    head = jnp.zeros((HEAD_ROWS, HEAD_W), jnp.float32)
    head = head.at[0:3 * HIDDEN, 0:32].set(params["fc_common"]["w"].T.astype(jnp.float32))
    head = head.at[SW:SW + 32, 0].set(params["fc_performance"]["w"][0].astype(jnp.float32))
    head = head.at[SW:SW + 32, 1].set(params["fc_injury"]["w"][0].astype(jnp.float32))
    head = head.at[BC_ROW, 0:32].set(params["fc_common"]["b"].astype(jnp.float32))
    head = head.at[BH_ROW, 0].set(params["fc_performance"]["b"][0].astype(jnp.float32))
    head = head.at[BH_ROW, 1].set(params["fc_injury"]["b"][0].astype(jnp.float32))
    return dict(rec=rec, head=head)


# ------------------------------ forward wrapper --------------------------------


def _prep_x_slab(physio, perf, psych, seq_len, batch, bp):
    """Three batch-first (B,T,F_s) inputs -> one time-major (T*Bp, 24) slab."""
    slab = jnp.zeros((seq_len, bp, FW), jnp.float32)
    for s, x in enumerate((physio, perf, psych)):
        f = x.shape[-1]
        slab = slab.at[:, :batch, s * FEAT_PAD:s * FEAT_PAD + f].set(
            jnp.transpose(x.astype(jnp.float32), (1, 0, 2)))
    return slab.reshape(seq_len * bp, FW)


@jax.jit
def player_performance_forward(packed, physio, perf, psych):
    batch, seq_len, _ = physio.shape
    bp = _pad_to(batch, 8)
    x_slab = _prep_x_slab(physio, perf, psych, seq_len, batch, bp)

    out = pl.pallas_call(
        functools.partial(fused_kernel, seq_len=seq_len, bp=bp),
        out_shape=jax.ShapeDtypeStruct((bp, HEAD_W), jnp.float32),
        in_specs=[_VMEM, _VMEM, _VMEM],
        out_specs=_VMEM,
        scratch_shapes=[pltpu.VMEM((seq_len * bp, GW), jnp.float32)],
    )(x_slab, packed["rec"], packed["head"])

    out = out[:batch]
    return out[:, 0:1], out[:, 1:2]


# ------------------------------- param init -----------------------------------


def init_params(key, physio_features, perf_features, psych_features, hidden=HIDDEN):
    """Deterministic init mirroring PyTorch default shapes (gate order i,f,g,o)."""
    params = {}
    k = 1.0 / jnp.sqrt(hidden)

    def uni(key, shape, bound):
        return jax.random.uniform(key, shape, jnp.float32, -bound, bound)

    keys = jax.random.split(key, 32)
    ki = iter(range(32))
    for name, feat in (("physio", physio_features),
                       ("perf", perf_features),
                       ("psych", psych_features)):
        params[f"lstm_{name}"] = dict(
            w_ih=uni(keys[next(ki)], (4 * hidden, feat), k),
            w_hh=uni(keys[next(ki)], (4 * hidden, hidden), k),
            b_ih=uni(keys[next(ki)], (4 * hidden,), k),
            b_hh=uni(keys[next(ki)], (4 * hidden,), k),
        )
    kc = 1.0 / jnp.sqrt(hidden * 3)
    params["fc_common"] = dict(
        w=uni(keys[next(ki)], (32, hidden * 3), kc),
        b=uni(keys[next(ki)], (32,), kc))
    kh = 1.0 / jnp.sqrt(32)
    params["fc_performance"] = dict(
        w=uni(keys[next(ki)], (1, 32), kh), b=uni(keys[next(ki)], (1,), kh))
    params["fc_injury"] = dict(
        w=uni(keys[next(ki)], (1, 32), kh), b=uni(keys[next(ki)], (1,), kh))
    return params


# --------------------------- pure-JAX reference -------------------------------


def _lstm_ref(x, w_ih, w_hh, b_ih, b_hh):
    B, T, F = x.shape
    H = w_hh.shape[1]

    def step(carry, x_t):
        h, c = carry
        gates = x_t @ w_ih.T + h @ w_hh.T + b_ih + b_hh
        i = jax.nn.sigmoid(gates[:, 0:H])
        f = jax.nn.sigmoid(gates[:, H:2 * H])
        g = jnp.tanh(gates[:, 2 * H:3 * H])
        o = jax.nn.sigmoid(gates[:, 3 * H:4 * H])
        c = f * c + i * g
        h = o * jnp.tanh(c)
        return (h, c), None

    (h, _), _ = lax.scan(step, (jnp.zeros((B, H)), jnp.zeros((B, H))),
                         jnp.transpose(x, (1, 0, 2)))
    return h


def _forward_ref(params, physio, perf, psych):
    hs = [_lstm_ref(x, **params[f"lstm_{n}"])
          for n, x in (("physio", physio), ("perf", perf), ("psych", psych))]
    concat = jnp.concatenate(hs, axis=1)
    x = jax.nn.relu(concat @ params["fc_common"]["w"].T + params["fc_common"]["b"])
    p = x @ params["fc_performance"]["w"].T + params["fc_performance"]["b"]
    i = jax.nn.sigmoid(x @ params["fc_injury"]["w"].T + params["fc_injury"]["b"])
    return p, i


# ---------------------------------- main --------------------------------------


if __name__ == "__main__":
    key = jax.random.PRNGKey(0)
    k_params, k_physio, k_perf, k_psych = jax.random.split(key, 4)

    batch, time_steps = 2, 8
    physio = jax.random.normal(k_physio, (batch, time_steps, PHYSIO_FEATURES), jnp.float32)
    perf = jax.random.normal(k_perf, (batch, time_steps, PERF_FEATURES), jnp.float32)
    psych = jax.random.normal(k_psych, (batch, time_steps, PSYCH_FEATURES), jnp.float32)

    params = init_params(k_params, PHYSIO_FEATURES, PERF_FEATURES, PSYCH_FEATURES)
    packed = pack_params(params)   # one-time weight packing (not per forward call)

    performance_score, injury_risk = player_performance_forward(packed, physio, perf, psych)
    jax.block_until_ready((performance_score, injury_risk))

    ref_p, ref_i = _forward_ref(params, physio, perf, psych)
    assert performance_score.shape == (batch, 1) and injury_risk.shape == (batch, 1)
    assert jnp.allclose(performance_score, ref_p, atol=1e-4, rtol=1e-4)
    assert jnp.allclose(injury_risk, ref_i, atol=1e-4, rtol=1e-4)

    print("KERNEL_OK")
</pallas_src>

<mosaic_0001>
module attributes {stable_mosaic.version = 11 : i64} {
  func.func @fused_kernel(%arg0: memref<64x24xf32, #tpu.memory_space<vmem>>, %arg1: memref<288x1024xf32, #tpu.memory_space<vmem>>, %arg2: memref<400x128xf32, #tpu.memory_space<vmem>>, %arg3: memref<8x128xf32, #tpu.memory_space<vmem>>, %arg4: memref<64x1024xf32, #tpu.memory_space<vmem>>) attributes {dimension_semantics = [], scalar_prefetch = 0 : i64, scratch_operands = 1 : i64, tpu.core_type = #tpu.core_type<tc>} {
    %c0 = arith.constant 0 : index
    %c0_0 = arith.constant 0 : index
    %0 = vector.load %arg1[%c0, %c0_0] : memref<288x1024xf32, #tpu.memory_space<vmem>>, vector<24x1024xf32>
    %c24 = arith.constant 24 : index
    %c0_1 = arith.constant 0 : index
    %1 = vector.load %arg1[%c24, %c0_1] : memref<288x1024xf32, #tpu.memory_space<vmem>>, vector<256x1024xf32>
    %c280 = arith.constant 280 : index
    %c0_2 = arith.constant 0 : index
    %2 = vector.load %arg1[%c280, %c0_2] : memref<288x1024xf32, #tpu.memory_space<vmem>>, vector<1x1024xf32>
    %c0_3 = arith.constant 0 : index
    %c0_4 = arith.constant 0 : index
    %3 = vector.load %arg0[%c0_3, %c0_4] : memref<64x24xf32, #tpu.memory_space<vmem>>, vector<64x24xf32>
    %cst = arith.constant dense<0.000000e+00> : vector<64x1024xf32>
    %4 = tpu.matmul %3, %0, %cst {dimension_numbers = #tpu.dot_dimension_numbers<[1], [0], [0], [1], [0, 0, 1, 1], [], []>} : vector<64x24xf32>, vector<24x1024xf32>, vector<64x1024xf32> -> vector<64x1024xf32>
    %5 = vector.broadcast %2 : vector<1x1024xf32> to vector<64x1024xf32>
    %6 = arith.addf %4, %5 : vector<64x1024xf32>
    %c0_5 = arith.constant 0 : index
    %c0_6 = arith.constant 0 : index
    %7 = vector.load %arg4[%c0_5, %c0_6] : memref<64x1024xf32, #tpu.memory_space<vmem>>, vector<64x1024xf32>
    tpu.vector_store %arg4[%c0_5, %c0_6], %6 {strides = array<i32>} : memref<64x1024xf32, #tpu.memory_space<vmem>>, vector<64x1024xf32>,
    %cst_7 = arith.constant 0.000000e+00 : f32
    %8 = vector.broadcast %cst_7 : f32 to vector<8x256xf32>
    %cst_8 = arith.constant 0.000000e+00 : f32
    %9 = vector.broadcast %cst_8 : f32 to vector<8x256xf32>
    %cst_9 = arith.constant dense<0.000000e+00> : vector<8x1024xf32>
    %10 = tpu.matmul %8, %1, %cst_9 {dimension_numbers = #tpu.dot_dimension_numbers<[1], [0], [0], [1], [0, 0, 1, 1], [], []>} : vector<8x256xf32>, vector<256x1024xf32>, vector<8x1024xf32> -> vector<8x1024xf32>
    %c0_10 = arith.constant 0 : index
    %c0_11 = arith.constant 0 : index
    %11 = vector.load %arg4[%c0_10, %c0_11] : memref<64x1024xf32, #tpu.memory_space<vmem>>, vector<8x1024xf32>
    %12 = arith.addf %10, %11 : vector<8x1024xf32>
    %13 = vector.extract_strided_slice %12 {offsets = [0, 0], sizes = [8, 256], strides = [1, 1]} : vector<8x1024xf32> to vector<8x256xf32>
    %14 = arith.negf %13 : vector<8x256xf32>
    %15 = math.exp %14 : vector<8x256xf32>
    %cst_12 = arith.constant 1.000000e+00 : f32
    %16 = vector.broadcast %cst_12 : f32 to vector<8x256xf32>
    %17 = arith.addf %16, %15 : vector<8x256xf32>
    %18 = arith.divf %16, %17 : vector<8x256xf32>
    %19 = vector.extract_strided_slice %12 {offsets = [0, 256], sizes = [8, 256], strides = [1, 1]} : vector<8x1024xf32> to vector<8x256xf32>
    %20 = arith.negf %19 : vector<8x256xf32>
    %21 = math.exp %20 : vector<8x256xf32>
    %cst_13 = arith.constant 1.000000e+00 : f32
    %22 = vector.broadcast %cst_13 : f32 to vector<8x256xf32>
    %23 = arith.addf %22, %21 : vector<8x256xf32>
    %24 = arith.divf %22, %23 : vector<8x256xf32>
    %25 = vector.extract_strided_slice %12 {offsets = [0, 512], sizes = [8, 256], strides = [1, 1]} : vector<8x1024xf32> to vector<8x256xf32>
    %26 = arith.negf %25 : vector<8x256xf32>
    %27 = math.exp %26 : vector<8x256xf32>
    %cst_14 = arith.constant 1.000000e+00 : f32
    %28 = vector.broadcast %cst_14 : f32 to vector<8x256xf32>
    %29 = arith.addf %28, %27 : vector<8x256xf32>
    %30 = arith.divf %28, %29 : vector<8x256xf32>
    %31 = vector.extract_strided_slice %12 {offsets = [0, 768], sizes = [8, 256], strides = [1, 1]} : vector<8x1024xf32> to vector<8x256xf32>
    %32 = math.tanh %31 : vector<8x256xf32>
    %33 = arith.mulf %24, %9 : vector<8x256xf32>
    %34 = arith.mulf %18, %32 : vector<8x256xf32>
    %35 = arith.addf %33, %34 : vector<8x256xf32>
    %36 = math.tanh %35 : vector<8x256xf32>
    %37 = arith.mulf %30, %36 : vector<8x256xf32>
    %cst_15 = arith.constant dense<0.000000e+00> : vector<8x1024xf32>
    %38 = tpu.matmul %37, %1, %cst_15 {dimension_numbers = #tpu.dot_dimension_numbers<[1], [0], [0], [1], [0, 0, 1, 1], [], []>} : vector<8x256xf32>, vector<256x1024xf32>, vector<8x1024xf32> -> vector<8x1024xf32>
    %c8 = arith.constant 8 : index
    %c0_16 = arith.constant 0 : index
    %39 = vector.load %arg4[%c8, %c0_16] : memref<64x1024xf32, #tpu.memory_space<vmem>>, vector<8x1024xf32>
    %40 = arith.addf %38, %39 : vector<8x1024xf32>
    %41 = vector.extract_strided_slice %40 {offsets = [0, 0], sizes = [8, 256], strides = [1, 1]} : vector<8x1024xf32> to vector<8x256xf32>
    %42 = arith.negf %41 : vector<8x256xf32>
    %43 = math.exp %42 : vector<8x256xf32>
    %cst_17 = arith.constant 1.000000e+00 : f32
    %44 = vector.broadcast %cst_17 : f32 to vector<8x256xf32>
    %45 = arith.addf %44, %43 : vector<8x256xf32>
    %46 = arith.divf %44, %45 : vector<8x256xf32>
    %47 = vector.extract_strided_slice %40 {offsets = [0, 256], sizes = [8, 256], strides = [1, 1]} : vector<8x1024xf32> to vector<8x256xf32>
    %48 = arith.negf %47 : vector<8x256xf32>
    %49 = math.exp %48 : vector<8x256xf32>
    %cst_18 = arith.constant 1.000000e+00 : f32
    %50 = vector.broadcast %cst_18 : f32 to vector<8x256xf32>
    %51 = arith.addf %50, %49 : vector<8x256xf32>
    %52 = arith.divf %50, %51 : vector<8x256xf32>
    %53 = vector.extract_strided_slice %40 {offsets = [0, 512], sizes = [8, 256], strides = [1, 1]} : vector<8x1024xf32> to vector<8x256xf32>
    %54 = arith.negf %53 : vector<8x256xf32>
    %55 = math.exp %54 : vector<8x256xf32>
    %cst_19 = arith.constant 1.000000e+00 : f32
    %56 = vector.broadcast %cst_19 : f32 to vector<8x256xf32>
    %57 = arith.addf %56, %55 : vector<8x256xf32>
    %58 = arith.divf %56, %57 : vector<8x256xf32>
    %59 = vector.extract_strided_slice %40 {offsets = [0, 768], sizes = [8, 256], strides = [1, 1]} : vector<8x1024xf32> to vector<8x256xf32>
    %60 = math.tanh %59 : vector<8x256xf32>
    %61 = arith.mulf %52, %35 : vector<8x256xf32>
    %62 = arith.mulf %46, %60 : vector<8x256xf32>
    %63 = arith.addf %61, %62 : vector<8x256xf32>
    %64 = math.tanh %63 : vector<8x256xf32>
    %65 = arith.mulf %58, %64 : vector<8x256xf32>
    %cst_20 = arith.constant dense<0.000000e+00> : vector<8x1024xf32>
    %66 = tpu.matmul %65, %1, %cst_20 {dimension_numbers = #tpu.dot_dimension_numbers<[1], [0], [0], [1], [0, 0, 1, 1], [], []>} : vector<8x256xf32>, vector<256x1024xf32>, vector<8x1024xf32> -> vector<8x1024xf32>
    %c16 = arith.constant 16 : index
    %c0_21 = arith.constant 0 : index
    %67 = vector.load %arg4[%c16, %c0_21] : memref<64x1024xf32, #tpu.memory_space<vmem>>, vector<8x1024xf32>
    %68 = arith.addf %66, %67 : vector<8x1024xf32>
    %69 = vector.extract_strided_slice %68 {offsets = [0, 0], sizes = [8, 256], strides = [1, 1]} : vector<8x1024xf32> to vector<8x256xf32>
    %70 = arith.negf %69 : vector<8x256xf32>
    %71 = math.exp %70 : vector<8x256xf32>
    %cst_22 = arith.constant 1.000000e+00 : f32
    %72 = vector.broadcast %cst_22 : f32 to vector<8x256xf32>
    %73 = arith.addf %72, %71 : vector<8x256xf32>
    %74 = arith.divf %72, %73 : vector<8x256xf32>
    %75 = vector.extract_strided_slice %68 {offsets = [0, 256], sizes = [8, 256], strides = [1, 1]} : vector<8x1024xf32> to vector<8x256xf32>
    %76 = arith.negf %75 : vector<8x256xf32>
    %77 = math.exp %76 : vector<8x256xf32>
    %cst_23 = arith.constant 1.000000e+00 : f32
    %78 = vector.broadcast %cst_23 : f32 to vector<8x256xf32>
    %79 = arith.addf %78, %77 : vector<8x256xf32>
    %80 = arith.divf %78, %79 : vector<8x256xf32>
    %81 = vector.extract_strided_slice %68 {offsets = [0, 512], sizes = [8, 256], strides = [1, 1]} : vector<8x1024xf32> to vector<8x256xf32>
    %82 = arith.negf %81 : vector<8x256xf32>
    %83 = math.exp %82 : vector<8x256xf32>
    %cst_24 = arith.constant 1.000000e+00 : f32
    %84 = vector.broadcast %cst_24 : f32 to vector<8x256xf32>
    %85 = arith.addf %84, %83 : vector<8x256xf32>
    %86 = arith.divf %84, %85 : vector<8x256xf32>
    %87 = vector.extract_strided_slice %68 {offsets = [0, 768], sizes = [8, 256], strides = [1, 1]} : vector<8x1024xf32> to vector<8x256xf32>
    %88 = math.tanh %87 : vector<8x256xf32>
    %89 = arith.mulf %80, %63 : vector<8x256xf32>
    %90 = arith.mulf %74, %88 : vector<8x256xf32>
    %91 = arith.addf %89, %90 : vector<8x256xf32>
    %92 = math.tanh %91 : vector<8x256xf32>
    %93 = arith.mulf %86, %92 : vector<8x256xf32>
    %cst_25 = arith.constant dense<0.000000e+00> : vector<8x1024xf32>
    %94 = tpu.matmul %93, %1, %cst_25 {dimension_numbers = #tpu.dot_dimension_numbers<[1], [0], [0], [1], [0, 0, 1, 1], [], []>} : vector<8x256xf32>, vector<256x1024xf32>, vector<8x1024xf32> -> vector<8x1024xf32>
    %c24_26 = arith.constant 24 : index
    %c0_27 = arith.constant 0 : index
    %95 = vector.load %arg4[%c24_26, %c0_27] : memref<64x1024xf32, #tpu.memory_space<vmem>>, vector<8x1024xf32>
    %96 = arith.addf %94, %95 : vector<8x1024xf32>
    %97 = vector.extract_strided_slice %96 {offsets = [0, 0], sizes = [8, 256], strides = [1, 1]} : vector<8x1024xf32> to vector<8x256xf32>
    %98 = arith.negf %97 : vector<8x256xf32>
    %99 = math.exp %98 : vector<8x256xf32>
    %cst_28 = arith.constant 1.000000e+00 : f32
    %100 = vector.broadcast %cst_28 : f32 to vector<8x256xf32>
    %101 = arith.addf %100, %99 : vector<8x256xf32>
    %102 = arith.divf %100, %101 : vector<8x256xf32>
    %103 = vector.extract_strided_slice %96 {offsets = [0, 256], sizes = [8, 256], strides = [1, 1]} : vector<8x1024xf32> to vector<8x256xf32>
    %104 = arith.negf %103 : vector<8x256xf32>
    %105 = math.exp %104 : vector<8x256xf32>
    %cst_29 = arith.constant 1.000000e+00 : f32
    %106 = vector.broadcast %cst_29 : f32 to vector<8x256xf32>
    %107 = arith.addf %106, %105 : vector<8x256xf32>
    %108 = arith.divf %106, %107 : vector<8x256xf32>
    %109 = vector.extract_strided_slice %96 {offsets = [0, 512], sizes = [8, 256], strides = [1, 1]} : vector<8x1024xf32> to vector<8x256xf32>
    %110 = arith.negf %109 : vector<8x256xf32>
    %111 = math.exp %110 : vector<8x256xf32>
    %cst_30 = arith.constant 1.000000e+00 : f32
    %112 = vector.broadcast %cst_30 : f32 to vector<8x256xf32>
    %113 = arith.addf %112, %111 : vector<8x256xf32>
    %114 = arith.divf %112, %113 : vector<8x256xf32>
    %115 = vector.extract_strided_slice %96 {offsets = [0, 768], sizes = [8, 256], strides = [1, 1]} : vector<8x1024xf32> to vector<8x256xf32>
    %116 = math.tanh %115 : vector<8x256xf32>
    %117 = arith.mulf %108, %91 : vector<8x256xf32>
    %118 = arith.mulf %102, %116 : vector<8x256xf32>
    %119 = arith.addf %117, %118 : vector<8x256xf32>
    %120 = math.tanh %119 : vector<8x256xf32>
    %121 = arith.mulf %114, %120 : vector<8x256xf32>
    %cst_31 = arith.constant dense<0.000000e+00> : vector<8x1024xf32>
    %122 = tpu.matmul %121, %1, %cst_31 {dimension_numbers = #tpu.dot_dimension_numbers<[1], [0], [0], [1], [0, 0, 1, 1], [], []>} : vector<8x256xf32>, vector<256x1024xf32>, vector<8x1024xf32> -> vector<8x1024xf32>
    %c32 = arith.constant 32 : index
    %c0_32 = arith.constant 0 : index
    %123 = vector.load %arg4[%c32, %c0_32] : memref<64x1024xf32, #tpu.memory_space<vmem>>, vector<8x1024xf32>
    %124 = arith.addf %122, %123 : vector<8x1024xf32>
    %125 = vector.extract_strided_slice %124 {offsets = [0, 0], sizes = [8, 256], strides = [1, 1]} : vector<8x1024xf32> to vector<8x256xf32>
    %126 = arith.negf %125 : vector<8x256xf32>
    %127 = math.exp %126 : vector<8x256xf32>
    %cst_33 = arith.constant 1.000000e+00 : f32
    %128 = vector.broadcast %cst_33 : f32 to vector<8x256xf32>
    %129 = arith.addf %128, %127 : vector<8x256xf32>
    %130 = arith.divf %128, %129 : vector<8x256xf32>
    %131 = vector.extract_strided_slice %124 {offsets = [0, 256], sizes = [8, 256], strides = [1, 1]} : vector<8x1024xf32> to vector<8x256xf32>
    %132 = arith.negf %131 : vector<8x256xf32>
    %133 = math.exp %132 : vector<8x256xf32>
    %cst_34 = arith.constant 1.000000e+00 : f32
    %134 = vector.broadcast %cst_34 : f32 to vector<8x256xf32>
    %135 = arith.addf %134, %133 : vector<8x256xf32>
    %136 = arith.divf %134, %135 : vector<8x256xf32>
    %137 = vector.extract_strided_slice %124 {offsets = [0, 512], sizes = [8, 256], strides = [1, 1]} : vector<8x1024xf32> to vector<8x256xf32>
    %138 = arith.negf %137 : vector<8x256xf32>
    %139 = math.exp %138 : vector<8x256xf32>
    %cst_35 = arith.constant 1.000000e+00 : f32
    %140 = vector.broadcast %cst_35 : f32 to vector<8x256xf32>
    %141 = arith.addf %140, %139 : vector<8x256xf32>
    %142 = arith.divf %140, %141 : vector<8x256xf32>
    %143 = vector.extract_strided_slice %124 {offsets = [0, 768], sizes = [8, 256], strides = [1, 1]} : vector<8x1024xf32> to vector<8x256xf32>
    %144 = math.tanh %143 : vector<8x256xf32>
    %145 = arith.mulf %136, %119 : vector<8x256xf32>
    %146 = arith.mulf %130, %144 : vector<8x256xf32>
    %147 = arith.addf %145, %146 : vector<8x256xf32>
    %148 = math.tanh %147 : vector<8x256xf32>
    %149 = arith.mulf %142, %148 : vector<8x256xf32>
    %cst_36 = arith.constant dense<0.000000e+00> : vector<8x1024xf32>
    %150 = tpu.matmul %149, %1, %cst_36 {dimension_numbers = #tpu.dot_dimension_numbers<[1], [0], [0], [1], [0, 0, 1, 1], [], []>} : vector<8x256xf32>, vector<256x1024xf32>, vector<8x1024xf32> -> vector<8x1024xf32>
    %c40 = arith.constant 40 : index
    %c0_37 = arith.constant 0 : index
    %151 = vector.load %arg4[%c40, %c0_37] : memref<64x1024xf32, #tpu.memory_space<vmem>>, vector<8x1024xf32>
    %152 = arith.addf %150, %151 : vector<8x1024xf32>
    %153 = vector.extract_strided_slice %152 {offsets = [0, 0], sizes = [8, 256], strides = [1, 1]} : vector<8x1024xf32> to vector<8x256xf32>
    %154 = arith.negf %153 : vector<8x256xf32>
    %155 = math.exp %154 : vector<8x256xf32>
    %cst_38 = arith.constant 1.000000e+00 : f32
    %156 = vector.broadcast %cst_38 : f32 to vector<8x256xf32>
    %157 = arith.addf %156, %155 : vector<8x256xf32>
    %158 = arith.divf %156, %157 : vector<8x256xf32>
    %159 = vector.extract_strided_slice %152 {offsets = [0, 256], sizes = [8, 256], strides = [1, 1]} : vector<8x1024xf32> to vector<8x256xf32>
    %160 = arith.negf %159 : vector<8x256xf32>
    %161 = math.exp %160 : vector<8x256xf32>
    %cst_39 = arith.constant 1.000000e+00 : f32
    %162 = vector.broadcast %cst_39 : f32 to vector<8x256xf32>
    %163 = arith.addf %162, %161 : vector<8x256xf32>
    %164 = arith.divf %162, %163 : vector<8x256xf32>
    %165 = vector.extract_strided_slice %152 {offsets = [0, 512], sizes = [8, 256], strides = [1, 1]} : vector<8x1024xf32> to vector<8x256xf32>
    %166 = arith.negf %165 : vector<8x256xf32>
    %167 = math.exp %166 : vector<8x256xf32>
    %cst_40 = arith.constant 1.000000e+00 : f32
    %168 = vector.broadcast %cst_40 : f32 to vector<8x256xf32>
    %169 = arith.addf %168, %167 : vector<8x256xf32>
    %170 = arith.divf %168, %169 : vector<8x256xf32>
    %171 = vector.extract_strided_slice %152 {offsets = [0, 768], sizes = [8, 256], strides = [1, 1]} : vector<8x1024xf32> to vector<8x256xf32>
    %172 = math.tanh %171 : vector<8x256xf32>
    %173 = arith.mulf %164, %147 : vector<8x256xf32>
    %174 = arith.mulf %158, %172 : vector<8x256xf32>
    %175 = arith.addf %173, %174 : vector<8x256xf32>
    %176 = math.tanh %175 : vector<8x256xf32>
    %177 = arith.mulf %170, %176 : vector<8x256xf32>
    %cst_41 = arith.constant dense<0.000000e+00> : vector<8x1024xf32>
    %178 = tpu.matmul %177, %1, %cst_41 {dimension_numbers = #tpu.dot_dimension_numbers<[1], [0], [0], [1], [0, 0, 1, 1], [], []>} : vector<8x256xf32>, vector<256x1024xf32>, vector<8x1024xf32> -> vector<8x1024xf32>
    %c48 = arith.constant 48 : index
    %c0_42 = arith.constant 0 : index
    %179 = vector.load %arg4[%c48, %c0_42] : memref<64x1024xf32, #tpu.memory_space<vmem>>, vector<8x1024xf32>
    %180 = arith.addf %178, %179 : vector<8x1024xf32>
    %181 = vector.extract_strided_slice %180 {offsets = [0, 0], sizes = [8, 256], strides = [1, 1]} : vector<8x1024xf32> to vector<8x256xf32>
    %182 = arith.negf %181 : vector<8x256xf32>
    %183 = math.exp %182 : vector<8x256xf32>
    %cst_43 = arith.constant 1.000000e+00 : f32
    %184 = vector.broadcast %cst_43 : f32 to vector<8x256xf32>
    %185 = arith.addf %184, %183 : vector<8x256xf32>
    %186 = arith.divf %184, %185 : vector<8x256xf32>
    %187 = vector.extract_strided_slice %180 {offsets = [0, 256], sizes = [8, 256], strides = [1, 1]} : vector<8x1024xf32> to vector<8x256xf32>
    %188 = arith.negf %187 : vector<8x256xf32>
    %189 = math.exp %188 : vector<8x256xf32>
    %cst_44 = arith.constant 1.000000e+00 : f32
    %190 = vector.broadcast %cst_44 : f32 to vector<8x256xf32>
    %191 = arith.addf %190, %189 : vector<8x256xf32>
    %192 = arith.divf %190, %191 : vector<8x256xf32>
    %193 = vector.extract_strided_slice %180 {offsets = [0, 512], sizes = [8, 256], strides = [1, 1]} : vector<8x1024xf32> to vector<8x256xf32>
    %194 = arith.negf %193 : vector<8x256xf32>
    %195 = math.exp %194 : vector<8x256xf32>
    %cst_45 = arith.constant 1.000000e+00 : f32
    %196 = vector.broadcast %cst_45 : f32 to vector<8x256xf32>
    %197 = arith.addf %196, %195 : vector<8x256xf32>
    %198 = arith.divf %196, %197 : vector<8x256xf32>
    %199 = vector.extract_strided_slice %180 {offsets = [0, 768], sizes = [8, 256], strides = [1, 1]} : vector<8x1024xf32> to vector<8x256xf32>
    %200 = math.tanh %199 : vector<8x256xf32>
    %201 = arith.mulf %192, %175 : vector<8x256xf32>
    %202 = arith.mulf %186, %200 : vector<8x256xf32>
    %203 = arith.addf %201, %202 : vector<8x256xf32>
    %204 = math.tanh %203 : vector<8x256xf32>
    %205 = arith.mulf %198, %204 : vector<8x256xf32>
    %cst_46 = arith.constant dense<0.000000e+00> : vector<8x1024xf32>
    %206 = tpu.matmul %205, %1, %cst_46 {dimension_numbers = #tpu.dot_dimension_numbers<[1], [0], [0], [1], [0, 0, 1, 1], [], []>} : vector<8x256xf32>, vector<256x1024xf32>, vector<8x1024xf32> -> vector<8x1024xf32>
    %c56 = arith.constant 56 : index
    %c0_47 = arith.constant 0 : index
    %207 = vector.load %arg4[%c56, %c0_47] : memref<64x1024xf32, #tpu.memory_space<vmem>>, vector<8x1024xf32>
    %208 = arith.addf %206, %207 : vector<8x1024xf32>
    %209 = vector.extract_strided_slice %208 {offsets = [0, 0], sizes = [8, 256], strides = [1, 1]} : vector<8x1024xf32> to vector<8x256xf32>
    %210 = arith.negf %209 : vector<8x256xf32>
    %211 = math.exp %210 : vector<8x256xf32>
    %cst_48 = arith.constant 1.000000e+00 : f32
    %212 = vector.broadcast %cst_48 : f32 to vector<8x256xf32>
    %213 = arith.addf %212, %211 : vector<8x256xf32>
    %214 = arith.divf %212, %213 : vector<8x256xf32>
    %215 = vector.extract_strided_slice %208 {offsets = [0, 256], sizes = [8, 256], strides = [1, 1]} : vector<8x1024xf32> to vector<8x256xf32>
    %216 = arith.negf %215 : vector<8x256xf32>
    %217 = math.exp %216 : vector<8x256xf32>
    %cst_49 = arith.constant 1.000000e+00 : f32
    %218 = vector.broadcast %cst_49 : f32 to vector<8x256xf32>
    %219 = arith.addf %218, %217 : vector<8x256xf32>
    %220 = arith.divf %218, %219 : vector<8x256xf32>
    %221 = vector.extract_strided_slice %208 {offsets = [0, 512], sizes = [8, 256], strides = [1, 1]} : vector<8x1024xf32> to vector<8x256xf32>
    %222 = arith.negf %221 : vector<8x256xf32>
    %223 = math.exp %222 : vector<8x256xf32>
    %cst_50 = arith.constant 1.000000e+00 : f32
    %224 = vector.broadcast %cst_50 : f32 to vector<8x256xf32>
    %225 = arith.addf %224, %223 : vector<8x256xf32>
    %226 = arith.divf %224, %225 : vector<8x256xf32>
    %227 = vector.extract_strided_slice %208 {offsets = [0, 768], sizes = [8, 256], strides = [1, 1]} : vector<8x1024xf32> to vector<8x256xf32>
    %228 = math.tanh %227 : vector<8x256xf32>
    %229 = arith.mulf %220, %203 : vector<8x256xf32>
    %230 = arith.mulf %214, %228 : vector<8x256xf32>
    %231 = arith.addf %229, %230 : vector<8x256xf32>
    %232 = math.tanh %231 : vector<8x256xf32>
    %233 = arith.mulf %226, %232 : vector<8x256xf32>
    %c0_51 = arith.constant 0 : index
    %c0_52 = arith.constant 0 : index
    %234 = vector.load %arg2[%c0_51, %c0_52] : memref<400x128xf32, #tpu.memory_space<vmem>>, vector<256x128xf32>
    %c256 = arith.constant 256 : index
    %c0_53 = arith.constant 0 : index
    %235 = vector.load %arg2[%c256, %c0_53] : memref<400x128xf32, #tpu.memory_space<vmem>>, vector<128x128xf32>
    %c384 = arith.constant 384 : index
    %c0_54 = arith.constant 0 : index
    %236 = vector.load %arg2[%c384, %c0_54] : memref<400x128xf32, #tpu.memory_space<vmem>>, vector<1x128xf32>
    %c392 = arith.constant 392 : index
    %c0_55 = arith.constant 0 : index
    %237 = vector.load %arg2[%c392, %c0_55] : memref<400x128xf32, #tpu.memory_space<vmem>>, vector<1x128xf32>
    %cst_56 = arith.constant dense<0.000000e+00> : vector<8x128xf32>
    %238 = tpu.matmul %233, %234, %cst_56 {dimension_numbers = #tpu.dot_dimension_numbers<[1], [0], [0], [1], [0, 0, 1, 1], [], []>} : vector<8x256xf32>, vector<256x128xf32>, vector<8x128xf32> -> vector<8x128xf32>
    %239 = vector.broadcast %236 : vector<1x128xf32> to vector<8x128xf32>
    %240 = arith.addf %238, %239 : vector<8x128xf32>
    %cst_57 = arith.constant 0.000000e+00 : f32
    %241 = vector.broadcast %cst_57 : f32 to vector<8x128xf32>
    %242 = arith.maximumf %240, %241 : vector<8x128xf32>
    %cst_58 = arith.constant dense<0.000000e+00> : vector<8x128xf32>
    %243 = tpu.matmul %242, %235, %cst_58 {dimension_numbers = #tpu.dot_dimension_numbers<[1], [0], [0], [1], [0, 0, 1, 1], [], []>} : vector<8x128xf32>, vector<128x128xf32>, vector<8x128xf32> -> vector<8x128xf32>
    %244 = vector.broadcast %237 : vector<1x128xf32> to vector<8x128xf32>
    %245 = arith.addf %243, %244 : vector<8x128xf32>
    %246 = tpu.iota {dimensions = array<i32: 1>} : vector<8x128xi32>
    %c1_i32 = arith.constant 1 : i32
    %247 = vector.broadcast %c1_i32 : i32 to vector<8x128xi32>
    %248 = arith.cmpi eq, %246, %247 : vector<8x128xi32>
    %249 = arith.negf %245 : vector<8x128xf32>
    %250 = math.exp %249 : vector<8x128xf32>
    %cst_59 = arith.constant 1.000000e+00 : f32
    %251 = vector.broadcast %cst_59 : f32 to vector<8x128xf32>
    %252 = arith.addf %251, %250 : vector<8x128xf32>
    %253 = arith.divf %251, %252 : vector<8x128xf32>
    %254 = arith.select %248, %253, %245 : vector<8x128xi1>, vector<8x128xf32>
    %c0_60 = arith.constant 0 : index
    %c0_61 = arith.constant 0 : index
    %255 = vector.load %arg3[%c0_60, %c0_61] : memref<8x128xf32, #tpu.memory_space<vmem>>, vector<8x128xf32>
    tpu.vector_store %arg3[%c0_60, %c0_61], %254 {strides = array<i32>} : memref<8x128xf32, #tpu.memory_space<vmem>>, vector<8x128xf32>,
    return
  }
}

</mosaic_0001>

<bundles_post_ra>
// kernel: player_performance_forward.1
= control target key start
LH: loop header
LB: loop body
LE: loop exit
PB: predicated region body
PF: predicated region fallthrough
CT: control target
= control target key end

     0   :  { %8 = vsyncpa [#allocation4], 0  ;;  %s9272_s0 = inlined_call_operand.vmem [shape: f32[64,24], index: 0, kind: input, shape index: {}]   ;;  %s9273_s1 = inlined_call_operand.hbm [shape: f32[288,1024], index: 1, kind: input, shape index: {}]   ;;  %s9274_s2 = inlined_call_operand.hbm [shape: f32[400,128], index: 2, kind: input, shape index: {}]   ;;  %s9275_s3 = inlined_call_operand.vmem [shape: f32[8,128], index: 3, kind: output, shape index: {}]  }
   0x1   :  { %9 = vsyncpa [#allocation6], 0  ;;  %s5274_s12 = smov [#allocation3]  }
   0x2   :  { %s17_s13 = sshll.u32 %s5274_s12, 4  ;;  %s18_s13 = int_to_ptr.vmem [resolvable:$true] %s17_s13 }
   0x3   :  { %s5238_s14 = scalar_lea.vmem %s18_s13, 36864  ;;  %p5243_p1 = scmp.lt.s32.totalorder %s18_s13, %s18_s13 }
   0x4   :  { %p5239_p0 = scmp.ne.s32.totalorder %s18_s13, %s5238_s14  ;;  %p5244_p2 = scmp.lt.s32.totalorder %s5238_s14, %s5238_s14 }
   0x6   :  { %p5245_p3 = por %p5244_p2, %p5243_p1 }
   0x8   :  { %p5246_p4 = pnand %p5245_p3, %p5239_p0 }
   0xa   :  { %5249 = shalt.err (!%p5246_p4)
}
   0xb   :  { %s5275_s15 = smov 1024   ;;  %s5276_s16 = smov 64  }
   0xc   :  { %23 = dma.hbm_to_vmem [thread:$0]  %s9273_s1, 36864, %s18_s13, [#allocation4], %s5275_s15, %s5275_s15, %s5276_s16  }
   0xd   :  { %s5277_s19 = smov [#allocation5]  }
   0xe   :  { %s29_s20 = sshll.u32 %s5277_s19, 4  ;;  %s30_s20 = int_to_ptr.vmem [resolvable:$true] %s29_s20 }
   0xf   :  { %s5258_s21 = scalar_lea.vmem %s30_s20, 6400  ;;  %p5263_p6 = scmp.lt.s32.totalorder %s30_s20, %s30_s20 }
  0x10   :  { %p5259_p5 = scmp.ne.s32.totalorder %s30_s20, %s5258_s21  ;;  %p5264_p7 = scmp.lt.s32.totalorder %s5258_s21, %s5258_s21 }
  0x12   :  { %p5265_p8 = por %p5264_p7, %p5263_p6 }
  0x14   :  { %p5266_p9 = pnand %p5265_p8, %p5259_p5 }
  0x16   :  { %5269 = shalt.err (!%p5266_p9)
}
  0x17   :  { %s5278_s22 = smov 128   ;;  %s5279_s23 = smov 8  }
  0x18   :  { %35 = dma.hbm_to_vmem [thread:$0]  %s9274_s2, 6400, %s30_s20, [#allocation6], %s5278_s22, %s5278_s22, %s5279_s23  }
  0x19   :  { %5270 = dma.done.wait [#allocation4], 36864  }
  0x1a   :  { %5271 = vsyncadd [#allocation4], 4294930432 }
  0x1b   :  { %5272 = dma.done.wait [#allocation6], 6400  }
  0x1c   :  { %5273 = vsyncadd [#allocation6], 4294960896  ;;  %v9276_v0 = vmov 0.0   ;;  %v59_v1 = vld [vmem:[#allocation3 + $0x88] sm:$0xff]  ;;  %v61_v2 = vld [vmem:[#allocation3 + $0x98] sm:$0xff]  ;;  %vm375_vm0 = vcmask 195584  }
  0x1d   :  { %464 = vmatprep.mubr.f32.mxu0 %v9276_v0  ;;  %577 = vmatprep.mubr.f32.mxu1 %v9276_v0  ;;  %v58_v3 = vld [vmem:[#allocation3 + $0x80] sm:$0xff]  ;;  %v60_v4 = vld [vmem:[#allocation3 + $0x90] sm:$0xff]  ;;  %v51_v5 = vld [vmem:[#allocation3 + $0x48] sm:$0xff]  ;;  %vm5281_vm1 = vmmov 0  }
  0x1e   :  { %426 = vmatprep.subr.mxu0 %v59_v1  ;;  %539 = vmatprep.subr.mxu1 %v61_v2  ;;  %v53_v6 = vld [vmem:[#allocation3 + $0x58] sm:$0xff]  ;;  %v50_v7 = vld [vmem:[#allocation3 + $0x40] sm:$0xff]  ;;  %v52_v8 = vld [vmem:[#allocation3 + $0x50] sm:$0xff] }
  0x1f   :  { %427 = vmatpush1.msra.mxu0 %v58_v3  ;;  %540 = vmatpush1.msra.mxu1 %v60_v4  ;;  %v43_v9 = vld [vmem:[#allocation3 + $0x8] sm:$0xff]  ;;  %v45_v10 = vld [vmem:[#allocation3 + $0x18] sm:$0xff]  ;;  %v42_v11 = vld [vmem:[#allocation3] sm:$0xff] }
  0x20   :  { %428 = vmatprep.subr.mxu0 %v51_v5  ;;  %541 = vmatprep.subr.mxu1 %v53_v6  ;;  %v44_v12 = vld [vmem:[#allocation3 + $0x10] sm:$0xff]  ;;  %v5313_v13 = vld [vmem:[%s9272_s0] sm:$0xff]  ;;  %v63_v14 = vld [vmem:[#allocation3 + $0xa8] sm:$0xff] }
  0x21   :  { %429 = vmatpush1.msra.mxu0 %v50_v7  ;;  %542 = vmatpush1.msra.mxu1 %v52_v8  ;;  %v65_v15 = vld [vmem:[#allocation3 + $0xb8] sm:$0xff]  ;;  %v62_v16 = vld [vmem:[#allocation3 + $0xa0] sm:$0xff]  ;;  %v64_v17 = vld [vmem:[#allocation3 + $0xb0] sm:$0xff] }
  0x22   :  { %430 = vmatprep.subr.mxu0 %v43_v9  ;;  %543 = vmatprep.subr.mxu1 %v45_v10  ;;  %v5322_v18 = vld [vmem:[%s9272_s0 + $0x8] sm:$0xff]  ;;  %v57_v20 = vld [vmem:[#allocation3 + $0x78] sm:$0xff]  ;;  %v54_v21 = vld [vmem:[#allocation3 + $0x60] sm:$0xff] }
  0x23   :  { %431 = vmatpush1.msra.mxu0 %v42_v11  ;;  %544 = vmatpush1.msra.mxu1 %v44_v12  ;;  %v55_v19 = vld [vmem:[#allocation3 + $0x68] sm:$0xff]  ;;  %v56_v22 = vld [vmem:[#allocation3 + $0x70] sm:$0xff]  ;;  %v49_v25 = vld [vmem:[#allocation3 + $0x38] sm:$0xff] }
  0x24   :  { %3852 = vmatmul.mubr.msk.f32.vlgmr.msra.gmra.mxu0 %vm375_vm0, %v5313_v13  ;;  %3860 = vmatmul.mubr.msk.f32.vlgmr.msra.gmra.mxu1 %vm375_vm0, %v5313_v13  ;;  %v5335_v23 = vld [vmem:[%s9272_s0 + $0x10] sm:$0xff]  ;;  %v47_v24 = vld [vmem:[#allocation3 + $0x28] sm:$0xff]  ;;  %v46_v26 = vld [vmem:[#allocation3 + $0x20] sm:$0xff] }
  0x25   :  { %652 = vmatprep.subr.mxu0 %v63_v14  ;;  %765 = vmatprep.subr.mxu1 %v65_v15  ;;  %v48_v27 = vld [vmem:[#allocation3 + $0x30] sm:$0xff]  ;;  %v5346_v28 = vld [vmem:[%s9272_s0 + $0x18] sm:$0xff]  ;;  %v187_v29 = vld [vmem:[#allocation3 + $0x488] sm:$0xff] }
  0x26   :  { %653 = vmatpush1.msra.mxu0 %v62_v16  ;;  %766 = vmatpush1.msra.mxu1 %v64_v17  ;;  %v189_v30 = vld [vmem:[#allocation3 + $0x498] sm:$0xff]  ;;  %v5357_v31 = vld [vmem:[%s9272_s0 + $0x20] sm:$0xff]  ;;  %v5368_v32 = vld [vmem:[%s9272_s0 + $0x28] sm:$0xff] }
  0x27   :  { %470 = vmatprep.mubr.f32.mxu0 %v9276_v0  ;;  %583 = vmatprep.mubr.f32.mxu1 %v9276_v0  ;;  %v5379_v33 = vld [vmem:[%s9272_s0 + $0x30] sm:$0xff]  ;;  %v5390_v34 = vld [vmem:[%s9272_s0 + $0x38] sm:$0xff]  ;;  %v186_v35 = vld [vmem:[#allocation3 + $0x480] sm:$0xff] }
  0x28   :  { %3853 = vmatmul.mubr.msk.f32.gmra.mxu0 %vm375_vm0, %v5322_v18  ;;  %3861 = vmatmul.mubr.msk.f32.gmra.mxu1 %vm375_vm0, %v5322_v18  ;;  %v188_v36 = vld [vmem:[#allocation3 + $0x490] sm:$0xff]  ;;  %v179_v37 = vld [vmem:[#allocation3 + $0x448] sm:$0xff]  ;;  %v181_v38 = vld [vmem:[#allocation3 + $0x458] sm:$0xff] }
  0x29   :  { %476 = vmatprep.mubr.f32.mxu0 %v9276_v0  ;;  %589 = vmatprep.mubr.f32.mxu1 %v9276_v0  ;;  %v178_v39 = vld [vmem:[#allocation3 + $0x440] sm:$0xff]  ;;  %v180_v40 = vld [vmem:[#allocation3 + $0x450] sm:$0xff]  ;;  %v171_v41 = vld [vmem:[#allocation3 + $0x408] sm:$0xff] }
  0x2a   :  { %654 = vmatprep.subr.mxu0 %v55_v19  ;;  %767 = vmatprep.subr.mxu1 %v57_v20  ;;  %v173_v42 = vld [vmem:[#allocation3 + $0x418] sm:$0xff]  ;;  %v170_v43 = vld [vmem:[#allocation3 + $0x400] sm:$0xff]  ;;  %v172_v44 = vld [vmem:[#allocation3 + $0x410] sm:$0xff] }
  0x2b   :  { %655 = vmatpush1.msra.mxu0 %v54_v21  ;;  %768 = vmatpush1.msra.mxu1 %v56_v22  ;;  %v163_v45 = vld [vmem:[#allocation3 + $0x3c8] sm:$0xff]  ;;  %v165_v46 = vld [vmem:[#allocation3 + $0x3d8] sm:$0xff]  ;;  %v162_v47 = vld [vmem:[#allocation3 + $0x3c0] sm:$0xff] }
  0x2c   :  { %3854 = vmatmul.mubr.msk.f32.gmra.mxu0 %vm375_vm0, %v5335_v23  ;;  %3862 = vmatmul.mubr.msk.f32.gmra.mxu1 %vm375_vm0, %v5335_v23  ;;  %v164_v48 = vld [vmem:[#allocation3 + $0x3d0] sm:$0xff]  ;;  %v155_v49 = vld [vmem:[#allocation3 + $0x388] sm:$0xff]  ;;  %v157_v50 = vld [vmem:[#allocation3 + $0x398] sm:$0xff] }
  0x2d   :  { %482 = vmatprep.mubr.f32.mxu0 %v9276_v0  ;;  %595 = vmatprep.mubr.f32.mxu1 %v9276_v0  ;;  %v154_v51 = vld [vmem:[#allocation3 + $0x380] sm:$0xff]  ;;  %v156_v52 = vld [vmem:[#allocation3 + $0x390] sm:$0xff]  ;;  %v147_v53 = vld [vmem:[#allocation3 + $0x348] sm:$0xff] }
  0x2e   :  { %656 = vmatprep.subr.mxu0 %v47_v24  ;;  %769 = vmatprep.subr.mxu1 %v49_v25  ;;  %v149_v54 = vld [vmem:[#allocation3 + $0x358] sm:$0xff]  ;;  %v146_v55 = vld [vmem:[#allocation3 + $0x340] sm:$0xff]  ;;  %v148_v56 = vld [vmem:[#allocation3 + $0x350] sm:$0xff] }
  0x2f   :  { %657 = vmatpush1.msra.mxu0 %v46_v26  ;;  %770 = vmatpush1.msra.mxu1 %v48_v27  ;;  %v139_v57 = vld [vmem:[#allocation3 + $0x308] sm:$0xff]  ;;  %v141_v58 = vld [vmem:[#allocation3 + $0x318] sm:$0xff]  ;;  %v138_v59 = vld [vmem:[#allocation3 + $0x300] sm:$0xff] }
  0x30   :  { %3855 = vmatmul.mubr.msk.f32.gmra.mxu0 %vm375_vm0, %v5346_v28  ;;  %3863 = vmatmul.mubr.msk.f32.gmra.mxu1 %vm375_vm0, %v5346_v28  ;;  %v140_v60 = vld [vmem:[#allocation3 + $0x310] sm:$0xff]  ;;  %v131_v61 = vld [vmem:[#allocation3 + $0x2c8] sm:$0xff]  ;;  %v133_v62 = vld [vmem:[#allocation3 + $0x2d8] sm:$0xff] }
  0x31   :  { %488 = vmatprep.mubr.f32.mxu0 %v9276_v0  ;;  %601 = vmatprep.mubr.f32.mxu1 %v9276_v0  ;;  %v130_v63 = vld [vmem:[#allocation3 + $0x2c0] sm:$0xff]  ;;  %v132_v1 = vld [vmem:[#allocation3 + $0x2d0] sm:$0xff]  ;;  %v123_v2 = vld [vmem:[#allocation3 + $0x288] sm:$0xff] }
  0x32   :  { %924 = vmatprep.subr.mxu0 %v187_v29  ;;  %995 = vmatprep.subr.mxu1 %v189_v30  ;;  %v125_v3 = vld [vmem:[#allocation3 + $0x298] sm:$0xff]  ;;  %v122_v4 = vld [vmem:[#allocation3 + $0x280] sm:$0xff]  ;;  %v124_v5 = vld [vmem:[#allocation3 + $0x290] sm:$0xff] }
  0x33   :  { %v115_v6 = vld [vmem:[#allocation3 + $0x248] sm:$0xff]  ;;  %v117_v7 = vld [vmem:[#allocation3 + $0x258] sm:$0xff]  ;;  %v114_v8 = vld [vmem:[#allocation3 + $0x240] sm:$0xff] }
  0x34   :  { %3856 = vmatmul.mubr.msk.f32.gmra.mxu0 %vm375_vm0, %v5357_v31  ;;  %3864 = vmatmul.mubr.msk.f32.gmra.mxu1 %vm375_vm0, %v5357_v31  ;;  %v116_v9 = vld [vmem:[#allocation3 + $0x250] sm:$0xff]  ;;  %v107_v10 = vld [vmem:[#allocation3 + $0x208] sm:$0xff]  ;;  %v109_v11 = vld [vmem:[#allocation3 + $0x218] sm:$0xff] }
  0x35   :  { %494 = vmatprep.mubr.f32.mxu0 %v9276_v0  ;;  %607 = vmatprep.mubr.f32.mxu1 %v9276_v0  ;;  %v106_v12 = vld [vmem:[#allocation3 + $0x200] sm:$0xff]  ;;  %v99_v14 = vld [vmem:[#allocation3 + $0x1c8] sm:$0xff]  ;;  %v101_v15 = vld [vmem:[#allocation3 + $0x1d8] sm:$0xff] }
  0x36   :  { %v98_v16 = vld [vmem:[#allocation3 + $0x1c0] sm:$0xff]  ;;  %v100_v17 = vld [vmem:[#allocation3 + $0x1d0] sm:$0xff]  ;;  %v91_v19 = vld [vmem:[#allocation3 + $0x188] sm:$0xff] }
  0x37   :  { %v93_v20 = vld [vmem:[#allocation3 + $0x198] sm:$0xff]  ;;  %v90_v21 = vld [vmem:[#allocation3 + $0x180] sm:$0xff]  ;;  %v92_v22 = vld [vmem:[#allocation3 + $0x190] sm:$0xff] }
  0x38   :  { %3857 = vmatmul.mubr.msk.f32.gmra.mxu0 %vm375_vm0, %v5368_v32  ;;  %3865 = vmatmul.mubr.msk.f32.gmra.mxu1 %vm375_vm0, %v5368_v32  ;;  %v83_v24 = vld [vmem:[#allocation3 + $0x148] sm:$0xff]  ;;  %v85_v25 = vld [vmem:[#allocation3 + $0x158] sm:$0xff]  ;;  %v82_v26 = vld [vmem:[#allocation3 + $0x140] sm:$0xff] }
  0x39   :  { %500 = vmatprep.mubr.f32.mxu0 %v9276_v0  ;;  %613 = vmatprep.mubr.f32.mxu1 %v9276_v0  ;;  %v84_v27 = vld [vmem:[#allocation3 + $0x150] sm:$0xff]  ;;  %v75_v29 = vld [vmem:[#allocation3 + $0x108] sm:$0xff]  ;;  %v77_v30 = vld [vmem:[#allocation3 + $0x118] sm:$0xff] }
  0x3c   :  { %3858 = vmatmul.mubr.msk.f32.gmra.mxu0 %vm375_vm0, %v5379_v33  ;;  %3866 = vmatmul.mubr.msk.f32.gmra.mxu1 %vm375_vm0, %v5379_v33 }
  0x3d   :  { %506 = vmatprep.mubr.f32.mxu0 %v9276_v0  ;;  %619 = vmatprep.mubr.f32.mxu1 %v9276_v0 }
  0x40   :  { %3859 = vmatmul.mubr.msk.f32.gmra.mxu0 %vm375_vm0, %v5390_v34  ;;  %3867 = vmatmul.mubr.msk.f32.gmra.mxu1 %vm375_vm0, %v5390_v34 }
  0x41   :  { %690 = vmatprep.mubr.f32.mxu0 %v9276_v0  ;;  %803 = vmatprep.mubr.f32.mxu1 %v9276_v0 }
  0x44   :  { %3868 = vmatmul.mubr.msk.f32.vlgmr.msra.gmra.mxu0 %vm375_vm0, %v5313_v13  ;;  %3876 = vmatmul.mubr.msk.f32.vlgmr.msra.gmra.mxu1 %vm375_vm0, %v5313_v13  ;;  %v108_v13 = vld [vmem:[#allocation3 + $0x210] sm:$0xff] }
  0x45   :  { %925 = vmatpush1.msra.mxu0 %v186_v35  ;;  %996 = vmatpush1.msra.mxu1 %v188_v36  ;;  %v74_v35 = vld [vmem:[#allocation3 + $0x100] sm:$0xff]  ;;  %v76_v36 = vld [vmem:[#allocation3 + $0x110] sm:$0xff] }
  0x46   :  { %926 = vmatprep.subr.mxu0 %v179_v37  ;;  %997 = vmatprep.subr.mxu1 %v181_v38  ;;  %v67_v37 = vld [vmem:[#allocation3 + $0xc8] sm:$0xff]  ;;  %v69_v38 = vld [vmem:[#allocation3 + $0xd8] sm:$0xff] }
  0x47   :  { %927 = vmatpush1.msra.mxu0 %v178_v39  ;;  %998 = vmatpush1.msra.mxu1 %v180_v40  ;;  %v66_v39 = vld [vmem:[#allocation3 + $0xc0] sm:$0xff]  ;;  %v68_v40 = vld [vmem:[#allocation3 + $0xd0] sm:$0xff] }
  0x48   :  { %928 = vmatprep.subr.mxu0 %v171_v41  ;;  %999 = vmatprep.subr.mxu1 %v173_v42  ;;  %v315_v41 = vld [vmem:[#allocation3 + $0x888] sm:$0xff]  ;;  %v317_v42 = vld [vmem:[#allocation3 + $0x898] sm:$0xff] }
  0x49   :  { %929 = vmatpush1.msra.mxu0 %v170_v43  ;;  %1000 = vmatpush1.msra.mxu1 %v172_v44  ;;  %v314_v43 = vld [vmem:[#allocation3 + $0x880] sm:$0xff]  ;;  %v316_v44 = vld [vmem:[#allocation3 + $0x890] sm:$0xff] }
  0x4a   :  { %930 = vmatprep.subr.mxu0 %v163_v45  ;;  %1001 = vmatprep.subr.mxu1 %v165_v46  ;;  %v307_v45 = vld [vmem:[#allocation3 + $0x848] sm:$0xff]  ;;  %v309_v46 = vld [vmem:[#allocation3 + $0x858] sm:$0xff] }
  0x4b   :  { %931 = vmatpush1.msra.mxu0 %v162_v47  ;;  %1002 = vmatpush1.msra.mxu1 %v164_v48  ;;  %v306_v47 = vld [vmem:[#allocation3 + $0x840] sm:$0xff]  ;;  %v308_v48 = vld [vmem:[#allocation3 + $0x850] sm:$0xff] }
  0x4c   :  { %932 = vmatprep.subr.mxu0 %v155_v49  ;;  %1003 = vmatprep.subr.mxu1 %v157_v50  ;;  %v299_v49 = vld [vmem:[#allocation3 + $0x808] sm:$0xff]  ;;  %v301_v50 = vld [vmem:[#allocation3 + $0x818] sm:$0xff] }
  0x4d   :  { %933 = vmatpush1.msra.mxu0 %v154_v51  ;;  %1004 = vmatpush1.msra.mxu1 %v156_v52  ;;  %v298_v51 = vld [vmem:[#allocation3 + $0x800] sm:$0xff]  ;;  %v300_v52 = vld [vmem:[#allocation3 + $0x810] sm:$0xff] }
  0x4e   :  { %934 = vmatprep.subr.mxu0 %v147_v53  ;;  %1005 = vmatprep.subr.mxu1 %v149_v54  ;;  %v291_v53 = vld [vmem:[#allocation3 + $0x7c8] sm:$0xff]  ;;  %v293_v54 = vld [vmem:[#allocation3 + $0x7d8] sm:$0xff] }
  0x4f   :  { %935 = vmatpush1.msra.mxu0 %v146_v55  ;;  %1006 = vmatpush1.msra.mxu1 %v148_v56  ;;  %v290_v55 = vld [vmem:[#allocation3 + $0x7c0] sm:$0xff]  ;;  %v292_v56 = vld [vmem:[#allocation3 + $0x7d0] sm:$0xff] }
  0x50   :  { %936 = vmatprep.subr.mxu0 %v139_v57  ;;  %1007 = vmatprep.subr.mxu1 %v141_v58  ;;  %v283_v57 = vld [vmem:[#allocation3 + $0x788] sm:$0xff]  ;;  %v285_v58 = vld [vmem:[#allocation3 + $0x798] sm:$0xff] }
  0x51   :  { %937 = vmatpush1.msra.mxu0 %v138_v59  ;;  %1008 = vmatpush1.msra.mxu1 %v140_v60  ;;  %v282_v59 = vld [vmem:[#allocation3 + $0x780] sm:$0xff]  ;;  %v275_v60 = vld [vmem:[#allocation3 + $0x748] sm:$0xff] }
  0x52   :  { %938 = vmatprep.subr.mxu0 %v131_v61  ;;  %1009 = vmatprep.subr.mxu1 %v133_v62  ;;  %v277_v61 = vld [vmem:[#allocation3 + $0x758] sm:$0xff]  ;;  %v274_v62 = vld [vmem:[#allocation3 + $0x740] sm:$0xff] }
  0x53   :  { %939 = vmatpush1.msra.mxu0 %v130_v63  ;;  %1010 = vmatpush1.msra.mxu1 %v132_v1  ;;  %v276_v63 = vld [vmem:[#allocation3 + $0x750] sm:$0xff]  ;;  %v267_v1 = vld [vmem:[#allocation3 + $0x708] sm:$0xff] }
  0x54   :  { %940 = vmatprep.subr.mxu0 %v123_v2  ;;  %1011 = vmatprep.subr.mxu1 %v125_v3  ;;  %v269_v2 = vld [vmem:[#allocation3 + $0x718] sm:$0xff]  ;;  %v266_v3 = vld [vmem:[#allocation3 + $0x700] sm:$0xff] }
  0x55   :  { %941 = vmatpush1.msra.mxu0 %v122_v4  ;;  %1012 = vmatpush1.msra.mxu1 %v124_v5  ;;  %v259_v4 = vld [vmem:[#allocation3 + $0x6c8] sm:$0xff]  ;;  %v261_v5 = vld [vmem:[#allocation3 + $0x6d8] sm:$0xff] }
  0x56   :  { %942 = vmatprep.subr.mxu0 %v115_v6  ;;  %1013 = vmatprep.subr.mxu1 %v117_v7  ;;  %v258_v6 = vld [vmem:[#allocation3 + $0x6c0] sm:$0xff]  ;;  %v260_v7 = vld [vmem:[#allocation3 + $0x6d0] sm:$0xff] }
  0x57   :  { %943 = vmatpush1.msra.mxu0 %v114_v8  ;;  %1014 = vmatpush1.msra.mxu1 %v116_v9  ;;  %v251_v8 = vld [vmem:[#allocation3 + $0x688] sm:$0xff]  ;;  %v253_v9 = vld [vmem:[#allocation3 + $0x698] sm:$0xff] }
  0x58   :  { %944 = vmatprep.subr.mxu0 %v107_v10  ;;  %1015 = vmatprep.subr.mxu1 %v109_v11  ;;  %v5422_v10 = vld [vmem:[#allocation3 + $0x680] sm:$0xff]  ;;  %v5430_v11 = vld [vmem:[#allocation3 + $0x648] sm:$0xff] }
  0x59   :  { %945 = vmatpush1.msra.mxu0 %v106_v12  ;;  %1016 = vmatpush1.msra.mxu1 %v108_v13  ;;  %v5432_v12 = vld [vmem:[#allocation3 + $0x658] sm:$0xff]  ;;  %v5436_v13 = vld [vmem:[#allocation3 + $0x640] sm:$0xff] }
  0x5a   :  { %946 = vmatprep.subr.mxu0 %v99_v14  ;;  %1017 = vmatprep.subr.mxu1 %v101_v15  ;;  %v5438_v14 = vld [vmem:[#allocation3 + $0x650] sm:$0xff]  ;;  %v5446_v15 = vld [vmem:[#allocation3 + $0x618] sm:$0xff] }
  0x5b   :  { %947 = vmatpush1.msra.mxu0 %v98_v16  ;;  %1018 = vmatpush1.msra.mxu1 %v100_v17  ;;  %v5450_v16 = vld [vmem:[#allocation3 + $0x600] sm:$0xff]  ;;  %v5452_v17 = vld [vmem:[#allocation3 + $0x610] sm:$0xff] }
  0x5c   :  { %948 = vmatprep.subr.mxu0 %v91_v19  ;;  %1019 = vmatprep.subr.mxu1 %v93_v20  ;;  %v5458_v19 = vld [vmem:[#allocation3 + $0x5c8] sm:$0xff]  ;;  %v5460_v20 = vld [vmem:[#allocation3 + $0x5d8] sm:$0xff] }
  0x5d   :  { %949 = vmatpush1.msra.mxu0 %v90_v21  ;;  %1020 = vmatpush1.msra.mxu1 %v92_v22  ;;  %v5466_v21 = vld [vmem:[#allocation3 + $0x5c0] sm:$0xff]  ;;  %v5468_v22 = vld [vmem:[#allocation3 + $0x5d0] sm:$0xff] }
  0x5e   :  { %950 = vmatprep.subr.mxu0 %v83_v24  ;;  %1021 = vmatprep.subr.mxu1 %v85_v25  ;;  %v5476_v24 = vld [vmem:[#allocation3 + $0x598] sm:$0xff]  ;;  %v5480_v25 = vld [vmem:[#allocation3 + $0x580] sm:$0xff] }
  0x5f   :  { %951 = vmatpush1.msra.mxu0 %v82_v26  ;;  %1022 = vmatpush1.msra.mxu1 %v84_v27  ;;  %v5482_v26 = vld [vmem:[#allocation3 + $0x590] sm:$0xff]  ;;  %v5488_v27 = vld [vmem:[#allocation3 + $0x548] sm:$0xff] }
  0x60   :  { %952 = vmatprep.subr.mxu0 %v75_v29  ;;  %1023 = vmatprep.subr.mxu1 %v77_v30  ;;  %v5490_v29 = vld [vmem:[#allocation3 + $0x558] sm:$0xff]  ;;  %v5496_v30 = vld [vmem:[#allocation3 + $0x540] sm:$0xff] }
  0x61   :  { %953 = vmatpush1.msra.mxu0 %v74_v35  ;;  %1024 = vmatpush1.msra.mxu1 %v76_v36  ;;  %v5498_v35 = vld [vmem:[#allocation3 + $0x550] sm:$0xff]  ;;  %v5506_v36 = vld [vmem:[#allocation3 + $0x518] sm:$0xff] }
  0x62   :  { %954 = vmatprep.subr.mxu0 %v67_v37  ;;  %1025 = vmatprep.subr.mxu1 %v69_v38  ;;  %v5510_v37 = vld [vmem:[#allocation3 + $0x500] sm:$0xff]  ;;  %v5512_v38 = vld [vmem:[#allocation3 + $0x510] sm:$0xff] }
  0x63   :  { %955 = vmatpush1.msra.mxu0 %v66_v39  ;;  %1026 = vmatpush1.msra.mxu1 %v68_v40  ;;  %v5518_v39 = vld [vmem:[#allocation3 + $0x4c8] sm:$0xff]  ;;  %v5520_v40 = vld [vmem:[#allocation3 + $0x4d8] sm:$0xff] }
  0x64   :  { %956 = vmatprep.subr.mxu0 %v315_v41  ;;  %1027 = vmatprep.subr.mxu1 %v317_v42  ;;  %v5524_v41 = vld [vmem:[#allocation3 + $0x4c0] sm:$0xff]  ;;  %v5528_v42 = vld [vmem:[#allocation3 + $0x4d0] sm:$0xff] }
  0x65   :  { %957 = vmatpush2.msra.mxu0 %v314_v43  ;;  %1028 = vmatpush2.msra.mxu1 %v316_v44  ;;  %v5536_v43 = vld [vmem:[#allocation3 + $0x4b8] sm:$0xff]  ;;  %v190_v44 = vld [vmem:[#allocation3 + $0x4a0] sm:$0xff] }
  0x66   :  { %958 = vmatprep.subr.mxu0 %v307_v45  ;;  %1029 = vmatprep.subr.mxu1 %v309_v46  ;;  %v192_v45 = vld [vmem:[#allocation3 + $0x4b0] sm:$0xff]  ;;  %v183_v46 = vld [vmem:[#allocation3 + $0x468] sm:$0xff] }
  0x67   :  { %696 = vmatprep.mubr.f32.mxu0 %v9276_v0  ;;  %809 = vmatprep.mubr.f32.mxu1 %v9276_v0 }
  0x68   :  { %959 = vmatpush2.msra.mxu0 %v306_v47  ;;  %1030 = vmatpush2.msra.mxu1 %v308_v48  ;;  %v185_v47 = vld [vmem:[#allocation3 + $0x478] sm:$0xff]  ;;  %v182_v48 = vld [vmem:[#allocation3 + $0x460] sm:$0xff] }
  0x69   :  { %3869 = vmatmul.mubr.msk.f32.gmra.mxu0 %vm375_vm0, %v5322_v18  ;;  %3877 = vmatmul.mubr.msk.f32.gmra.mxu1 %vm375_vm0, %v5322_v18  ;;  %v284_v18 = vld [vmem:[#allocation3 + $0x790] sm:$0xff] }
  0x6a   :  { %960 = vmatprep.subr.mxu0 %v299_v49  ;;  %1031 = vmatprep.subr.mxu1 %v301_v50  ;;  %v184_v49 = vld [vmem:[#allocation3 + $0x470] sm:$0xff]  ;;  %v175_v50 = vld [vmem:[#allocation3 + $0x428] sm:$0xff] }
  0x6b   :  { %961 = vmatpush2.msra.mxu0 %v298_v51  ;;  %1032 = vmatpush2.msra.mxu1 %v300_v52  ;;  %v177_v51 = vld [vmem:[#allocation3 + $0x438] sm:$0xff]  ;;  %v174_v52 = vld [vmem:[#allocation3 + $0x420] sm:$0xff] }
  0x6c   :  { %962 = vmatprep.subr.mxu0 %v291_v53  ;;  %1033 = vmatprep.subr.mxu1 %v293_v54  ;;  %v176_v53 = vld [vmem:[#allocation3 + $0x430] sm:$0xff]  ;;  %v167_v54 = vld [vmem:[#allocation3 + $0x3e8] sm:$0xff] }
  0x6d   :  { %702 = vmatprep.mubr.f32.mxu0 %v9276_v0  ;;  %815 = vmatprep.mubr.f32.mxu1 %v9276_v0 }
  0x6e   :  { %963 = vmatpush2.msra.mxu0 %v290_v55  ;;  %1034 = vmatpush2.msra.mxu1 %v292_v56  ;;  %v169_v55 = vld [vmem:[#allocation3 + $0x3f8] sm:$0xff]  ;;  %v166_v56 = vld [vmem:[#allocation3 + $0x3e0] sm:$0xff] }
  0x6f   :  { %3870 = vmatmul.mubr.msk.f32.gmra.mxu0 %vm375_vm0, %v5335_v23  ;;  %3878 = vmatmul.mubr.msk.f32.gmra.mxu1 %vm375_vm0, %v5335_v23  ;;  %v268_v23 = vld [vmem:[#allocation3 + $0x710] sm:$0xff] }
  0x70   :  { %964 = vmatprep.subr.mxu0 %v283_v57  ;;  %1035 = vmatprep.subr.mxu1 %v285_v58  ;;  %v168_v57 = vld [vmem:[#allocation3 + $0x3f0] sm:$0xff]  ;;  %v159_v58 = vld [vmem:[#allocation3 + $0x3a8] sm:$0xff] }
  0x71   :  { %965 = vmatpush2.msra.mxu0 %v282_v59  ;;  %1036 = vmatpush2.msra.mxu1 %v284_v18  ;;  %v161_v59 = vld [vmem:[#allocation3 + $0x3b8] sm:$0xff]  ;;  %v158_v18 = vld [vmem:[#allocation3 + $0x3a0] sm:$0xff] }
  0x72   :  { %966 = vmatprep.subr.mxu0 %v275_v60  ;;  %1037 = vmatprep.subr.mxu1 %v277_v61  ;;  %v160_v60 = vld [vmem:[#allocation3 + $0x3b0] sm:$0xff]  ;;  %v151_v61 = vld [vmem:[#allocation3 + $0x368] sm:$0xff] }
  0x73   :  { %708 = vmatprep.mubr.f32.mxu0 %v9276_v0  ;;  %821 = vmatprep.mubr.f32.mxu1 %v9276_v0 }
  0x74   :  { %967 = vmatpush2.msra.mxu0 %v274_v62  ;;  %1038 = vmatpush2.msra.mxu1 %v276_v63  ;;  %v153_v62 = vld [vmem:[#allocation3 + $0x378] sm:$0xff]  ;;  %v150_v63 = vld [vmem:[#allocation3 + $0x360] sm:$0xff] }
  0x75   :  { %3871 = vmatmul.mubr.msk.f32.gmra.mxu0 %vm375_vm0, %v5346_v28  ;;  %3879 = vmatmul.mubr.msk.f32.gmra.mxu1 %vm375_vm0, %v5346_v28  ;;  %v5424_v28 = vld [vmem:[#allocation3 + $0x690] sm:$0xff] }
  0x76   :  { %968 = vmatprep.subr.mxu0 %v267_v1  ;;  %1039 = vmatprep.subr.mxu1 %v269_v2  ;;  %v152_v1 = vld [vmem:[#allocation3 + $0x370] sm:$0xff]  ;;  %v143_v2 = vld [vmem:[#allocation3 + $0x328] sm:$0xff] }
  0x77   :  { %969 = vmatpush2.msra.mxu0 %v266_v3  ;;  %1040 = vmatpush2.msra.mxu1 %v268_v23  ;;  %v145_v3 = vld [vmem:[#allocation3 + $0x338] sm:$0xff]  ;;  %v142_v23 = vld [vmem:[#allocation3 + $0x320] sm:$0xff] }
  0x78   :  { %970 = vmatprep.subr.mxu0 %v259_v4  ;;  %1041 = vmatprep.subr.mxu1 %v261_v5  ;;  %v144_v4 = vld [vmem:[#allocation3 + $0x330] sm:$0xff]  ;;  %v135_v5 = vld [vmem:[#allocation3 + $0x2e8] sm:$0xff] }
  0x79   :  { %714 = vmatprep.mubr.f32.mxu0 %v9276_v0  ;;  %827 = vmatprep.mubr.f32.mxu1 %v9276_v0 }
  0x7a   :  { %971 = vmatpush2.msra.mxu0 %v258_v6  ;;  %1042 = vmatpush2.msra.mxu1 %v260_v7  ;;  %v137_v6 = vld [vmem:[#allocation3 + $0x2f8] sm:$0xff]  ;;  %v134_v7 = vld [vmem:[#allocation3 + $0x2e0] sm:$0xff] }
  0x7b   :  { %3872 = vmatmul.mubr.msk.f32.gmra.mxu0 %vm375_vm0, %v5357_v31  ;;  %3880 = vmatmul.mubr.msk.f32.gmra.mxu1 %vm375_vm0, %v5357_v31  ;;  %v5444_v31 = vld [vmem:[#allocation3 + $0x608] sm:$0xff] }
  0x7c   :  { %972 = vmatprep.subr.mxu0 %v251_v8  ;;  %1043 = vmatprep.subr.mxu1 %v253_v9  ;;  %v136_v8 = vld [vmem:[#allocation3 + $0x2f0] sm:$0xff]  ;;  %v127_v9 = vld [vmem:[#allocation3 + $0x2a8] sm:$0xff] }
  0x7d   :  { %973 = vmatpush2.msra.mxu0 %v5422_v10  ;;  %1044 = vmatpush2.msra.mxu1 %v5424_v28 }
  0x7e   :  { %974 = vmatprep.subr.mxu0 %v5430_v11  ;;  %1045 = vmatprep.subr.mxu1 %v5432_v12 }
  0x7f   :  { %720 = vmatprep.mubr.f32.mxu0 %v9276_v0  ;;  %833 = vmatprep.mubr.f32.mxu1 %v9276_v0 }
  0x80   :  { %975 = vmatpush2.msra.mxu0 %v5436_v13  ;;  %1046 = vmatpush2.msra.mxu1 %v5438_v14 }
  0x81   :  { %3873 = vmatmul.mubr.msk.f32.gmra.mxu0 %vm375_vm0, %v5368_v32  ;;  %3881 = vmatmul.mubr.msk.f32.gmra.mxu1 %vm375_vm0, %v5368_v32  ;;  %v5474_v32 = vld [vmem:[#allocation3 + $0x588] sm:$0xff] }
  0x82   :  { %976 = vmatprep.subr.mxu0 %v5444_v31  ;;  %1047 = vmatprep.subr.mxu1 %v5446_v15 }
  0x83   :  { %977 = vmatpush2.msra.mxu0 %v5450_v16  ;;  %1048 = vmatpush2.msra.mxu1 %v5452_v17 }
  0x84   :  { %978 = vmatprep.subr.mxu0 %v5458_v19  ;;  %1049 = vmatprep.subr.mxu1 %v5460_v20 }
  0x85   :  { %726 = vmatprep.mubr.f32.mxu0 %v9276_v0  ;;  %839 = vmatprep.mubr.f32.mxu1 %v9276_v0 }
  0x86   :  { %979 = vmatpush2.msra.mxu0 %v5466_v21  ;;  %1050 = vmatpush2.msra.mxu1 %v5468_v22 }
  0x87   :  { %3874 = vmatmul.mubr.msk.f32.gmra.mxu0 %vm375_vm0, %v5379_v33  ;;  %3882 = vmatmul.mubr.msk.f32.gmra.mxu1 %vm375_vm0, %v5379_v33  ;;  %v5504_v33 = vld [vmem:[#allocation3 + $0x508] sm:$0xff] }
  0x88   :  { %980 = vmatprep.subr.mxu0 %v5474_v32  ;;  %1051 = vmatprep.subr.mxu1 %v5476_v24 }
  0x89   :  { %981 = vmatpush2.msra.mxu0 %v5480_v25  ;;  %1052 = vmatpush2.msra.mxu1 %v5482_v26 }
  0x8a   :  { %982 = vmatprep.subr.mxu0 %v5488_v27  ;;  %1053 = vmatprep.subr.mxu1 %v5490_v29 }
  0x8b   :  { %732 = vmatprep.mubr.f32.mxu0 %v9276_v0  ;;  %845 = vmatprep.mubr.f32.mxu1 %v9276_v0 }
  0x8c   :  { %983 = vmatpush2.msra.mxu0 %v5496_v30  ;;  %1054 = vmatpush2.msra.mxu1 %v5498_v35 }
  0x8d   :  { %3875 = vmatmul.mubr.msk.f32.gmra.mxu0 %vm375_vm0, %v5390_v34  ;;  %3883 = vmatmul.mubr.msk.f32.gmra.mxu1 %vm375_vm0, %v5390_v34  ;;  %v5534_v34 = vld [vmem:[#allocation3 + $0x4a8] sm:$0xff] }
  0x8e   :  { %984 = vmatprep.subr.mxu0 %v5504_v33  ;;  %1055 = vmatprep.subr.mxu1 %v5506_v36 }
  0x8f   :  { %985 = vmatpush2.msra.mxu0 %v5510_v37  ;;  %1056 = vmatpush2.msra.mxu1 %v5512_v38 }
  0x90   :  { %986 = vmatprep.subr.mxu0 %v5518_v39  ;;  %1057 = vmatprep.subr.mxu1 %v5520_v40 }
  0x91   :  { %987 = vmatpush2.msra.mxu0 %v5524_v41  ;;  %988 = vmatprep.mubr.f32.mxu0 %v9276_v0 }
  0x92   :  { %1058 = vmatpush2.msra.mxu1 %v5528_v42  ;;  %1059 = vmatprep.mubr.f32.mxu1 %v9276_v0 }
  0x93   :  { %989 = vmatmul.mubr.f32.vlgmr.msra.gmra.mxu0 %v9276_v0  ;;  %1060 = vmatmul.mubr.f32.vlgmr.msra.gmra.mxu1 %v9276_v0  ;;  %v5632_v0 = vld [vmem:[#allocation3 + $0x630] sm:$0xff] }
  0x94   :  { %1066 = vmatprep.subr.mxu0 %v5534_v34  ;;  %1137 = vmatprep.subr.mxu1 %v5536_v43  ;;  %9882 = vst [vmem:[#allocation28_spill] sm:$0xff] %v5632_v0 }
  0x95   :  { %1067 = vmatpush1.msra.mxu0 %v190_v44  ;;  %1138 = vmatpush1.msra.mxu1 %v192_v45  ;;  %v129_v44 = vld [vmem:[#allocation3 + $0x2b8] sm:$0xff]  ;;  %v126_v45 = vld [vmem:[#allocation3 + $0x2a0] sm:$0xff] }
  0x96   :  { %1068 = vmatprep.subr.mxu0 %v183_v46  ;;  %1139 = vmatprep.subr.mxu1 %v185_v47  ;;  %v128_v46 = vld [vmem:[#allocation3 + $0x2b0] sm:$0xff]  ;;  %v119_v47 = vld [vmem:[#allocation3 + $0x268] sm:$0xff] }
  0x97   :  { %1069 = vmatpush1.msra.mxu0 %v182_v48  ;;  %1140 = vmatpush1.msra.mxu1 %v184_v49  ;;  %v121_v48 = vld [vmem:[#allocation3 + $0x278] sm:$0xff]  ;;  %v118_v49 = vld [vmem:[#allocation3 + $0x260] sm:$0xff] }
  0x98   :  { %1070 = vmatprep.subr.mxu0 %v175_v50  ;;  %1141 = vmatprep.subr.mxu1 %v177_v51  ;;  %v120_v50 = vld [vmem:[#allocation3 + $0x270] sm:$0xff]  ;;  %v111_v51 = vld [vmem:[#allocation3 + $0x228] sm:$0xff] }
  0x99   :  { %1071 = vmatpush1.msra.mxu0 %v174_v52  ;;  %1142 = vmatpush1.msra.mxu1 %v176_v53  ;;  %v113_v52 = vld [vmem:[#allocation3 + $0x238] sm:$0xff]  ;;  %v110_v53 = vld [vmem:[#allocation3 + $0x220] sm:$0xff] }
  0x9a   :  { %1072 = vmatprep.subr.mxu0 %v167_v54  ;;  %1143 = vmatprep.subr.mxu1 %v169_v55  ;;  %v112_v54 = vld [vmem:[#allocation3 + $0x230] sm:$0xff]  ;;  %v103_v55 = vld [vmem:[#allocation3 + $0x1e8] sm:$0xff] }
  0x9b   :  { %1073 = vmatpush1.msra.mxu0 %v166_v56  ;;  %1144 = vmatpush1.msra.mxu1 %v168_v57  ;;  %v105_v56 = vld [vmem:[#allocation3 + $0x1f8] sm:$0xff]  ;;  %v102_v57 = vld [vmem:[#allocation3 + $0x1e0] sm:$0xff] }
  0x9c   :  { %1074 = vmatprep.subr.mxu0 %v159_v58  ;;  %1145 = vmatprep.subr.mxu1 %v161_v59  ;;  %v104_v58 = vld [vmem:[#allocation3 + $0x1f0] sm:$0xff]  ;;  %v95_v59 = vld [vmem:[#allocation3 + $0x1a8] sm:$0xff] }
  0x9d   :  { %1075 = vmatpush1.msra.mxu0 %v158_v18  ;;  %1146 = vmatpush1.msra.mxu1 %v160_v60  ;;  %v97_v18 = vld [vmem:[#allocation3 + $0x1b8] sm:$0xff]  ;;  %v94_v60 = vld [vmem:[#allocation3 + $0x1a0] sm:$0xff] }
  0x9e   :  { %1076 = vmatprep.subr.mxu0 %v151_v61  ;;  %1147 = vmatprep.subr.mxu1 %v153_v62  ;;  %v96_v61 = vld [vmem:[#allocation3 + $0x1b0] sm:$0xff]  ;;  %v87_v62 = vld [vmem:[#allocation3 + $0x168] sm:$0xff] }
  0x9f   :  { %1077 = vmatpush1.msra.mxu0 %v150_v63  ;;  %1148 = vmatpush1.msra.mxu1 %v152_v1  ;;  %v89_v63 = vld [vmem:[#allocation3 + $0x178] sm:$0xff]  ;;  %v86_v1 = vld [vmem:[#allocation3 + $0x160] sm:$0xff] }
  0xa0   :  { %1078 = vmatprep.subr.mxu0 %v143_v2  ;;  %1149 = vmatprep.subr.mxu1 %v145_v3  ;;  %v88_v2 = vld [vmem:[#allocation3 + $0x170] sm:$0xff]  ;;  %v79_v3 = vld [vmem:[#allocation3 + $0x128] sm:$0xff] }
  0xa1   :  { %1079 = vmatpush1.msra.mxu0 %v142_v23  ;;  %1150 = vmatpush1.msra.mxu1 %v144_v4  ;;  %v81_v23 = vld [vmem:[#allocation3 + $0x138] sm:$0xff]  ;;  %v78_v4 = vld [vmem:[#allocation3 + $0x120] sm:$0xff] }
  0xa2   :  { %1080 = vmatprep.subr.mxu0 %v135_v5  ;;  %1151 = vmatprep.subr.mxu1 %v137_v6  ;;  %v80_v5 = vld [vmem:[#allocation3 + $0x130] sm:$0xff]  ;;  %v71_v6 = vld [vmem:[#allocation3 + $0xe8] sm:$0xff] }
  0xa3   :  { %1081 = vmatpush1.msra.mxu0 %v134_v7  ;;  %1152 = vmatpush1.msra.mxu1 %v136_v8  ;;  %v73_v7 = vld [vmem:[#allocation3 + $0xf8] sm:$0xff]  ;;  %v70_v8 = vld [vmem:[#allocation3 + $0xe0] sm:$0xff] }
  0xa4   :  { %1082 = vmatprep.subr.mxu0 %v127_v9  ;;  %1153 = vmatprep.subr.mxu1 %v129_v44  ;;  %v72_v9 = vld [vmem:[#allocation3 + $0xf0] sm:$0xff]  ;;  %v319_v44 = vld [vmem:[#allocation3 + $0x8a8] sm:$0xff] }
  0xa5   :  { %1083 = vmatpush1.msra.mxu0 %v126_v45  ;;  %1154 = vmatpush1.msra.mxu1 %v128_v46  ;;  %v321_v45 = vld [vmem:[#allocation3 + $0x8b8] sm:$0xff]  ;;  %v318_v46 = vld [vmem:[#allocation3 + $0x8a0] sm:$0xff] }
  0xa6   :  { %1084 = vmatprep.subr.mxu0 %v119_v47  ;;  %1155 = vmatprep.subr.mxu1 %v121_v48  ;;  %v320_v47 = vld [vmem:[#allocation3 + $0x8b0] sm:$0xff]  ;;  %v311_v48 = vld [vmem:[#allocation3 + $0x868] sm:$0xff] }
  0xa7   :  { %1085 = vmatpush1.msra.mxu0 %v118_v49  ;;  %1156 = vmatpush1.msra.mxu1 %v120_v50  ;;  %v313_v49 = vld [vmem:[#allocation3 + $0x878] sm:$0xff]  ;;  %v310_v50 = vld [vmem:[#allocation3 + $0x860] sm:$0xff] }
  0xa8   :  { %1086 = vmatprep.subr.mxu0 %v111_v51  ;;  %1157 = vmatprep.subr.mxu1 %v113_v52  ;;  %v312_v51 = vld [vmem:[#allocation3 + $0x870] sm:$0xff]  ;;  %v303_v52 = vld [vmem:[#allocation3 + $0x828] sm:$0xff] }
  0xa9   :  { %1087 = vmatpush1.msra.mxu0 %v110_v53  ;;  %1158 = vmatpush1.msra.mxu1 %v112_v54  ;;  %v305_v53 = vld [vmem:[#allocation3 + $0x838] sm:$0xff]  ;;  %v302_v54 = vld [vmem:[#allocation3 + $0x820] sm:$0xff] }
  0xaa   :  { %1088 = vmatprep.subr.mxu0 %v103_v55  ;;  %1159 = vmatprep.subr.mxu1 %v105_v56  ;;  %v304_v55 = vld [vmem:[#allocation3 + $0x830] sm:$0xff]  ;;  %v5544_v56 = vld [vmem:[#allocation3 + $0x7e8] sm:$0xff] }
  0xab   :  { %1089 = vmatpush1.msra.mxu0 %v102_v57  ;;  %1160 = vmatpush1.msra.mxu1 %v104_v58  ;;  %v5546_v57 = vld [vmem:[#allocation3 + $0x7f8] sm:$0xff]  ;;  %v5548_v58 = vld [vmem:[#allocation3 + $0x7e0] sm:$0xff] }
  0xac   :  { %1090 = vmatprep.subr.mxu0 %v95_v59  ;;  %1161 = vmatprep.subr.mxu1 %v97_v18  ;;  %v5550_v59 = vld [vmem:[#allocation3 + $0x7f0] sm:$0xff]  ;;  %v5552_v18 = vld [vmem:[#allocation3 + $0x7a8] sm:$0xff] }
  0xad   :  { %1091 = vmatpush1.msra.mxu0 %v94_v60  ;;  %1162 = vmatpush1.msra.mxu1 %v96_v61  ;;  %v5554_v60 = vld [vmem:[#allocation3 + $0x7b8] sm:$0xff]  ;;  %v5558_v61 = vld [vmem:[#allocation3 + $0x7a0] sm:$0xff] }
  0xae   :  { %1092 = vmatprep.subr.mxu0 %v87_v62  ;;  %1163 = vmatprep.subr.mxu1 %v89_v63  ;;  %v5560_v62 = vld [vmem:[#allocation3 + $0x7b0] sm:$0xff]  ;;  %v5564_v63 = vld [vmem:[#allocation3 + $0x768] sm:$0xff] }
  0xaf   :  { %1093 = vmatpush1.msra.mxu0 %v86_v1  ;;  %1164 = vmatpush1.msra.mxu1 %v88_v2  ;;  %v5566_v1 = vld [vmem:[#allocation3 + $0x778] sm:$0xff]  ;;  %v5570_v2 = vld [vmem:[#allocation3 + $0x760] sm:$0xff] }
  0xb0   :  { %1094 = vmatprep.subr.mxu0 %v79_v3  ;;  %1165 = vmatprep.subr.mxu1 %v81_v23  ;;  %v5572_v3 = vld [vmem:[#allocation3 + $0x770] sm:$0xff]  ;;  %v5576_v23 = vld [vmem:[#allocation3 + $0x728] sm:$0xff] }
  0xb1   :  { %1095 = vmatpush1.msra.mxu0 %v78_v4  ;;  %1166 = vmatpush1.msra.mxu1 %v80_v5  ;;  %9863 = vst [vmem:[#allocation9_spill] sm:$0xff] %v5576_v23  ;;  %v5578_v4 = vld [vmem:[#allocation3 + $0x738] sm:$0xff]  ;;  %v5582_v5 = vld [vmem:[#allocation3 + $0x720] sm:$0xff] }
  0xb2   :  { %1096 = vmatprep.subr.mxu0 %v71_v6  ;;  %1167 = vmatprep.subr.mxu1 %v73_v7  ;;  %9864 = vst [vmem:[#allocation10_spill] sm:$0xff] %v5578_v4  ;;  %9865 = vst [vmem:[#allocation11_spill] sm:$0xff] %v5582_v5  ;;  %v5584_v6 = vld [vmem:[#allocation3 + $0x730] sm:$0xff]  ;;  %v5588_v7 = vld [vmem:[#allocation3 + $0x6e8] sm:$0xff] }
  0xb3   :  { %1097 = vmatpush1.msra.mxu0 %v70_v8  ;;  %1168 = vmatpush1.msra.mxu1 %v72_v9  ;;  %9866 = vst [vmem:[#allocation12_spill] sm:$0xff] %v5584_v6  ;;  %9867 = vst [vmem:[#allocation13_spill] sm:$0xff] %v5588_v7  ;;  %v5590_v8 = vld [vmem:[#allocation3 + $0x6f8] sm:$0xff]  ;;  %v5594_v9 = vld [vmem:[#allocation3 + $0x6e0] sm:$0xff] }
  0xb4   :  { %1098 = vmatprep.subr.mxu0 %v319_v44  ;;  %1169 = vmatprep.subr.mxu1 %v321_v45  ;;  %9868 = vst [vmem:[#allocation14_spill] sm:$0xff] %v5590_v8  ;;  %9869 = vst [vmem:[#allocation15_spill] sm:$0xff] %v5594_v9  ;;  %v5596_v44 = vld [vmem:[#allocation3 + $0x6f0] sm:$0xff]  ;;  %v5600_v45 = vld [vmem:[#allocation3 + $0x6a8] sm:$0xff] }
  0xb5   :  { %1099 = vmatpush2.msra.mxu0 %v318_v46  ;;  %1170 = vmatpush2.msra.mxu1 %v320_v47  ;;  %9870 = vst [vmem:[#allocation16_spill] sm:$0xff] %v5596_v44  ;;  %9871 = vst [vmem:[#allocation17_spill] sm:$0xff] %v5600_v45  ;;  %v5602_v46 = vld [vmem:[#allocation3 + $0x6b8] sm:$0xff]  ;;  %v5606_v47 = vld [vmem:[#allocation3 + $0x6a0] sm:$0xff] }
  0xb6   :  { %1100 = vmatprep.subr.mxu0 %v311_v48  ;;  %1171 = vmatprep.subr.mxu1 %v313_v49  ;;  %9872 = vst [vmem:[#allocation18_spill] sm:$0xff] %v5602_v46  ;;  %9873 = vst [vmem:[#allocation19_spill] sm:$0xff] %v5606_v47  ;;  %v5608_v48 = vld [vmem:[#allocation3 + $0x6b0] sm:$0xff]  ;;  %v5612_v49 = vld [vmem:[#allocation3 + $0x668] sm:$0xff] }
  0xb7   :  { %1101 = vmatpush2.msra.mxu0 %v310_v50  ;;  %1172 = vmatpush2.msra.mxu1 %v312_v51  ;;  %9874 = vst [vmem:[#allocation20_spill] sm:$0xff] %v5608_v48  ;;  %9875 = vst [vmem:[#allocation21_spill] sm:$0xff] %v5612_v49  ;;  %v5614_v50 = vld [vmem:[#allocation3 + $0x678] sm:$0xff]  ;;  %v5618_v51 = vld [vmem:[#allocation3 + $0x660] sm:$0xff] }
  0xb8   :  { %1102 = vmatprep.subr.mxu0 %v303_v52  ;;  %1173 = vmatprep.subr.mxu1 %v305_v53  ;;  %9876 = vst [vmem:[#allocation22_spill] sm:$0xff] %v5614_v50  ;;  %9877 = vst [vmem:[#allocation23_spill] sm:$0xff] %v5618_v51  ;;  %v5620_v52 = vld [vmem:[#allocation3 + $0x670] sm:$0xff]  ;;  %v5624_v53 = vld [vmem:[#allocation3 + $0x628] sm:$0xff] }
  0xb9   :  { %1103 = vmatpush2.msra.mxu0 %v302_v54  ;;  %1174 = vmatpush2.msra.mxu1 %v304_v55  ;;  %9878 = vst [vmem:[#allocation24_spill] sm:$0xff] %v5620_v52  ;;  %9879 = vst [vmem:[#allocation25_spill] sm:$0xff] %v5624_v53  ;;  %v5626_v54 = vld [vmem:[#allocation3 + $0x638] sm:$0xff]  ;;  %v5630_v55 = vld [vmem:[#allocation3 + $0x620] sm:$0xff] }
  0xba   :  { %1104 = vmatprep.subr.mxu0 %v5544_v56  ;;  %1175 = vmatprep.subr.mxu1 %v5546_v57  ;;  %9880 = vst [vmem:[#allocation26_spill] sm:$0xff] %v5626_v54  ;;  %9881 = vst [vmem:[#allocation27_spill] sm:$0xff] %v5630_v55 }
  0xbb   :  { %1105 = vmatpush2.msra.mxu0 %v5548_v58  ;;  %1176 = vmatpush2.msra.mxu1 %v5550_v59 }
  0xbc   :  { %1106 = vmatprep.subr.mxu0 %v5552_v18  ;;  %1177 = vmatprep.subr.mxu1 %v5554_v60 }
  0xbd   :  { %1107 = vmatpush2.msra.mxu0 %v5558_v61  ;;  %1178 = vmatpush2.msra.mxu1 %v5560_v62 }
  0xbe   :  { %1108 = vmatprep.subr.mxu0 %v5564_v63  ;;  %1179 = vmatprep.subr.mxu1 %v5566_v1 }
  0xbf   :  { %1109 = vmatpush2.msra.mxu0 %v5570_v2  ;;  %1180 = vmatpush2.msra.mxu1 %v5572_v3 }
  0xc0   :  { %1110 = vmatprep.subr.mxu0 %v5576_v23  ;;  %1181 = vmatprep.subr.mxu1 %v5578_v4  ;;  %v5856_v4 = vld [vmem:[#allocation3 + $0x250] sm:$0xff] }
  0xc1   :  { %1111 = vmatpush2.msra.mxu0 %v5582_v5  ;;  %1182 = vmatpush2.msra.mxu1 %v5584_v6  ;;  %9946 = vst [vmem:[#allocation90_spill] sm:$0xff] %v5856_v4 }
  0xc2   :  { %1112 = vmatprep.subr.mxu0 %v5588_v7  ;;  %1183 = vmatprep.subr.mxu1 %v5590_v8  ;;  %v5817_v8 = vld [vmem:[#allocation3 + $0x288] sm:$0xff]  ;;  %v5829_v7 = vld [vmem:[#allocation3 + $0x280] sm:$0xff] }
  0xc3   :  { %1113 = vmatpush2.msra.mxu0 %v5594_v9  ;;  %1184 = vmatpush2.msra.mxu1 %v5596_v44  ;;  %9937 = vst [vmem:[#allocation81_spill] sm:$0xff] %v5817_v8  ;;  %9939 = vst [vmem:[#allocation83_spill] sm:$0xff] %v5829_v7 }
  0xc4   :  { %1114 = vmatprep.subr.mxu0 %v5600_v45  ;;  %1185 = vmatprep.subr.mxu1 %v5602_v46  ;;  %v5636_v46 = vld [vmem:[#allocation3 + $0x5e8] sm:$0xff]  ;;  %v5807_v45 = vld [vmem:[#allocation3 + $0x2c0] sm:$0xff] }
  0xc5   :  { %1115 = vmatpush2.msra.mxu0 %v5606_v47  ;;  %1186 = vmatpush2.msra.mxu1 %v5608_v48  ;;  %9883 = vst [vmem:[#allocation29_spill] sm:$0xff] %v5636_v46  ;;  %v5638_v47 = vld [vmem:[#allocation3 + $0x5f8] sm:$0xff]  ;;  %v5642_v48 = vld [vmem:[#allocation3 + $0x5e0] sm:$0xff]  ;;  %9935 = vst [vmem:[#allocation79_spill] sm:$0xff] %v5807_v45 }
  0xc6   :  { %1116 = vmatprep.subr.mxu0 %v5612_v49  ;;  %1187 = vmatprep.subr.mxu1 %v5614_v50  ;;  %9884 = vst [vmem:[#allocation30_spill] sm:$0xff] %v5638_v47  ;;  %9885 = vst [vmem:[#allocation31_spill] sm:$0xff] %v5642_v48  ;;  %v5644_v49 = vld [vmem:[#allocation3 + $0x5f0] sm:$0xff]  ;;  %v5648_v50 = vld [vmem:[#allocation3 + $0x5a8] sm:$0xff] }
  0xc7   :  { %1117 = vmatpush2.msra.mxu0 %v5618_v51  ;;  %1188 = vmatpush2.msra.mxu1 %v5620_v52  ;;  %9886 = vst [vmem:[#allocation32_spill] sm:$0xff] %v5644_v49  ;;  %9887 = vst [vmem:[#allocation33_spill] sm:$0xff] %v5648_v50  ;;  %v5650_v51 = vld [vmem:[#allocation3 + $0x5b8] sm:$0xff]  ;;  %v5654_v52 = vld [vmem:[#allocation3 + $0x5a0] sm:$0xff] }
  0xc8   :  { %1118 = vmatprep.subr.mxu0 %v5624_v53  ;;  %1189 = vmatprep.subr.mxu1 %v5626_v54  ;;  %9888 = vst [vmem:[#allocation34_spill] sm:$0xff] %v5650_v51  ;;  %9889 = vst [vmem:[#allocation35_spill] sm:$0xff] %v5654_v52  ;;  %v5656_v53 = vld [vmem:[#allocation3 + $0x5b0] sm:$0xff]  ;;  %v5660_v54 = vld [vmem:[#allocation3 + $0x568] sm:$0xff] }
  0xc9   :  { %1119 = vmatpush2.msra.mxu0 %v5630_v55  ;;  %1190 = vmatpush2.msra.mxu1 %v5632_v0  ;;  %9890 = vst [vmem:[#allocation36_spill] sm:$0xff] %v5656_v53  ;;  %9891 = vst [vmem:[#allocation37_spill] sm:$0xff] %v5660_v54  ;;  %v5662_v55 = vld [vmem:[#allocation3 + $0x578] sm:$0xff]  ;;  %v5666_v0 = vld [vmem:[#allocation3 + $0x560] sm:$0xff] }
  0xca   :  { %1120 = vmatprep.subr.mxu0 %v5636_v46  ;;  %1191 = vmatprep.subr.mxu1 %v5638_v47  ;;  %9892 = vst [vmem:[#allocation38_spill] sm:$0xff] %v5662_v55  ;;  %9893 = vst [vmem:[#allocation39_spill] sm:$0xff] %v5666_v0  ;;  %v5668_v46 = vld [vmem:[#allocation3 + $0x570] sm:$0xff]  ;;  %v5672_v47 = vld [vmem:[#allocation3 + $0x528] sm:$0xff] }
  0xcb   :  { %1121 = vmatpush2.msra.mxu0 %v5642_v48  ;;  %1192 = vmatpush2.msra.mxu1 %v5644_v49  ;;  %9894 = vst [vmem:[#allocation40_spill] sm:$0xff] %v5668_v46  ;;  %9895 = vst [vmem:[#allocation41_spill] sm:$0xff] %v5672_v47  ;;  %v5674_v48 = vld [vmem:[#allocation3 + $0x538] sm:$0xff]  ;;  %v5678_v49 = vld [vmem:[#allocation3 + $0x520] sm:$0xff] }
  0xcc   :  { %1122 = vmatprep.subr.mxu0 %v5648_v50  ;;  %1193 = vmatprep.subr.mxu1 %v5650_v51  ;;  %9896 = vst [vmem:[#allocation42_spill] sm:$0xff] %v5674_v48  ;;  %9897 = vst [vmem:[#allocation43_spill] sm:$0xff] %v5678_v49  ;;  %v5680_v50 = vld [vmem:[#allocation3 + $0x530] sm:$0xff]  ;;  %v5684_v51 = vld [vmem:[#allocation3 + $0x4e8] sm:$0xff] }
  0xcd   :  { %1123 = vmatpush2.msra.mxu0 %v5654_v52  ;;  %1194 = vmatpush2.msra.mxu1 %v5656_v53  ;;  %9898 = vst [vmem:[#allocation44_spill] sm:$0xff] %v5680_v50  ;;  %9899 = vst [vmem:[#allocation45_spill] sm:$0xff] %v5684_v51  ;;  %v5686_v52 = vld [vmem:[#allocation3 + $0x4f8] sm:$0xff]  ;;  %v5690_v53 = vld [vmem:[#allocation3 + $0x4e0] sm:$0xff] }
  0xce   :  { %1124 = vmatprep.subr.mxu0 %v5660_v54  ;;  %1195 = vmatprep.subr.mxu1 %v5662_v55  ;;  %9900 = vst [vmem:[#allocation46_spill] sm:$0xff] %v5686_v52  ;;  %9901 = vst [vmem:[#allocation47_spill] sm:$0xff] %v5690_v53  ;;  %v5694_v55 = vld [vmem:[#allocation3 + $0x4f0] sm:$0xff]  ;;  %v5789_v54 = vld [vmem:[#allocation3 + $0x300] sm:$0xff] }
  0xcf   :  { %1125 = vmatpush2.msra.mxu0 %v5666_v0  ;;  %1196 = vmatpush2.msra.mxu1 %v5668_v46  ;;  %9902 = vst [vmem:[#allocation48_spill] sm:$0xff] %v5694_v55  ;;  %v9903_v46 = vmov 0.0   ;;  %9931 = vst [vmem:[#allocation75_spill] sm:$0xff] %v5789_v54 }
  0xd0   :  { %1126 = vmatprep.subr.mxu0 %v5672_v47  ;;  %1197 = vmatprep.subr.mxu1 %v5674_v48  ;;  %v324_v48 = vld [vmem:[#allocation3 + $0x8c0] ss:$8 sm:$0xf0] }
  0xd1   :  { %1127 = vmatpush2.msra.mxu0 %v5678_v49  ;;  %1198 = vmatpush2.msra.mxu1 %v5680_v50  ;;  %v5704_v49 = vld [vmem:[#allocation3 + $0x488] sm:$0xff]  ;;  %v5707_v50 = vld [vmem:[#allocation3 + $0x498] sm:$0xff] }
  0xd2   :  { %1128 = vmatprep.subr.mxu0 %v5684_v51  ;;  %1199 = vmatprep.subr.mxu1 %v5686_v52  ;;  %9904 = vst [vmem:[#allocation49_spill] sm:$0xff] %v5704_v49  ;;  %9905 = vst [vmem:[#allocation50_spill] sm:$0xff] %v5707_v50  ;;  %v5710_v52 = vld [vmem:[#allocation3 + $0x480] sm:$0xff]  ;;  %v5767_v47 = vld [vmem:[#allocation3 + $0x348] sm:$0xff] }
  0xd3   :  { %1129 = vmatpush2.msra.mxu0 %v5690_v53  ;;  %1130 = vmatprep.mubr.f32.mxu0 %v9903_v46  ;;  %9906 = vst [vmem:[#allocation51_spill] sm:$0xff] %v5710_v52  ;;  %v5713_v53 = vld [vmem:[#allocation3 + $0x490] sm:$0xff]  ;;  %v5734_v51 = vld [vmem:[#allocation3 + $0x400] sm:$0xff]  ;;  %9925 = vst [vmem:[#allocation69_spill] sm:$0xff] %v5767_v47 }
  0xd4   :  { %1200 = vmatpush2.msra.mxu1 %v5694_v55  ;;  %1201 = vmatprep.mubr.f32.mxu1 %v9903_v46  ;;  %9907 = vst [vmem:[#allocation52_spill] sm:$0xff] %v5713_v53  ;;  %v5716_v55 = vld [vmem:[#allocation3 + $0x448] sm:$0xff]  ;;  %9914 = vst [vmem:[#allocation59_spill] sm:$0xff] %v5734_v51 }
  0xd5   :  { %1131 = vmatmul.mubr.f32.vlgmr.msra.gmra.mxu0 %v9903_v46  ;;  %1202 = vmatmul.mubr.f32.vlgmr.msra.gmra.mxu1 %v9903_v46  ;;  %9908 = vst [vmem:[#allocation53_spill] sm:$0xff] %v5716_v55  ;;  %v5719_v46 = vld [vmem:[#allocation3 + $0x458] sm:$0xff] }
  0xd6   :  { %1264 = vmatprep.subr.mxu0 %v5704_v49  ;;  %1335 = vmatprep.subr.mxu1 %v5707_v50  ;;  %9909 = vst [vmem:[#allocation54_spill] sm:$0xff] %v5719_v46  ;;  %v5722_v49 = vld [vmem:[#allocation3 + $0x440] sm:$0xff]  ;;  %v5725_v50 = vld [vmem:[#allocation3 + $0x450] sm:$0xff] }
  0xd7   :  { %1265 = vmatpush1.msra.mxu0 %v5710_v52  ;;  %1336 = vmatpush1.msra.mxu1 %v5713_v53  ;;  %9910 = vst [vmem:[#allocation55_spill] sm:$0xff] %v5722_v49  ;;  %9911 = vst [vmem:[#allocation56_spill] sm:$0xff] %v5725_v50  ;;  %v5728_v52 = vld [vmem:[#allocation3 + $0x408] sm:$0xff]  ;;  %v5731_v53 = vld [vmem:[#allocation3 + $0x418] sm:$0xff] }
  0xd8   :  { %1266 = vmatprep.subr.mxu0 %v5716_v55  ;;  %1337 = vmatprep.subr.mxu1 %v5719_v46  ;;  %9912 = vst [vmem:[#allocation57_spill] sm:$0xff] %v5728_v52  ;;  %9913 = vst [vmem:[#allocation58_spill] sm:$0xff] %v5731_v53  ;;  %v5737_v46 = vld [vmem:[#allocation3 + $0x410] sm:$0xff] }
  0xd9   :  { %1267 = vmatpush1.msra.mxu0 %v5722_v49  ;;  %1338 = vmatpush1.msra.mxu1 %v5725_v50  ;;  %9915 = vst [vmem:[#allocation60_spill] sm:$0xff] %v5737_v46  ;;  %v5740_v49 = vld [vmem:[#allocation3 + $0x3c8] sm:$0xff]  ;;  %v5743_v50 = vld [vmem:[#allocation3 + $0x3d8] sm:$0xff]  ;;  %v5749_v55 = vld [vmem:[#allocation3 + $0x3d0] sm:$0xff] }
  0xda   :  { %1268 = vmatprep.subr.mxu0 %v5728_v52  ;;  %1339 = vmatprep.subr.mxu1 %v5731_v53  ;;  %9916 = vst [vmem:[#allocation61_spill] sm:$0xff] %v5740_v49  ;;  %9917 = vst [vmem:[#allocation62_spill] sm:$0xff] %v5743_v50  ;;  %v5746_v52 = vld [vmem:[#allocation3 + $0x3c0] sm:$0xff] }
  0xdb   :  { %1269 = vmatpush1.msra.mxu0 %v5734_v51  ;;  %1340 = vmatpush1.msra.mxu1 %v5737_v46  ;;  %9918 = vst [vmem:[#allocation63_spill] sm:$0xff] %v5746_v52  ;;  %9919 = vst [vmem:[#allocation64_spill] sm:$0xff] %v5749_v55  ;;  %v5752_v51 = vld [vmem:[#allocation3 + $0x388] sm:$0xff]  ;;  %v5755_v46 = vld [vmem:[#allocation3 + $0x398] sm:$0xff] }
  0xdc   :  { %1270 = vmatprep.subr.mxu0 %v5740_v49  ;;  %1341 = vmatprep.subr.mxu1 %v5743_v50  ;;  %9920 = vst [vmem:[#allocation65_spill] sm:$0xff] %v5752_v51  ;;  %9921 = vst [vmem:[#allocation66_spill] sm:$0xff] %v5755_v46  ;;  %v9922_v49 = vlaneseq  ;;  %v5761_v50 = vld [vmem:[#allocation3 + $0x380] sm:$0xff] }
  0xdd   :  { %1271 = vmatpush1.msra.mxu0 %v5746_v52  ;;  %1342 = vmatpush1.msra.mxu1 %v5749_v55  ;;  %9923 = vst [vmem:[#allocation67_spill] sm:$0xff] %v5761_v50  ;;  %v5764_v52 = vld [vmem:[#allocation3 + $0x390] sm:$0xff] }
  0xde   :  { %1272 = vmatprep.subr.mxu0 %v5752_v51  ;;  %1343 = vmatprep.subr.mxu1 %v5755_v46  ;;  %v5759_v53 = vshrl.u32 %v9922_v49, 7  ;;  %9924 = vst [vmem:[#allocation68_spill] sm:$0xff] %v5764_v52  ;;  %v323_v55 = vld [vmem:[#allocation3 + $0x8c0] ss:$8 sm:$0xf] }
  0xdf   :  { %1273 = vmatpush1.msra.mxu0 %v5761_v50  ;;  %1344 = vmatpush1.msra.mxu1 %v5764_v52  ;;  %v5770_v51 = vld [vmem:[#allocation3 + $0x358] sm:$0xff]  ;;  %v5773_v49 = vld [vmem:[#allocation3 + $0x340] sm:$0xff]  ;;  %v5776_v46 = vld [vmem:[#allocation3 + $0x350] sm:$0xff] }
  0xe0   :  { %1274 = vmatprep.subr.mxu0 %v5767_v47  ;;  %9926 = vst [vmem:[#allocation70_spill] sm:$0xff] %v5770_v51  ;;  %1345 = vmatprep.subr.mxu1 %v5770_v51  ;;  %9927 = vst [vmem:[#allocation71_spill] sm:$0xff] %v5773_v49  ;;  %v5779_v50 = vld [vmem:[#allocation3 + $0x308] sm:$0xff]  ;;  %v5782_v52 = vld [vmem:[#allocation3 + $0x318] sm:$0xff]  ;;  %v5785_v47 = vor.u32 %v324_v48, %v323_v55  ;;  %v337_v51 = vsub.s32 0, %v5759_v53  ;;  %v345_v0 = vsub.s32 2, %v5759_v53 }
  0xe1   :  { %1275 = vmatpush1.msra.mxu0 %v5773_v49  ;;  %9928 = vst [vmem:[#allocation72_spill] sm:$0xff] %v5776_v46  ;;  %1346 = vmatpush1.msra.mxu1 %v5776_v46  ;;  %9929 = vst [vmem:[#allocation73_spill] sm:$0xff] %v5779_v50  ;;  %v5792_v49 = vld [vmem:[#allocation3 + $0x310] sm:$0xff]  ;;  %v5800_v48 = vld [vmem:[#allocation3 + $0x2c8] sm:$0xff] }
  0xe2   :  { %1276 = vmatprep.subr.mxu0 %v5779_v50  ;;  %9930 = vst [vmem:[#allocation74_spill] sm:$0xff] %v5782_v52  ;;  %1347 = vmatprep.subr.mxu1 %v5782_v52  ;;  %9932 = vst [vmem:[#allocation76_spill] sm:$0xff] %v5792_v49  ;;  %v341_v52 = vsub.s32 1, %v5759_v53  ;;  %v5803_v55 = vld [vmem:[#allocation3 + $0x2d8] sm:$0xff] }
  0xe3   :  { %1277 = vmatpush1.msra.mxu0 %v5789_v54  ;;  %1348 = vmatpush1.msra.mxu1 %v5792_v49  ;;  %9933 = vst [vmem:[#allocation77_spill] sm:$0xff] %v5800_v48  ;;  %9934 = vst [vmem:[#allocation78_spill] sm:$0xff] %v5803_v55  ;;  %v349_v54 = vsub.s32 3, %v5759_v53  ;;  %v5810_v49 = vld [vmem:[#allocation3 + $0x2d0] sm:$0xff] }
  0xe4   :  { %v5795_v46 = vpop.f32.mrf.mxu0  ;;  %v5797_v50 = vpop.f32.mrf.mxu1  ;;  %1278 = vmatprep.subr.mxu0 %v5800_v48  ;;  %1349 = vmatprep.subr.mxu1 %v5803_v55  ;;  %9936 = vst [vmem:[#allocation80_spill] sm:$0xff] %v5810_v49  ;;  %v5820_v48 = vld [vmem:[#allocation3 + $0x298] sm:$0xff]  ;;  %v5824_v55 = vrot.slane %v5785_v47, %v337_v51 }
  0xe5   :  { %1279 = vmatpush1.msra.mxu0 %v5807_v45  ;;  %1350 = vmatpush1.msra.mxu1 %v5810_v49  ;;  %9938 = vst [vmem:[#allocation82_spill] sm:$0xff] %v5820_v48  ;;  %v5827_v45 = vrot.slane %v5785_v47, %v345_v0  ;;  %v5832_v49 = vld [vmem:[#allocation3 + $0x290] sm:$0xff]  ;;  %v5841_v51 = vld [vmem:[#allocation3 + $0x258] sm:$0xff]  ;;  %v5845_v0 = vrot.slane %v5785_v47, %v349_v54 }
  0xe6   :  { %v5813_v44 = vpop.f32.mrf.mxu0  ;;  %v5815_v9 = vpop.f32.mrf.mxu1  ;;  %1280 = vmatprep.subr.mxu0 %v5817_v8  ;;  %1351 = vmatprep.subr.mxu1 %v5820_v48  ;;  %9940 = vst [vmem:[#allocation84_spill] sm:$0xff] %v5832_v49  ;;  %v5836_v8 = vrot.slane %v5785_v47, %v341_v52  ;;  %v5838_v48 = vld [vmem:[#allocation3 + $0x248] sm:$0xff]  ;;  %9942 = vst [vmem:[#allocation86_spill] sm:$0xff] %v5841_v51  ;;  %v5853_v52 = vld [vmem:[#allocation3 + $0x240] sm:$0xff] }
  0xe7   :  { %1281 = vmatpush1.msra.mxu0 %v5829_v7  ;;  %1352 = vmatpush1.msra.mxu1 %v5832_v49  ;;  %9941 = vst [vmem:[#allocation85_spill] sm:$0xff] %v5838_v48  ;;  %9945 = vst [vmem:[#allocation89_spill] sm:$0xff] %v5853_v52  ;;  %v5862_v54 = vld [vmem:[#allocation3 + $0x218] sm:$0xff] }
  0xe8   :  { %v472_v6 = vpop.f32.mrf.mxu0  ;;  %v585_v5 = vpop.f32.mrf.mxu1  ;;  %1282 = vmatprep.subr.mxu0 %v5838_v48  ;;  %1353 = vmatprep.subr.mxu1 %v5841_v51  ;;  %v5859_v51 = vld [vmem:[#allocation3 + $0x208] sm:$0xff]  ;;  %9948 = vst [vmem:[#allocation92_spill] sm:$0xff] %v5862_v54 }
  0xe9   :  { %v5848_v7 = vadd.f32 %v472_v6, %v5824_v55  ;;  %v5851_v49 = vadd.f32 %v585_v5, %v5827_v45  ;;  %1283 = vmatpush1.msra.mxu0 %v5853_v52  ;;  %1354 = vmatpush1.msra.mxu1 %v5856_v4  ;;  %9947 = vst [vmem:[#allocation91_spill] sm:$0xff] %v5859_v51  ;;  %v5877_v52 = vld [vmem:[#allocation3 + $0x1c8] sm:$0xff] }
  0xea   :  { %v474_v48 = vpop.f32.mrf.mxu0  ;;  %v587_v23 = vpop.f32.mrf.mxu1  ;;  %1284 = vmatprep.subr.mxu0 %v5859_v51  ;;  %1355 = vmatprep.subr.mxu1 %v5862_v54  ;;  %9953 = vst [vmem:[#allocation97_spill] sm:$0xff] %v5877_v52  ;;  %v5880_v54 = vld [vmem:[#allocation3 + $0x1d8] sm:$0xff] }
  0xeb   :  { %9943 = vst [vmem:[#allocation87_spill] sm:$0xff] %v5848_v7  ;;  %9944 = vst [vmem:[#allocation88_spill] sm:$0xff] %v5851_v49  ;;  %v5866_v5 = vadd.f32 %v474_v48, %v5836_v8  ;;  %v5869_v6 = vadd.f32 %v587_v23, %v5845_v0  ;;  %v5871_v49 = vld [vmem:[#allocation3 + $0x200] sm:$0xff]  ;;  %v5874_v7 = vld [vmem:[#allocation3 + $0x210] sm:$0xff] }
  0xec   :  { %9951 = vst [vmem:[#allocation95_spill] sm:$0xff] %v5871_v49  ;;  %1285 = vmatpush1.msra.mxu0 %v5871_v49  ;;  %9952 = vst [vmem:[#allocation96_spill] sm:$0xff] %v5874_v7  ;;  %1356 = vmatpush1.msra.mxu1 %v5874_v7  ;;  %v478_v4 = vpop.f32.mrf.mxu0  ;;  %v591_v51 = vpop.f32.mrf.mxu1  ;;  %v5895_v49 = vld [vmem:[#allocation3 + $0x188] sm:$0xff] }
  0xed   :  { %9949 = vst [vmem:[#allocation93_spill] sm:$0xff] %v5866_v5  ;;  %9950 = vst [vmem:[#allocation94_spill] sm:$0xff] %v5869_v6  ;;  %1286 = vmatprep.subr.mxu0 %v5877_v52  ;;  %1357 = vmatprep.subr.mxu1 %v5880_v54  ;;  %v5884_v23 = vadd.f32 %v478_v4, %v5824_v55  ;;  %v5887_v48 = vadd.f32 %v591_v51, %v5827_v45  ;;  %v5889_v6 = vld [vmem:[#allocation3 + $0x1c0] sm:$0xff]  ;;  %v5892_v5 = vld [vmem:[#allocation3 + $0x1d0] sm:$0xff] }
  0xee   :  { %9954 = vst [vmem:[#allocation98_spill] sm:$0xff] %v5880_v54  ;;  %9957 = vst [vmem:[#allocation101_spill] sm:$0xff] %v5889_v6  ;;  %1287 = vmatpush1.msra.mxu0 %v5889_v6  ;;  %1358 = vmatpush1.msra.mxu1 %v5892_v5  ;;  %v480_v7 = vpop.f32.mrf.mxu0  ;;  %v593_v52 = vpop.f32.mrf.mxu1  ;;  %v5898_v54 = vld [vmem:[#allocation3 + $0x198] sm:$0xff]  ;;  %v5913_v6 = vld [vmem:[#allocation3 + $0x148] sm:$0xff] }
  0xef   :  { %9955 = vst [vmem:[#allocation99_spill] sm:$0xff] %v5884_v23  ;;  %9956 = vst [vmem:[#allocation100_spill] sm:$0xff] %v5887_v48  ;;  %1288 = vmatprep.subr.mxu0 %v5895_v49  ;;  %1359 = vmatprep.subr.mxu1 %v5898_v54  ;;  %v5902_v4 = vadd.f32 %v480_v7, %v5836_v8  ;;  %v5905_v51 = vadd.f32 %v593_v52, %v5845_v0  ;;  %v5907_v48 = vld [vmem:[#allocation3 + $0x180] sm:$0xff]  ;;  %v5910_v23 = vld [vmem:[#allocation3 + $0x190] sm:$0xff] }
  0xf0   :  { %9958 = vst [vmem:[#allocation102_spill] sm:$0xff] %v5892_v5  ;;  %9959 = vst [vmem:[#allocation103_spill] sm:$0xff] %v5895_v49  ;;  %1289 = vmatpush1.msra.mxu0 %v5907_v48  ;;  %1360 = vmatpush1.msra.mxu1 %v5910_v23  ;;  %v484_v5 = vpop.f32.mrf.mxu0  ;;  %v597_v49 = vpop.f32.mrf.mxu1 }
  0xf1   :  { %9960 = vst [vmem:[#allocation104_spill] sm:$0xff] %v5898_v54  ;;  %9961 = vst [vmem:[#allocation105_spill] sm:$0xff] %v5902_v4  ;;  %1290 = vmatprep.subr.mxu0 %v5913_v6  ;;  %v5916_v54 = vld [vmem:[#allocation3 + $0x158] sm:$0xff]  ;;  %v5920_v7 = vadd.f32 %v484_v5, %v5824_v55  ;;  %v5923_v52 = vadd.f32 %v597_v49, %v5827_v45  ;;  %v5928_v4 = vld [vmem:[#allocation3 + $0x150] sm:$0xff] }
  0xf2   :  { %9962 = vst [vmem:[#allocation106_spill] sm:$0xff] %v5905_v51  ;;  %9963 = vst [vmem:[#allocation107_spill] sm:$0xff] %v5907_v48  ;;  %1361 = vmatprep.subr.mxu1 %v5916_v54  ;;  %v5925_v51 = vld [vmem:[#allocation3 + $0x140] sm:$0xff]  ;;  %v5931_v48 = vld [vmem:[#allocation3 + $0x108] sm:$0xff] }
  0xf3   :  { %9964 = vst [vmem:[#allocation108_spill] sm:$0xff] %v5910_v23  ;;  %9965 = vst [vmem:[#allocation109_spill] sm:$0xff] %v5913_v6  ;;  %1291 = vmatpush1.msra.mxu0 %v5925_v51  ;;  %1362 = vmatpush1.msra.mxu1 %v5928_v4  ;;  %v486_v23 = vpop.f32.mrf.mxu0  ;;  %v599_v6 = vpop.f32.mrf.mxu1 }
  0xf4   :  { %9966 = vst [vmem:[#allocation110_spill] sm:$0xff] %v5916_v54  ;;  %9967 = vst [vmem:[#allocation111_spill] sm:$0xff] %v5920_v7  ;;  %1292 = vmatprep.subr.mxu0 %v5931_v48  ;;  %v5934_v54 = vld [vmem:[#allocation3 + $0x118] sm:$0xff]  ;;  %v5938_v49 = vadd.f32 %v486_v23, %v5836_v8  ;;  %v5941_v5 = vadd.f32 %v599_v6, %v5845_v0  ;;  %v5946_v7 = vld [vmem:[#allocation3 + $0x110] sm:$0xff] }
  0xf5   :  { %9968 = vst [vmem:[#allocation112_spill] sm:$0xff] %v5923_v52  ;;  %9969 = vst [vmem:[#allocation113_spill] sm:$0xff] %v5925_v51  ;;  %1363 = vmatprep.subr.mxu1 %v5934_v54  ;;  %v5943_v52 = vld [vmem:[#allocation3 + $0x100] sm:$0xff]  ;;  %v5949_v51 = vld [vmem:[#allocation3 + $0xc8] sm:$0xff] }
  0xf6   :  { %9970 = vst [vmem:[#allocation114_spill] sm:$0xff] %v5928_v4  ;;  %9971 = vst [vmem:[#allocation115_spill] sm:$0xff] %v5931_v48  ;;  %1293 = vmatpush1.msra.mxu0 %v5943_v52  ;;  %1364 = vmatpush1.msra.mxu1 %v5946_v7  ;;  %v490_v4 = vpop.f32.mrf.mxu0  ;;  %v603_v48 = vpop.f32.mrf.mxu1 }
  0xf7   :  { %9972 = vst [vmem:[#allocation116_spill] sm:$0xff] %v5934_v54  ;;  %9973 = vst [vmem:[#allocation117_spill] sm:$0xff] %v5938_v49  ;;  %1294 = vmatprep.subr.mxu0 %v5949_v51  ;;  %v5952_v54 = vld [vmem:[#allocation3 + $0xd8] sm:$0xff]  ;;  %v5956_v6 = vadd.f32 %v490_v4, %v5824_v55  ;;  %v5959_v23 = vadd.f32 %v603_v48, %v5827_v45  ;;  %v5964_v49 = vld [vmem:[#allocation3 + $0xd0] sm:$0xff] }
  0xf8   :  { %9974 = vst [vmem:[#allocation118_spill] sm:$0xff] %v5941_v5  ;;  %9975 = vst [vmem:[#allocation119_spill] sm:$0xff] %v5943_v52  ;;  %1365 = vmatprep.subr.mxu1 %v5952_v54  ;;  %v5961_v5 = vld [vmem:[#allocation3 + $0xc0] sm:$0xff]  ;;  %v5967_v52 = vld [vmem:[#allocation3 + $0x888] sm:$0xff] }
  0xf9   :  { %9976 = vst [vmem:[#allocation120_spill] sm:$0xff] %v5946_v7  ;;  %9977 = vst [vmem:[#allocation121_spill] sm:$0xff] %v5949_v51  ;;  %1295 = vmatpush1.msra.mxu0 %v5961_v5  ;;  %1366 = vmatpush1.msra.mxu1 %v5964_v49  ;;  %v492_v7 = vpop.f32.mrf.mxu0  ;;  %v605_v51 = vpop.f32.mrf.mxu1 }
  0xfa   :  { %9978 = vst [vmem:[#allocation122_spill] sm:$0xff] %v5952_v54  ;;  %9979 = vst [vmem:[#allocation123_spill] sm:$0xff] %v5956_v6  ;;  %1296 = vmatprep.subr.mxu0 %v5967_v52  ;;  %v5970_v54 = vld [vmem:[#allocation3 + $0x898] sm:$0xff]  ;;  %v5974_v48 = vadd.f32 %v492_v7, %v5836_v8  ;;  %v5977_v4 = vadd.f32 %v605_v51, %v5845_v0  ;;  %v5982_v6 = vld [vmem:[#allocation3 + $0x890] sm:$0xff] }
  0xfb   :  { %9980 = vst [vmem:[#allocation124_spill] sm:$0xff] %v5959_v23  ;;  %9981 = vst [vmem:[#allocation125_spill] sm:$0xff] %v5961_v5  ;;  %1367 = vmatprep.subr.mxu1 %v5970_v54  ;;  %v5979_v23 = vld [vmem:[#allocation3 + $0x880] sm:$0xff]  ;;  %v5985_v5 = vld [vmem:[#allocation3 + $0x848] sm:$0xff] }
  0xfc   :  { %9982 = vst [vmem:[#allocation126_spill] sm:$0xff] %v5964_v49  ;;  %9983 = vst [vmem:[#allocation127_spill] sm:$0xff] %v5967_v52  ;;  %1297 = vmatpush2.msra.mxu0 %v5979_v23  ;;  %1368 = vmatpush2.msra.mxu1 %v5982_v6  ;;  %v496_v49 = vpop.f32.mrf.mxu0  ;;  %v609_v52 = vpop.f32.mrf.mxu1 }
  0xfd   :  { %9984 = vst [vmem:[#allocation128_spill] sm:$0xff] %v5970_v54  ;;  %9985 = vst [vmem:[#allocation129_spill] sm:$0xff] %v5974_v48  ;;  %1298 = vmatprep.subr.mxu0 %v5985_v5  ;;  %v5988_v54 = vld [vmem:[#allocation3 + $0x858] sm:$0xff]  ;;  %v5992_v51 = vadd.f32 %v496_v49, %v5824_v55  ;;  %v5995_v7 = vadd.f32 %v609_v52, %v5827_v45  ;;  %v6000_v48 = vld [vmem:[#allocation3 + $0x850] sm:$0xff] }
  0xfe   :  { %9986 = vst [vmem:[#allocation130_spill] sm:$0xff] %v5977_v4  ;;  %9987 = vst [vmem:[#allocation131_spill] sm:$0xff] %v5979_v23  ;;  %1369 = vmatprep.subr.mxu1 %v5988_v54  ;;  %v5997_v4 = vld [vmem:[#allocation3 + $0x840] sm:$0xff]  ;;  %v6003_v23 = vld [vmem:[#allocation3 + $0x808] sm:$0xff] }
  0xff   :  { %9988 = vst [vmem:[#allocation132_spill] sm:$0xff] %v5982_v6  ;;  %9989 = vst [vmem:[#allocation133_spill] sm:$0xff] %v5985_v5  ;;  %1299 = vmatpush2.msra.mxu0 %v5997_v4  ;;  %1370 = vmatpush2.msra.mxu1 %v6000_v48  ;;  %v498_v6 = vpop.f32.mrf.mxu0  ;;  %v611_v5 = vpop.f32.mrf.mxu1 }
 0x100   :  { %9990 = vst [vmem:[#allocation134_spill] sm:$0xff] %v5988_v54  ;;  %9991 = vst [vmem:[#allocation135_spill] sm:$0xff] %v5992_v51  ;;  %1300 = vmatprep.subr.mxu0 %v6003_v23  ;;  %v6006_v54 = vld [vmem:[#allocation3 + $0x818] sm:$0xff]  ;;  %v6010_v52 = vadd.f32 %v498_v6, %v5836_v8  ;;  %v6013_v49 = vadd.f32 %v611_v5, %v5845_v0  ;;  %v6018_v51 = vld [vmem:[#allocation3 + $0x810] sm:$0xff] }
 0x101   :  { %9992 = vst [vmem:[#allocation136_spill] sm:$0xff] %v5995_v7  ;;  %9993 = vst [vmem:[#allocation137_spill] sm:$0xff] %v5997_v4  ;;  %1371 = vmatprep.subr.mxu1 %v6006_v54  ;;  %v6015_v7 = vld [vmem:[#allocation3 + $0x800] sm:$0xff]  ;;  %v6021_v4 = vld [vmem:[#allocation3 + $0x7c8] sm:$0xff] }
 0x102   :  { %9994 = vst [vmem:[#allocation138_spill] sm:$0xff] %v6000_v48  ;;  %9995 = vst [vmem:[#allocation139_spill] sm:$0xff] %v6003_v23  ;;  %1301 = vmatpush2.msra.mxu0 %v6015_v7  ;;  %1372 = vmatpush2.msra.mxu1 %v6018_v51  ;;  %v502_v48 = vpop.f32.mrf.mxu0  ;;  %v615_v23 = vpop.f32.mrf.mxu1 }
 0x103   :  { %9996 = vst [vmem:[#allocation140_spill] sm:$0xff] %v6006_v54  ;;  %9997 = vst [vmem:[#allocation141_spill] sm:$0xff] %v6010_v52  ;;  %1302 = vmatprep.subr.mxu0 %v6021_v4  ;;  %v6024_v54 = vld [vmem:[#allocation3 + $0x7d8] sm:$0xff]  ;;  %v6028_v5 = vadd.f32 %v502_v48, %v5824_v55  ;;  %v6031_v6 = vadd.f32 %v615_v23, %v5827_v45  ;;  %v6036_v52 = vld [vmem:[#allocation3 + $0x7d0] sm:$0xff] }
 0x104   :  { %9998 = vst [vmem:[#allocation142_spill] sm:$0xff] %v6013_v49  ;;  %9999 = vst [vmem:[#allocation143_spill] sm:$0xff] %v6015_v7  ;;  %1373 = vmatprep.subr.mxu1 %v6024_v54  ;;  %v6033_v49 = vld [vmem:[#allocation3 + $0x7c0] sm:$0xff]  ;;  %v6039_v7 = vld [vmem:[#allocation3 + $0x788] sm:$0xff] }
 0x105   :  { %10000 = vst [vmem:[#allocation144_spill] sm:$0xff] %v6018_v51  ;;  %10001 = vst [vmem:[#allocation145_spill] sm:$0xff] %v6021_v4  ;;  %1303 = vmatpush2.msra.mxu0 %v6033_v49  ;;  %1374 = vmatpush2.msra.mxu1 %v6036_v52  ;;  %v504_v51 = vpop.f32.mrf.mxu0  ;;  %v617_v4 = vpop.f32.mrf.mxu1 }
 0x106   :  { %10002 = vst [vmem:[#allocation146_spill] sm:$0xff] %v6024_v54  ;;  %10003 = vst [vmem:[#allocation147_spill] sm:$0xff] %v6028_v5  ;;  %1304 = vmatprep.subr.mxu0 %v6039_v7  ;;  %v6042_v54 = vld [vmem:[#allocation3 + $0x798] sm:$0xff]  ;;  %v6046_v23 = vadd.f32 %v504_v51, %v5836_v8  ;;  %v6049_v48 = vadd.f32 %v617_v4, %v5845_v0  ;;  %v6054_v5 = vld [vmem:[#allocation3 + $0x790] sm:$0xff] }
 0x107   :  { %10004 = vst [vmem:[#allocation148_spill] sm:$0xff] %v6031_v6  ;;  %10005 = vst [vmem:[#allocation149_spill] sm:$0xff] %v6033_v49  ;;  %1375 = vmatprep.subr.mxu1 %v6042_v54  ;;  %v6051_v6 = vld [vmem:[#allocation3 + $0x780] sm:$0xff]  ;;  %v6057_v49 = vld [vmem:[#allocation3 + $0x748] sm:$0xff] }
 0x108   :  { %10006 = vst [vmem:[#allocation150_spill] sm:$0xff] %v6036_v52  ;;  %10007 = vst [vmem:[#allocation151_spill] sm:$0xff] %v6039_v7  ;;  %1305 = vmatpush2.msra.mxu0 %v6051_v6  ;;  %1376 = vmatpush2.msra.mxu1 %v6054_v5  ;;  %v508_v52 = vpop.f32.mrf.mxu0  ;;  %v621_v7 = vpop.f32.mrf.mxu1 }
 0x109   :  { %10008 = vst [vmem:[#allocation152_spill] sm:$0xff] %v6042_v54  ;;  %10009 = vst [vmem:[#allocation153_spill] sm:$0xff] %v6046_v23  ;;  %1306 = vmatprep.subr.mxu0 %v6057_v49  ;;  %v6060_v54 = vld [vmem:[#allocation3 + $0x758] sm:$0xff]  ;;  %v6064_v4 = vadd.f32 %v508_v52, %v5824_v55  ;;  %v6067_v51 = vadd.f32 %v621_v7, %v5827_v45  ;;  %v6072_v23 = vld [vmem:[#allocation3 + $0x750] sm:$0xff] }
 0x10a   :  { %10010 = vst [vmem:[#allocation154_spill] sm:$0xff] %v6049_v48  ;;  %10011 = vst [vmem:[#allocation155_spill] sm:$0xff] %v6051_v6  ;;  %1377 = vmatprep.subr.mxu1 %v6060_v54  ;;  %v6069_v48 = vld [vmem:[#allocation3 + $0x740] sm:$0xff]  ;;  %v6075_v6 = vld [vmem:[#allocation3 + $0x708] sm:$0xff] }
 0x10b   :  { %10012 = vst [vmem:[#allocation156_spill] sm:$0xff] %v6054_v5  ;;  %10013 = vst [vmem:[#allocation157_spill] sm:$0xff] %v6057_v49  ;;  %1307 = vmatpush2.msra.mxu0 %v6069_v48  ;;  %1378 = vmatpush2.msra.mxu1 %v6072_v23  ;;  %v510_v5 = vpop.f32.mrf.mxu0  ;;  %v623_v49 = vpop.f32.mrf.mxu1 }
 0x10c   :  { %10014 = vst [vmem:[#allocation158_spill] sm:$0xff] %v6060_v54  ;;  %10015 = vst [vmem:[#allocation159_spill] sm:$0xff] %v6064_v4  ;;  %1308 = vmatprep.subr.mxu0 %v6075_v6  ;;  %v6078_v54 = vld [vmem:[#allocation3 + $0x718] sm:$0xff]  ;;  %v6082_v7 = vadd.f32 %v510_v5, %v5836_v8  ;;  %v6085_v52 = vadd.f32 %v623_v49, %v5845_v0  ;;  %v6090_v4 = vld [vmem:[#allocation3 + $0x710] sm:$0xff] }
 0x10d   :  { %10016 = vst [vmem:[#allocation160_spill] sm:$0xff] %v6067_v51  ;;  %10017 = vst [vmem:[#allocation161_spill] sm:$0xff] %v6072_v23  ;;  %1379 = vmatprep.subr.mxu1 %v6078_v54  ;;  %v6087_v51 = vld [vmem:[#allocation3 + $0x700] sm:$0xff]  ;;  %v6093_v23 = vld [vmem:[#allocation3 + $0x6c8] sm:$0xff] }
 0x10e   :  { %10018 = vst [vmem:[#allocation162_spill] sm:$0xff] %v6075_v6  ;;  %10019 = vst [vmem:[#allocation163_spill] sm:$0xff] %v6082_v7  ;;  %1309 = vmatpush2.msra.mxu0 %v6087_v51  ;;  %1380 = vmatpush2.msra.mxu1 %v6090_v4  ;;  %v6096_v6 = vld [vmem:[#allocation3 + $0x6d8] sm:$0xff]  ;;  %v6099_v5 = vld [vmem:[#allocation3 + $0x6c0] sm:$0xff] }
 0x10f   :  { %10020 = vst [vmem:[#allocation164_spill] sm:$0xff] %v6085_v52  ;;  %1310 = vmatprep.subr.mxu0 %v6093_v23  ;;  %1381 = vmatprep.subr.mxu1 %v6096_v6  ;;  %v6102_v49 = vld [vmem:[#allocation3 + $0x6d0] sm:$0xff]  ;;  %v6105_v52 = vld [vmem:[#allocation3 + $0x688] sm:$0xff]  ;;  %v6108_v7 = vld [vmem:[#allocation3 + $0x698] sm:$0xff] }
 0x110   :  { %1311 = vmatpush2.msra.mxu0 %v6099_v5  ;;  %1382 = vmatpush2.msra.mxu1 %v6102_v49 }
 0x111   :  { %1312 = vmatprep.subr.mxu0 %v6105_v52  ;;  %1383 = vmatprep.subr.mxu1 %v6108_v7 }
 0x112   :  { %1313 = vmatpush2.msra.mxu0 %v5422_v10  ;;  %1384 = vmatpush2.msra.mxu1 %v5424_v28  ;;  %v6143_v10 = vpop.f32.mrf.mxu0  ;;  %v6145_v28 = vpop.f32.mrf.mxu1 }
 0x113   :  { %1314 = vmatprep.subr.mxu0 %v5430_v11  ;;  %1385 = vmatprep.subr.mxu1 %v5432_v12 }
 0x114   :  { %1315 = vmatpush2.msra.mxu0 %v5436_v13  ;;  %1386 = vmatpush2.msra.mxu1 %v5438_v14  ;;  %v6147_v11 = vpop.f32.mrf.mxu0  ;;  %v6149_v12 = vpop.f32.mrf.mxu1 }
 0x115   :  { %1316 = vmatprep.subr.mxu0 %v5444_v31  ;;  %1387 = vmatprep.subr.mxu1 %v5446_v15 }
 0x116   :  { %1317 = vmatpush2.msra.mxu0 %v5450_v16  ;;  %1388 = vmatpush2.msra.mxu1 %v5452_v17 }
 0x117   :  { %1318 = vmatprep.subr.mxu0 %v5458_v19  ;;  %1389 = vmatprep.subr.mxu1 %v5460_v20 }
 0x118   :  { %1319 = vmatpush2.msra.mxu0 %v5466_v21  ;;  %1390 = vmatpush2.msra.mxu1 %v5468_v22 }
 0x119   :  { %1320 = vmatprep.subr.mxu0 %v5474_v32  ;;  %1391 = vmatprep.subr.mxu1 %v5476_v24 }
 0x11a   :  { %1321 = vmatpush2.msra.mxu0 %v5480_v25  ;;  %1392 = vmatpush2.msra.mxu1 %v5482_v26 }
 0x11b   :  { %1322 = vmatprep.subr.mxu0 %v5488_v27  ;;  %1393 = vmatprep.subr.mxu1 %v5490_v29 }
 0x11c   :  { %1323 = vmatpush2.msra.mxu0 %v5496_v30  ;;  %1394 = vmatpush2.msra.mxu1 %v5498_v35 }
 0x11d   :  { %1324 = vmatprep.subr.mxu0 %v5504_v33  ;;  %1395 = vmatprep.subr.mxu1 %v5506_v36 }
 0x11e   :  { %1325 = vmatpush2.msra.mxu0 %v5510_v37  ;;  %1396 = vmatpush2.msra.mxu1 %v5512_v38 }
 0x11f   :  { %1326 = vmatprep.subr.mxu0 %v5518_v39  ;;  %1397 = vmatprep.subr.mxu1 %v5520_v40 }
 0x120   :  { %1327 = vmatpush2.msra.mxu0 %v5524_v41  ;;  %1398 = vmatpush2.msra.mxu1 %v5528_v42 }
 0x121   :  { %1406 = vmatprep.subr.mxu0 %v5534_v34  ;;  %1477 = vmatprep.subr.mxu1 %v5536_v43 }
 0x129   :  { %v6151_v13 = vpop.f32.mrf.mxu0  ;;  %v6153_v14 = vpop.f32.mrf.mxu1 }
 0x12b   :  { %v6155_v31 = vpop.f32.mrf.mxu0  ;;  %v6157_v15 = vpop.f32.mrf.mxu1 }
 0x12f   :  { %v6159_v16 = vpop.f32.mrf.mxu0  ;;  %v6161_v17 = vpop.f32.mrf.mxu1 }
 0x130   :  { %10021 = vst [vmem:[#allocation165_spill] sm:$0xff] %v6159_v16  ;;  %10022 = vst [vmem:[#allocation166_spill] sm:$0xff] %v6161_v17  ;;  %v6336_v17 = vld [vmem:[#allocation3 + $0x2f0] sm:$0xff]  ;;  %v6339_v16 = vld [vmem:[#allocation3 + $0x2a8] sm:$0xff] }
 0x131   :  { %v6163_v19 = vpop.f32.mrf.mxu0  ;;  %v6165_v20 = vpop.f32.mrf.mxu1  ;;  %10052 = vst [vmem:[#allocation196_spill] sm:$0xff] %v6336_v17  ;;  %10053 = vst [vmem:[#allocation197_spill] sm:$0xff] %v6339_v16 }
 0x132   :  { %10023 = vst [vmem:[#allocation167_spill] sm:$0xff] %v6163_v19  ;;  %10024 = vst [vmem:[#allocation168_spill] sm:$0xff] %v6165_v20  ;;  %v6330_v20 = vld [vmem:[#allocation3 + $0x2f8] sm:$0xff]  ;;  %v6333_v19 = vld [vmem:[#allocation3 + $0x2e0] sm:$0xff] }
 0x133   :  { %10050 = vst [vmem:[#allocation194_spill] sm:$0xff] %v6330_v20  ;;  %10051 = vst [vmem:[#allocation195_spill] sm:$0xff] %v6333_v19 }
 0x135   :  { %v6167_v21 = vpop.f32.mrf.mxu0  ;;  %v6169_v22 = vpop.f32.mrf.mxu1 }
 0x136   :  { %10025 = vst [vmem:[#allocation169_spill] sm:$0xff] %v6167_v21  ;;  %10026 = vst [vmem:[#allocation170_spill] sm:$0xff] %v6169_v22  ;;  %v6324_v22 = vld [vmem:[#allocation3 + $0x330] sm:$0xff]  ;;  %v6327_v21 = vld [vmem:[#allocation3 + $0x2e8] sm:$0xff] }
 0x137   :  { %v6171_v32 = vpop.f32.mrf.mxu0  ;;  %v6173_v24 = vpop.f32.mrf.mxu1  ;;  %10048 = vst [vmem:[#allocation192_spill] sm:$0xff] %v6324_v22  ;;  %10049 = vst [vmem:[#allocation193_spill] sm:$0xff] %v6327_v21 }
 0x138   :  { %10027 = vst [vmem:[#allocation171_spill] sm:$0xff] %v6171_v32  ;;  %10028 = vst [vmem:[#allocation172_spill] sm:$0xff] %v6173_v24  ;;  %v6318_v24 = vld [vmem:[#allocation3 + $0x338] sm:$0xff]  ;;  %v6321_v32 = vld [vmem:[#allocation3 + $0x320] sm:$0xff] }
 0x13b   :  { %v6175_v25 = vpop.f32.mrf.mxu0  ;;  %v6177_v26 = vpop.f32.mrf.mxu1 }
 0x13c   :  { %10029 = vst [vmem:[#allocation173_spill] sm:$0xff] %v6175_v25  ;;  %10030 = vst [vmem:[#allocation174_spill] sm:$0xff] %v6177_v26  ;;  %v6315_v25 = vld [vmem:[#allocation3 + $0x328] sm:$0xff] }
 0x13d   :  { %v6179_v27 = vpop.f32.mrf.mxu0  ;;  %v6181_v29 = vpop.f32.mrf.mxu1 }
 0x13e   :  { %10031 = vst [vmem:[#allocation175_spill] sm:$0xff] %v6179_v27  ;;  %10032 = vst [vmem:[#allocation176_spill] sm:$0xff] %v6181_v29 }
 0x141   :  { %v6183_v30 = vpop.f32.mrf.mxu0  ;;  %v6185_v35 = vpop.f32.mrf.mxu1 }
 0x142   :  { %10033 = vst [vmem:[#allocation177_spill] sm:$0xff] %v6183_v30  ;;  %10034 = vst [vmem:[#allocation178_spill] sm:$0xff] %v6185_v35 }
 0x143   :  { %v6187_v33 = vpop.f32.mrf.mxu0  ;;  %v6189_v36 = vpop.f32.mrf.mxu1 }
 0x144   :  { %10035 = vst [vmem:[#allocation179_spill] sm:$0xff] %v6187_v33  ;;  %10036 = vst [vmem:[#allocation180_spill] sm:$0xff] %v6189_v36  ;;  %v467_v36 = vadd.f32 %v5795_v46, %v5824_v55  ;;  %v365_v55 = vsub.s32 7, %v5759_v53 }
 0x147   :  { %v6191_v37 = vpop.f32.mrf.mxu0  ;;  %v6193_v38 = vpop.f32.mrf.mxu1 }
 0x148   :  { %10037 = vst [vmem:[#allocation181_spill] sm:$0xff] %v6191_v37  ;;  %10038 = vst [vmem:[#allocation182_spill] sm:$0xff] %v6193_v38  ;;  %v580_v38 = vadd.f32 %v5797_v50, %v5827_v45  ;;  %v353_v45 = vsub.s32 4, %v5759_v53 }
 0x149   :  { %v6195_v39 = vpop.f32.mrf.mxu0  ;;  %v6197_v40 = vpop.f32.mrf.mxu1 }
 0x14a   :  { %10039 = vst [vmem:[#allocation183_spill] sm:$0xff] %v6195_v39  ;;  %10040 = vst [vmem:[#allocation184_spill] sm:$0xff] %v6197_v40  ;;  %v469_v40 = vadd.f32 %v5813_v44, %v5836_v8  ;;  %v361_v8 = vsub.s32 6, %v5759_v53  ;;  %v357_v44 = vsub.s32 5, %v5759_v53 }
 0x14d   :  { %v6199_v41 = vpop.f32.mrf.mxu0  ;;  %v6201_v42 = vpop.f32.mrf.mxu1 }
 0x14e   :  { %10041 = vst [vmem:[#allocation185_spill] sm:$0xff] %v6199_v41  ;;  %10042 = vst [vmem:[#allocation186_spill] sm:$0xff] %v6201_v42 }
 0x14f   :  { %v6203_v34 = vpop.f32.mrf.mxu0  ;;  %v6205_v43 = vpop.f32.mrf.mxu1 }
 0x150   :  { %10043 = vst [vmem:[#allocation187_spill] sm:$0xff] %v6203_v34  ;;  %10044 = vst [vmem:[#allocation188_spill] sm:$0xff] %v6205_v43  ;;  %v582_v34 = vadd.f32 %v5815_v9, %v5845_v0 }
 0x153   :  { %v990_v35 = vpop.f32.mrf.mxu0  ;;  %v1061_v33 = vpop.f32.mrf.mxu1 }
 0x154   :  { %v991_v39 = vadd.f32 %v990_v35, %v467_v36  ;;  %v1062_v41 = vadd.f32 %v1061_v33, %v580_v38  ;;  %v6223_v35 = vrot.slane %v5785_v47, %v361_v8  ;;  %v6229_v33 = vrot.slane %v5785_v47, %v365_v55 }
 0x155   :  { %v992_v37 = vpop.f32.mrf.mxu0  ;;  %v1063_v30 = vpop.f32.mrf.mxu1 }
 0x156   :  { %v993_v42 = vadd.f32 %v992_v37, %v469_v40  ;;  %v3884_v43 = vmul.f32 -1.442695, %v991_v39  ;;  %v1064_v29 = vadd.f32 %v1063_v30, %v582_v34  ;;  %v3886_v27 = vmul.f32 -1.442695, %v1062_v41  ;;  %10046 = vst [vmem:[#allocation190_spill] sm:$0xff] %v6223_v35 }
 0x157   :  { %v6220_v30 = vrot.slane %v5785_v47, %v353_v45  ;;  %v806_v38 = vadd.f32 %v6145_v28, %v6223_v35  ;;  %v808_v34 = vadd.f32 %v6149_v12, %v6229_v33 }
 0x158   :  { %v3885_v26 = vmul.f32 -1.442695, %v993_v42  ;;  %4030 = vpow2.f32 %v3884_v43  ;;  %v3887_v46 = vmul.f32 -1.442695, %v1064_v29 }
 0x159   :  { %4032 = vpow2.f32 %v3886_v27  ;;  %10045 = vst [vmem:[#allocation189_spill] sm:$0xff] %v6220_v30  ;;  %v693_v53 = vadd.f32 %v6143_v10, %v6220_v30 }
 0x15a   :  { %4034 = vpow2.f32 %v3885_v26  ;;  %v6226_v26 = vrot.slane %v5785_v47, %v357_v44 }
 0x15b   :  { %4036 = vpow2.f32 %v3887_v46 }
 0x15c   :  { %10047 = vst [vmem:[#allocation191_spill] sm:$0xff] %v6226_v26  ;;  %v695_v39 = vadd.f32 %v6147_v11, %v6226_v26 }
 0x165   :  { %v4031_v50 = vpop.eup %4030 }
 0x166   :  { %v4033_v9 = vpop.eup %4032  ;;  %v1214_v27 = vadd.f32 1.0, %v4031_v50 }
 0x167   :  { %v4035_v0 = vpop.eup %4034  ;;  %v1226_v36 = vadd.f32 1.0, %v4033_v9 }
 0x168   :  { %v4037_v29 = vpop.eup %4036  ;;  %v1215_v37 = vadd.f32 1.0, %v4035_v0  ;;  %4038 = vrcp.f32 %v1214_v27 }
 0x169   :  { %v1227_v40 = vadd.f32 1.0, %v4037_v29  ;;  %4040 = vrcp.f32 %v1226_v36 }
 0x16a   :  { %4042 = vrcp.f32 %v1215_v37 }
 0x175   :  { %v4039_v44 = vpop.eup %4038 }
 0x176   :  { %v4041_v50 = vpop.eup %4040 }
 0x177   :  { %v4043_v55 = vpop.eup %4042  ;;  %v1246_v0 = vmul.f32 0.0, %v4041_v50  ;;  %v6261_v50 = vld [vmem:[#allocation3 + $0x460] sm:$0xff] }
 0x195   :  { %v1132_v41 = vpop.f32.mrf.mxu0  ;;  %v1203_v42 = vpop.f32.mrf.mxu1 }
 0x196   :  { %v1133_v47 = vadd.f32 %v1132_v41, %v693_v53  ;;  %v1204_v43 = vadd.f32 %v1203_v42, %v806_v38 }
 0x197   :  { %v1134_v46 = vpop.f32.mrf.mxu0  ;;  %v1205_v45 = vpop.f32.mrf.mxu1 }
 0x198   :  { %v3888_v10 = vmul.f32 -1.442695, %v1133_v47  ;;  %4044 = vtanh.f32 %v1204_v43  ;;  %v1135_v8 = vadd.f32 %v1134_v46, %v695_v39  ;;  %v1206_v28 = vadd.f32 %v1205_v45, %v808_v34 }
 0x199   :  { %4046 = vrcp.f32 %v1227_v40 }
 0x19a   :  { %4048 = vpow2.f32 %v3888_v10  ;;  %v3889_v11 = vmul.f32 -1.442695, %v1135_v8  ;;  %v6249_v8 = vld [vmem:[#allocation3 + $0x4a0] sm:$0xff] }
 0x19b   :  { %4050 = vtanh.f32 %v1206_v28  ;;  %v6252_v28 = vld [vmem:[#allocation3 + $0x4b0] sm:$0xff] }
 0x19c   :  { %4052 = vpow2.f32 %v3889_v11  ;;  %v6255_v11 = vld [vmem:[#allocation3 + $0x468] sm:$0xff] }
 0x1a5   :  { %v4045_v9 = vpop.eup %4044 }
 0x1a6   :  { %v4047_v12 = vpop.eup %4046  ;;  %v1248_v27 = vmul.f32 %v4045_v9, %v4039_v44  ;;  %v6258_v44 = vld [vmem:[#allocation3 + $0x478] sm:$0xff]  ;;  %v6267_v9 = vld [vmem:[#allocation3 + $0x428] sm:$0xff] }
 0x1a7   :  { %v4049_v29 = vpop.eup %4048  ;;  %v1247_v39 = vmul.f32 0.0, %v4047_v12  ;;  %v6270_v12 = vld [vmem:[#allocation3 + $0x438] sm:$0xff] }
 0x1a8   :  { %v4051_v36 = vpop.eup %4050  ;;  %v1238_v37 = vadd.f32 1.0, %v4049_v29  ;;  %v6239_v53 = vadd.f32 %v1248_v27, %v1246_v0  ;;  %v6273_v0 = vld [vmem:[#allocation3 + $0x420] sm:$0xff]  ;;  %v6276_v27 = vld [vmem:[#allocation3 + $0x430] sm:$0xff]  ;;  %v6279_v29 = vld [vmem:[#allocation3 + $0x3e8] sm:$0xff] }
 0x1a9   :  { %v4053_v38 = vpop.eup %4052  ;;  %v1249_v41 = vmul.f32 %v4051_v36, %v4043_v55  ;;  %v6264_v55 = vld [vmem:[#allocation3 + $0x470] sm:$0xff]  ;;  %v6282_v36 = vld [vmem:[#allocation3 + $0x3f8] sm:$0xff] }
 0x1aa   :  { %4054 = vrcp.f32 %v1238_v37  ;;  %v1239_v40 = vadd.f32 1.0, %v4053_v38  ;;  %v6285_v37 = vld [vmem:[#allocation3 + $0x3e0] sm:$0xff]  ;;  %v6288_v38 = vld [vmem:[#allocation3 + $0x3f0] sm:$0xff] }
 0x1ab   :  { %4056 = vtanh.f32 %v6239_v53  ;;  %v6242_v42 = vadd.f32 %v1249_v41, %v1247_v39  ;;  %v6291_v39 = vld [vmem:[#allocation3 + $0x3a8] sm:$0xff]  ;;  %v6294_v41 = vld [vmem:[#allocation3 + $0x3b8] sm:$0xff] }
 0x1ac   :  { %4058 = vrcp.f32 %v1239_v40  ;;  %v6297_v40 = vld [vmem:[#allocation3 + $0x3a0] sm:$0xff] }
 0x1ad   :  { %4060 = vtanh.f32 %v6242_v42 }
 0x1b7   :  { %v4055_v34 = vpop.eup %4054 }
 0x1b8   :  { %v4057_v47 = vpop.eup %4056 }
 0x1b9   :  { %v4059_v43 = vpop.eup %4058  ;;  %v6245_v10 = vmul.f32 %v4057_v47, %v4055_v34  ;;  %v6300_v34 = vld [vmem:[#allocation3 + $0x3b0] sm:$0xff]  ;;  %v6303_v47 = vld [vmem:[#allocation3 + $0x368] sm:$0xff] }
 0x1ba   :  { %v4061_v46 = vpop.eup %4060 }
 0x1bb   :  { %v1255_v45 = vmul.f32 %v4061_v46, %v4059_v43  ;;  %v6306_v43 = vld [vmem:[#allocation3 + $0x378] sm:$0xff]  ;;  %v6309_v46 = vld [vmem:[#allocation3 + $0x360] sm:$0xff] }
 0x1bd   :  { %1328 = vmatprep.mubr.f32.mxu0 %v1255_v45  ;;  %1399 = vmatprep.mubr.f32.mxu1 %v1255_v45 }
 0x1be   :  { %1329 = vmatmul.mubr.f32.vlgmr.msra.gmra.mxu0 %v6245_v10  ;;  %1400 = vmatmul.mubr.f32.vlgmr.msra.gmra.mxu1 %v6245_v10 }
 0x1bf   :  { %1407 = vmatpush1.msra.mxu0 %v6249_v8  ;;  %1478 = vmatpush1.msra.mxu1 %v6252_v28 }
 0x1c0   :  { %1408 = vmatprep.subr.mxu0 %v6255_v11  ;;  %1470 = vmatprep.mubr.f32.mxu0 %v1255_v45 }
 0x1c1   :  { %1479 = vmatprep.subr.mxu1 %v6258_v44  ;;  %1541 = vmatprep.mubr.f32.mxu1 %v1255_v45  ;;  %v6312_v45 = vld [vmem:[#allocation3 + $0x370] sm:$0xff] }
 0x1c2   :  { %1409 = vmatpush1.msra.mxu0 %v6261_v50  ;;  %1480 = vmatpush1.msra.mxu1 %v6264_v55 }
 0x1c3   :  { %1410 = vmatprep.subr.mxu0 %v6267_v9  ;;  %1481 = vmatprep.subr.mxu1 %v6270_v12 }
 0x1c4   :  { %1411 = vmatpush1.msra.mxu0 %v6273_v0  ;;  %1482 = vmatpush1.msra.mxu1 %v6276_v27 }
 0x1c5   :  { %1412 = vmatprep.subr.mxu0 %v6279_v29  ;;  %1483 = vmatprep.subr.mxu1 %v6282_v36 }
 0x1c6   :  { %1413 = vmatpush1.msra.mxu0 %v6285_v37  ;;  %1484 = vmatpush1.msra.mxu1 %v6288_v38 }
 0x1c7   :  { %1414 = vmatprep.subr.mxu0 %v6291_v39  ;;  %1485 = vmatprep.subr.mxu1 %v6294_v41 }
 0x1c8   :  { %1415 = vmatpush1.msra.mxu0 %v6297_v40  ;;  %1486 = vmatpush1.msra.mxu1 %v6300_v34 }
 0x1c9   :  { %1416 = vmatprep.subr.mxu0 %v6303_v47  ;;  %1487 = vmatprep.subr.mxu1 %v6306_v43 }
 0x1ca   :  { %1417 = vmatpush1.msra.mxu0 %v6309_v46  ;;  %1488 = vmatpush1.msra.mxu1 %v6312_v45 }
 0x1cb   :  { %1418 = vmatprep.subr.mxu0 %v6315_v25  ;;  %1489 = vmatprep.subr.mxu1 %v6318_v24 }
 0x1cc   :  { %1419 = vmatpush1.msra.mxu0 %v6321_v32  ;;  %1490 = vmatpush1.msra.mxu1 %v6324_v22  ;;  %v6342_v22 = vld [vmem:[#allocation3 + $0x2b8] sm:$0xff] }
 0x1cd   :  { %1420 = vmatprep.subr.mxu0 %v6327_v21  ;;  %1491 = vmatprep.subr.mxu1 %v6330_v20  ;;  %10054 = vst [vmem:[#allocation198_spill] sm:$0xff] %v6342_v22  ;;  %v6345_v21 = vld [vmem:[#allocation3 + $0x2a0] sm:$0xff]  ;;  %v6348_v20 = vld [vmem:[#allocation3 + $0x2b0] sm:$0xff] }
 0x1ce   :  { %1421 = vmatpush1.msra.mxu0 %v6333_v19  ;;  %1492 = vmatpush1.msra.mxu1 %v6336_v17  ;;  %10055 = vst [vmem:[#allocation199_spill] sm:$0xff] %v6345_v21  ;;  %10056 = vst [vmem:[#allocation200_spill] sm:$0xff] %v6348_v20  ;;  %v6351_v19 = vld [vmem:[#allocation3 + $0x268] sm:$0xff]  ;;  %v6354_v17 = vld [vmem:[#allocation3 + $0x278] sm:$0xff] }
 0x1cf   :  { %1422 = vmatprep.subr.mxu0 %v6339_v16  ;;  %1493 = vmatprep.subr.mxu1 %v6342_v22  ;;  %10057 = vst [vmem:[#allocation201_spill] sm:$0xff] %v6351_v19  ;;  %10058 = vst [vmem:[#allocation202_spill] sm:$0xff] %v6354_v17  ;;  %v6357_v16 = vld [vmem:[#allocation3 + $0x260] sm:$0xff]  ;;  %v6360_v22 = vld [vmem:[#allocation3 + $0x270] sm:$0xff] }
 0x1d0   :  { %1423 = vmatpush1.msra.mxu0 %v6345_v21  ;;  %1494 = vmatpush1.msra.mxu1 %v6348_v20  ;;  %10059 = vst [vmem:[#allocation203_spill] sm:$0xff] %v6357_v16  ;;  %10060 = vst [vmem:[#allocation204_spill] sm:$0xff] %v6360_v22  ;;  %v6363_v21 = vld [vmem:[#allocation3 + $0x228] sm:$0xff]  ;;  %v6366_v20 = vld [vmem:[#allocation3 + $0x238] sm:$0xff] }
 0x1d1   :  { %1424 = vmatprep.subr.mxu0 %v6351_v19  ;;  %1495 = vmatprep.subr.mxu1 %v6354_v17  ;;  %10061 = vst [vmem:[#allocation205_spill] sm:$0xff] %v6363_v21  ;;  %10062 = vst [vmem:[#allocation206_spill] sm:$0xff] %v6366_v20  ;;  %v6369_v19 = vld [vmem:[#allocation3 + $0x220] sm:$0xff]  ;;  %v6372_v17 = vld [vmem:[#allocation3 + $0x230] sm:$0xff] }
 0x1d2   :  { %1425 = vmatpush1.msra.mxu0 %v6357_v16  ;;  %1496 = vmatpush1.msra.mxu1 %v6360_v22  ;;  %10063 = vst [vmem:[#allocation207_spill] sm:$0xff] %v6369_v19  ;;  %10064 = vst [vmem:[#allocation208_spill] sm:$0xff] %v6372_v17  ;;  %v6375_v16 = vld [vmem:[#allocation3 + $0x1e8] sm:$0xff]  ;;  %v6378_v22 = vld [vmem:[#allocation3 + $0x1f8] sm:$0xff] }
 0x1d3   :  { %1426 = vmatprep.subr.mxu0 %v6363_v21  ;;  %1497 = vmatprep.subr.mxu1 %v6366_v20  ;;  %10065 = vst [vmem:[#allocation209_spill] sm:$0xff] %v6375_v16  ;;  %10066 = vst [vmem:[#allocation210_spill] sm:$0xff] %v6378_v22  ;;  %v6381_v21 = vld [vmem:[#allocation3 + $0x1e0] sm:$0xff]  ;;  %v6384_v20 = vld [vmem:[#allocation3 + $0x1f0] sm:$0xff] }
 0x1d4   :  { %1427 = vmatpush1.msra.mxu0 %v6369_v19  ;;  %1498 = vmatpush1.msra.mxu1 %v6372_v17  ;;  %10067 = vst [vmem:[#allocation211_spill] sm:$0xff] %v6381_v21  ;;  %10068 = vst [vmem:[#allocation212_spill] sm:$0xff] %v6384_v20  ;;  %v6387_v19 = vld [vmem:[#allocation3 + $0x1a8] sm:$0xff]  ;;  %v6390_v17 = vld [vmem:[#allocation3 + $0x1b8] sm:$0xff] }
 0x1d5   :  { %1428 = vmatprep.subr.mxu0 %v6375_v16  ;;  %1499 = vmatprep.subr.mxu1 %v6378_v22  ;;  %10069 = vst [vmem:[#allocation213_spill] sm:$0xff] %v6387_v19  ;;  %10070 = vst [vmem:[#allocation214_spill] sm:$0xff] %v6390_v17  ;;  %v6393_v16 = vld [vmem:[#allocation3 + $0x1a0] sm:$0xff]  ;;  %v6396_v22 = vld [vmem:[#allocation3 + $0x1b0] sm:$0xff] }
 0x1d6   :  { %1429 = vmatpush1.msra.mxu0 %v6381_v21  ;;  %1500 = vmatpush1.msra.mxu1 %v6384_v20  ;;  %10071 = vst [vmem:[#allocation215_spill] sm:$0xff] %v6393_v16  ;;  %10072 = vst [vmem:[#allocation216_spill] sm:$0xff] %v6396_v22  ;;  %v6399_v21 = vld [vmem:[#allocation3 + $0x168] sm:$0xff]  ;;  %v6402_v20 = vld [vmem:[#allocation3 + $0x178] sm:$0xff] }
 0x1d7   :  { %1430 = vmatprep.subr.mxu0 %v6387_v19  ;;  %1501 = vmatprep.subr.mxu1 %v6390_v17  ;;  %10073 = vst [vmem:[#allocation217_spill] sm:$0xff] %v6399_v21  ;;  %10074 = vst [vmem:[#allocation218_spill] sm:$0xff] %v6402_v20  ;;  %v6405_v19 = vld [vmem:[#allocation3 + $0x160] sm:$0xff]  ;;  %v6408_v17 = vld [vmem:[#allocation3 + $0x170] sm:$0xff] }
 0x1d8   :  { %1431 = vmatpush1.msra.mxu0 %v6393_v16  ;;  %1502 = vmatpush1.msra.mxu1 %v6396_v22  ;;  %10075 = vst [vmem:[#allocation219_spill] sm:$0xff] %v6405_v19  ;;  %10076 = vst [vmem:[#allocation220_spill] sm:$0xff] %v6408_v17  ;;  %v6411_v16 = vld [vmem:[#allocation3 + $0x128] sm:$0xff]  ;;  %v6414_v22 = vld [vmem:[#allocation3 + $0x138] sm:$0xff] }
 0x1d9   :  { %1432 = vmatprep.subr.mxu0 %v6399_v21  ;;  %1503 = vmatprep.subr.mxu1 %v6402_v20  ;;  %10077 = vst [vmem:[#allocation221_spill] sm:$0xff] %v6411_v16  ;;  %10078 = vst [vmem:[#allocation222_spill] sm:$0xff] %v6414_v22  ;;  %v6417_v21 = vld [vmem:[#allocation3 + $0x120] sm:$0xff]  ;;  %v6420_v20 = vld [vmem:[#allocation3 + $0x130] sm:$0xff] }
 0x1da   :  { %1433 = vmatpush1.msra.mxu0 %v6405_v19  ;;  %1504 = vmatpush1.msra.mxu1 %v6408_v17  ;;  %10079 = vst [vmem:[#allocation223_spill] sm:$0xff] %v6417_v21  ;;  %10080 = vst [vmem:[#allocation224_spill] sm:$0xff] %v6420_v20  ;;  %v6423_v19 = vld [vmem:[#allocation3 + $0xe8] sm:$0xff]  ;;  %v6426_v17 = vld [vmem:[#allocation3 + $0xf8] sm:$0xff] }
 0x1db   :  { %1434 = vmatprep.subr.mxu0 %v6411_v16  ;;  %1505 = vmatprep.subr.mxu1 %v6414_v22  ;;  %10081 = vst [vmem:[#allocation225_spill] sm:$0xff] %v6423_v19  ;;  %10082 = vst [vmem:[#allocation226_spill] sm:$0xff] %v6426_v17  ;;  %v6429_v16 = vld [vmem:[#allocation3 + $0xe0] sm:$0xff]  ;;  %v6432_v22 = vld [vmem:[#allocation3 + $0xf0] sm:$0xff] }
 0x1dc   :  { %1435 = vmatpush1.msra.mxu0 %v6417_v21  ;;  %1506 = vmatpush1.msra.mxu1 %v6420_v20  ;;  %10083 = vst [vmem:[#allocation227_spill] sm:$0xff] %v6429_v16  ;;  %10084 = vst [vmem:[#allocation228_spill] sm:$0xff] %v6432_v22  ;;  %v6435_v21 = vld [vmem:[#allocation3 + $0x8a8] sm:$0xff]  ;;  %v6438_v20 = vld [vmem:[#allocation3 + $0x8b8] sm:$0xff] }
 0x1dd   :  { %1436 = vmatprep.subr.mxu0 %v6423_v19  ;;  %1507 = vmatprep.subr.mxu1 %v6426_v17  ;;  %10085 = vst [vmem:[#allocation229_spill] sm:$0xff] %v6435_v21  ;;  %10086 = vst [vmem:[#allocation230_spill] sm:$0xff] %v6438_v20  ;;  %v6441_v19 = vld [vmem:[#allocation3 + $0x8a0] sm:$0xff]  ;;  %v6444_v17 = vld [vmem:[#allocation3 + $0x8b0] sm:$0xff] }
 0x1de   :  { %1437 = vmatpush1.msra.mxu0 %v6429_v16  ;;  %1508 = vmatpush1.msra.mxu1 %v6432_v22  ;;  %10087 = vst [vmem:[#allocation231_spill] sm:$0xff] %v6441_v19  ;;  %10088 = vst [vmem:[#allocation232_spill] sm:$0xff] %v6444_v17  ;;  %v6447_v16 = vld [vmem:[#allocation3 + $0x868] sm:$0xff]  ;;  %v6450_v22 = vld [vmem:[#allocation3 + $0x878] sm:$0xff] }
 0x1df   :  { %1438 = vmatprep.subr.mxu0 %v6435_v21  ;;  %1509 = vmatprep.subr.mxu1 %v6438_v20  ;;  %10089 = vst [vmem:[#allocation233_spill] sm:$0xff] %v6447_v16  ;;  %10090 = vst [vmem:[#allocation234_spill] sm:$0xff] %v6450_v22  ;;  %v6453_v21 = vld [vmem:[#allocation3 + $0x860] sm:$0xff]  ;;  %v6456_v20 = vld [vmem:[#allocation3 + $0x870] sm:$0xff] }
 0x1e0   :  { %1439 = vmatpush2.msra.mxu0 %v6441_v19  ;;  %1510 = vmatpush2.msra.mxu1 %v6444_v17  ;;  %v6459_v19 = vld [vmem:[#allocation3 + $0x828] sm:$0xff]  ;;  %v6462_v17 = vld [vmem:[#allocation3 + $0x838] sm:$0xff] }
 0x1e1   :  { %1440 = vmatprep.subr.mxu0 %v6447_v16  ;;  %1511 = vmatprep.subr.mxu1 %v6450_v22  ;;  %v6465_v16 = vld [vmem:[#allocation3 + $0x820] sm:$0xff]  ;;  %v6468_v22 = vld [vmem:[#allocation3 + $0x830] sm:$0xff] }
 0x1e2   :  { %1441 = vmatpush2.msra.mxu0 %v6453_v21  ;;  %1512 = vmatpush2.msra.mxu1 %v6456_v20 }
 0x1e3   :  { %1442 = vmatprep.subr.mxu0 %v6459_v19  ;;  %1513 = vmatprep.subr.mxu1 %v6462_v17 }
 0x1e4   :  { %1443 = vmatpush2.msra.mxu0 %v6465_v16  ;;  %1514 = vmatpush2.msra.mxu1 %v6468_v22 }
 0x1e5   :  { %1444 = vmatprep.subr.mxu0 %v5544_v56  ;;  %1515 = vmatprep.subr.mxu1 %v5546_v57  ;;  %v10091_v56 = vld [vmem:[#allocation9_spill] sm:$0xff]  ;;  %v10092_v57 = vld [vmem:[#allocation10_spill] sm:$0xff] }
 0x1e6   :  { %1445 = vmatpush2.msra.mxu0 %v5548_v58  ;;  %1516 = vmatpush2.msra.mxu1 %v5550_v59  ;;  %v10093_v58 = vld [vmem:[#allocation11_spill] sm:$0xff]  ;;  %v10094_v59 = vld [vmem:[#allocation12_spill] sm:$0xff] }
 0x1e7   :  { %1446 = vmatprep.subr.mxu0 %v5552_v18  ;;  %1517 = vmatprep.subr.mxu1 %v5554_v60  ;;  %v10095_v18 = vld [vmem:[#allocation13_spill] sm:$0xff]  ;;  %v10096_v60 = vld [vmem:[#allocation14_spill] sm:$0xff] }
 0x1e8   :  { %1447 = vmatpush2.msra.mxu0 %v5558_v61  ;;  %1518 = vmatpush2.msra.mxu1 %v5560_v62  ;;  %v10097_v61 = vld [vmem:[#allocation15_spill] sm:$0xff]  ;;  %v10098_v62 = vld [vmem:[#allocation16_spill] sm:$0xff] }
 0x1e9   :  { %1448 = vmatprep.subr.mxu0 %v5564_v63  ;;  %1519 = vmatprep.subr.mxu1 %v5566_v1  ;;  %v10099_v63 = vld [vmem:[#allocation17_spill] sm:$0xff]  ;;  %v10100_v1 = vld [vmem:[#allocation18_spill] sm:$0xff] }
 0x1ea   :  { %1449 = vmatpush2.msra.mxu0 %v5570_v2  ;;  %1520 = vmatpush2.msra.mxu1 %v5572_v3  ;;  %v10101_v2 = vld [vmem:[#allocation19_spill] sm:$0xff]  ;;  %v10102_v3 = vld [vmem:[#allocation20_spill] sm:$0xff] }
 0x1eb   :  { %1450 = vmatprep.subr.mxu0 %v10091_v56  ;;  %1521 = vmatprep.subr.mxu1 %v10092_v57  ;;  %v10103_v56 = vld [vmem:[#allocation21_spill] sm:$0xff]  ;;  %v10104_v57 = vld [vmem:[#allocation22_spill] sm:$0xff] }
 0x1ec   :  { %1451 = vmatpush2.msra.mxu0 %v10093_v58  ;;  %1522 = vmatpush2.msra.mxu1 %v10094_v59  ;;  %v10105_v58 = vld [vmem:[#allocation23_spill] sm:$0xff]  ;;  %v10106_v59 = vld [vmem:[#allocation24_spill] sm:$0xff] }
 0x1ed   :  { %1452 = vmatprep.subr.mxu0 %v10095_v18  ;;  %1523 = vmatprep.subr.mxu1 %v10096_v60  ;;  %v10107_v18 = vld [vmem:[#allocation25_spill] sm:$0xff]  ;;  %v10108_v60 = vld [vmem:[#allocation26_spill] sm:$0xff] }
 0x1ee   :  { %1453 = vmatpush2.msra.mxu0 %v10097_v61  ;;  %1524 = vmatpush2.msra.mxu1 %v10098_v62  ;;  %v10109_v61 = vld [vmem:[#allocation27_spill] sm:$0xff]  ;;  %v10110_v62 = vld [vmem:[#allocation28_spill] sm:$0xff] }
 0x1ef   :  { %1454 = vmatprep.subr.mxu0 %v10099_v63  ;;  %1525 = vmatprep.subr.mxu1 %v10100_v1  ;;  %v10111_v63 = vld [vmem:[#allocation29_spill] sm:$0xff]  ;;  %v10112_v1 = vld [vmem:[#allocation30_spill] sm:$0xff] }
 0x1f0   :  { %1455 = vmatpush2.msra.mxu0 %v10101_v2  ;;  %1526 = vmatpush2.msra.mxu1 %v10102_v3  ;;  %v10113_v2 = vld [vmem:[#allocation31_spill] sm:$0xff]  ;;  %v10114_v3 = vld [vmem:[#allocation32_spill] sm:$0xff] }
 0x1f1   :  { %1456 = vmatprep.subr.mxu0 %v10103_v56  ;;  %1527 = vmatprep.subr.mxu1 %v10104_v57  ;;  %v10115_v56 = vld [vmem:[#allocation33_spill] sm:$0xff]  ;;  %v10116_v57 = vld [vmem:[#allocation34_spill] sm:$0xff] }
 0x1f2   :  { %1457 = vmatpush2.msra.mxu0 %v10105_v58  ;;  %1528 = vmatpush2.msra.mxu1 %v10106_v59  ;;  %v10117_v58 = vld [vmem:[#allocation35_spill] sm:$0xff]  ;;  %v10118_v59 = vld [vmem:[#allocation36_spill] sm:$0xff] }
 0x1f3   :  { %1458 = vmatprep.subr.mxu0 %v10107_v18  ;;  %1529 = vmatprep.subr.mxu1 %v10108_v60  ;;  %v10119_v18 = vld [vmem:[#allocation37_spill] sm:$0xff]  ;;  %v10120_v60 = vld [vmem:[#allocation38_spill] sm:$0xff] }
 0x1f4   :  { %1459 = vmatpush2.msra.mxu0 %v10109_v61  ;;  %1530 = vmatpush2.msra.mxu1 %v10110_v62  ;;  %v10121_v61 = vld [vmem:[#allocation39_spill] sm:$0xff]  ;;  %v10122_v62 = vld [vmem:[#allocation40_spill] sm:$0xff] }
 0x1f5   :  { %1460 = vmatprep.subr.mxu0 %v10111_v63  ;;  %1531 = vmatprep.subr.mxu1 %v10112_v1  ;;  %v10123_v63 = vld [vmem:[#allocation41_spill] sm:$0xff]  ;;  %v10124_v1 = vld [vmem:[#allocation42_spill] sm:$0xff] }
 0x1f6   :  { %1461 = vmatpush2.msra.mxu0 %v10113_v2  ;;  %1532 = vmatpush2.msra.mxu1 %v10114_v3  ;;  %v10125_v2 = vld [vmem:[#allocation43_spill] sm:$0xff]  ;;  %v10126_v3 = vld [vmem:[#allocation44_spill] sm:$0xff] }
 0x1f7   :  { %1462 = vmatprep.subr.mxu0 %v10115_v56  ;;  %1533 = vmatprep.subr.mxu1 %v10116_v57  ;;  %v10127_v56 = vld [vmem:[#allocation45_spill] sm:$0xff]  ;;  %v10128_v57 = vld [vmem:[#allocation46_spill] sm:$0xff] }
 0x1f8   :  { %1463 = vmatpush2.msra.mxu0 %v10117_v58  ;;  %1534 = vmatpush2.msra.mxu1 %v10118_v59  ;;  %v10129_v58 = vld [vmem:[#allocation47_spill] sm:$0xff]  ;;  %v10130_v59 = vld [vmem:[#allocation48_spill] sm:$0xff] }
 0x1f9   :  { %1464 = vmatprep.subr.mxu0 %v10119_v18  ;;  %1535 = vmatprep.subr.mxu1 %v10120_v60  ;;  %v10131_v18 = vld [vmem:[#allocation49_spill] sm:$0xff]  ;;  %v10132_v60 = vld [vmem:[#allocation50_spill] sm:$0xff] }
 0x1fa   :  { %1465 = vmatpush2.msra.mxu0 %v10121_v61  ;;  %1536 = vmatpush2.msra.mxu1 %v10122_v62  ;;  %v10133_v61 = vld [vmem:[#allocation51_spill] sm:$0xff]  ;;  %v10134_v62 = vld [vmem:[#allocation52_spill] sm:$0xff] }
 0x1fb   :  { %1466 = vmatprep.subr.mxu0 %v10123_v63  ;;  %1537 = vmatprep.subr.mxu1 %v10124_v1  ;;  %v10135_v63 = vld [vmem:[#allocation53_spill] sm:$0xff]  ;;  %v10136_v1 = vld [vmem:[#allocation54_spill] sm:$0xff] }
 0x1fc   :  { %1467 = vmatpush2.msra.mxu0 %v10125_v2  ;;  %1538 = vmatpush2.msra.mxu1 %v10126_v3  ;;  %v10137_v2 = vld [vmem:[#allocation55_spill] sm:$0xff]  ;;  %v10138_v3 = vld [vmem:[#allocation56_spill] sm:$0xff] }
 0x1fd   :  { %1468 = vmatprep.subr.mxu0 %v10127_v56  ;;  %1539 = vmatprep.subr.mxu1 %v10128_v57  ;;  %v10139_v56 = vld [vmem:[#allocation57_spill] sm:$0xff]  ;;  %v10140_v57 = vld [vmem:[#allocation58_spill] sm:$0xff] }
 0x1fe   :  { %1469 = vmatpush2.msra.mxu0 %v10129_v58  ;;  %1540 = vmatpush2.msra.mxu1 %v10130_v59  ;;  %v10142_v58 = vld [vmem:[#allocation60_spill] sm:$0xff]  ;;  %v10143_v59 = vld [vmem:[#allocation61_spill] sm:$0xff] }
 0x1ff   :  { %1471 = vmatmul.mubr.f32.vlgmr.msra.gmra.mxu0 %v6245_v10  ;;  %1542 = vmatmul.mubr.f32.vlgmr.msra.gmra.mxu1 %v6245_v10  ;;  %v10141_v10 = vld [vmem:[#allocation59_spill] sm:$0xff] }
 0x200   :  { %1604 = vmatprep.subr.mxu0 %v10131_v18  ;;  %1675 = vmatprep.subr.mxu1 %v10132_v60  ;;  %v10144_v18 = vld [vmem:[#allocation62_spill] sm:$0xff]  ;;  %v10145_v60 = vld [vmem:[#allocation63_spill] sm:$0xff] }
 0x201   :  { %1605 = vmatpush1.msra.mxu0 %v10133_v61  ;;  %1676 = vmatpush1.msra.mxu1 %v10134_v62  ;;  %v10146_v61 = vld [vmem:[#allocation64_spill] sm:$0xff]  ;;  %v10147_v62 = vld [vmem:[#allocation65_spill] sm:$0xff] }
 0x202   :  { %1606 = vmatprep.subr.mxu0 %v10135_v63  ;;  %1677 = vmatprep.subr.mxu1 %v10136_v1  ;;  %v10148_v63 = vld [vmem:[#allocation66_spill] sm:$0xff]  ;;  %v10149_v1 = vld [vmem:[#allocation67_spill] sm:$0xff] }
 0x203   :  { %1607 = vmatpush1.msra.mxu0 %v10137_v2  ;;  %1678 = vmatpush1.msra.mxu1 %v10138_v3  ;;  %v10150_v2 = vld [vmem:[#allocation68_spill] sm:$0xff]  ;;  %v10151_v3 = vld [vmem:[#allocation69_spill] sm:$0xff] }
 0x204   :  { %1608 = vmatprep.subr.mxu0 %v10139_v56  ;;  %1679 = vmatprep.subr.mxu1 %v10140_v57  ;;  %v10152_v56 = vld [vmem:[#allocation70_spill] sm:$0xff]  ;;  %v10153_v57 = vld [vmem:[#allocation71_spill] sm:$0xff] }
 0x205   :  { %1609 = vmatpush1.msra.mxu0 %v10141_v10  ;;  %1680 = vmatpush1.msra.mxu1 %v10142_v58  ;;  %v10154_v10 = vld [vmem:[#allocation72_spill] sm:$0xff]  ;;  %v10155_v58 = vld [vmem:[#allocation73_spill] sm:$0xff] }
 0x206   :  { %1610 = vmatprep.subr.mxu0 %v10143_v59  ;;  %1681 = vmatprep.subr.mxu1 %v10144_v18  ;;  %v10156_v59 = vld [vmem:[#allocation74_spill] sm:$0xff]  ;;  %v10157_v18 = vld [vmem:[#allocation75_spill] sm:$0xff] }
 0x207   :  { %1611 = vmatpush1.msra.mxu0 %v10145_v60  ;;  %1682 = vmatpush1.msra.mxu1 %v10146_v61  ;;  %v10158_v60 = vld [vmem:[#allocation76_spill] sm:$0xff]  ;;  %v10159_v61 = vld [vmem:[#allocation77_spill] sm:$0xff] }
 0x208   :  { %1612 = vmatprep.subr.mxu0 %v10147_v62  ;;  %1683 = vmatprep.subr.mxu1 %v10148_v63  ;;  %v10160_v62 = vld [vmem:[#allocation78_spill] sm:$0xff]  ;;  %v10161_v63 = vld [vmem:[#allocation79_spill] sm:$0xff] }
 0x209   :  { %1613 = vmatpush1.msra.mxu0 %v10149_v1  ;;  %1684 = vmatpush1.msra.mxu1 %v10150_v2  ;;  %v10162_v1 = vld [vmem:[#allocation80_spill] sm:$0xff]  ;;  %v10163_v2 = vld [vmem:[#allocation81_spill] sm:$0xff] }
 0x20a   :  { %1614 = vmatprep.subr.mxu0 %v10151_v3  ;;  %1685 = vmatprep.subr.mxu1 %v10152_v56  ;;  %v10164_v3 = vld [vmem:[#allocation82_spill] sm:$0xff]  ;;  %v10165_v56 = vld [vmem:[#allocation83_spill] sm:$0xff] }
 0x20b   :  { %1615 = vmatpush1.msra.mxu0 %v10153_v57  ;;  %1686 = vmatpush1.msra.mxu1 %v10154_v10  ;;  %v10166_v57 = vld [vmem:[#allocation84_spill] sm:$0xff]  ;;  %v10167_v10 = vld [vmem:[#allocation85_spill] sm:$0xff] }
 0x20c   :  { %1616 = vmatprep.subr.mxu0 %v10155_v58  ;;  %1687 = vmatprep.subr.mxu1 %v10156_v59  ;;  %v10168_v58 = vld [vmem:[#allocation86_spill] sm:$0xff]  ;;  %v10169_v59 = vld [vmem:[#allocation89_spill] sm:$0xff] }
 0x20d   :  { %1617 = vmatpush1.msra.mxu0 %v10157_v18  ;;  %1688 = vmatpush1.msra.mxu1 %v10158_v60  ;;  %v10170_v18 = vld [vmem:[#allocation90_spill] sm:$0xff]  ;;  %v10171_v60 = vld [vmem:[#allocation91_spill] sm:$0xff] }
 0x20e   :  { %1618 = vmatprep.subr.mxu0 %v10159_v61  ;;  %1689 = vmatprep.subr.mxu1 %v10160_v62  ;;  %v10172_v61 = vld [vmem:[#allocation92_spill] sm:$0xff]  ;;  %v10173_v62 = vld [vmem:[#allocation95_spill] sm:$0xff] }
 0x20f   :  { %1619 = vmatpush1.msra.mxu0 %v10161_v63  ;;  %1690 = vmatpush1.msra.mxu1 %v10162_v1  ;;  %v10174_v63 = vld [vmem:[#allocation96_spill] sm:$0xff]  ;;  %v10175_v1 = vld [vmem:[#allocation97_spill] sm:$0xff] }
 0x210   :  { %1620 = vmatprep.subr.mxu0 %v10163_v2  ;;  %1691 = vmatprep.subr.mxu1 %v10164_v3  ;;  %v10176_v2 = vld [vmem:[#allocation98_spill] sm:$0xff]  ;;  %v10177_v3 = vld [vmem:[#allocation101_spill] sm:$0xff] }
 0x211   :  { %1621 = vmatpush1.msra.mxu0 %v10165_v56  ;;  %1692 = vmatpush1.msra.mxu1 %v10166_v57  ;;  %v10178_v56 = vld [vmem:[#allocation102_spill] sm:$0xff]  ;;  %v10179_v57 = vld [vmem:[#allocation103_spill] sm:$0xff] }
 0x212   :  { %1622 = vmatprep.subr.mxu0 %v10167_v10  ;;  %1693 = vmatprep.subr.mxu1 %v10168_v58  ;;  %v10180_v10 = vld [vmem:[#allocation104_spill] sm:$0xff]  ;;  %v10181_v58 = vld [vmem:[#allocation107_spill] sm:$0xff] }
 0x213   :  { %1623 = vmatpush1.msra.mxu0 %v10169_v59  ;;  %1694 = vmatpush1.msra.mxu1 %v10170_v18  ;;  %v10182_v59 = vld [vmem:[#allocation108_spill] sm:$0xff]  ;;  %v10183_v18 = vld [vmem:[#allocation109_spill] sm:$0xff] }
 0x214   :  { %1624 = vmatprep.subr.mxu0 %v10171_v60  ;;  %1695 = vmatprep.subr.mxu1 %v10172_v61  ;;  %v10184_v60 = vld [vmem:[#allocation110_spill] sm:$0xff]  ;;  %v10185_v61 = vld [vmem:[#allocation113_spill] sm:$0xff] }
 0x215   :  { %1625 = vmatpush1.msra.mxu0 %v10173_v62  ;;  %1696 = vmatpush1.msra.mxu1 %v10174_v63  ;;  %v10186_v62 = vld [vmem:[#allocation114_spill] sm:$0xff]  ;;  %v10187_v63 = vld [vmem:[#allocation115_spill] sm:$0xff] }
 0x216   :  { %1626 = vmatprep.subr.mxu0 %v10175_v1  ;;  %1697 = vmatprep.subr.mxu1 %v10176_v2  ;;  %v10188_v1 = vld [vmem:[#allocation116_spill] sm:$0xff]  ;;  %v10189_v2 = vld [vmem:[#allocation119_spill] sm:$0xff] }
 0x217   :  { %1627 = vmatpush1.msra.mxu0 %v10177_v3  ;;  %1698 = vmatpush1.msra.mxu1 %v10178_v56  ;;  %v10190_v3 = vld [vmem:[#allocation120_spill] sm:$0xff]  ;;  %v10191_v56 = vld [vmem:[#allocation121_spill] sm:$0xff] }
 0x218   :  { %1628 = vmatprep.subr.mxu0 %v10179_v57  ;;  %1699 = vmatprep.subr.mxu1 %v10180_v10  ;;  %v10192_v57 = vld [vmem:[#allocation122_spill] sm:$0xff]  ;;  %v10193_v10 = vld [vmem:[#allocation125_spill] sm:$0xff] }
 0x219   :  { %1629 = vmatpush1.msra.mxu0 %v10181_v58  ;;  %1700 = vmatpush1.msra.mxu1 %v10182_v59  ;;  %v10194_v58 = vld [vmem:[#allocation126_spill] sm:$0xff]  ;;  %v10195_v59 = vld [vmem:[#allocation127_spill] sm:$0xff] }
 0x21a   :  { %1630 = vmatprep.subr.mxu0 %v10183_v18  ;;  %1701 = vmatprep.subr.mxu1 %v10184_v60  ;;  %v10196_v18 = vld [vmem:[#allocation128_spill] sm:$0xff]  ;;  %v10197_v60 = vld [vmem:[#allocation131_spill] sm:$0xff] }
 0x21b   :  { %1631 = vmatpush1.msra.mxu0 %v10185_v61  ;;  %1702 = vmatpush1.msra.mxu1 %v10186_v62  ;;  %v10198_v61 = vld [vmem:[#allocation132_spill] sm:$0xff]  ;;  %v10199_v62 = vld [vmem:[#allocation133_spill] sm:$0xff] }
 0x21c   :  { %1632 = vmatprep.subr.mxu0 %v10187_v63  ;;  %1703 = vmatprep.subr.mxu1 %v10188_v1  ;;  %v10200_v63 = vld [vmem:[#allocation134_spill] sm:$0xff]  ;;  %v10201_v1 = vld [vmem:[#allocation137_spill] sm:$0xff] }
 0x21d   :  { %1633 = vmatpush1.msra.mxu0 %v10189_v2  ;;  %1704 = vmatpush1.msra.mxu1 %v10190_v3  ;;  %v10202_v2 = vld [vmem:[#allocation138_spill] sm:$0xff]  ;;  %v10203_v3 = vld [vmem:[#allocation139_spill] sm:$0xff] }
 0x21e   :  { %1634 = vmatprep.subr.mxu0 %v10191_v56  ;;  %1705 = vmatprep.subr.mxu1 %v10192_v57  ;;  %v10204_v56 = vld [vmem:[#allocation140_spill] sm:$0xff]  ;;  %v10205_v57 = vld [vmem:[#allocation143_spill] sm:$0xff] }
 0x21f   :  { %1635 = vmatpush1.msra.mxu0 %v10193_v10  ;;  %1706 = vmatpush1.msra.mxu1 %v10194_v58  ;;  %v10206_v10 = vld [vmem:[#allocation144_spill] sm:$0xff]  ;;  %v10207_v58 = vld [vmem:[#allocation145_spill] sm:$0xff] }
 0x220   :  { %1636 = vmatprep.subr.mxu0 %v10195_v59  ;;  %1707 = vmatprep.subr.mxu1 %v10196_v18  ;;  %v10208_v59 = vld [vmem:[#allocation146_spill] sm:$0xff]  ;;  %v10209_v18 = vld [vmem:[#allocation149_spill] sm:$0xff] }
 0x221   :  { %1637 = vmatpush2.msra.mxu0 %v10197_v60  ;;  %1708 = vmatpush2.msra.mxu1 %v10198_v61  ;;  %v10210_v60 = vld [vmem:[#allocation150_spill] sm:$0xff]  ;;  %v10211_v61 = vld [vmem:[#allocation151_spill] sm:$0xff] }
 0x222   :  { %1638 = vmatprep.subr.mxu0 %v10199_v62  ;;  %1709 = vmatprep.subr.mxu1 %v10200_v63  ;;  %v10212_v62 = vld [vmem:[#allocation152_spill] sm:$0xff]  ;;  %v10213_v63 = vld [vmem:[#allocation155_spill] sm:$0xff] }
 0x223   :  { %1639 = vmatpush2.msra.mxu0 %v10201_v1  ;;  %1710 = vmatpush2.msra.mxu1 %v10202_v2  ;;  %v10214_v1 = vld [vmem:[#allocation156_spill] sm:$0xff]  ;;  %v10215_v2 = vld [vmem:[#allocation157_spill] sm:$0xff] }
 0x224   :  { %1640 = vmatprep.subr.mxu0 %v10203_v3  ;;  %1711 = vmatprep.subr.mxu1 %v10204_v56  ;;  %v10216_v3 = vld [vmem:[#allocation158_spill] sm:$0xff]  ;;  %v10217_v56 = vld [vmem:[#allocation161_spill] sm:$0xff] }
 0x225   :  { %1641 = vmatpush2.msra.mxu0 %v10205_v57  ;;  %1712 = vmatpush2.msra.mxu1 %v10206_v10  ;;  %v10218_v57 = vld [vmem:[#allocation162_spill] sm:$0xff]  ;;  %v6653_v10 = vld [vmem:[#allocation3 + $0x5c8] sm:$0xff] }
 0x226   :  { %1642 = vmatprep.subr.mxu0 %v10207_v58  ;;  %1713 = vmatprep.subr.mxu1 %v10208_v59  ;;  %10226 = vst [vmem:[#allocation16_spill] sm:$0xff] %v6653_v10  ;;  %v6656_v58 = vld [vmem:[#allocation3 + $0x5d8] sm:$0xff]  ;;  %v6659_v59 = vld [vmem:[#allocation3 + $0x5c0] sm:$0xff] }
 0x227   :  { %1643 = vmatpush2.msra.mxu0 %v10209_v18  ;;  %1714 = vmatpush2.msra.mxu1 %v10210_v60  ;;  %10227 = vst [vmem:[#allocation17_spill] sm:$0xff] %v6656_v58  ;;  %10228 = vst [vmem:[#allocation18_spill] sm:$0xff] %v6659_v59  ;;  %v6662_v18 = vld [vmem:[#allocation3 + $0x5d0] sm:$0xff]  ;;  %v6665_v60 = vld [vmem:[#allocation3 + $0x588] sm:$0xff] }
 0x228   :  { %1644 = vmatprep.subr.mxu0 %v10211_v61  ;;  %1715 = vmatprep.subr.mxu1 %v10212_v62  ;;  %10229 = vst [vmem:[#allocation19_spill] sm:$0xff] %v6662_v18  ;;  %10230 = vst [vmem:[#allocation20_spill] sm:$0xff] %v6665_v60  ;;  %v6668_v61 = vld [vmem:[#allocation3 + $0x598] sm:$0xff]  ;;  %v6671_v62 = vld [vmem:[#allocation3 + $0x580] sm:$0xff] }
 0x229   :  { %1645 = vmatpush2.msra.mxu0 %v10213_v63  ;;  %1716 = vmatpush2.msra.mxu1 %v10214_v1  ;;  %10231 = vst [vmem:[#allocation21_spill] sm:$0xff] %v6668_v61  ;;  %10232 = vst [vmem:[#allocation22_spill] sm:$0xff] %v6671_v62  ;;  %v6674_v63 = vld [vmem:[#allocation3 + $0x590] sm:$0xff]  ;;  %v6677_v1 = vld [vmem:[#allocation3 + $0x548] sm:$0xff] }
 0x22a   :  { %1646 = vmatprep.subr.mxu0 %v10215_v2  ;;  %1717 = vmatprep.subr.mxu1 %v10216_v3  ;;  %10233 = vst [vmem:[#allocation23_spill] sm:$0xff] %v6674_v63  ;;  %10234 = vst [vmem:[#allocation24_spill] sm:$0xff] %v6677_v1  ;;  %v6680_v2 = vld [vmem:[#allocation3 + $0x558] sm:$0xff]  ;;  %v6683_v3 = vld [vmem:[#allocation3 + $0x540] sm:$0xff] }
 0x22b   :  { %1647 = vmatpush2.msra.mxu0 %v6069_v48  ;;  %1718 = vmatpush2.msra.mxu1 %v10217_v56  ;;  %v6623_v48 = vld [vmem:[#allocation3 + $0x680] sm:$0xff]  ;;  %10235 = vst [vmem:[#allocation25_spill] sm:$0xff] %v6680_v2  ;;  %10236 = vst [vmem:[#allocation26_spill] sm:$0xff] %v6683_v3  ;;  %v6686_v56 = vld [vmem:[#allocation3 + $0x550] sm:$0xff] }
 0x22c   :  { %1648 = vmatprep.subr.mxu0 %v10218_v57  ;;  %1719 = vmatprep.subr.mxu1 %v6078_v54  ;;  %v6626_v54 = vld [vmem:[#allocation3 + $0x690] sm:$0xff]  ;;  %10237 = vst [vmem:[#allocation27_spill] sm:$0xff] %v6686_v56  ;;  %v6689_v57 = vld [vmem:[#allocation3 + $0x508] sm:$0xff] }
 0x22d   :  { %1649 = vmatpush2.msra.mxu0 %v6087_v51  ;;  %1720 = vmatpush2.msra.mxu1 %v6090_v4  ;;  %v6629_v4 = vld [vmem:[#allocation3 + $0x648] sm:$0xff]  ;;  %v6638_v51 = vld [vmem:[#allocation3 + $0x650] sm:$0xff]  ;;  %10238 = vst [vmem:[#allocation28_spill] sm:$0xff] %v6689_v57 }
 0x22e   :  { %1650 = vmatprep.subr.mxu0 %v6093_v23  ;;  %1721 = vmatprep.subr.mxu1 %v6096_v6  ;;  %v6632_v6 = vld [vmem:[#allocation3 + $0x658] sm:$0xff]  ;;  %v6635_v23 = vld [vmem:[#allocation3 + $0x640] sm:$0xff]  ;;  %10221 = vst [vmem:[#allocation11_spill] sm:$0xff] %v6638_v51 }
 0x22f   :  { %1651 = vmatpush2.msra.mxu0 %v6099_v5  ;;  %1722 = vmatpush2.msra.mxu1 %v6102_v49  ;;  %10219 = vst [vmem:[#allocation9_spill] sm:$0xff] %v6632_v6  ;;  %10220 = vst [vmem:[#allocation10_spill] sm:$0xff] %v6635_v23  ;;  %v6647_v5 = vld [vmem:[#allocation3 + $0x600] sm:$0xff]  ;;  %v6650_v49 = vld [vmem:[#allocation3 + $0x610] sm:$0xff] }
 0x230   :  { %1652 = vmatprep.subr.mxu0 %v6105_v52  ;;  %1723 = vmatprep.subr.mxu1 %v6108_v7  ;;  %v6641_v7 = vld [vmem:[#allocation3 + $0x608] sm:$0xff]  ;;  %v6644_v52 = vld [vmem:[#allocation3 + $0x618] sm:$0xff]  ;;  %10224 = vst [vmem:[#allocation14_spill] sm:$0xff] %v6647_v5  ;;  %10225 = vst [vmem:[#allocation15_spill] sm:$0xff] %v6650_v49 }
 0x231   :  { %1653 = vmatpush2.msra.mxu0 %v6623_v48  ;;  %1724 = vmatpush2.msra.mxu1 %v6626_v54  ;;  %10222 = vst [vmem:[#allocation12_spill] sm:$0xff] %v6641_v7  ;;  %10223 = vst [vmem:[#allocation13_spill] sm:$0xff] %v6644_v52 }
 0x232   :  { %1654 = vmatprep.subr.mxu0 %v6629_v4  ;;  %1725 = vmatprep.subr.mxu1 %v6632_v6 }
 0x233   :  { %1655 = vmatpush2.msra.mxu0 %v6635_v23  ;;  %1726 = vmatpush2.msra.mxu1 %v6638_v51 }
 0x234   :  { %1656 = vmatprep.subr.mxu0 %v6641_v7  ;;  %1727 = vmatprep.subr.mxu1 %v6644_v52 }
 0x235   :  { %1657 = vmatpush2.msra.mxu0 %v6647_v5  ;;  %1728 = vmatpush2.msra.mxu1 %v6650_v49 }
 0x236   :  { %1658 = vmatprep.subr.mxu0 %v6653_v10  ;;  %1729 = vmatprep.subr.mxu1 %v6656_v58  ;;  %v10250_v58 = vld [vmem:[#allocation93_spill] sm:$0xff] }
 0x237   :  { %1659 = vmatpush2.msra.mxu0 %v6659_v59  ;;  %1730 = vmatpush2.msra.mxu1 %v6662_v18  ;;  %v10249_v18 = vld [vmem:[#allocation88_spill] sm:$0xff] }
 0x238   :  { %1660 = vmatprep.subr.mxu0 %v6665_v60  ;;  %1731 = vmatprep.subr.mxu1 %v6668_v61 }
 0x239   :  { %1661 = vmatpush2.msra.mxu0 %v6671_v62  ;;  %1732 = vmatpush2.msra.mxu1 %v6674_v63  ;;  %v6692_v63 = vld [vmem:[#allocation3 + $0x518] sm:$0xff] }
 0x23a   :  { %1662 = vmatprep.subr.mxu0 %v6677_v1  ;;  %1733 = vmatprep.subr.mxu1 %v6680_v2  ;;  %10239 = vst [vmem:[#allocation29_spill] sm:$0xff] %v6692_v63  ;;  %v6695_v1 = vld [vmem:[#allocation3 + $0x500] sm:$0xff]  ;;  %v6698_v2 = vld [vmem:[#allocation3 + $0x510] sm:$0xff] }
 0x23b   :  { %1663 = vmatpush2.msra.mxu0 %v6683_v3  ;;  %1734 = vmatpush2.msra.mxu1 %v6686_v56  ;;  %10240 = vst [vmem:[#allocation30_spill] sm:$0xff] %v6695_v1  ;;  %10241 = vst [vmem:[#allocation31_spill] sm:$0xff] %v6698_v2  ;;  %v6701_v3 = vld [vmem:[#allocation3 + $0x4c8] sm:$0xff]  ;;  %v6704_v56 = vld [vmem:[#allocation3 + $0x4d8] sm:$0xff] }
 0x23c   :  { %1664 = vmatprep.subr.mxu0 %v6689_v57  ;;  %1735 = vmatprep.subr.mxu1 %v6692_v63  ;;  %10242 = vst [vmem:[#allocation32_spill] sm:$0xff] %v6701_v3  ;;  %10243 = vst [vmem:[#allocation33_spill] sm:$0xff] %v6704_v56  ;;  %v6707_v57 = vld [vmem:[#allocation3 + $0x4c0] sm:$0xff]  ;;  %v6710_v63 = vld [vmem:[#allocation3 + $0x4d0] sm:$0xff] }
 0x23d   :  { %1665 = vmatpush2.msra.mxu0 %v6695_v1  ;;  %1736 = vmatpush2.msra.mxu1 %v6698_v2  ;;  %10244 = vst [vmem:[#allocation34_spill] sm:$0xff] %v6707_v57  ;;  %10245 = vst [vmem:[#allocation35_spill] sm:$0xff] %v6710_v63  ;;  %v6713_v1 = vld [vmem:[#allocation3 + $0x4a8] sm:$0xff]  ;;  %v6716_v2 = vld [vmem:[#allocation3 + $0x4b8] sm:$0xff] }
 0x23e   :  { %1666 = vmatprep.subr.mxu0 %v6701_v3  ;;  %1737 = vmatprep.subr.mxu1 %v6704_v56  ;;  %10246 = vst [vmem:[#allocation36_spill] sm:$0xff] %v6713_v1  ;;  %10247 = vst [vmem:[#allocation37_spill] sm:$0xff] %v6716_v2  ;;  %v10248_v56 = vld [vmem:[#allocation87_spill] sm:$0xff] }
 0x23f   :  { %1667 = vmatpush2.msra.mxu0 %v6707_v57  ;;  %1738 = vmatpush2.msra.mxu1 %v6710_v63  ;;  %v10251_v63 = vld [vmem:[#allocation94_spill] sm:$0xff] }
 0x240   :  { %1746 = vmatprep.subr.mxu0 %v6713_v1  ;;  %1817 = vmatprep.subr.mxu1 %v6716_v2 }
 0x27e   :  { %v1330_v3 = vpop.f32.mrf.mxu0  ;;  %v1401_v62 = vpop.f32.mrf.mxu1 }
 0x27f   :  { %v1331_v60 = vadd.f32 %v1330_v3, %v10248_v56  ;;  %v1402_v59 = vadd.f32 %v1401_v62, %v10249_v18 }
 0x280   :  { %v1332_v61 = vpop.f32.mrf.mxu0  ;;  %v1403_v57 = vpop.f32.mrf.mxu1 }
 0x281   :  { %v1333_v10 = vadd.f32 %v1332_v61, %v10250_v58  ;;  %v3890_v49 = vmul.f32 -1.442695, %v1331_v60  ;;  %v1404_v5 = vadd.f32 %v1403_v57, %v10251_v63  ;;  %v3892_v52 = vmul.f32 -1.442695, %v1402_v59 }
 0x282   :  { %v699_v58 = vadd.f32 %v6151_v13, %v6220_v30  ;;  %v812_v60 = vadd.f32 %v6153_v14, %v6223_v35 }
 0x283   :  { %v3891_v7 = vmul.f32 -1.442695, %v1333_v10  ;;  %4062 = vpow2.f32 %v3890_v49  ;;  %v3893_v1 = vmul.f32 -1.442695, %v1404_v5  ;;  %v701_v49 = vadd.f32 %v6155_v31, %v6226_v26 }
 0x284   :  { %4064 = vpow2.f32 %v3892_v52  ;;  %v814_v10 = vadd.f32 %v6157_v15, %v6229_v33 }
 0x285   :  { %4066 = vpow2.f32 %v3891_v7 }
 0x286   :  { %4068 = vpow2.f32 %v3893_v1 }
 0x290   :  { %v4063_v2 = vpop.eup %4062 }
 0x291   :  { %v4065_v51 = vpop.eup %4064  ;;  %v1554_v6 = vadd.f32 1.0, %v4063_v2 }
 0x292   :  { %v4067_v23 = vpop.eup %4066  ;;  %v1566_v56 = vadd.f32 1.0, %v4065_v51 }
 0x293   :  { %v4069_v3 = vpop.eup %4068  ;;  %v1555_v18 = vadd.f32 1.0, %v4067_v23  ;;  %4070 = vrcp.f32 %v1554_v6 }
 0x294   :  { %v1567_v52 = vadd.f32 1.0, %v4069_v3  ;;  %4072 = vrcp.f32 %v1566_v56 }
 0x295   :  { %4074 = vrcp.f32 %v1555_v18 }
 0x2a0   :  { %v4071_v6 = vpop.eup %4070 }
 0x2a1   :  { %v4073_v63 = vpop.eup %4072 }
 0x2a2   :  { %v4075_v1 = vpop.eup %4074  ;;  %v1586_v57 = vmul.f32 %v4073_v63, %v6239_v53  ;;  %v10282_v63 = vld [vmem:[#allocation222_spill] sm:$0xff] }
 0x2bf   :  { %v1472_v7 = vpop.f32.mrf.mxu0  ;;  %v1543_v5 = vpop.f32.mrf.mxu1 }
 0x2c0   :  { %v1473_v59 = vadd.f32 %v1472_v7, %v699_v58  ;;  %v1544_v51 = vadd.f32 %v1543_v5, %v812_v60 }
 0x2c1   :  { %v1474_v23 = vpop.f32.mrf.mxu0  ;;  %v1545_v61 = vpop.f32.mrf.mxu1 }
 0x2c2   :  { %v3894_v13 = vmul.f32 -1.442695, %v1473_v59  ;;  %4076 = vtanh.f32 %v1544_v51  ;;  %v1475_v62 = vadd.f32 %v1474_v23, %v701_v49  ;;  %v1546_v14 = vadd.f32 %v1545_v61, %v814_v10 }
 0x2c3   :  { %4078 = vrcp.f32 %v1567_v52 }
 0x2c4   :  { %4080 = vpow2.f32 %v3894_v13  ;;  %v3895_v31 = vmul.f32 -1.442695, %v1475_v62  ;;  %v10278_v62 = vld [vmem:[#allocation218_spill] sm:$0xff] }
 0x2c5   :  { %4082 = vtanh.f32 %v1546_v14  ;;  %v10279_v14 = vld [vmem:[#allocation219_spill] sm:$0xff] }
 0x2c6   :  { %4084 = vpow2.f32 %v3895_v31  ;;  %v10280_v31 = vld [vmem:[#allocation220_spill] sm:$0xff] }
 0x2cf   :  { %v4077_v2 = vpop.eup %4076 }
 0x2d0   :  { %v4079_v15 = vpop.eup %4078  ;;  %v1588_v3 = vmul.f32 %v4077_v2, %v4071_v6  ;;  %v10281_v6 = vld [vmem:[#allocation221_spill] sm:$0xff]  ;;  %v10284_v2 = vld [vmem:[#allocation224_spill] sm:$0xff] }
 0x2d1   :  { %v4081_v56 = vpop.eup %4080  ;;  %v1587_v52 = vmul.f32 %v4079_v15, %v6242_v42  ;;  %v10252_v42 = vld [vmem:[#allocation192_spill] sm:$0xff]  ;;  %v10285_v15 = vld [vmem:[#allocation225_spill] sm:$0xff] }
 0x2d2   :  { %v4083_v18 = vpop.eup %4082  ;;  %v1578_v58 = vadd.f32 1.0, %v4081_v56  ;;  %v6732_v60 = vadd.f32 %v1588_v3, %v1586_v57  ;;  %v10286_v57 = vld [vmem:[#allocation226_spill] sm:$0xff]  ;;  %v10287_v3 = vld [vmem:[#allocation227_spill] sm:$0xff]  ;;  %v10288_v56 = vld [vmem:[#allocation228_spill] sm:$0xff] }
 0x2d3   :  { %v4085_v49 = vpop.eup %4084  ;;  %v1589_v7 = vmul.f32 %v4083_v18, %v4075_v1  ;;  %v10283_v1 = vld [vmem:[#allocation223_spill] sm:$0xff]  ;;  %v10289_v18 = vld [vmem:[#allocation229_spill] sm:$0xff] }
 0x2d4   :  { %4086 = vrcp.f32 %v1578_v58  ;;  %v1579_v5 = vadd.f32 1.0, %v4085_v49  ;;  %v10290_v58 = vld [vmem:[#allocation230_spill] sm:$0xff]  ;;  %v10291_v49 = vld [vmem:[#allocation231_spill] sm:$0xff] }
 0x2d5   :  { %4088 = vtanh.f32 %v6732_v60  ;;  %v6736_v10 = vadd.f32 %v1589_v7, %v1587_v52  ;;  %v10292_v52 = vld [vmem:[#allocation232_spill] sm:$0xff]  ;;  %v10293_v7 = vld [vmem:[#allocation233_spill] sm:$0xff] }
 0x2d6   :  { %4090 = vrcp.f32 %v1579_v5  ;;  %v10294_v5 = vld [vmem:[#allocation234_spill] sm:$0xff] }
 0x2d7   :  { %4092 = vtanh.f32 %v6736_v10 }
 0x2e1   :  { %v4087_v53 = vpop.eup %4086 }
 0x2e2   :  { %v4089_v59 = vpop.eup %4088 }
 0x2e3   :  { %v4091_v51 = vpop.eup %4090  ;;  %v6739_v13 = vmul.f32 %v4089_v59, %v4087_v53  ;;  %v6817_v53 = vld [vmem:[#allocation3 + $0x7e8] sm:$0xff]  ;;  %v6820_v59 = vld [vmem:[#allocation3 + $0x7f8] sm:$0xff] }
 0x2e4   :  { %v4093_v23 = vpop.eup %4092 }
 0x2e5   :  { %v1595_v61 = vmul.f32 %v4093_v23, %v4091_v51  ;;  %v6823_v51 = vld [vmem:[#allocation3 + $0x7e0] sm:$0xff]  ;;  %v6844_v23 = vld [vmem:[#allocation3 + $0x778] sm:$0xff] }
 0x2e7   :  { %1668 = vmatprep.mubr.f32.mxu0 %v1595_v61  ;;  %1739 = vmatprep.mubr.f32.mxu1 %v1595_v61 }
 0x2e8   :  { %1669 = vmatmul.mubr.f32.vlgmr.msra.gmra.mxu0 %v6739_v13  ;;  %1740 = vmatmul.mubr.f32.vlgmr.msra.gmra.mxu1 %v6739_v13 }
 0x2e9   :  { %1747 = vmatpush1.msra.mxu0 %v6249_v8  ;;  %1818 = vmatpush1.msra.mxu1 %v6252_v28  ;;  %v10253_v8 = vld [vmem:[#allocation193_spill] sm:$0xff]  ;;  %v10254_v28 = vld [vmem:[#allocation194_spill] sm:$0xff] }
 0x2ea   :  { %1748 = vmatprep.subr.mxu0 %v6255_v11  ;;  %1810 = vmatprep.mubr.f32.mxu0 %v1595_v61  ;;  %v10255_v11 = vld [vmem:[#allocation195_spill] sm:$0xff] }
 0x2eb   :  { %1819 = vmatprep.subr.mxu1 %v6258_v44  ;;  %1881 = vmatprep.mubr.f32.mxu1 %v1595_v61  ;;  %v10256_v44 = vld [vmem:[#allocation196_spill] sm:$0xff]  ;;  %v6847_v61 = vld [vmem:[#allocation3 + $0x760] sm:$0xff] }
 0x2ec   :  { %1749 = vmatpush1.msra.mxu0 %v6261_v50  ;;  %1820 = vmatpush1.msra.mxu1 %v6264_v55  ;;  %v10257_v50 = vld [vmem:[#allocation197_spill] sm:$0xff]  ;;  %v10258_v55 = vld [vmem:[#allocation198_spill] sm:$0xff] }
 0x2ed   :  { %1750 = vmatprep.subr.mxu0 %v6267_v9  ;;  %1821 = vmatprep.subr.mxu1 %v6270_v12  ;;  %v10259_v9 = vld [vmem:[#allocation199_spill] sm:$0xff] }
 0x2ee   :  { %1751 = vmatpush1.msra.mxu0 %v6273_v0  ;;  %1822 = vmatpush1.msra.mxu1 %v6276_v27  ;;  %v10263_v12 = vld [vmem:[#allocation203_spill] sm:$0xff]  ;;  %v10264_v0 = vld [vmem:[#allocation204_spill] sm:$0xff]  ;;  %v10265_v27 = vld [vmem:[#allocation205_spill] sm:$0xff] }
 0x2ef   :  { %1752 = vmatprep.subr.mxu0 %v6279_v29  ;;  %1823 = vmatprep.subr.mxu1 %v6282_v36  ;;  %v10266_v29 = vld [vmem:[#allocation206_spill] sm:$0xff]  ;;  %v10267_v36 = vld [vmem:[#allocation207_spill] sm:$0xff] }
 0x2f0   :  { %1753 = vmatpush1.msra.mxu0 %v6285_v37  ;;  %1824 = vmatpush1.msra.mxu1 %v6288_v38  ;;  %v10268_v37 = vld [vmem:[#allocation208_spill] sm:$0xff]  ;;  %v10269_v38 = vld [vmem:[#allocation209_spill] sm:$0xff] }
 0x2f1   :  { %1754 = vmatprep.subr.mxu0 %v6291_v39  ;;  %1825 = vmatprep.subr.mxu1 %v6294_v41  ;;  %v10270_v39 = vld [vmem:[#allocation210_spill] sm:$0xff]  ;;  %v10271_v41 = vld [vmem:[#allocation211_spill] sm:$0xff] }
 0x2f2   :  { %1755 = vmatpush1.msra.mxu0 %v6297_v40  ;;  %1826 = vmatpush1.msra.mxu1 %v6300_v34  ;;  %v10272_v40 = vld [vmem:[#allocation212_spill] sm:$0xff]  ;;  %v10273_v34 = vld [vmem:[#allocation213_spill] sm:$0xff] }
 0x2f3   :  { %1756 = vmatprep.subr.mxu0 %v6303_v47  ;;  %1827 = vmatprep.subr.mxu1 %v6306_v43  ;;  %v10274_v47 = vld [vmem:[#allocation214_spill] sm:$0xff]  ;;  %v10275_v43 = vld [vmem:[#allocation215_spill] sm:$0xff] }
 0x2f4   :  { %1757 = vmatpush1.msra.mxu0 %v6309_v46  ;;  %1828 = vmatpush1.msra.mxu1 %v6312_v45  ;;  %v10276_v46 = vld [vmem:[#allocation216_spill] sm:$0xff]  ;;  %v10277_v45 = vld [vmem:[#allocation217_spill] sm:$0xff] }
 0x2f5   :  { %1758 = vmatprep.subr.mxu0 %v6315_v25  ;;  %1829 = vmatprep.subr.mxu1 %v6318_v24  ;;  %v10260_v25 = vld [vmem:[#allocation200_spill] sm:$0xff]  ;;  %v10261_v24 = vld [vmem:[#allocation201_spill] sm:$0xff] }
 0x2f6   :  { %1759 = vmatpush1.msra.mxu0 %v6321_v32  ;;  %1830 = vmatpush1.msra.mxu1 %v10252_v42  ;;  %v10262_v32 = vld [vmem:[#allocation202_spill] sm:$0xff]  ;;  %v6850_v42 = vld [vmem:[#allocation3 + $0x770] sm:$0xff] }
 0x2f7   :  { %1760 = vmatprep.subr.mxu0 %v10253_v8  ;;  %1831 = vmatprep.subr.mxu1 %v10254_v28  ;;  %v6853_v8 = vld [vmem:[#allocation3 + $0x728] sm:$0xff]  ;;  %v6856_v28 = vld [vmem:[#allocation3 + $0x738] sm:$0xff] }
 0x2f8   :  { %1761 = vmatpush1.msra.mxu0 %v10255_v11  ;;  %1832 = vmatpush1.msra.mxu1 %v10256_v44  ;;  %v6859_v11 = vld [vmem:[#allocation3 + $0x720] sm:$0xff]  ;;  %v6862_v44 = vld [vmem:[#allocation3 + $0x730] sm:$0xff] }
 0x2f9   :  { %1762 = vmatprep.subr.mxu0 %v10257_v50  ;;  %1833 = vmatprep.subr.mxu1 %v10258_v55  ;;  %v6865_v50 = vld [vmem:[#allocation3 + $0x6e8] sm:$0xff]  ;;  %v6868_v55 = vld [vmem:[#allocation3 + $0x6f8] sm:$0xff] }
 0x2fa   :  { %1763 = vmatpush1.msra.mxu0 %v10259_v9  ;;  %1834 = vmatpush1.msra.mxu1 %v10260_v25  ;;  %v6871_v9 = vld [vmem:[#allocation3 + $0x6e0] sm:$0xff]  ;;  %v6874_v25 = vld [vmem:[#allocation3 + $0x6f0] sm:$0xff] }
 0x2fb   :  { %1764 = vmatprep.subr.mxu0 %v10261_v24  ;;  %1835 = vmatprep.subr.mxu1 %v10262_v32  ;;  %v6877_v24 = vld [vmem:[#allocation3 + $0x6a8] sm:$0xff]  ;;  %v6880_v32 = vld [vmem:[#allocation3 + $0x6b8] sm:$0xff] }
 0x2fc   :  { %1765 = vmatpush1.msra.mxu0 %v10263_v12  ;;  %1836 = vmatpush1.msra.mxu1 %v10264_v0  ;;  %v6883_v12 = vld [vmem:[#allocation3 + $0x6a0] sm:$0xff]  ;;  %v6886_v0 = vld [vmem:[#allocation3 + $0x6b0] sm:$0xff] }
 0x2fd   :  { %1766 = vmatprep.subr.mxu0 %v10265_v27  ;;  %1837 = vmatprep.subr.mxu1 %v10266_v29  ;;  %v6889_v27 = vld [vmem:[#allocation3 + $0x668] sm:$0xff]  ;;  %v6892_v29 = vld [vmem:[#allocation3 + $0x678] sm:$0xff] }
 0x2fe   :  { %1767 = vmatpush1.msra.mxu0 %v10267_v36  ;;  %1838 = vmatpush1.msra.mxu1 %v10268_v37  ;;  %v6895_v36 = vld [vmem:[#allocation3 + $0x660] sm:$0xff]  ;;  %v6898_v37 = vld [vmem:[#allocation3 + $0x670] sm:$0xff] }
 0x2ff   :  { %1768 = vmatprep.subr.mxu0 %v10269_v38  ;;  %1839 = vmatprep.subr.mxu1 %v10270_v39  ;;  %v6901_v38 = vld [vmem:[#allocation3 + $0x628] sm:$0xff]  ;;  %v6904_v39 = vld [vmem:[#allocation3 + $0x638] sm:$0xff] }
 0x300   :  { %1769 = vmatpush1.msra.mxu0 %v10271_v41  ;;  %1840 = vmatpush1.msra.mxu1 %v10272_v40  ;;  %v6907_v41 = vld [vmem:[#allocation3 + $0x620] sm:$0xff]  ;;  %v6910_v40 = vld [vmem:[#allocation3 + $0x630] sm:$0xff] }
 0x301   :  { %1770 = vmatprep.subr.mxu0 %v10273_v34  ;;  %1841 = vmatprep.subr.mxu1 %v10274_v47  ;;  %v6913_v34 = vld [vmem:[#allocation3 + $0x5e8] sm:$0xff]  ;;  %v6916_v47 = vld [vmem:[#allocation3 + $0x5f8] sm:$0xff] }
 0x302   :  { %1771 = vmatpush1.msra.mxu0 %v10275_v43  ;;  %1842 = vmatpush1.msra.mxu1 %v10276_v46  ;;  %v6919_v43 = vld [vmem:[#allocation3 + $0x5e0] sm:$0xff]  ;;  %v6922_v46 = vld [vmem:[#allocation3 + $0x5f0] sm:$0xff] }
 0x303   :  { %1772 = vmatprep.subr.mxu0 %v10277_v45  ;;  %1843 = vmatprep.subr.mxu1 %v10278_v62  ;;  %v6925_v45 = vld [vmem:[#allocation3 + $0x5a8] sm:$0xff]  ;;  %v6928_v62 = vld [vmem:[#allocation3 + $0x5b8] sm:$0xff] }
 0x304   :  { %1773 = vmatpush1.msra.mxu0 %v10279_v14  ;;  %1844 = vmatpush1.msra.mxu1 %v10280_v31  ;;  %v6931_v14 = vld [vmem:[#allocation3 + $0x5a0] sm:$0xff]  ;;  %v6934_v31 = vld [vmem:[#allocation3 + $0x5b0] sm:$0xff] }
 0x305   :  { %1774 = vmatprep.subr.mxu0 %v10281_v6  ;;  %1845 = vmatprep.subr.mxu1 %v10282_v63  ;;  %10295 = vst [vmem:[#allocation38_spill] sm:$0xff] %v6931_v14  ;;  %10296 = vst [vmem:[#allocation39_spill] sm:$0xff] %v6934_v31  ;;  %v6937_v6 = vld [vmem:[#allocation3 + $0x568] sm:$0xff]  ;;  %v6940_v63 = vld [vmem:[#allocation3 + $0x578] sm:$0xff] }
 0x306   :  { %1775 = vmatpush1.msra.mxu0 %v10283_v1  ;;  %1846 = vmatpush1.msra.mxu1 %v10284_v2  ;;  %10297 = vst [vmem:[#allocation40_spill] sm:$0xff] %v6937_v6  ;;  %10298 = vst [vmem:[#allocation41_spill] sm:$0xff] %v6940_v63  ;;  %v6943_v1 = vld [vmem:[#allocation3 + $0x560] sm:$0xff]  ;;  %v6946_v2 = vld [vmem:[#allocation3 + $0x570] sm:$0xff] }
 0x307   :  { %1776 = vmatprep.subr.mxu0 %v10285_v15  ;;  %1847 = vmatprep.subr.mxu1 %v10286_v57  ;;  %10299 = vst [vmem:[#allocation42_spill] sm:$0xff] %v6943_v1  ;;  %10300 = vst [vmem:[#allocation43_spill] sm:$0xff] %v6946_v2  ;;  %v6949_v15 = vld [vmem:[#allocation3 + $0x528] sm:$0xff]  ;;  %v6952_v57 = vld [vmem:[#allocation3 + $0x538] sm:$0xff] }
 0x308   :  { %1777 = vmatpush1.msra.mxu0 %v10287_v3  ;;  %1848 = vmatpush1.msra.mxu1 %v10288_v56  ;;  %10301 = vst [vmem:[#allocation44_spill] sm:$0xff] %v6949_v15  ;;  %10302 = vst [vmem:[#allocation45_spill] sm:$0xff] %v6952_v57  ;;  %v6955_v3 = vld [vmem:[#allocation3 + $0x520] sm:$0xff]  ;;  %v6958_v56 = vld [vmem:[#allocation3 + $0x530] sm:$0xff] }
 0x309   :  { %1778 = vmatprep.subr.mxu0 %v10289_v18  ;;  %1849 = vmatprep.subr.mxu1 %v10290_v58  ;;  %10303 = vst [vmem:[#allocation46_spill] sm:$0xff] %v6955_v3  ;;  %10304 = vst [vmem:[#allocation47_spill] sm:$0xff] %v6958_v56  ;;  %v6961_v18 = vld [vmem:[#allocation3 + $0x4e8] sm:$0xff]  ;;  %v6964_v58 = vld [vmem:[#allocation3 + $0x4f8] sm:$0xff] }
 0x30a   :  { %1779 = vmatpush2.msra.mxu0 %v10291_v49  ;;  %1850 = vmatpush2.msra.mxu1 %v10292_v52  ;;  %10305 = vst [vmem:[#allocation48_spill] sm:$0xff] %v6961_v18  ;;  %10306 = vst [vmem:[#allocation49_spill] sm:$0xff] %v6964_v58  ;;  %v6967_v49 = vld [vmem:[#allocation3 + $0x4e0] sm:$0xff]  ;;  %v6970_v52 = vld [vmem:[#allocation3 + $0x4f0] sm:$0xff] }
 0x30b   :  { %1780 = vmatprep.subr.mxu0 %v10293_v7  ;;  %1851 = vmatprep.subr.mxu1 %v10294_v5  ;;  %10307 = vst [vmem:[#allocation50_spill] sm:$0xff] %v6967_v49  ;;  %10308 = vst [vmem:[#allocation51_spill] sm:$0xff] %v6970_v52  ;;  %v6975_v7 = vld [vmem:[#allocation3 + $0x488] sm:$0xff]  ;;  %v6978_v5 = vld [vmem:[#allocation3 + $0x498] sm:$0xff] }
 0x30c   :  { %1781 = vmatpush2.msra.mxu0 %v6453_v21  ;;  %1852 = vmatpush2.msra.mxu1 %v6456_v20  ;;  %v6826_v20 = vld [vmem:[#allocation3 + $0x7f0] sm:$0xff]  ;;  %10309 = vst [vmem:[#allocation52_spill] sm:$0xff] %v6975_v7  ;;  %10310 = vst [vmem:[#allocation53_spill] sm:$0xff] %v6978_v5 }
 0x30d   :  { %1782 = vmatprep.subr.mxu0 %v6459_v19  ;;  %1853 = vmatprep.subr.mxu1 %v6462_v17  ;;  %v6829_v17 = vld [vmem:[#allocation3 + $0x7a8] sm:$0xff]  ;;  %v6835_v19 = vld [vmem:[#allocation3 + $0x7a0] sm:$0xff]  ;;  %v6838_v21 = vld [vmem:[#allocation3 + $0x7b0] sm:$0xff] }
 0x30e   :  { %1783 = vmatpush2.msra.mxu0 %v6465_v16  ;;  %1854 = vmatpush2.msra.mxu1 %v6468_v22  ;;  %v6832_v16 = vld [vmem:[#allocation3 + $0x7b8] sm:$0xff]  ;;  %v6841_v22 = vld [vmem:[#allocation3 + $0x768] sm:$0xff] }
 0x30f   :  { %1784 = vmatprep.subr.mxu0 %v6817_v53  ;;  %1855 = vmatprep.subr.mxu1 %v6820_v59 }
 0x310   :  { %1785 = vmatpush2.msra.mxu0 %v6823_v51  ;;  %1856 = vmatpush2.msra.mxu1 %v6826_v20 }
 0x311   :  { %1786 = vmatprep.subr.mxu0 %v6829_v17  ;;  %1857 = vmatprep.subr.mxu1 %v6832_v16 }
 0x312   :  { %1787 = vmatpush2.msra.mxu0 %v6835_v19  ;;  %1858 = vmatpush2.msra.mxu1 %v6838_v21 }
 0x313   :  { %1788 = vmatprep.subr.mxu0 %v6841_v22  ;;  %1859 = vmatprep.subr.mxu1 %v6844_v23 }
 0x314   :  { %1789 = vmatpush2.msra.mxu0 %v6847_v61  ;;  %1860 = vmatpush2.msra.mxu1 %v6850_v42 }
 0x315   :  { %1790 = vmatprep.subr.mxu0 %v6853_v8  ;;  %1861 = vmatprep.subr.mxu1 %v6856_v28 }
 0x316   :  { %1791 = vmatpush2.msra.mxu0 %v6859_v11  ;;  %1862 = vmatpush2.msra.mxu1 %v6862_v44 }
 0x317   :  { %1792 = vmatprep.subr.mxu0 %v6865_v50  ;;  %1863 = vmatprep.subr.mxu1 %v6868_v55 }
 0x318   :  { %1793 = vmatpush2.msra.mxu0 %v6871_v9  ;;  %1864 = vmatpush2.msra.mxu1 %v6874_v25 }
 0x319   :  { %1794 = vmatprep.subr.mxu0 %v6877_v24  ;;  %1865 = vmatprep.subr.mxu1 %v6880_v32 }
 0x31a   :  { %1795 = vmatpush2.msra.mxu0 %v6883_v12  ;;  %1866 = vmatpush2.msra.mxu1 %v6886_v0 }
 0x31b   :  { %1796 = vmatprep.subr.mxu0 %v6889_v27  ;;  %1867 = vmatprep.subr.mxu1 %v6892_v29 }
 0x31c   :  { %1797 = vmatpush2.msra.mxu0 %v6895_v36  ;;  %1868 = vmatpush2.msra.mxu1 %v6898_v37 }
 0x31d   :  { %1798 = vmatprep.subr.mxu0 %v6901_v38  ;;  %1869 = vmatprep.subr.mxu1 %v6904_v39 }
 0x31e   :  { %1799 = vmatpush2.msra.mxu0 %v6907_v41  ;;  %1870 = vmatpush2.msra.mxu1 %v6910_v40 }
 0x31f   :  { %1800 = vmatprep.subr.mxu0 %v6913_v34  ;;  %1871 = vmatprep.subr.mxu1 %v6916_v47 }
 0x320   :  { %1801 = vmatpush2.msra.mxu0 %v6919_v43  ;;  %1872 = vmatpush2.msra.mxu1 %v6922_v46 }
 0x321   :  { %1802 = vmatprep.subr.mxu0 %v6925_v45  ;;  %1873 = vmatprep.subr.mxu1 %v6928_v62 }
 0x322   :  { %1803 = vmatpush2.msra.mxu0 %v6931_v14  ;;  %1874 = vmatpush2.msra.mxu1 %v6934_v31 }
 0x323   :  { %1804 = vmatprep.subr.mxu0 %v6937_v6  ;;  %1875 = vmatprep.subr.mxu1 %v6940_v63 }
 0x324   :  { %1805 = vmatpush2.msra.mxu0 %v6943_v1  ;;  %1876 = vmatpush2.msra.mxu1 %v6946_v2  ;;  %v10438_v2 = vld [vmem:[#allocation105_spill] sm:$0xff] }
 0x325   :  { %1806 = vmatprep.subr.mxu0 %v6949_v15  ;;  %1877 = vmatprep.subr.mxu1 %v6952_v57 }
 0x326   :  { %1807 = vmatpush2.msra.mxu0 %v6955_v3  ;;  %1878 = vmatpush2.msra.mxu1 %v6958_v56  ;;  %v10413_v56 = vld [vmem:[#allocation15_spill] sm:$0xff] }
 0x327   :  { %1808 = vmatprep.subr.mxu0 %v6961_v18  ;;  %1879 = vmatprep.subr.mxu1 %v6964_v58  ;;  %v6981_v58 = vld [vmem:[#allocation3 + $0x480] sm:$0xff]  ;;  %v10411_v18 = vld [vmem:[#allocation13_spill] sm:$0xff] }
 0x328   :  { %1809 = vmatpush2.msra.mxu0 %v6967_v49  ;;  %1880 = vmatpush2.msra.mxu1 %v6970_v52  ;;  %10311 = vst [vmem:[#allocation54_spill] sm:$0xff] %v6981_v58  ;;  %v6984_v49 = vld [vmem:[#allocation3 + $0x490] sm:$0xff]  ;;  %v6987_v52 = vld [vmem:[#allocation3 + $0x448] sm:$0xff] }
 0x329   :  { %1811 = vmatmul.mubr.f32.vlgmr.msra.gmra.mxu0 %v6739_v13  ;;  %1882 = vmatmul.mubr.f32.vlgmr.msra.gmra.mxu1 %v6739_v13  ;;  %10312 = vst [vmem:[#allocation55_spill] sm:$0xff] %v6984_v49  ;;  %10313 = vst [vmem:[#allocation56_spill] sm:$0xff] %v6987_v52  ;;  %v6990_v13 = vld [vmem:[#allocation3 + $0x458] sm:$0xff] }
 0x32a   :  { %1944 = vmatprep.subr.mxu0 %v6975_v7  ;;  %2015 = vmatprep.subr.mxu1 %v6978_v5  ;;  %10314 = vst [vmem:[#allocation57_spill] sm:$0xff] %v6990_v13  ;;  %v6993_v7 = vld [vmem:[#allocation3 + $0x440] sm:$0xff]  ;;  %v6996_v5 = vld [vmem:[#allocation3 + $0x450] sm:$0xff] }
 0x32b   :  { %1945 = vmatpush1.msra.mxu0 %v6981_v58  ;;  %2016 = vmatpush1.msra.mxu1 %v6984_v49  ;;  %10315 = vst [vmem:[#allocation58_spill] sm:$0xff] %v6993_v7  ;;  %10316 = vst [vmem:[#allocation59_spill] sm:$0xff] %v6996_v5  ;;  %v6999_v58 = vld [vmem:[#allocation3 + $0x408] sm:$0xff]  ;;  %v7002_v49 = vld [vmem:[#allocation3 + $0x418] sm:$0xff] }
 0x32c   :  { %1946 = vmatprep.subr.mxu0 %v6987_v52  ;;  %2017 = vmatprep.subr.mxu1 %v6990_v13  ;;  %10317 = vst [vmem:[#allocation60_spill] sm:$0xff] %v6999_v58  ;;  %10318 = vst [vmem:[#allocation61_spill] sm:$0xff] %v7002_v49  ;;  %v7005_v52 = vld [vmem:[#allocation3 + $0x400] sm:$0xff]  ;;  %v7008_v13 = vld [vmem:[#allocation3 + $0x410] sm:$0xff] }
 0x32d   :  { %1947 = vmatpush1.msra.mxu0 %v6993_v7  ;;  %2018 = vmatpush1.msra.mxu1 %v6996_v5  ;;  %10319 = vst [vmem:[#allocation62_spill] sm:$0xff] %v7005_v52  ;;  %10320 = vst [vmem:[#allocation63_spill] sm:$0xff] %v7008_v13  ;;  %v7011_v7 = vld [vmem:[#allocation3 + $0x3c8] sm:$0xff]  ;;  %v7014_v5 = vld [vmem:[#allocation3 + $0x3d8] sm:$0xff] }
 0x32e   :  { %1948 = vmatprep.subr.mxu0 %v6999_v58  ;;  %2019 = vmatprep.subr.mxu1 %v7002_v49  ;;  %10321 = vst [vmem:[#allocation64_spill] sm:$0xff] %v7011_v7  ;;  %10322 = vst [vmem:[#allocation65_spill] sm:$0xff] %v7014_v5  ;;  %v7017_v58 = vld [vmem:[#allocation3 + $0x3c0] sm:$0xff]  ;;  %v7020_v49 = vld [vmem:[#allocation3 + $0x3d0] sm:$0xff] }
 0x32f   :  { %1949 = vmatpush1.msra.mxu0 %v7005_v52  ;;  %2020 = vmatpush1.msra.mxu1 %v7008_v13  ;;  %10323 = vst [vmem:[#allocation66_spill] sm:$0xff] %v7017_v58  ;;  %10324 = vst [vmem:[#allocation67_spill] sm:$0xff] %v7020_v49  ;;  %v7023_v52 = vld [vmem:[#allocation3 + $0x388] sm:$0xff]  ;;  %v7026_v13 = vld [vmem:[#allocation3 + $0x398] sm:$0xff] }
 0x330   :  { %1950 = vmatprep.subr.mxu0 %v7011_v7  ;;  %2021 = vmatprep.subr.mxu1 %v7014_v5  ;;  %10325 = vst [vmem:[#allocation68_spill] sm:$0xff] %v7023_v52  ;;  %10326 = vst [vmem:[#allocation69_spill] sm:$0xff] %v7026_v13  ;;  %v7029_v7 = vld [vmem:[#allocation3 + $0x380] sm:$0xff]  ;;  %v7032_v5 = vld [vmem:[#allocation3 + $0x390] sm:$0xff] }
 0x331   :  { %1951 = vmatpush1.msra.mxu0 %v7017_v58  ;;  %2022 = vmatpush1.msra.mxu1 %v7020_v49  ;;  %10327 = vst [vmem:[#allocation70_spill] sm:$0xff] %v7029_v7  ;;  %10328 = vst [vmem:[#allocation71_spill] sm:$0xff] %v7032_v5  ;;  %v7035_v58 = vld [vmem:[#allocation3 + $0x348] sm:$0xff]  ;;  %v7038_v49 = vld [vmem:[#allocation3 + $0x358] sm:$0xff] }
 0x332   :  { %1952 = vmatprep.subr.mxu0 %v7023_v52  ;;  %2023 = vmatprep.subr.mxu1 %v7026_v13  ;;  %10329 = vst [vmem:[#allocation72_spill] sm:$0xff] %v7035_v58  ;;  %10330 = vst [vmem:[#allocation73_spill] sm:$0xff] %v7038_v49  ;;  %v7041_v52 = vld [vmem:[#allocation3 + $0x340] sm:$0xff]  ;;  %v7044_v13 = vld [vmem:[#allocation3 + $0x350] sm:$0xff] }
 0x333   :  { %1953 = vmatpush1.msra.mxu0 %v7029_v7  ;;  %2024 = vmatpush1.msra.mxu1 %v7032_v5  ;;  %10331 = vst [vmem:[#allocation74_spill] sm:$0xff] %v7041_v52  ;;  %10332 = vst [vmem:[#allocation75_spill] sm:$0xff] %v7044_v13  ;;  %v7047_v7 = vld [vmem:[#allocation3 + $0x308] sm:$0xff]  ;;  %v7050_v5 = vld [vmem:[#allocation3 + $0x318] sm:$0xff] }
 0x334   :  { %1954 = vmatprep.subr.mxu0 %v7035_v58  ;;  %2025 = vmatprep.subr.mxu1 %v7038_v49  ;;  %10333 = vst [vmem:[#allocation76_spill] sm:$0xff] %v7047_v7  ;;  %10334 = vst [vmem:[#allocation77_spill] sm:$0xff] %v7050_v5  ;;  %v7053_v58 = vld [vmem:[#allocation3 + $0x300] sm:$0xff]  ;;  %v7056_v49 = vld [vmem:[#allocation3 + $0x310] sm:$0xff] }
 0x335   :  { %1955 = vmatpush1.msra.mxu0 %v7041_v52  ;;  %2026 = vmatpush1.msra.mxu1 %v7044_v13  ;;  %10335 = vst [vmem:[#allocation78_spill] sm:$0xff] %v7053_v58  ;;  %10336 = vst [vmem:[#allocation79_spill] sm:$0xff] %v7056_v49  ;;  %v7059_v52 = vld [vmem:[#allocation3 + $0x2c8] sm:$0xff]  ;;  %v7062_v13 = vld [vmem:[#allocation3 + $0x2d8] sm:$0xff] }
 0x336   :  { %1956 = vmatprep.subr.mxu0 %v7047_v7  ;;  %2027 = vmatprep.subr.mxu1 %v7050_v5  ;;  %10337 = vst [vmem:[#allocation80_spill] sm:$0xff] %v7059_v52  ;;  %10338 = vst [vmem:[#allocation81_spill] sm:$0xff] %v7062_v13  ;;  %v7065_v7 = vld [vmem:[#allocation3 + $0x2c0] sm:$0xff]  ;;  %v7068_v5 = vld [vmem:[#allocation3 + $0x2d0] sm:$0xff] }
 0x337   :  { %1957 = vmatpush1.msra.mxu0 %v7053_v58  ;;  %2028 = vmatpush1.msra.mxu1 %v7056_v49  ;;  %10339 = vst [vmem:[#allocation82_spill] sm:$0xff] %v7065_v7  ;;  %10340 = vst [vmem:[#allocation83_spill] sm:$0xff] %v7068_v5  ;;  %v7071_v58 = vld [vmem:[#allocation3 + $0x288] sm:$0xff]  ;;  %v7074_v49 = vld [vmem:[#allocation3 + $0x298] sm:$0xff] }
 0x338   :  { %1958 = vmatprep.subr.mxu0 %v7059_v52  ;;  %2029 = vmatprep.subr.mxu1 %v7062_v13  ;;  %10341 = vst [vmem:[#allocation84_spill] sm:$0xff] %v7071_v58  ;;  %10342 = vst [vmem:[#allocation85_spill] sm:$0xff] %v7074_v49  ;;  %v7077_v52 = vld [vmem:[#allocation3 + $0x280] sm:$0xff]  ;;  %v7080_v13 = vld [vmem:[#allocation3 + $0x290] sm:$0xff] }
 0x339   :  { %1959 = vmatpush1.msra.mxu0 %v7065_v7  ;;  %2030 = vmatpush1.msra.mxu1 %v7068_v5  ;;  %10343 = vst [vmem:[#allocation86_spill] sm:$0xff] %v7077_v52  ;;  %10344 = vst [vmem:[#allocation89_spill] sm:$0xff] %v7080_v13  ;;  %v7083_v7 = vld [vmem:[#allocation3 + $0x248] sm:$0xff]  ;;  %v7086_v5 = vld [vmem:[#allocation3 + $0x258] sm:$0xff] }
 0x33a   :  { %1960 = vmatprep.subr.mxu0 %v7071_v58  ;;  %2031 = vmatprep.subr.mxu1 %v7074_v49  ;;  %10345 = vst [vmem:[#allocation90_spill] sm:$0xff] %v7083_v7  ;;  %10346 = vst [vmem:[#allocation91_spill] sm:$0xff] %v7086_v5  ;;  %v7089_v58 = vld [vmem:[#allocation3 + $0x240] sm:$0xff]  ;;  %v7092_v49 = vld [vmem:[#allocation3 + $0x250] sm:$0xff] }
 0x33b   :  { %1961 = vmatpush1.msra.mxu0 %v7077_v52  ;;  %2032 = vmatpush1.msra.mxu1 %v7080_v13  ;;  %10347 = vst [vmem:[#allocation92_spill] sm:$0xff] %v7089_v58  ;;  %10348 = vst [vmem:[#allocation95_spill] sm:$0xff] %v7092_v49  ;;  %v7095_v52 = vld [vmem:[#allocation3 + $0x208] sm:$0xff]  ;;  %v7098_v13 = vld [vmem:[#allocation3 + $0x218] sm:$0xff] }
 0x33c   :  { %1962 = vmatprep.subr.mxu0 %v7083_v7  ;;  %2033 = vmatprep.subr.mxu1 %v7086_v5  ;;  %10349 = vst [vmem:[#allocation96_spill] sm:$0xff] %v7095_v52  ;;  %10350 = vst [vmem:[#allocation97_spill] sm:$0xff] %v7098_v13  ;;  %v7101_v7 = vld [vmem:[#allocation3 + $0x200] sm:$0xff]  ;;  %v7104_v5 = vld [vmem:[#allocation3 + $0x210] sm:$0xff] }
 0x33d   :  { %1963 = vmatpush1.msra.mxu0 %v7089_v58  ;;  %2034 = vmatpush1.msra.mxu1 %v7092_v49  ;;  %10351 = vst [vmem:[#allocation98_spill] sm:$0xff] %v7101_v7  ;;  %10352 = vst [vmem:[#allocation101_spill] sm:$0xff] %v7104_v5  ;;  %v7107_v58 = vld [vmem:[#allocation3 + $0x1c8] sm:$0xff]  ;;  %v7110_v49 = vld [vmem:[#allocation3 + $0x1d8] sm:$0xff] }
 0x33e   :  { %1964 = vmatprep.subr.mxu0 %v7095_v52  ;;  %2035 = vmatprep.subr.mxu1 %v7098_v13  ;;  %10353 = vst [vmem:[#allocation102_spill] sm:$0xff] %v7107_v58  ;;  %10354 = vst [vmem:[#allocation103_spill] sm:$0xff] %v7110_v49  ;;  %v7113_v52 = vld [vmem:[#allocation3 + $0x1c0] sm:$0xff]  ;;  %v7116_v13 = vld [vmem:[#allocation3 + $0x1d0] sm:$0xff] }
 0x33f   :  { %1965 = vmatpush1.msra.mxu0 %v7101_v7  ;;  %2036 = vmatpush1.msra.mxu1 %v7104_v5  ;;  %10355 = vst [vmem:[#allocation104_spill] sm:$0xff] %v7113_v52  ;;  %10356 = vst [vmem:[#allocation107_spill] sm:$0xff] %v7116_v13  ;;  %v7119_v7 = vld [vmem:[#allocation3 + $0x188] sm:$0xff]  ;;  %v7122_v5 = vld [vmem:[#allocation3 + $0x198] sm:$0xff] }
 0x340   :  { %1966 = vmatprep.subr.mxu0 %v7107_v58  ;;  %2037 = vmatprep.subr.mxu1 %v7110_v49  ;;  %10357 = vst [vmem:[#allocation108_spill] sm:$0xff] %v7119_v7  ;;  %10358 = vst [vmem:[#allocation109_spill] sm:$0xff] %v7122_v5  ;;  %v7125_v58 = vld [vmem:[#allocation3 + $0x180] sm:$0xff]  ;;  %v7128_v49 = vld [vmem:[#allocation3 + $0x190] sm:$0xff] }
 0x341   :  { %1967 = vmatpush1.msra.mxu0 %v7113_v52  ;;  %2038 = vmatpush1.msra.mxu1 %v7116_v13  ;;  %10359 = vst [vmem:[#allocation110_spill] sm:$0xff] %v7125_v58  ;;  %10360 = vst [vmem:[#allocation113_spill] sm:$0xff] %v7128_v49  ;;  %v7131_v52 = vld [vmem:[#allocation3 + $0x148] sm:$0xff]  ;;  %v7134_v13 = vld [vmem:[#allocation3 + $0x158] sm:$0xff] }
 0x342   :  { %1968 = vmatprep.subr.mxu0 %v7119_v7  ;;  %2039 = vmatprep.subr.mxu1 %v7122_v5  ;;  %10361 = vst [vmem:[#allocation114_spill] sm:$0xff] %v7131_v52  ;;  %10362 = vst [vmem:[#allocation115_spill] sm:$0xff] %v7134_v13  ;;  %v7137_v7 = vld [vmem:[#allocation3 + $0x140] sm:$0xff]  ;;  %v7140_v5 = vld [vmem:[#allocation3 + $0x150] sm:$0xff] }
 0x343   :  { %1969 = vmatpush1.msra.mxu0 %v7125_v58  ;;  %2040 = vmatpush1.msra.mxu1 %v7128_v49  ;;  %10363 = vst [vmem:[#allocation116_spill] sm:$0xff] %v7137_v7  ;;  %10364 = vst [vmem:[#allocation119_spill] sm:$0xff] %v7140_v5  ;;  %v7143_v58 = vld [vmem:[#allocation3 + $0x108] sm:$0xff]  ;;  %v7146_v49 = vld [vmem:[#allocation3 + $0x118] sm:$0xff] }
 0x344   :  { %1970 = vmatprep.subr.mxu0 %v7131_v52  ;;  %2041 = vmatprep.subr.mxu1 %v7134_v13  ;;  %10365 = vst [vmem:[#allocation120_spill] sm:$0xff] %v7143_v58  ;;  %10366 = vst [vmem:[#allocation121_spill] sm:$0xff] %v7146_v49  ;;  %v7149_v52 = vld [vmem:[#allocation3 + $0x100] sm:$0xff]  ;;  %v7152_v13 = vld [vmem:[#allocation3 + $0x110] sm:$0xff] }
 0x345   :  { %1971 = vmatpush1.msra.mxu0 %v7137_v7  ;;  %2042 = vmatpush1.msra.mxu1 %v7140_v5  ;;  %10367 = vst [vmem:[#allocation122_spill] sm:$0xff] %v7149_v52  ;;  %10368 = vst [vmem:[#allocation125_spill] sm:$0xff] %v7152_v13  ;;  %v7155_v7 = vld [vmem:[#allocation3 + $0xc8] sm:$0xff]  ;;  %v7158_v5 = vld [vmem:[#allocation3 + $0xd8] sm:$0xff] }
 0x346   :  { %1972 = vmatprep.subr.mxu0 %v7143_v58  ;;  %2043 = vmatprep.subr.mxu1 %v7146_v49  ;;  %10369 = vst [vmem:[#allocation126_spill] sm:$0xff] %v7155_v7  ;;  %10370 = vst [vmem:[#allocation127_spill] sm:$0xff] %v7158_v5  ;;  %v7161_v58 = vld [vmem:[#allocation3 + $0xc0] sm:$0xff]  ;;  %v7164_v49 = vld [vmem:[#allocation3 + $0xd0] sm:$0xff] }
 0x347   :  { %1973 = vmatpush1.msra.mxu0 %v7149_v52  ;;  %2044 = vmatpush1.msra.mxu1 %v7152_v13  ;;  %10371 = vst [vmem:[#allocation128_spill] sm:$0xff] %v7161_v58  ;;  %10372 = vst [vmem:[#allocation131_spill] sm:$0xff] %v7164_v49  ;;  %v7167_v52 = vld [vmem:[#allocation3 + $0x888] sm:$0xff]  ;;  %v7170_v13 = vld [vmem:[#allocation3 + $0x898] sm:$0xff] }
 0x348   :  { %1974 = vmatprep.subr.mxu0 %v7155_v7  ;;  %2045 = vmatprep.subr.mxu1 %v7158_v5  ;;  %10373 = vst [vmem:[#allocation132_spill] sm:$0xff] %v7167_v52  ;;  %10374 = vst [vmem:[#allocation133_spill] sm:$0xff] %v7170_v13  ;;  %v7173_v7 = vld [vmem:[#allocation3 + $0x880] sm:$0xff]  ;;  %v7176_v5 = vld [vmem:[#allocation3 + $0x890] sm:$0xff] }
 0x349   :  { %1975 = vmatpush1.msra.mxu0 %v7161_v58  ;;  %2046 = vmatpush1.msra.mxu1 %v7164_v49  ;;  %10375 = vst [vmem:[#allocation134_spill] sm:$0xff] %v7173_v7  ;;  %10376 = vst [vmem:[#allocation137_spill] sm:$0xff] %v7176_v5  ;;  %v7179_v58 = vld [vmem:[#allocation3 + $0x848] sm:$0xff]  ;;  %v7182_v49 = vld [vmem:[#allocation3 + $0x858] sm:$0xff] }
 0x34a   :  { %1976 = vmatprep.subr.mxu0 %v7167_v52  ;;  %2047 = vmatprep.subr.mxu1 %v7170_v13  ;;  %10377 = vst [vmem:[#allocation138_spill] sm:$0xff] %v7179_v58  ;;  %10378 = vst [vmem:[#allocation139_spill] sm:$0xff] %v7182_v49  ;;  %v7185_v52 = vld [vmem:[#allocation3 + $0x840] sm:$0xff]  ;;  %v7188_v13 = vld [vmem:[#allocation3 + $0x850] sm:$0xff] }
 0x34b   :  { %1977 = vmatpush2.msra.mxu0 %v7173_v7  ;;  %2048 = vmatpush2.msra.mxu1 %v7176_v5  ;;  %10379 = vst [vmem:[#allocation140_spill] sm:$0xff] %v7185_v52  ;;  %10380 = vst [vmem:[#allocation143_spill] sm:$0xff] %v7188_v13  ;;  %v7191_v7 = vld [vmem:[#allocation3 + $0x808] sm:$0xff]  ;;  %v7194_v5 = vld [vmem:[#allocation3 + $0x818] sm:$0xff] }
 0x34c   :  { %1978 = vmatprep.subr.mxu0 %v7179_v58  ;;  %2049 = vmatprep.subr.mxu1 %v7182_v49  ;;  %10381 = vst [vmem:[#allocation144_spill] sm:$0xff] %v7191_v7  ;;  %10382 = vst [vmem:[#allocation145_spill] sm:$0xff] %v7194_v5  ;;  %v7197_v58 = vld [vmem:[#allocation3 + $0x800] sm:$0xff]  ;;  %v7200_v49 = vld [vmem:[#allocation3 + $0x810] sm:$0xff] }
 0x34d   :  { %1979 = vmatpush2.msra.mxu0 %v7185_v52  ;;  %2050 = vmatpush2.msra.mxu1 %v7188_v13  ;;  %10383 = vst [vmem:[#allocation146_spill] sm:$0xff] %v7197_v58  ;;  %10384 = vst [vmem:[#allocation149_spill] sm:$0xff] %v7200_v49  ;;  %v7203_v52 = vld [vmem:[#allocation3 + $0x7c8] sm:$0xff]  ;;  %v7206_v13 = vld [vmem:[#allocation3 + $0x7d8] sm:$0xff] }
 0x34e   :  { %1980 = vmatprep.subr.mxu0 %v7191_v7  ;;  %2051 = vmatprep.subr.mxu1 %v7194_v5  ;;  %10385 = vst [vmem:[#allocation150_spill] sm:$0xff] %v7203_v52  ;;  %10386 = vst [vmem:[#allocation151_spill] sm:$0xff] %v7206_v13  ;;  %v7209_v7 = vld [vmem:[#allocation3 + $0x7c0] sm:$0xff]  ;;  %v7212_v5 = vld [vmem:[#allocation3 + $0x7d0] sm:$0xff] }
 0x34f   :  { %1981 = vmatpush2.msra.mxu0 %v7197_v58  ;;  %2052 = vmatpush2.msra.mxu1 %v7200_v49  ;;  %10387 = vst [vmem:[#allocation152_spill] sm:$0xff] %v7209_v7  ;;  %10388 = vst [vmem:[#allocation155_spill] sm:$0xff] %v7212_v5  ;;  %v7215_v58 = vld [vmem:[#allocation3 + $0x788] sm:$0xff]  ;;  %v7218_v49 = vld [vmem:[#allocation3 + $0x798] sm:$0xff] }
 0x350   :  { %1982 = vmatprep.subr.mxu0 %v7203_v52  ;;  %2053 = vmatprep.subr.mxu1 %v7206_v13  ;;  %10389 = vst [vmem:[#allocation156_spill] sm:$0xff] %v7215_v58  ;;  %10390 = vst [vmem:[#allocation157_spill] sm:$0xff] %v7218_v49  ;;  %v7221_v52 = vld [vmem:[#allocation3 + $0x780] sm:$0xff]  ;;  %v7224_v13 = vld [vmem:[#allocation3 + $0x790] sm:$0xff] }
 0x351   :  { %1983 = vmatpush2.msra.mxu0 %v7209_v7  ;;  %2054 = vmatpush2.msra.mxu1 %v7212_v5  ;;  %10391 = vst [vmem:[#allocation158_spill] sm:$0xff] %v7221_v52  ;;  %10392 = vst [vmem:[#allocation161_spill] sm:$0xff] %v7224_v13  ;;  %v7227_v7 = vld [vmem:[#allocation3 + $0x748] sm:$0xff]  ;;  %v7230_v5 = vld [vmem:[#allocation3 + $0x758] sm:$0xff] }
 0x352   :  { %1984 = vmatprep.subr.mxu0 %v7215_v58  ;;  %2055 = vmatprep.subr.mxu1 %v7218_v49  ;;  %10393 = vst [vmem:[#allocation162_spill] sm:$0xff] %v7227_v7  ;;  %10394 = vst [vmem:[#allocation87_spill] sm:$0xff] %v7230_v5  ;;  %v7233_v58 = vld [vmem:[#allocation3 + $0x740] sm:$0xff]  ;;  %v7236_v49 = vld [vmem:[#allocation3 + $0x750] sm:$0xff] }
 0x353   :  { %1985 = vmatpush2.msra.mxu0 %v7221_v52  ;;  %2056 = vmatpush2.msra.mxu1 %v7224_v13  ;;  %10395 = vst [vmem:[#allocation88_spill] sm:$0xff] %v7233_v58  ;;  %10396 = vst [vmem:[#allocation93_spill] sm:$0xff] %v7236_v49  ;;  %v7239_v52 = vld [vmem:[#allocation3 + $0x708] sm:$0xff]  ;;  %v7242_v13 = vld [vmem:[#allocation3 + $0x718] sm:$0xff] }
 0x354   :  { %1986 = vmatprep.subr.mxu0 %v7227_v7  ;;  %2057 = vmatprep.subr.mxu1 %v7230_v5  ;;  %10397 = vst [vmem:[#allocation94_spill] sm:$0xff] %v7239_v52  ;;  %10398 = vst [vmem:[#allocation192_spill] sm:$0xff] %v7242_v13  ;;  %v7245_v7 = vld [vmem:[#allocation3 + $0x700] sm:$0xff]  ;;  %v7248_v5 = vld [vmem:[#allocation3 + $0x710] sm:$0xff] }
 0x355   :  { %1987 = vmatpush2.msra.mxu0 %v7233_v58  ;;  %2058 = vmatpush2.msra.mxu1 %v7236_v49  ;;  %10399 = vst [vmem:[#allocation193_spill] sm:$0xff] %v7245_v7  ;;  %10400 = vst [vmem:[#allocation194_spill] sm:$0xff] %v7248_v5  ;;  %v7251_v58 = vld [vmem:[#allocation3 + $0x6c8] sm:$0xff]  ;;  %v7254_v49 = vld [vmem:[#allocation3 + $0x6d8] sm:$0xff] }
 0x356   :  { %1988 = vmatprep.subr.mxu0 %v7239_v52  ;;  %2059 = vmatprep.subr.mxu1 %v7242_v13  ;;  %10401 = vst [vmem:[#allocation195_spill] sm:$0xff] %v7251_v58  ;;  %10402 = vst [vmem:[#allocation196_spill] sm:$0xff] %v7254_v49  ;;  %v7257_v52 = vld [vmem:[#allocation3 + $0x6c0] sm:$0xff]  ;;  %v7260_v13 = vld [vmem:[#allocation3 + $0x6d0] sm:$0xff] }
 0x357   :  { %1989 = vmatpush2.msra.mxu0 %v7245_v7  ;;  %2060 = vmatpush2.msra.mxu1 %v7248_v5  ;;  %10403 = vst [vmem:[#allocation197_spill] sm:$0xff] %v7257_v52  ;;  %10404 = vst [vmem:[#allocation198_spill] sm:$0xff] %v7260_v13  ;;  %v7263_v7 = vld [vmem:[#allocation3 + $0x688] sm:$0xff]  ;;  %v7266_v5 = vld [vmem:[#allocation3 + $0x698] sm:$0xff] }
 0x358   :  { %1990 = vmatprep.subr.mxu0 %v7251_v58  ;;  %2061 = vmatprep.subr.mxu1 %v7254_v49  ;;  %10405 = vst [vmem:[#allocation199_spill] sm:$0xff] %v7263_v7  ;;  %10406 = vst [vmem:[#allocation200_spill] sm:$0xff] %v7266_v5  ;;  %v10407_v49 = vld [vmem:[#allocation9_spill] sm:$0xff]  ;;  %v10409_v58 = vld [vmem:[#allocation11_spill] sm:$0xff] }
 0x359   :  { %1991 = vmatpush2.msra.mxu0 %v7257_v52  ;;  %2062 = vmatpush2.msra.mxu1 %v7260_v13  ;;  %v10408_v52 = vld [vmem:[#allocation10_spill] sm:$0xff]  ;;  %v10410_v13 = vld [vmem:[#allocation12_spill] sm:$0xff] }
 0x35a   :  { %1992 = vmatprep.subr.mxu0 %v7263_v7  ;;  %2063 = vmatprep.subr.mxu1 %v7266_v5  ;;  %v10412_v7 = vld [vmem:[#allocation14_spill] sm:$0xff]  ;;  %v10414_v5 = vld [vmem:[#allocation16_spill] sm:$0xff] }
 0x35b   :  { %1993 = vmatpush2.msra.mxu0 %v6623_v48  ;;  %2064 = vmatpush2.msra.mxu1 %v6626_v54  ;;  %v10415_v48 = vld [vmem:[#allocation17_spill] sm:$0xff]  ;;  %v10416_v54 = vld [vmem:[#allocation18_spill] sm:$0xff] }
 0x35c   :  { %1994 = vmatprep.subr.mxu0 %v6629_v4  ;;  %2065 = vmatprep.subr.mxu1 %v10407_v49  ;;  %v10417_v4 = vld [vmem:[#allocation19_spill] sm:$0xff]  ;;  %v10418_v49 = vld [vmem:[#allocation20_spill] sm:$0xff] }
 0x35d   :  { %1995 = vmatpush2.msra.mxu0 %v10408_v52  ;;  %2066 = vmatpush2.msra.mxu1 %v10409_v58  ;;  %v10419_v52 = vld [vmem:[#allocation21_spill] sm:$0xff]  ;;  %v10420_v58 = vld [vmem:[#allocation22_spill] sm:$0xff] }
 0x35e   :  { %1996 = vmatprep.subr.mxu0 %v10410_v13  ;;  %2067 = vmatprep.subr.mxu1 %v10411_v18  ;;  %v10421_v13 = vld [vmem:[#allocation23_spill] sm:$0xff]  ;;  %v10422_v18 = vld [vmem:[#allocation24_spill] sm:$0xff] }
 0x35f   :  { %1997 = vmatpush2.msra.mxu0 %v10412_v7  ;;  %2068 = vmatpush2.msra.mxu1 %v10413_v56  ;;  %v10423_v7 = vld [vmem:[#allocation25_spill] sm:$0xff]  ;;  %v10424_v56 = vld [vmem:[#allocation26_spill] sm:$0xff] }
 0x360   :  { %1998 = vmatprep.subr.mxu0 %v10414_v5  ;;  %2069 = vmatprep.subr.mxu1 %v10415_v48  ;;  %v10425_v5 = vld [vmem:[#allocation27_spill] sm:$0xff]  ;;  %v10426_v48 = vld [vmem:[#allocation28_spill] sm:$0xff] }
 0x361   :  { %1999 = vmatpush2.msra.mxu0 %v10416_v54  ;;  %2070 = vmatpush2.msra.mxu1 %v10417_v4  ;;  %v10427_v54 = vld [vmem:[#allocation29_spill] sm:$0xff]  ;;  %v10428_v4 = vld [vmem:[#allocation30_spill] sm:$0xff] }
 0x362   :  { %2000 = vmatprep.subr.mxu0 %v10418_v49  ;;  %2071 = vmatprep.subr.mxu1 %v10419_v52  ;;  %v10429_v49 = vld [vmem:[#allocation31_spill] sm:$0xff]  ;;  %v10430_v52 = vld [vmem:[#allocation32_spill] sm:$0xff] }
 0x363   :  { %2001 = vmatpush2.msra.mxu0 %v10420_v58  ;;  %2072 = vmatpush2.msra.mxu1 %v10421_v13  ;;  %v10431_v58 = vld [vmem:[#allocation33_spill] sm:$0xff]  ;;  %v10432_v13 = vld [vmem:[#allocation34_spill] sm:$0xff] }
 0x364   :  { %2002 = vmatprep.subr.mxu0 %v10422_v18  ;;  %2073 = vmatprep.subr.mxu1 %v10423_v7  ;;  %v10433_v18 = vld [vmem:[#allocation35_spill] sm:$0xff]  ;;  %v10434_v7 = vld [vmem:[#allocation36_spill] sm:$0xff] }
 0x365   :  { %2003 = vmatpush2.msra.mxu0 %v10424_v56  ;;  %2074 = vmatpush2.msra.mxu1 %v10425_v5  ;;  %v10435_v56 = vld [vmem:[#allocation37_spill] sm:$0xff] }
 0x366   :  { %2004 = vmatprep.subr.mxu0 %v10426_v48  ;;  %2075 = vmatprep.subr.mxu1 %v10427_v54  ;;  %v10436_v54 = vld [vmem:[#allocation99_spill] sm:$0xff] }
 0x367   :  { %2005 = vmatpush2.msra.mxu0 %v10428_v4  ;;  %2076 = vmatpush2.msra.mxu1 %v10429_v49  ;;  %v10437_v4 = vld [vmem:[#allocation100_spill] sm:$0xff] }
 0x368   :  { %2006 = vmatprep.subr.mxu0 %v10430_v52  ;;  %2077 = vmatprep.subr.mxu1 %v10431_v58  ;;  %v10439_v58 = vld [vmem:[#allocation106_spill] sm:$0xff] }
 0x369   :  { %2007 = vmatpush2.msra.mxu0 %v10432_v13  ;;  %2078 = vmatpush2.msra.mxu1 %v10433_v18 }
 0x36a   :  { %2086 = vmatprep.subr.mxu0 %v10434_v7  ;;  %2157 = vmatprep.subr.mxu1 %v10435_v56 }
 0x3a8   :  { %v1670_v5 = vpop.f32.mrf.mxu0  ;;  %v1741_v48 = vpop.f32.mrf.mxu1 }
 0x3a9   :  { %v1671_v57 = vadd.f32 %v1670_v5, %v10436_v54  ;;  %v1742_v15 = vadd.f32 %v1741_v48, %v10437_v4  ;;  %v10440_v4 = vld [vmem:[#allocation165_spill] sm:$0xff] }
 0x3aa   :  { %v1672_v3 = vpop.f32.mrf.mxu0  ;;  %v1743_v49 = vpop.f32.mrf.mxu1 }
 0x3ab   :  { %v1673_v52 = vadd.f32 %v1672_v3, %v10438_v2  ;;  %v3896_v1 = vmul.f32 -1.442695, %v1671_v57  ;;  %v1744_v63 = vadd.f32 %v1743_v49, %v10439_v58  ;;  %v3898_v13 = vmul.f32 -1.442695, %v1742_v15  ;;  %v10441_v57 = vld [vmem:[#allocation166_spill] sm:$0xff]  ;;  %v10442_v15 = vld [vmem:[#allocation167_spill] sm:$0xff] }
 0x3ac   :  { %v705_v2 = vadd.f32 %v10440_v4, %v6220_v30  ;;  %v818_v3 = vadd.f32 %v10441_v57, %v6223_v35 }
 0x3ad   :  { %v3897_v6 = vmul.f32 -1.442695, %v1673_v52  ;;  %4094 = vpow2.f32 %v3896_v1  ;;  %v3899_v18 = vmul.f32 -1.442695, %v1744_v63  ;;  %v707_v1 = vadd.f32 %v10442_v15, %v6226_v26  ;;  %v10443_v52 = vld [vmem:[#allocation168_spill] sm:$0xff] }
 0x3ae   :  { %4096 = vpow2.f32 %v3898_v13  ;;  %v820_v58 = vadd.f32 %v10443_v52, %v6229_v33 }
 0x3af   :  { %4098 = vpow2.f32 %v3897_v6 }
 0x3b0   :  { %4100 = vpow2.f32 %v3899_v18 }
 0x3ba   :  { %v4095_v7 = vpop.eup %4094 }
 0x3bb   :  { %v4097_v56 = vpop.eup %4096  ;;  %v1894_v14 = vadd.f32 1.0, %v4095_v7 }
 0x3bc   :  { %v4099_v31 = vpop.eup %4098  ;;  %v1906_v54 = vadd.f32 1.0, %v4097_v56 }
 0x3bd   :  { %v4101_v5 = vpop.eup %4100  ;;  %v1895_v48 = vadd.f32 1.0, %v4099_v31  ;;  %4102 = vrcp.f32 %v1894_v14 }
 0x3be   :  { %v1907_v63 = vadd.f32 1.0, %v4101_v5  ;;  %4104 = vrcp.f32 %v1906_v54 }
 0x3bf   :  { %4106 = vrcp.f32 %v1895_v48 }
 0x3ca   :  { %v4103_v14 = vpop.eup %4102 }
 0x3cb   :  { %v4105_v5 = vpop.eup %4104 }
 0x3cc   :  { %v4107_v26 = vpop.eup %4106  ;;  %v1926_v54 = vmul.f32 %v4105_v5, %v6732_v60  ;;  %v7340_v5 = vld [vmem:[#allocation3 + $0x470] sm:$0xff] }
 0x3e9   :  { %v1812_v6 = vpop.f32.mrf.mxu0  ;;  %v1883_v49 = vpop.f32.mrf.mxu1 }
 0x3ea   :  { %v1813_v13 = vadd.f32 %v1812_v6, %v705_v2  ;;  %v1884_v18 = vadd.f32 %v1883_v49, %v818_v3 }
 0x3eb   :  { %v1814_v31 = vpop.f32.mrf.mxu0  ;;  %v1885_v7 = vpop.f32.mrf.mxu1 }
 0x3ec   :  { %v3900_v56 = vmul.f32 -1.442695, %v1813_v13  ;;  %4108 = vtanh.f32 %v1884_v18  ;;  %v1815_v4 = vadd.f32 %v1814_v31, %v707_v1  ;;  %v1886_v57 = vadd.f32 %v1885_v7, %v820_v58 }
 0x3ed   :  { %4110 = vrcp.f32 %v1907_v63 }
 0x3ee   :  { %4112 = vpow2.f32 %v3900_v56  ;;  %v3901_v15 = vmul.f32 -1.442695, %v1815_v4 }
 0x3ef   :  { %4114 = vtanh.f32 %v1886_v57  ;;  %v7331_v57 = vld [vmem:[#allocation3 + $0x468] sm:$0xff] }
 0x3f0   :  { %4116 = vpow2.f32 %v3901_v15  ;;  %v7334_v15 = vld [vmem:[#allocation3 + $0x478] sm:$0xff] }
 0x3f9   :  { %v4109_v35 = vpop.eup %4108 }
 0x3fa   :  { %v4111_v52 = vpop.eup %4110  ;;  %v1928_v2 = vmul.f32 %v4109_v35, %v4103_v14  ;;  %v7337_v14 = vld [vmem:[#allocation3 + $0x460] sm:$0xff] }
 0x3fb   :  { %v4113_v48 = vpop.eup %4112  ;;  %v1927_v63 = vmul.f32 %v4111_v52, %v6736_v10  ;;  %v7328_v10 = vld [vmem:[#allocation3 + $0x4b0] sm:$0xff]  ;;  %v7343_v52 = vld [vmem:[#allocation3 + $0x428] sm:$0xff] }
 0x3fc   :  { %v4115_v3 = vpop.eup %4114  ;;  %v1918_v6 = vadd.f32 1.0, %v4113_v48  ;;  %v7314_v49 = vadd.f32 %v1928_v2, %v1926_v54  ;;  %v7346_v54 = vld [vmem:[#allocation3 + $0x438] sm:$0xff]  ;;  %v7349_v2 = vld [vmem:[#allocation3 + $0x420] sm:$0xff]  ;;  %v7352_v48 = vld [vmem:[#allocation3 + $0x430] sm:$0xff] }
 0x3fd   :  { %v4117_v1 = vpop.eup %4116  ;;  %v1929_v58 = vmul.f32 %v4115_v3, %v4107_v26  ;;  %v7325_v26 = vld [vmem:[#allocation3 + $0x4a0] sm:$0xff]  ;;  %v7355_v3 = vld [vmem:[#allocation3 + $0x3e8] sm:$0xff] }
 0x3fe   :  { %4118 = vrcp.f32 %v1918_v6  ;;  %v1919_v13 = vadd.f32 1.0, %v4117_v1  ;;  %v7358_v6 = vld [vmem:[#allocation3 + $0x3f8] sm:$0xff]  ;;  %v7361_v1 = vld [vmem:[#allocation3 + $0x3e0] sm:$0xff] }
 0x3ff   :  { %4120 = vtanh.f32 %v7314_v49  ;;  %v7318_v18 = vadd.f32 %v1929_v58, %v1927_v63  ;;  %v7364_v63 = vld [vmem:[#allocation3 + $0x3f0] sm:$0xff]  ;;  %v7367_v58 = vld [vmem:[#allocation3 + $0x3a8] sm:$0xff] }
 0x400   :  { %4122 = vrcp.f32 %v1919_v13  ;;  %v7370_v13 = vld [vmem:[#allocation3 + $0x3b8] sm:$0xff] }
 0x401   :  { %4124 = vtanh.f32 %v7318_v18  ;;  %10444 = vst [vmem:[#allocation201_spill] sm:$0xff] %v7370_v13 }
 0x40b   :  { %v4119_v60 = vpop.eup %4118 }
 0x40c   :  { %v4121_v35 = vpop.eup %4120 }
 0x40d   :  { %v4123_v31 = vpop.eup %4122  ;;  %v7321_v4 = vmul.f32 %v4121_v35, %v4119_v60  ;;  %v7373_v60 = vld [vmem:[#allocation3 + $0x3a0] sm:$0xff]  ;;  %v7376_v35 = vld [vmem:[#allocation3 + $0x3b0] sm:$0xff] }
 0x40e   :  { %v4125_v7 = vpop.eup %4124  ;;  %10445 = vst [vmem:[#allocation202_spill] sm:$0xff] %v7373_v60  ;;  %10446 = vst [vmem:[#allocation203_spill] sm:$0xff] %v7376_v35 }
 0x40f   :  { %v1935_v56 = vmul.f32 %v4125_v7, %v4123_v31  ;;  %v7379_v31 = vld [vmem:[#allocation3 + $0x368] sm:$0xff]  ;;  %v7382_v7 = vld [vmem:[#allocation3 + $0x378] sm:$0xff] }
 0x410   :  { %10447 = vst [vmem:[#allocation204_spill] sm:$0xff] %v7379_v31  ;;  %10448 = vst [vmem:[#allocation205_spill] sm:$0xff] %v7382_v7 }
 0x411   :  { %2008 = vmatprep.mubr.f32.mxu0 %v1935_v56  ;;  %2079 = vmatprep.mubr.f32.mxu1 %v1935_v56 }
 0x412   :  { %2009 = vmatmul.mubr.f32.vlgmr.msra.gmra.mxu0 %v7321_v4  ;;  %2080 = vmatmul.mubr.f32.vlgmr.msra.gmra.mxu1 %v7321_v4 }
 0x413   :  { %2087 = vmatpush1.msra.mxu0 %v7325_v26  ;;  %2158 = vmatpush1.msra.mxu1 %v7328_v10 }
 0x414   :  { %2088 = vmatprep.subr.mxu0 %v7331_v57  ;;  %2150 = vmatprep.mubr.f32.mxu0 %v1935_v56 }
 0x415   :  { %2159 = vmatprep.subr.mxu1 %v7334_v15  ;;  %2221 = vmatprep.mubr.f32.mxu1 %v1935_v56  ;;  %v7385_v56 = vld [vmem:[#allocation3 + $0x360] sm:$0xff] }
 0x416   :  { %2089 = vmatpush1.msra.mxu0 %v7337_v14  ;;  %2160 = vmatpush1.msra.mxu1 %v7340_v5  ;;  %10449 = vst [vmem:[#allocation206_spill] sm:$0xff] %v7385_v56 }
 0x417   :  { %2090 = vmatprep.subr.mxu0 %v7343_v52  ;;  %2161 = vmatprep.subr.mxu1 %v7346_v54 }
 0x418   :  { %2091 = vmatpush1.msra.mxu0 %v7349_v2  ;;  %2162 = vmatpush1.msra.mxu1 %v7352_v48 }
 0x419   :  { %2092 = vmatprep.subr.mxu0 %v7355_v3  ;;  %2163 = vmatprep.subr.mxu1 %v7358_v6 }
 0x41a   :  { %2093 = vmatpush1.msra.mxu0 %v7361_v1  ;;  %2164 = vmatpush1.msra.mxu1 %v7364_v63 }
 0x41b   :  { %2094 = vmatprep.subr.mxu0 %v7367_v58  ;;  %2165 = vmatprep.subr.mxu1 %v7370_v13  ;;  %v7388_v13 = vld [vmem:[#allocation3 + $0x370] sm:$0xff] }
 0x41c   :  { %2095 = vmatpush1.msra.mxu0 %v7373_v60  ;;  %2166 = vmatpush1.msra.mxu1 %v7376_v35  ;;  %10450 = vst [vmem:[#allocation207_spill] sm:$0xff] %v7388_v13  ;;  %v7391_v60 = vld [vmem:[#allocation3 + $0x328] sm:$0xff]  ;;  %v7394_v35 = vld [vmem:[#allocation3 + $0x338] sm:$0xff] }
 0x41d   :  { %2096 = vmatprep.subr.mxu0 %v7379_v31  ;;  %2167 = vmatprep.subr.mxu1 %v7382_v7  ;;  %10451 = vst [vmem:[#allocation208_spill] sm:$0xff] %v7391_v60  ;;  %10452 = vst [vmem:[#allocation209_spill] sm:$0xff] %v7394_v35  ;;  %v7397_v31 = vld [vmem:[#allocation3 + $0x320] sm:$0xff]  ;;  %v7400_v7 = vld [vmem:[#allocation3 + $0x330] sm:$0xff] }
 0x41e   :  { %2097 = vmatpush1.msra.mxu0 %v7385_v56  ;;  %2168 = vmatpush1.msra.mxu1 %v7388_v13  ;;  %10453 = vst [vmem:[#allocation210_spill] sm:$0xff] %v7397_v31  ;;  %10454 = vst [vmem:[#allocation211_spill] sm:$0xff] %v7400_v7  ;;  %v7403_v56 = vld [vmem:[#allocation3 + $0x2e8] sm:$0xff]  ;;  %v7406_v13 = vld [vmem:[#allocation3 + $0x2f8] sm:$0xff] }
 0x41f   :  { %2098 = vmatprep.subr.mxu0 %v7391_v60  ;;  %2169 = vmatprep.subr.mxu1 %v7394_v35  ;;  %10455 = vst [vmem:[#allocation212_spill] sm:$0xff] %v7403_v56  ;;  %10456 = vst [vmem:[#allocation213_spill] sm:$0xff] %v7406_v13  ;;  %v7409_v60 = vld [vmem:[#allocation3 + $0x2e0] sm:$0xff]  ;;  %v7412_v35 = vld [vmem:[#allocation3 + $0x2f0] sm:$0xff] }
 0x420   :  { %2099 = vmatpush1.msra.mxu0 %v7397_v31  ;;  %2170 = vmatpush1.msra.mxu1 %v7400_v7  ;;  %10457 = vst [vmem:[#allocation214_spill] sm:$0xff] %v7409_v60  ;;  %10458 = vst [vmem:[#allocation215_spill] sm:$0xff] %v7412_v35  ;;  %v7415_v31 = vld [vmem:[#allocation3 + $0x2a8] sm:$0xff]  ;;  %v7418_v7 = vld [vmem:[#allocation3 + $0x2b8] sm:$0xff] }
 0x421   :  { %2100 = vmatprep.subr.mxu0 %v7403_v56  ;;  %2171 = vmatprep.subr.mxu1 %v7406_v13  ;;  %10459 = vst [vmem:[#allocation216_spill] sm:$0xff] %v7415_v31  ;;  %10460 = vst [vmem:[#allocation217_spill] sm:$0xff] %v7418_v7  ;;  %v7421_v56 = vld [vmem:[#allocation3 + $0x2a0] sm:$0xff]  ;;  %v7424_v13 = vld [vmem:[#allocation3 + $0x2b0] sm:$0xff] }
 0x422   :  { %2101 = vmatpush1.msra.mxu0 %v7409_v60  ;;  %2172 = vmatpush1.msra.mxu1 %v7412_v35  ;;  %10461 = vst [vmem:[#allocation218_spill] sm:$0xff] %v7421_v56  ;;  %10462 = vst [vmem:[#allocation219_spill] sm:$0xff] %v7424_v13  ;;  %v7427_v60 = vld [vmem:[#allocation3 + $0x268] sm:$0xff]  ;;  %v7430_v35 = vld [vmem:[#allocation3 + $0x278] sm:$0xff] }
 0x423   :  { %2102 = vmatprep.subr.mxu0 %v7415_v31  ;;  %2173 = vmatprep.subr.mxu1 %v7418_v7  ;;  %10463 = vst [vmem:[#allocation220_spill] sm:$0xff] %v7427_v60  ;;  %10464 = vst [vmem:[#allocation221_spill] sm:$0xff] %v7430_v35  ;;  %v7433_v31 = vld [vmem:[#allocation3 + $0x260] sm:$0xff]  ;;  %v7436_v7 = vld [vmem:[#allocation3 + $0x270] sm:$0xff] }
 0x424   :  { %2103 = vmatpush1.msra.mxu0 %v7421_v56  ;;  %2174 = vmatpush1.msra.mxu1 %v7424_v13  ;;  %10465 = vst [vmem:[#allocation222_spill] sm:$0xff] %v7433_v31  ;;  %10466 = vst [vmem:[#allocation223_spill] sm:$0xff] %v7436_v7  ;;  %v7439_v56 = vld [vmem:[#allocation3 + $0x228] sm:$0xff]  ;;  %v7442_v13 = vld [vmem:[#allocation3 + $0x238] sm:$0xff] }
 0x425   :  { %2104 = vmatprep.subr.mxu0 %v7427_v60  ;;  %2175 = vmatprep.subr.mxu1 %v7430_v35  ;;  %10467 = vst [vmem:[#allocation224_spill] sm:$0xff] %v7439_v56  ;;  %10468 = vst [vmem:[#allocation225_spill] sm:$0xff] %v7442_v13  ;;  %v7445_v60 = vld [vmem:[#allocation3 + $0x220] sm:$0xff]  ;;  %v7448_v35 = vld [vmem:[#allocation3 + $0x230] sm:$0xff] }
 0x426   :  { %2105 = vmatpush1.msra.mxu0 %v7433_v31  ;;  %2176 = vmatpush1.msra.mxu1 %v7436_v7  ;;  %10469 = vst [vmem:[#allocation226_spill] sm:$0xff] %v7445_v60  ;;  %10470 = vst [vmem:[#allocation227_spill] sm:$0xff] %v7448_v35  ;;  %v7451_v31 = vld [vmem:[#allocation3 + $0x1e8] sm:$0xff]  ;;  %v7454_v7 = vld [vmem:[#allocation3 + $0x1f8] sm:$0xff] }
 0x427   :  { %2106 = vmatprep.subr.mxu0 %v7439_v56  ;;  %2177 = vmatprep.subr.mxu1 %v7442_v13  ;;  %10471 = vst [vmem:[#allocation228_spill] sm:$0xff] %v7451_v31  ;;  %10472 = vst [vmem:[#allocation229_spill] sm:$0xff] %v7454_v7  ;;  %v7457_v56 = vld [vmem:[#allocation3 + $0x1e0] sm:$0xff]  ;;  %v7460_v13 = vld [vmem:[#allocation3 + $0x1f0] sm:$0xff] }
 0x428   :  { %2107 = vmatpush1.msra.mxu0 %v7445_v60  ;;  %2178 = vmatpush1.msra.mxu1 %v7448_v35  ;;  %10473 = vst [vmem:[#allocation230_spill] sm:$0xff] %v7457_v56  ;;  %10474 = vst [vmem:[#allocation231_spill] sm:$0xff] %v7460_v13  ;;  %v7463_v60 = vld [vmem:[#allocation3 + $0x1a8] sm:$0xff]  ;;  %v7466_v35 = vld [vmem:[#allocation3 + $0x1b8] sm:$0xff] }
 0x429   :  { %2108 = vmatprep.subr.mxu0 %v7451_v31  ;;  %2179 = vmatprep.subr.mxu1 %v7454_v7  ;;  %10475 = vst [vmem:[#allocation232_spill] sm:$0xff] %v7463_v60  ;;  %10476 = vst [vmem:[#allocation233_spill] sm:$0xff] %v7466_v35  ;;  %v7469_v31 = vld [vmem:[#allocation3 + $0x1a0] sm:$0xff]  ;;  %v7472_v7 = vld [vmem:[#allocation3 + $0x1b0] sm:$0xff] }
 0x42a   :  { %2109 = vmatpush1.msra.mxu0 %v7457_v56  ;;  %2180 = vmatpush1.msra.mxu1 %v7460_v13  ;;  %10477 = vst [vmem:[#allocation234_spill] sm:$0xff] %v7469_v31  ;;  %10478 = vst [vmem:[#allocation9_spill] sm:$0xff] %v7472_v7  ;;  %v7475_v56 = vld [vmem:[#allocation3 + $0x168] sm:$0xff]  ;;  %v7478_v13 = vld [vmem:[#allocation3 + $0x178] sm:$0xff] }
 0x42b   :  { %2110 = vmatprep.subr.mxu0 %v7463_v60  ;;  %2181 = vmatprep.subr.mxu1 %v7466_v35  ;;  %10479 = vst [vmem:[#allocation10_spill] sm:$0xff] %v7475_v56  ;;  %10480 = vst [vmem:[#allocation11_spill] sm:$0xff] %v7478_v13  ;;  %v7481_v60 = vld [vmem:[#allocation3 + $0x160] sm:$0xff]  ;;  %v7484_v35 = vld [vmem:[#allocation3 + $0x170] sm:$0xff] }
 0x42c   :  { %2111 = vmatpush1.msra.mxu0 %v7469_v31  ;;  %2182 = vmatpush1.msra.mxu1 %v7472_v7  ;;  %10481 = vst [vmem:[#allocation12_spill] sm:$0xff] %v7481_v60  ;;  %10482 = vst [vmem:[#allocation13_spill] sm:$0xff] %v7484_v35  ;;  %v7487_v31 = vld [vmem:[#allocation3 + $0x128] sm:$0xff]  ;;  %v7490_v7 = vld [vmem:[#allocation3 + $0x138] sm:$0xff] }
 0x42d   :  { %2112 = vmatprep.subr.mxu0 %v7475_v56  ;;  %2183 = vmatprep.subr.mxu1 %v7478_v13  ;;  %10483 = vst [vmem:[#allocation14_spill] sm:$0xff] %v7487_v31  ;;  %10484 = vst [vmem:[#allocation15_spill] sm:$0xff] %v7490_v7  ;;  %v7493_v56 = vld [vmem:[#allocation3 + $0x120] sm:$0xff]  ;;  %v7496_v13 = vld [vmem:[#allocation3 + $0x130] sm:$0xff] }
 0x42e   :  { %2113 = vmatpush1.msra.mxu0 %v7481_v60  ;;  %2184 = vmatpush1.msra.mxu1 %v7484_v35  ;;  %10485 = vst [vmem:[#allocation16_spill] sm:$0xff] %v7493_v56  ;;  %10486 = vst [vmem:[#allocation17_spill] sm:$0xff] %v7496_v13  ;;  %v7499_v60 = vld [vmem:[#allocation3 + $0xe8] sm:$0xff]  ;;  %v7502_v35 = vld [vmem:[#allocation3 + $0xf8] sm:$0xff] }
 0x42f   :  { %2114 = vmatprep.subr.mxu0 %v7487_v31  ;;  %2185 = vmatprep.subr.mxu1 %v7490_v7  ;;  %10487 = vst [vmem:[#allocation18_spill] sm:$0xff] %v7499_v60  ;;  %10488 = vst [vmem:[#allocation19_spill] sm:$0xff] %v7502_v35  ;;  %v7505_v31 = vld [vmem:[#allocation3 + $0xe0] sm:$0xff]  ;;  %v7508_v7 = vld [vmem:[#allocation3 + $0xf0] sm:$0xff] }
 0x430   :  { %2115 = vmatpush1.msra.mxu0 %v7493_v56  ;;  %2186 = vmatpush1.msra.mxu1 %v7496_v13  ;;  %10489 = vst [vmem:[#allocation20_spill] sm:$0xff] %v7505_v31  ;;  %10490 = vst [vmem:[#allocation21_spill] sm:$0xff] %v7508_v7  ;;  %v7511_v56 = vld [vmem:[#allocation3 + $0x8a8] sm:$0xff]  ;;  %v7514_v13 = vld [vmem:[#allocation3 + $0x8b8] sm:$0xff] }
 0x431   :  { %2116 = vmatprep.subr.mxu0 %v7499_v60  ;;  %2187 = vmatprep.subr.mxu1 %v7502_v35  ;;  %10491 = vst [vmem:[#allocation22_spill] sm:$0xff] %v7511_v56  ;;  %10492 = vst [vmem:[#allocation23_spill] sm:$0xff] %v7514_v13  ;;  %v7517_v60 = vld [vmem:[#allocation3 + $0x8a0] sm:$0xff]  ;;  %v7520_v35 = vld [vmem:[#allocation3 + $0x8b0] sm:$0xff] }
 0x432   :  { %2117 = vmatpush1.msra.mxu0 %v7505_v31  ;;  %2188 = vmatpush1.msra.mxu1 %v7508_v7  ;;  %10493 = vst [vmem:[#allocation24_spill] sm:$0xff] %v7517_v60  ;;  %10494 = vst [vmem:[#allocation25_spill] sm:$0xff] %v7520_v35  ;;  %v7523_v31 = vld [vmem:[#allocation3 + $0x868] sm:$0xff]  ;;  %v7526_v7 = vld [vmem:[#allocation3 + $0x878] sm:$0xff] }
 0x433   :  { %2118 = vmatprep.subr.mxu0 %v7511_v56  ;;  %2189 = vmatprep.subr.mxu1 %v7514_v13  ;;  %10495 = vst [vmem:[#allocation26_spill] sm:$0xff] %v7523_v31  ;;  %10496 = vst [vmem:[#allocation27_spill] sm:$0xff] %v7526_v7  ;;  %v7529_v56 = vld [vmem:[#allocation3 + $0x860] sm:$0xff]  ;;  %v7532_v13 = vld [vmem:[#allocation3 + $0x870] sm:$0xff] }
 0x434   :  { %2119 = vmatpush2.msra.mxu0 %v7517_v60  ;;  %2190 = vmatpush2.msra.mxu1 %v7520_v35  ;;  %v7535_v60 = vld [vmem:[#allocation3 + $0x828] sm:$0xff]  ;;  %v7538_v35 = vld [vmem:[#allocation3 + $0x838] sm:$0xff] }
 0x435   :  { %2120 = vmatprep.subr.mxu0 %v7523_v31  ;;  %2191 = vmatprep.subr.mxu1 %v7526_v7  ;;  %v7541_v31 = vld [vmem:[#allocation3 + $0x820] sm:$0xff]  ;;  %v7544_v7 = vld [vmem:[#allocation3 + $0x830] sm:$0xff] }
 0x436   :  { %2121 = vmatpush2.msra.mxu0 %v7529_v56  ;;  %2192 = vmatpush2.msra.mxu1 %v7532_v13 }
 0x437   :  { %2122 = vmatprep.subr.mxu0 %v7535_v60  ;;  %2193 = vmatprep.subr.mxu1 %v7538_v35 }
 0x438   :  { %2123 = vmatpush2.msra.mxu0 %v7541_v31  ;;  %2194 = vmatpush2.msra.mxu1 %v7544_v7 }
 0x439   :  { %2124 = vmatprep.subr.mxu0 %v6817_v53  ;;  %2195 = vmatprep.subr.mxu1 %v6820_v59  ;;  %v10497_v53 = vld [vmem:[#allocation38_spill] sm:$0xff]  ;;  %v10498_v59 = vld [vmem:[#allocation39_spill] sm:$0xff] }
 0x43a   :  { %2125 = vmatpush2.msra.mxu0 %v6823_v51  ;;  %2196 = vmatpush2.msra.mxu1 %v6826_v20  ;;  %v10499_v51 = vld [vmem:[#allocation40_spill] sm:$0xff]  ;;  %v10500_v20 = vld [vmem:[#allocation41_spill] sm:$0xff] }
 0x43b   :  { %2126 = vmatprep.subr.mxu0 %v6829_v17  ;;  %2197 = vmatprep.subr.mxu1 %v6832_v16  ;;  %v10501_v17 = vld [vmem:[#allocation42_spill] sm:$0xff]  ;;  %v10502_v16 = vld [vmem:[#allocation43_spill] sm:$0xff] }
 0x43c   :  { %2127 = vmatpush2.msra.mxu0 %v6835_v19  ;;  %2198 = vmatpush2.msra.mxu1 %v6838_v21  ;;  %v10503_v19 = vld [vmem:[#allocation44_spill] sm:$0xff]  ;;  %v10504_v21 = vld [vmem:[#allocation45_spill] sm:$0xff] }
 0x43d   :  { %2128 = vmatprep.subr.mxu0 %v6841_v22  ;;  %2199 = vmatprep.subr.mxu1 %v6844_v23  ;;  %v10505_v22 = vld [vmem:[#allocation46_spill] sm:$0xff]  ;;  %v10506_v23 = vld [vmem:[#allocation47_spill] sm:$0xff] }
 0x43e   :  { %2129 = vmatpush2.msra.mxu0 %v6847_v61  ;;  %2200 = vmatpush2.msra.mxu1 %v6850_v42  ;;  %v10507_v61 = vld [vmem:[#allocation48_spill] sm:$0xff]  ;;  %v10508_v42 = vld [vmem:[#allocation49_spill] sm:$0xff] }
 0x43f   :  { %2130 = vmatprep.subr.mxu0 %v6853_v8  ;;  %2201 = vmatprep.subr.mxu1 %v6856_v28  ;;  %v10509_v8 = vld [vmem:[#allocation50_spill] sm:$0xff]  ;;  %v10510_v28 = vld [vmem:[#allocation51_spill] sm:$0xff] }
 0x440   :  { %2131 = vmatpush2.msra.mxu0 %v6859_v11  ;;  %2202 = vmatpush2.msra.mxu1 %v6862_v44  ;;  %v10511_v11 = vld [vmem:[#allocation52_spill] sm:$0xff]  ;;  %v10512_v44 = vld [vmem:[#allocation53_spill] sm:$0xff] }
 0x441   :  { %2132 = vmatprep.subr.mxu0 %v6865_v50  ;;  %2203 = vmatprep.subr.mxu1 %v6868_v55  ;;  %v10513_v50 = vld [vmem:[#allocation54_spill] sm:$0xff]  ;;  %v10514_v55 = vld [vmem:[#allocation55_spill] sm:$0xff] }
 0x442   :  { %2133 = vmatpush2.msra.mxu0 %v6871_v9  ;;  %2204 = vmatpush2.msra.mxu1 %v6874_v25  ;;  %v10515_v9 = vld [vmem:[#allocation56_spill] sm:$0xff]  ;;  %v10516_v25 = vld [vmem:[#allocation57_spill] sm:$0xff] }
 0x443   :  { %2134 = vmatprep.subr.mxu0 %v6877_v24  ;;  %2205 = vmatprep.subr.mxu1 %v6880_v32  ;;  %v10517_v24 = vld [vmem:[#allocation58_spill] sm:$0xff]  ;;  %v10518_v32 = vld [vmem:[#allocation59_spill] sm:$0xff] }
 0x444   :  { %2135 = vmatpush2.msra.mxu0 %v6883_v12  ;;  %2206 = vmatpush2.msra.mxu1 %v6886_v0  ;;  %v10519_v12 = vld [vmem:[#allocation60_spill] sm:$0xff]  ;;  %v10520_v0 = vld [vmem:[#allocation61_spill] sm:$0xff] }
 0x445   :  { %2136 = vmatprep.subr.mxu0 %v6889_v27  ;;  %2207 = vmatprep.subr.mxu1 %v6892_v29  ;;  %v10521_v27 = vld [vmem:[#allocation62_spill] sm:$0xff]  ;;  %v10522_v29 = vld [vmem:[#allocation63_spill] sm:$0xff] }
 0x446   :  { %2137 = vmatpush2.msra.mxu0 %v6895_v36  ;;  %2208 = vmatpush2.msra.mxu1 %v6898_v37  ;;  %v10523_v36 = vld [vmem:[#allocation64_spill] sm:$0xff]  ;;  %v10524_v37 = vld [vmem:[#allocation65_spill] sm:$0xff] }
 0x447   :  { %2138 = vmatprep.subr.mxu0 %v6901_v38  ;;  %2209 = vmatprep.subr.mxu1 %v6904_v39  ;;  %v10525_v38 = vld [vmem:[#allocation66_spill] sm:$0xff]  ;;  %v10526_v39 = vld [vmem:[#allocation67_spill] sm:$0xff] }
 0x448   :  { %2139 = vmatpush2.msra.mxu0 %v6907_v41  ;;  %2210 = vmatpush2.msra.mxu1 %v6910_v40  ;;  %v10527_v41 = vld [vmem:[#allocation68_spill] sm:$0xff]  ;;  %v10528_v40 = vld [vmem:[#allocation69_spill] sm:$0xff] }
 0x449   :  { %2140 = vmatprep.subr.mxu0 %v6913_v34  ;;  %2211 = vmatprep.subr.mxu1 %v6916_v47  ;;  %v10529_v34 = vld [vmem:[#allocation70_spill] sm:$0xff]  ;;  %v10530_v47 = vld [vmem:[#allocation71_spill] sm:$0xff] }
 0x44a   :  { %2141 = vmatpush2.msra.mxu0 %v6919_v43  ;;  %2212 = vmatpush2.msra.mxu1 %v6922_v46  ;;  %v10531_v43 = vld [vmem:[#allocation72_spill] sm:$0xff]  ;;  %v10532_v46 = vld [vmem:[#allocation73_spill] sm:$0xff] }
 0x44b   :  { %2142 = vmatprep.subr.mxu0 %v6925_v45  ;;  %2213 = vmatprep.subr.mxu1 %v6928_v62  ;;  %v10533_v45 = vld [vmem:[#allocation74_spill] sm:$0xff]  ;;  %v10534_v62 = vld [vmem:[#allocation75_spill] sm:$0xff] }
 0x44c   :  { %2143 = vmatpush2.msra.mxu0 %v10497_v53  ;;  %2214 = vmatpush2.msra.mxu1 %v10498_v59  ;;  %v10536_v53 = vld [vmem:[#allocation77_spill] sm:$0xff]  ;;  %v10537_v59 = vld [vmem:[#allocation78_spill] sm:$0xff] }
 0x44d   :  { %2144 = vmatprep.subr.mxu0 %v10499_v51  ;;  %2215 = vmatprep.subr.mxu1 %v10500_v20  ;;  %v10538_v51 = vld [vmem:[#allocation79_spill] sm:$0xff]  ;;  %v10539_v20 = vld [vmem:[#allocation80_spill] sm:$0xff] }
 0x44e   :  { %2145 = vmatpush2.msra.mxu0 %v10501_v17  ;;  %2216 = vmatpush2.msra.mxu1 %v10502_v16  ;;  %v10540_v17 = vld [vmem:[#allocation81_spill] sm:$0xff]  ;;  %v10541_v16 = vld [vmem:[#allocation82_spill] sm:$0xff] }
 0x44f   :  { %2146 = vmatprep.subr.mxu0 %v10503_v19  ;;  %2217 = vmatprep.subr.mxu1 %v10504_v21  ;;  %v10542_v19 = vld [vmem:[#allocation83_spill] sm:$0xff]  ;;  %v10543_v21 = vld [vmem:[#allocation84_spill] sm:$0xff] }
 0x450   :  { %2147 = vmatpush2.msra.mxu0 %v10505_v22  ;;  %2218 = vmatpush2.msra.mxu1 %v10506_v23  ;;  %v10544_v22 = vld [vmem:[#allocation85_spill] sm:$0xff]  ;;  %v10545_v23 = vld [vmem:[#allocation86_spill] sm:$0xff] }
 0x451   :  { %2148 = vmatprep.subr.mxu0 %v10507_v61  ;;  %2219 = vmatprep.subr.mxu1 %v10508_v42  ;;  %v10546_v61 = vld [vmem:[#allocation89_spill] sm:$0xff]  ;;  %v10547_v42 = vld [vmem:[#allocation90_spill] sm:$0xff] }
 0x452   :  { %2149 = vmatpush2.msra.mxu0 %v10509_v8  ;;  %2220 = vmatpush2.msra.mxu1 %v10510_v28  ;;  %v10548_v8 = vld [vmem:[#allocation91_spill] sm:$0xff]  ;;  %v10549_v28 = vld [vmem:[#allocation92_spill] sm:$0xff] }
 0x453   :  { %2151 = vmatmul.mubr.f32.vlgmr.msra.gmra.mxu0 %v7321_v4  ;;  %2222 = vmatmul.mubr.f32.vlgmr.msra.gmra.mxu1 %v7321_v4  ;;  %v10535_v4 = vld [vmem:[#allocation76_spill] sm:$0xff] }
 0x454   :  { %2284 = vmatprep.subr.mxu0 %v10511_v11  ;;  %2355 = vmatprep.subr.mxu1 %v10512_v44  ;;  %v10550_v11 = vld [vmem:[#allocation95_spill] sm:$0xff]  ;;  %v10551_v44 = vld [vmem:[#allocation96_spill] sm:$0xff] }
 0x455   :  { %2285 = vmatpush1.msra.mxu0 %v10513_v50  ;;  %2356 = vmatpush1.msra.mxu1 %v10514_v55  ;;  %v10552_v50 = vld [vmem:[#allocation97_spill] sm:$0xff]  ;;  %v10553_v55 = vld [vmem:[#allocation98_spill] sm:$0xff] }
 0x456   :  { %2286 = vmatprep.subr.mxu0 %v10515_v9  ;;  %2357 = vmatprep.subr.mxu1 %v10516_v25  ;;  %v10554_v9 = vld [vmem:[#allocation101_spill] sm:$0xff]  ;;  %v10555_v25 = vld [vmem:[#allocation102_spill] sm:$0xff] }
 0x457   :  { %2287 = vmatpush1.msra.mxu0 %v10517_v24  ;;  %2358 = vmatpush1.msra.mxu1 %v10518_v32  ;;  %v10556_v24 = vld [vmem:[#allocation103_spill] sm:$0xff]  ;;  %v10557_v32 = vld [vmem:[#allocation104_spill] sm:$0xff] }
 0x458   :  { %2288 = vmatprep.subr.mxu0 %v10519_v12  ;;  %2359 = vmatprep.subr.mxu1 %v10520_v0  ;;  %v10558_v12 = vld [vmem:[#allocation107_spill] sm:$0xff]  ;;  %v10559_v0 = vld [vmem:[#allocation108_spill] sm:$0xff] }
 0x459   :  { %2289 = vmatpush1.msra.mxu0 %v10521_v27  ;;  %2360 = vmatpush1.msra.mxu1 %v10522_v29  ;;  %v10560_v27 = vld [vmem:[#allocation109_spill] sm:$0xff]  ;;  %v10561_v29 = vld [vmem:[#allocation110_spill] sm:$0xff] }
 0x45a   :  { %2290 = vmatprep.subr.mxu0 %v10523_v36  ;;  %2361 = vmatprep.subr.mxu1 %v10524_v37  ;;  %v10562_v36 = vld [vmem:[#allocation113_spill] sm:$0xff]  ;;  %v10563_v37 = vld [vmem:[#allocation114_spill] sm:$0xff] }
 0x45b   :  { %2291 = vmatpush1.msra.mxu0 %v10525_v38  ;;  %2362 = vmatpush1.msra.mxu1 %v10526_v39  ;;  %v10564_v38 = vld [vmem:[#allocation115_spill] sm:$0xff]  ;;  %v10565_v39 = vld [vmem:[#allocation116_spill] sm:$0xff] }
 0x45c   :  { %2292 = vmatprep.subr.mxu0 %v10527_v41  ;;  %2363 = vmatprep.subr.mxu1 %v10528_v40  ;;  %v10566_v41 = vld [vmem:[#allocation119_spill] sm:$0xff]  ;;  %v10567_v40 = vld [vmem:[#allocation120_spill] sm:$0xff] }
 0x45d   :  { %2293 = vmatpush1.msra.mxu0 %v10529_v34  ;;  %2364 = vmatpush1.msra.mxu1 %v10530_v47  ;;  %v10568_v34 = vld [vmem:[#allocation121_spill] sm:$0xff]  ;;  %v10569_v47 = vld [vmem:[#allocation122_spill] sm:$0xff] }
 0x45e   :  { %2294 = vmatprep.subr.mxu0 %v10531_v43  ;;  %2365 = vmatprep.subr.mxu1 %v10532_v46  ;;  %v10570_v43 = vld [vmem:[#allocation125_spill] sm:$0xff]  ;;  %v10571_v46 = vld [vmem:[#allocation126_spill] sm:$0xff] }
 0x45f   :  { %2295 = vmatpush1.msra.mxu0 %v10533_v45  ;;  %2366 = vmatpush1.msra.mxu1 %v10534_v62  ;;  %v10572_v45 = vld [vmem:[#allocation127_spill] sm:$0xff]  ;;  %v10573_v62 = vld [vmem:[#allocation128_spill] sm:$0xff] }
 0x460   :  { %2296 = vmatprep.subr.mxu0 %v10535_v4  ;;  %2367 = vmatprep.subr.mxu1 %v10536_v53  ;;  %v10574_v4 = vld [vmem:[#allocation131_spill] sm:$0xff]  ;;  %v10575_v53 = vld [vmem:[#allocation132_spill] sm:$0xff] }
 0x461   :  { %2297 = vmatpush1.msra.mxu0 %v10537_v59  ;;  %2368 = vmatpush1.msra.mxu1 %v10538_v51  ;;  %v10576_v59 = vld [vmem:[#allocation133_spill] sm:$0xff]  ;;  %v10577_v51 = vld [vmem:[#allocation134_spill] sm:$0xff] }
 0x462   :  { %2298 = vmatprep.subr.mxu0 %v10539_v20  ;;  %2369 = vmatprep.subr.mxu1 %v10540_v17  ;;  %v10578_v20 = vld [vmem:[#allocation137_spill] sm:$0xff]  ;;  %v10579_v17 = vld [vmem:[#allocation138_spill] sm:$0xff] }
 0x463   :  { %2299 = vmatpush1.msra.mxu0 %v10541_v16  ;;  %2370 = vmatpush1.msra.mxu1 %v10542_v19  ;;  %v10580_v16 = vld [vmem:[#allocation139_spill] sm:$0xff]  ;;  %v10581_v19 = vld [vmem:[#allocation140_spill] sm:$0xff] }
 0x464   :  { %2300 = vmatprep.subr.mxu0 %v10543_v21  ;;  %2371 = vmatprep.subr.mxu1 %v10544_v22  ;;  %v10582_v21 = vld [vmem:[#allocation143_spill] sm:$0xff]  ;;  %v10583_v22 = vld [vmem:[#allocation144_spill] sm:$0xff] }
 0x465   :  { %2301 = vmatpush1.msra.mxu0 %v10545_v23  ;;  %2372 = vmatpush1.msra.mxu1 %v10546_v61  ;;  %v10584_v23 = vld [vmem:[#allocation145_spill] sm:$0xff]  ;;  %v10585_v61 = vld [vmem:[#allocation146_spill] sm:$0xff] }
 0x466   :  { %2302 = vmatprep.subr.mxu0 %v10547_v42  ;;  %2373 = vmatprep.subr.mxu1 %v10548_v8  ;;  %v10586_v42 = vld [vmem:[#allocation149_spill] sm:$0xff]  ;;  %v10587_v8 = vld [vmem:[#allocation150_spill] sm:$0xff] }
 0x467   :  { %2303 = vmatpush1.msra.mxu0 %v10549_v28  ;;  %2374 = vmatpush1.msra.mxu1 %v10550_v11  ;;  %v10588_v28 = vld [vmem:[#allocation151_spill] sm:$0xff]  ;;  %v10589_v11 = vld [vmem:[#allocation152_spill] sm:$0xff] }
 0x468   :  { %2304 = vmatprep.subr.mxu0 %v10551_v44  ;;  %2375 = vmatprep.subr.mxu1 %v10552_v50  ;;  %v10590_v44 = vld [vmem:[#allocation155_spill] sm:$0xff]  ;;  %v10591_v50 = vld [vmem:[#allocation156_spill] sm:$0xff] }
 0x469   :  { %2305 = vmatpush1.msra.mxu0 %v10553_v55  ;;  %2376 = vmatpush1.msra.mxu1 %v10554_v9  ;;  %v10592_v55 = vld [vmem:[#allocation157_spill] sm:$0xff]  ;;  %v10593_v9 = vld [vmem:[#allocation158_spill] sm:$0xff] }
 0x46a   :  { %2306 = vmatprep.subr.mxu0 %v10555_v25  ;;  %2377 = vmatprep.subr.mxu1 %v10556_v24  ;;  %v10594_v25 = vld [vmem:[#allocation161_spill] sm:$0xff]  ;;  %v10595_v24 = vld [vmem:[#allocation162_spill] sm:$0xff] }
 0x46b   :  { %2307 = vmatpush1.msra.mxu0 %v10557_v32  ;;  %2378 = vmatpush1.msra.mxu1 %v10558_v12  ;;  %v10596_v32 = vld [vmem:[#allocation87_spill] sm:$0xff]  ;;  %v10597_v12 = vld [vmem:[#allocation88_spill] sm:$0xff] }
 0x46c   :  { %2308 = vmatprep.subr.mxu0 %v10559_v0  ;;  %2379 = vmatprep.subr.mxu1 %v10560_v27  ;;  %v10598_v0 = vld [vmem:[#allocation93_spill] sm:$0xff]  ;;  %v10599_v27 = vld [vmem:[#allocation94_spill] sm:$0xff] }
 0x46d   :  { %2309 = vmatpush1.msra.mxu0 %v10561_v29  ;;  %2380 = vmatpush1.msra.mxu1 %v10562_v36  ;;  %v10600_v29 = vld [vmem:[#allocation192_spill] sm:$0xff]  ;;  %v10601_v36 = vld [vmem:[#allocation193_spill] sm:$0xff] }
 0x46e   :  { %2310 = vmatprep.subr.mxu0 %v10563_v37  ;;  %2381 = vmatprep.subr.mxu1 %v10564_v38  ;;  %v10602_v37 = vld [vmem:[#allocation194_spill] sm:$0xff]  ;;  %v10603_v38 = vld [vmem:[#allocation195_spill] sm:$0xff] }
 0x46f   :  { %2311 = vmatpush1.msra.mxu0 %v10565_v39  ;;  %2382 = vmatpush1.msra.mxu1 %v10566_v41  ;;  %v10604_v39 = vld [vmem:[#allocation196_spill] sm:$0xff]  ;;  %v10605_v41 = vld [vmem:[#allocation197_spill] sm:$0xff] }
 0x470   :  { %2312 = vmatprep.subr.mxu0 %v10567_v40  ;;  %2383 = vmatprep.subr.mxu1 %v10568_v34  ;;  %v10606_v40 = vld [vmem:[#allocation198_spill] sm:$0xff]  ;;  %v10607_v34 = vld [vmem:[#allocation199_spill] sm:$0xff] }
 0x471   :  { %2313 = vmatpush1.msra.mxu0 %v10569_v47  ;;  %2384 = vmatpush1.msra.mxu1 %v10570_v43  ;;  %v10608_v47 = vld [vmem:[#allocation200_spill] sm:$0xff]  ;;  %v7699_v43 = vld [vmem:[#allocation3 + $0x680] sm:$0xff] }
 0x472   :  { %2314 = vmatprep.subr.mxu0 %v10571_v46  ;;  %2385 = vmatprep.subr.mxu1 %v10572_v45  ;;  %v7702_v46 = vld [vmem:[#allocation3 + $0x690] sm:$0xff]  ;;  %v7705_v45 = vld [vmem:[#allocation3 + $0x648] sm:$0xff] }
 0x473   :  { %2315 = vmatpush1.msra.mxu0 %v10573_v62  ;;  %2386 = vmatpush1.msra.mxu1 %v10574_v4  ;;  %v7708_v62 = vld [vmem:[#allocation3 + $0x658] sm:$0xff]  ;;  %v7711_v4 = vld [vmem:[#allocation3 + $0x640] sm:$0xff] }
 0x474   :  { %2316 = vmatprep.subr.mxu0 %v10575_v53  ;;  %2387 = vmatprep.subr.mxu1 %v10576_v59  ;;  %v7714_v53 = vld [vmem:[#allocation3 + $0x650] sm:$0xff]  ;;  %v7717_v59 = vld [vmem:[#allocation3 + $0x608] sm:$0xff] }
 0x475   :  { %2317 = vmatpush2.msra.mxu0 %v10577_v51  ;;  %2388 = vmatpush2.msra.mxu1 %v10578_v20  ;;  %v7720_v51 = vld [vmem:[#allocation3 + $0x618] sm:$0xff]  ;;  %v7723_v20 = vld [vmem:[#allocation3 + $0x600] sm:$0xff] }
 0x476   :  { %2318 = vmatprep.subr.mxu0 %v10579_v17  ;;  %2389 = vmatprep.subr.mxu1 %v10580_v16  ;;  %v7726_v17 = vld [vmem:[#allocation3 + $0x610] sm:$0xff]  ;;  %v7729_v16 = vld [vmem:[#allocation3 + $0x5c8] sm:$0xff] }
 0x477   :  { %2319 = vmatpush2.msra.mxu0 %v10581_v19  ;;  %2390 = vmatpush2.msra.mxu1 %v10582_v21  ;;  %v7732_v19 = vld [vmem:[#allocation3 + $0x5d8] sm:$0xff]  ;;  %v7735_v21 = vld [vmem:[#allocation3 + $0x5c0] sm:$0xff] }
 0x478   :  { %2320 = vmatprep.subr.mxu0 %v10583_v22  ;;  %2391 = vmatprep.subr.mxu1 %v10584_v23  ;;  %v7738_v22 = vld [vmem:[#allocation3 + $0x5d0] sm:$0xff]  ;;  %v7741_v23 = vld [vmem:[#allocation3 + $0x588] sm:$0xff] }
 0x479   :  { %2321 = vmatpush2.msra.mxu0 %v10585_v61  ;;  %2392 = vmatpush2.msra.mxu1 %v10586_v42  ;;  %v7744_v61 = vld [vmem:[#allocation3 + $0x598] sm:$0xff]  ;;  %v7747_v42 = vld [vmem:[#allocation3 + $0x580] sm:$0xff] }
 0x47a   :  { %2322 = vmatprep.subr.mxu0 %v10587_v8  ;;  %2393 = vmatprep.subr.mxu1 %v10588_v28  ;;  %v7750_v8 = vld [vmem:[#allocation3 + $0x590] sm:$0xff]  ;;  %v7753_v28 = vld [vmem:[#allocation3 + $0x548] sm:$0xff] }
 0x47b   :  { %2323 = vmatpush2.msra.mxu0 %v10589_v11  ;;  %2394 = vmatpush2.msra.mxu1 %v10590_v44  ;;  %10609 = vst [vmem:[#allocation28_spill] sm:$0xff] %v7753_v28  ;;  %v7756_v11 = vld [vmem:[#allocation3 + $0x558] sm:$0xff]  ;;  %v7759_v44 = vld [vmem:[#allocation3 + $0x540] sm:$0xff] }
 0x47c   :  { %2324 = vmatprep.subr.mxu0 %v10591_v50  ;;  %2395 = vmatprep.subr.mxu1 %v10592_v55  ;;  %10610 = vst [vmem:[#allocation29_spill] sm:$0xff] %v7756_v11  ;;  %10611 = vst [vmem:[#allocation30_spill] sm:$0xff] %v7759_v44  ;;  %v7762_v50 = vld [vmem:[#allocation3 + $0x550] sm:$0xff]  ;;  %v7765_v55 = vld [vmem:[#allocation3 + $0x508] sm:$0xff] }
 0x47d   :  { %2325 = vmatpush2.msra.mxu0 %v10593_v9  ;;  %2396 = vmatpush2.msra.mxu1 %v10594_v25  ;;  %10612 = vst [vmem:[#allocation31_spill] sm:$0xff] %v7762_v50  ;;  %10613 = vst [vmem:[#allocation32_spill] sm:$0xff] %v7765_v55  ;;  %v7768_v9 = vld [vmem:[#allocation3 + $0x518] sm:$0xff]  ;;  %v7771_v25 = vld [vmem:[#allocation3 + $0x500] sm:$0xff] }
 0x47e   :  { %2326 = vmatprep.subr.mxu0 %v10595_v24  ;;  %2397 = vmatprep.subr.mxu1 %v10596_v32  ;;  %10614 = vst [vmem:[#allocation33_spill] sm:$0xff] %v7768_v9  ;;  %10615 = vst [vmem:[#allocation34_spill] sm:$0xff] %v7771_v25  ;;  %v7774_v24 = vld [vmem:[#allocation3 + $0x510] sm:$0xff]  ;;  %v7777_v32 = vld [vmem:[#allocation3 + $0x4c8] sm:$0xff] }
 0x47f   :  { %2327 = vmatpush2.msra.mxu0 %v10597_v12  ;;  %2398 = vmatpush2.msra.mxu1 %v10598_v0  ;;  %10616 = vst [vmem:[#allocation35_spill] sm:$0xff] %v7774_v24  ;;  %10617 = vst [vmem:[#allocation36_spill] sm:$0xff] %v7777_v32  ;;  %v7780_v12 = vld [vmem:[#allocation3 + $0x4d8] sm:$0xff]  ;;  %v7783_v0 = vld [vmem:[#allocation3 + $0x4c0] sm:$0xff] }
 0x480   :  { %2328 = vmatprep.subr.mxu0 %v10599_v27  ;;  %2399 = vmatprep.subr.mxu1 %v10600_v29  ;;  %10618 = vst [vmem:[#allocation37_spill] sm:$0xff] %v7780_v12  ;;  %10619 = vst [vmem:[#allocation99_spill] sm:$0xff] %v7783_v0  ;;  %v7786_v27 = vld [vmem:[#allocation3 + $0x4d0] sm:$0xff]  ;;  %v7789_v29 = vld [vmem:[#allocation3 + $0x4a8] sm:$0xff] }
 0x481   :  { %2329 = vmatpush2.msra.mxu0 %v10601_v36  ;;  %2400 = vmatpush2.msra.mxu1 %v10602_v37  ;;  %10620 = vst [vmem:[#allocation100_spill] sm:$0xff] %v7786_v27  ;;  %10621 = vst [vmem:[#allocation105_spill] sm:$0xff] %v7789_v29  ;;  %v7792_v36 = vld [vmem:[#allocation3 + $0x4b8] sm:$0xff] }
 0x482   :  { %2330 = vmatprep.subr.mxu0 %v10603_v38  ;;  %2401 = vmatprep.subr.mxu1 %v10604_v39  ;;  %10622 = vst [vmem:[#allocation106_spill] sm:$0xff] %v7792_v36 }
 0x483   :  { %2331 = vmatpush2.msra.mxu0 %v10605_v41  ;;  %2402 = vmatpush2.msra.mxu1 %v10606_v40  ;;  %v10623_v41 = vld [vmem:[#allocation111_spill] sm:$0xff] }
 0x484   :  { %2332 = vmatprep.subr.mxu0 %v10607_v34  ;;  %2403 = vmatprep.subr.mxu1 %v10608_v47  ;;  %v10624_v34 = vld [vmem:[#allocation112_spill] sm:$0xff] }
 0x485   :  { %2333 = vmatpush2.msra.mxu0 %v7699_v43  ;;  %2404 = vmatpush2.msra.mxu1 %v7702_v46 }
 0x486   :  { %2334 = vmatprep.subr.mxu0 %v7705_v45  ;;  %2405 = vmatprep.subr.mxu1 %v7708_v62 }
 0x487   :  { %2335 = vmatpush2.msra.mxu0 %v7711_v4  ;;  %2406 = vmatpush2.msra.mxu1 %v7714_v53 }
 0x488   :  { %2336 = vmatprep.subr.mxu0 %v7717_v59  ;;  %2407 = vmatprep.subr.mxu1 %v7720_v51 }
 0x489   :  { %2337 = vmatpush2.msra.mxu0 %v7723_v20  ;;  %2408 = vmatpush2.msra.mxu1 %v7726_v17 }
 0x48a   :  { %2338 = vmatprep.subr.mxu0 %v7729_v16  ;;  %2409 = vmatprep.subr.mxu1 %v7732_v19 }
 0x48b   :  { %2339 = vmatpush2.msra.mxu0 %v7735_v21  ;;  %2410 = vmatpush2.msra.mxu1 %v7738_v22 }
 0x48c   :  { %2340 = vmatprep.subr.mxu0 %v7741_v23  ;;  %2411 = vmatprep.subr.mxu1 %v7744_v61 }
 0x48d   :  { %2341 = vmatpush2.msra.mxu0 %v7747_v42  ;;  %2412 = vmatpush2.msra.mxu1 %v7750_v8 }
 0x48e   :  { %2342 = vmatprep.subr.mxu0 %v7753_v28  ;;  %2413 = vmatprep.subr.mxu1 %v7756_v11 }
 0x48f   :  { %2343 = vmatpush2.msra.mxu0 %v7759_v44  ;;  %2414 = vmatpush2.msra.mxu1 %v7762_v50 }
 0x490   :  { %2344 = vmatprep.subr.mxu0 %v7765_v55  ;;  %2415 = vmatprep.subr.mxu1 %v7768_v9 }
 0x491   :  { %2345 = vmatpush2.msra.mxu0 %v7771_v25  ;;  %2416 = vmatpush2.msra.mxu1 %v7774_v24 }
 0x492   :  { %2346 = vmatprep.subr.mxu0 %v7777_v32  ;;  %2417 = vmatprep.subr.mxu1 %v7780_v12  ;;  %v10625_v12 = vld [vmem:[#allocation117_spill] sm:$0xff] }
 0x493   :  { %2347 = vmatpush2.msra.mxu0 %v7783_v0  ;;  %2418 = vmatpush2.msra.mxu1 %v7786_v27  ;;  %v10626_v27 = vld [vmem:[#allocation118_spill] sm:$0xff] }
 0x494   :  { %2426 = vmatprep.subr.mxu0 %v7789_v29  ;;  %2497 = vmatprep.subr.mxu1 %v7792_v36 }
 0x4d2   :  { %v2010_v37 = vpop.f32.mrf.mxu0  ;;  %v2081_v38 = vpop.f32.mrf.mxu1 }
 0x4d3   :  { %v2011_v40 = vadd.f32 %v2010_v37, %v10623_v41  ;;  %v2082_v47 = vadd.f32 %v2081_v38, %v10624_v34  ;;  %v10627_v34 = vld [vmem:[#allocation169_spill] sm:$0xff] }
 0x4d4   :  { %v2012_v39 = vpop.f32.mrf.mxu0  ;;  %v2083_v0 = vpop.f32.mrf.mxu1 }
 0x4d5   :  { %v2013_v32 = vadd.f32 %v2012_v39, %v10625_v12  ;;  %v3902_v24 = vmul.f32 -1.442695, %v2011_v40  ;;  %v2084_v25 = vadd.f32 %v2083_v0, %v10626_v27  ;;  %v3904_v9 = vmul.f32 -1.442695, %v2082_v47  ;;  %v10628_v39 = vld [vmem:[#allocation190_spill] sm:$0xff]  ;;  %v10630_v27 = vld [vmem:[#allocation191_spill] sm:$0xff] }
 0x4d6   :  { %v711_v12 = vadd.f32 %v10627_v34, %v6220_v30  ;;  %v10629_v40 = vld [vmem:[#allocation170_spill] sm:$0xff] }
 0x4d7   :  { %v3903_v55 = vmul.f32 -1.442695, %v2013_v32  ;;  %4126 = vpow2.f32 %v3902_v24  ;;  %v3905_v29 = vmul.f32 -1.442695, %v2084_v25  ;;  %v824_v0 = vadd.f32 %v10629_v40, %v10628_v39  ;;  %v10631_v32 = vld [vmem:[#allocation171_spill] sm:$0xff] }
 0x4d8   :  { %4128 = vpow2.f32 %v3904_v9  ;;  %v713_v24 = vadd.f32 %v10631_v32, %v10630_v27 }
 0x4d9   :  { %4130 = vpow2.f32 %v3903_v55 }
 0x4da   :  { %4132 = vpow2.f32 %v3905_v29  ;;  %v10632_v29 = vld [vmem:[#allocation172_spill] sm:$0xff] }
 0x4db   :  { %v826_v47 = vadd.f32 %v10632_v29, %v6229_v33 }
 0x4e4   :  { %v4127_v36 = vpop.eup %4126 }
 0x4e5   :  { %v4129_v50 = vpop.eup %4128  ;;  %v2234_v11 = vadd.f32 1.0, %v4127_v36 }
 0x4e6   :  { %v4131_v44 = vpop.eup %4130  ;;  %v2246_v41 = vadd.f32 1.0, %v4129_v50 }
 0x4e7   :  { %v4133_v37 = vpop.eup %4132  ;;  %v2235_v38 = vadd.f32 1.0, %v4131_v44  ;;  %4134 = vrcp.f32 %v2234_v11 }
 0x4e8   :  { %v2247_v9 = vadd.f32 1.0, %v4133_v37  ;;  %4136 = vrcp.f32 %v2246_v41 }
 0x4e9   :  { %4138 = vrcp.f32 %v2235_v38 }
 0x4f4   :  { %v4135_v11 = vpop.eup %4134 }
 0x4f5   :  { %v4137_v37 = vpop.eup %4136 }
 0x4f6   :  { %v4139_v27 = vpop.eup %4138  ;;  %v2266_v41 = vmul.f32 %v4137_v37, %v7314_v49  ;;  %v10653_v37 = vld [vmem:[#allocation221_spill] sm:$0xff] }
 0x513   :  { %v2152_v55 = vpop.f32.mrf.mxu0  ;;  %v2223_v25 = vpop.f32.mrf.mxu1 }
 0x514   :  { %v2153_v36 = vadd.f32 %v2152_v55, %v711_v12  ;;  %v2224_v50 = vadd.f32 %v2223_v25, %v824_v0 }
 0x515   :  { %v2154_v44 = vpop.f32.mrf.mxu0  ;;  %v2225_v28 = vpop.f32.mrf.mxu1 }
 0x516   :  { %v3906_v34 = vmul.f32 -1.442695, %v2153_v36  ;;  %4140 = vtanh.f32 %v2224_v50  ;;  %v2155_v30 = vadd.f32 %v2154_v44, %v713_v24  ;;  %v2226_v40 = vadd.f32 %v2225_v28, %v826_v47 }
 0x517   :  { %4142 = vrcp.f32 %v2247_v9 }
 0x518   :  { %4144 = vpow2.f32 %v3906_v34  ;;  %v3907_v32 = vmul.f32 -1.442695, %v2155_v30 }
 0x519   :  { %4146 = vtanh.f32 %v2226_v40  ;;  %v10650_v40 = vld [vmem:[#allocation218_spill] sm:$0xff] }
 0x51a   :  { %4148 = vpow2.f32 %v3907_v32  ;;  %v10651_v32 = vld [vmem:[#allocation219_spill] sm:$0xff] }
 0x523   :  { %v4141_v39 = vpop.eup %4140 }
 0x524   :  { %v4143_v29 = vpop.eup %4142  ;;  %v2268_v12 = vmul.f32 %v4141_v39, %v4135_v11  ;;  %v10652_v11 = vld [vmem:[#allocation220_spill] sm:$0xff] }
 0x525   :  { %v4145_v38 = vpop.eup %4144  ;;  %v2267_v28 = vmul.f32 %v4143_v29, %v7318_v18  ;;  %v10633_v18 = vld [vmem:[#allocation201_spill] sm:$0xff]  ;;  %v10654_v29 = vld [vmem:[#allocation222_spill] sm:$0xff] }
 0x526   :  { %v4147_v0 = vpop.eup %4146  ;;  %v2258_v55 = vadd.f32 1.0, %v4145_v38  ;;  %v7808_v25 = vadd.f32 %v2268_v12, %v2266_v41  ;;  %v10655_v41 = vld [vmem:[#allocation223_spill] sm:$0xff]  ;;  %v10656_v12 = vld [vmem:[#allocation224_spill] sm:$0xff]  ;;  %v10657_v38 = vld [vmem:[#allocation225_spill] sm:$0xff] }
 0x527   :  { %v4149_v24 = vpop.eup %4148  ;;  %v2269_v9 = vmul.f32 %v4147_v0, %v4139_v27  ;;  %v10649_v27 = vld [vmem:[#allocation217_spill] sm:$0xff]  ;;  %v10658_v0 = vld [vmem:[#allocation226_spill] sm:$0xff] }
 0x528   :  { %4150 = vrcp.f32 %v2258_v55  ;;  %v2259_v30 = vadd.f32 1.0, %v4149_v24  ;;  %v10659_v55 = vld [vmem:[#allocation227_spill] sm:$0xff]  ;;  %v10660_v24 = vld [vmem:[#allocation228_spill] sm:$0xff] }
 0x529   :  { %4152 = vtanh.f32 %v7808_v25  ;;  %v7812_v47 = vadd.f32 %v2269_v9, %v2267_v28  ;;  %v10661_v28 = vld [vmem:[#allocation229_spill] sm:$0xff]  ;;  %v10662_v9 = vld [vmem:[#allocation230_spill] sm:$0xff] }
 0x52a   :  { %4154 = vrcp.f32 %v2259_v30  ;;  %v10663_v30 = vld [vmem:[#allocation231_spill] sm:$0xff] }
 0x52b   :  { %4156 = vtanh.f32 %v7812_v47 }
 0x535   :  { %v4151_v49 = vpop.eup %4150 }
 0x536   :  { %v4153_v39 = vpop.eup %4152 }
 0x537   :  { %v4155_v36 = vpop.eup %4154  ;;  %v7815_v34 = vmul.f32 %v4153_v39, %v4151_v49  ;;  %v10664_v49 = vld [vmem:[#allocation232_spill] sm:$0xff]  ;;  %v10665_v39 = vld [vmem:[#allocation233_spill] sm:$0xff] }
 0x538   :  { %v4157_v50 = vpop.eup %4156 }
 0x539   :  { %v2275_v44 = vmul.f32 %v4157_v50, %v4155_v36  ;;  %v10666_v36 = vld [vmem:[#allocation234_spill] sm:$0xff]  ;;  %v10667_v50 = vld [vmem:[#allocation9_spill] sm:$0xff] }
 0x53b   :  { %2348 = vmatprep.mubr.f32.mxu0 %v2275_v44  ;;  %2419 = vmatprep.mubr.f32.mxu1 %v2275_v44 }
 0x53c   :  { %2349 = vmatmul.mubr.f32.vlgmr.msra.gmra.mxu0 %v7815_v34  ;;  %2420 = vmatmul.mubr.f32.vlgmr.msra.gmra.mxu1 %v7815_v34 }
 0x53d   :  { %2427 = vmatpush1.msra.mxu0 %v7325_v26  ;;  %2498 = vmatpush1.msra.mxu1 %v7328_v10  ;;  %v10634_v26 = vld [vmem:[#allocation202_spill] sm:$0xff]  ;;  %v10635_v10 = vld [vmem:[#allocation203_spill] sm:$0xff] }
 0x53e   :  { %2428 = vmatprep.subr.mxu0 %v7331_v57  ;;  %2490 = vmatprep.mubr.f32.mxu0 %v2275_v44  ;;  %v10636_v57 = vld [vmem:[#allocation204_spill] sm:$0xff] }
 0x53f   :  { %2499 = vmatprep.subr.mxu1 %v7334_v15  ;;  %2561 = vmatprep.mubr.f32.mxu1 %v2275_v44  ;;  %v10637_v15 = vld [vmem:[#allocation205_spill] sm:$0xff]  ;;  %v10668_v44 = vld [vmem:[#allocation10_spill] sm:$0xff] }
 0x540   :  { %2429 = vmatpush1.msra.mxu0 %v7337_v14  ;;  %2500 = vmatpush1.msra.mxu1 %v7340_v5  ;;  %v10638_v14 = vld [vmem:[#allocation206_spill] sm:$0xff]  ;;  %v10639_v5 = vld [vmem:[#allocation207_spill] sm:$0xff] }
 0x541   :  { %2430 = vmatprep.subr.mxu0 %v7343_v52  ;;  %2501 = vmatprep.subr.mxu1 %v7346_v54  ;;  %v10640_v52 = vld [vmem:[#allocation208_spill] sm:$0xff]  ;;  %v10641_v54 = vld [vmem:[#allocation209_spill] sm:$0xff] }
 0x542   :  { %2431 = vmatpush1.msra.mxu0 %v7349_v2  ;;  %2502 = vmatpush1.msra.mxu1 %v7352_v48  ;;  %v10642_v2 = vld [vmem:[#allocation210_spill] sm:$0xff]  ;;  %v10643_v48 = vld [vmem:[#allocation211_spill] sm:$0xff] }
 0x543   :  { %2432 = vmatprep.subr.mxu0 %v7355_v3  ;;  %2503 = vmatprep.subr.mxu1 %v7358_v6  ;;  %v10644_v3 = vld [vmem:[#allocation212_spill] sm:$0xff]  ;;  %v10645_v6 = vld [vmem:[#allocation213_spill] sm:$0xff] }
 0x544   :  { %2433 = vmatpush1.msra.mxu0 %v7361_v1  ;;  %2504 = vmatpush1.msra.mxu1 %v7364_v63  ;;  %v10646_v1 = vld [vmem:[#allocation214_spill] sm:$0xff]  ;;  %v10647_v63 = vld [vmem:[#allocation215_spill] sm:$0xff] }
 0x545   :  { %2434 = vmatprep.subr.mxu0 %v7367_v58  ;;  %2505 = vmatprep.subr.mxu1 %v10633_v18  ;;  %v10648_v58 = vld [vmem:[#allocation216_spill] sm:$0xff]  ;;  %v10669_v18 = vld [vmem:[#allocation11_spill] sm:$0xff] }
 0x546   :  { %2435 = vmatpush1.msra.mxu0 %v10634_v26  ;;  %2506 = vmatpush1.msra.mxu1 %v10635_v10  ;;  %v10670_v26 = vld [vmem:[#allocation12_spill] sm:$0xff]  ;;  %v10671_v10 = vld [vmem:[#allocation13_spill] sm:$0xff] }
 0x547   :  { %2436 = vmatprep.subr.mxu0 %v10636_v57  ;;  %2507 = vmatprep.subr.mxu1 %v10637_v15  ;;  %v10672_v57 = vld [vmem:[#allocation14_spill] sm:$0xff]  ;;  %v10673_v15 = vld [vmem:[#allocation15_spill] sm:$0xff] }
 0x548   :  { %2437 = vmatpush1.msra.mxu0 %v10638_v14  ;;  %2508 = vmatpush1.msra.mxu1 %v10639_v5  ;;  %v10674_v14 = vld [vmem:[#allocation16_spill] sm:$0xff]  ;;  %v10675_v5 = vld [vmem:[#allocation17_spill] sm:$0xff] }
 0x549   :  { %2438 = vmatprep.subr.mxu0 %v10640_v52  ;;  %2509 = vmatprep.subr.mxu1 %v10641_v54  ;;  %v10676_v52 = vld [vmem:[#allocation18_spill] sm:$0xff]  ;;  %v10677_v54 = vld [vmem:[#allocation19_spill] sm:$0xff] }
 0x54a   :  { %2439 = vmatpush1.msra.mxu0 %v10642_v2  ;;  %2510 = vmatpush1.msra.mxu1 %v10643_v48  ;;  %v10678_v2 = vld [vmem:[#allocation20_spill] sm:$0xff]  ;;  %v10679_v48 = vld [vmem:[#allocation21_spill] sm:$0xff] }
 0x54b   :  { %2440 = vmatprep.subr.mxu0 %v10644_v3  ;;  %2511 = vmatprep.subr.mxu1 %v10645_v6  ;;  %v10680_v3 = vld [vmem:[#allocation22_spill] sm:$0xff]  ;;  %v10681_v6 = vld [vmem:[#allocation23_spill] sm:$0xff] }
 0x54c   :  { %2441 = vmatpush1.msra.mxu0 %v10646_v1  ;;  %2512 = vmatpush1.msra.mxu1 %v10647_v63  ;;  %v10682_v1 = vld [vmem:[#allocation24_spill] sm:$0xff]  ;;  %v10683_v63 = vld [vmem:[#allocation25_spill] sm:$0xff] }
 0x54d   :  { %2442 = vmatprep.subr.mxu0 %v10648_v58  ;;  %2513 = vmatprep.subr.mxu1 %v10649_v27  ;;  %v10684_v58 = vld [vmem:[#allocation26_spill] sm:$0xff]  ;;  %v10685_v27 = vld [vmem:[#allocation27_spill] sm:$0xff] }
 0x54e   :  { %2443 = vmatpush1.msra.mxu0 %v10650_v40  ;;  %2514 = vmatpush1.msra.mxu1 %v10651_v32  ;;  %v7893_v40 = vld [vmem:[#allocation3 + $0x7e8] sm:$0xff]  ;;  %v7896_v32 = vld [vmem:[#allocation3 + $0x7f8] sm:$0xff] }
 0x54f   :  { %2444 = vmatprep.subr.mxu0 %v10652_v11  ;;  %2515 = vmatprep.subr.mxu1 %v10653_v37  ;;  %v7899_v11 = vld [vmem:[#allocation3 + $0x7e0] sm:$0xff]  ;;  %v7920_v37 = vld [vmem:[#allocation3 + $0x778] sm:$0xff] }
 0x550   :  { %2445 = vmatpush1.msra.mxu0 %v10654_v29  ;;  %2516 = vmatpush1.msra.mxu1 %v10655_v41  ;;  %v7923_v29 = vld [vmem:[#allocation3 + $0x760] sm:$0xff]  ;;  %v7926_v41 = vld [vmem:[#allocation3 + $0x770] sm:$0xff] }
 0x551   :  { %2446 = vmatprep.subr.mxu0 %v10656_v12  ;;  %2517 = vmatprep.subr.mxu1 %v10657_v38  ;;  %v7929_v12 = vld [vmem:[#allocation3 + $0x728] sm:$0xff]  ;;  %v7932_v38 = vld [vmem:[#allocation3 + $0x738] sm:$0xff] }
 0x552   :  { %2447 = vmatpush1.msra.mxu0 %v10658_v0  ;;  %2518 = vmatpush1.msra.mxu1 %v10659_v55  ;;  %v7935_v0 = vld [vmem:[#allocation3 + $0x720] sm:$0xff]  ;;  %v7938_v55 = vld [vmem:[#allocation3 + $0x730] sm:$0xff] }
 0x553   :  { %2448 = vmatprep.subr.mxu0 %v10660_v24  ;;  %2519 = vmatprep.subr.mxu1 %v10661_v28  ;;  %v7941_v24 = vld [vmem:[#allocation3 + $0x6e8] sm:$0xff]  ;;  %v7944_v28 = vld [vmem:[#allocation3 + $0x6f8] sm:$0xff] }
 0x554   :  { %2449 = vmatpush1.msra.mxu0 %v10662_v9  ;;  %2520 = vmatpush1.msra.mxu1 %v10663_v30  ;;  %v7947_v9 = vld [vmem:[#allocation3 + $0x6e0] sm:$0xff]  ;;  %v7950_v30 = vld [vmem:[#allocation3 + $0x6f0] sm:$0xff] }
 0x555   :  { %2450 = vmatprep.subr.mxu0 %v10664_v49  ;;  %2521 = vmatprep.subr.mxu1 %v10665_v39  ;;  %v7953_v49 = vld [vmem:[#allocation3 + $0x6a8] sm:$0xff]  ;;  %v7956_v39 = vld [vmem:[#allocation3 + $0x6b8] sm:$0xff] }
 0x556   :  { %2451 = vmatpush1.msra.mxu0 %v10666_v36  ;;  %2522 = vmatpush1.msra.mxu1 %v10667_v50  ;;  %v7959_v36 = vld [vmem:[#allocation3 + $0x6a0] sm:$0xff]  ;;  %v7962_v50 = vld [vmem:[#allocation3 + $0x6b0] sm:$0xff] }
 0x557   :  { %2452 = vmatprep.subr.mxu0 %v10668_v44  ;;  %2523 = vmatprep.subr.mxu1 %v10669_v18  ;;  %v7965_v44 = vld [vmem:[#allocation3 + $0x668] sm:$0xff]  ;;  %v7968_v18 = vld [vmem:[#allocation3 + $0x678] sm:$0xff] }
 0x558   :  { %2453 = vmatpush1.msra.mxu0 %v10670_v26  ;;  %2524 = vmatpush1.msra.mxu1 %v10671_v10  ;;  %v7971_v26 = vld [vmem:[#allocation3 + $0x660] sm:$0xff]  ;;  %v7974_v10 = vld [vmem:[#allocation3 + $0x670] sm:$0xff] }
 0x559   :  { %2454 = vmatprep.subr.mxu0 %v10672_v57  ;;  %2525 = vmatprep.subr.mxu1 %v10673_v15  ;;  %v7977_v57 = vld [vmem:[#allocation3 + $0x628] sm:$0xff]  ;;  %v7980_v15 = vld [vmem:[#allocation3 + $0x638] sm:$0xff] }
 0x55a   :  { %2455 = vmatpush1.msra.mxu0 %v10674_v14  ;;  %2526 = vmatpush1.msra.mxu1 %v10675_v5  ;;  %v7983_v14 = vld [vmem:[#allocation3 + $0x620] sm:$0xff]  ;;  %v7986_v5 = vld [vmem:[#allocation3 + $0x630] sm:$0xff] }
 0x55b   :  { %2456 = vmatprep.subr.mxu0 %v10676_v52  ;;  %2527 = vmatprep.subr.mxu1 %v10677_v54  ;;  %v7989_v52 = vld [vmem:[#allocation3 + $0x5e8] sm:$0xff]  ;;  %v7992_v54 = vld [vmem:[#allocation3 + $0x5f8] sm:$0xff] }
 0x55c   :  { %2457 = vmatpush1.msra.mxu0 %v10678_v2  ;;  %2528 = vmatpush1.msra.mxu1 %v10679_v48  ;;  %v7995_v2 = vld [vmem:[#allocation3 + $0x5e0] sm:$0xff]  ;;  %v7998_v48 = vld [vmem:[#allocation3 + $0x5f0] sm:$0xff] }
 0x55d   :  { %2458 = vmatprep.subr.mxu0 %v10680_v3  ;;  %2529 = vmatprep.subr.mxu1 %v10681_v6  ;;  %v8001_v3 = vld [vmem:[#allocation3 + $0x5a8] sm:$0xff]  ;;  %v8004_v6 = vld [vmem:[#allocation3 + $0x5b8] sm:$0xff] }
 0x55e   :  { %2459 = vmatpush2.msra.mxu0 %v10682_v1  ;;  %2530 = vmatpush2.msra.mxu1 %v10683_v63  ;;  %10686 = vst [vmem:[#allocation165_spill] sm:$0xff] %v8001_v3  ;;  %10687 = vst [vmem:[#allocation166_spill] sm:$0xff] %v8004_v6  ;;  %v8007_v1 = vld [vmem:[#allocation3 + $0x5a0] sm:$0xff]  ;;  %v8010_v63 = vld [vmem:[#allocation3 + $0x5b0] sm:$0xff] }
 0x55f   :  { %2460 = vmatprep.subr.mxu0 %v10684_v58  ;;  %2531 = vmatprep.subr.mxu1 %v10685_v27  ;;  %10688 = vst [vmem:[#allocation167_spill] sm:$0xff] %v8007_v1  ;;  %10689 = vst [vmem:[#allocation168_spill] sm:$0xff] %v8010_v63  ;;  %v8013_v58 = vld [vmem:[#allocation3 + $0x568] sm:$0xff]  ;;  %v8016_v27 = vld [vmem:[#allocation3 + $0x578] sm:$0xff] }
 0x560   :  { %2461 = vmatpush2.msra.mxu0 %v7529_v56  ;;  %2532 = vmatpush2.msra.mxu1 %v7532_v13  ;;  %v7902_v13 = vld [vmem:[#allocation3 + $0x7f0] sm:$0xff]  ;;  %v7917_v56 = vld [vmem:[#allocation3 + $0x768] sm:$0xff]  ;;  %10690 = vst [vmem:[#allocation38_spill] sm:$0xff] %v8013_v58  ;;  %10691 = vst [vmem:[#allocation39_spill] sm:$0xff] %v8016_v27 }
 0x561   :  { %2462 = vmatprep.subr.mxu0 %v7535_v60  ;;  %2533 = vmatprep.subr.mxu1 %v7538_v35  ;;  %v7905_v60 = vld [vmem:[#allocation3 + $0x7a8] sm:$0xff]  ;;  %v7908_v35 = vld [vmem:[#allocation3 + $0x7b8] sm:$0xff] }
 0x562   :  { %2463 = vmatpush2.msra.mxu0 %v7541_v31  ;;  %2534 = vmatpush2.msra.mxu1 %v7544_v7  ;;  %v7911_v31 = vld [vmem:[#allocation3 + $0x7a0] sm:$0xff]  ;;  %v7914_v7 = vld [vmem:[#allocation3 + $0x7b0] sm:$0xff] }
 0x563   :  { %2464 = vmatprep.subr.mxu0 %v7893_v40  ;;  %2535 = vmatprep.subr.mxu1 %v7896_v32 }
 0x564   :  { %2465 = vmatpush2.msra.mxu0 %v7899_v11  ;;  %2536 = vmatpush2.msra.mxu1 %v7902_v13 }
 0x565   :  { %2466 = vmatprep.subr.mxu0 %v7905_v60  ;;  %2537 = vmatprep.subr.mxu1 %v7908_v35 }
 0x566   :  { %2467 = vmatpush2.msra.mxu0 %v7911_v31  ;;  %2538 = vmatpush2.msra.mxu1 %v7914_v7 }
 0x567   :  { %2468 = vmatprep.subr.mxu0 %v7917_v56  ;;  %2539 = vmatprep.subr.mxu1 %v7920_v37 }
 0x568   :  { %2469 = vmatpush2.msra.mxu0 %v7923_v29  ;;  %2540 = vmatpush2.msra.mxu1 %v7926_v41 }
 0x569   :  { %2470 = vmatprep.subr.mxu0 %v7929_v12  ;;  %2541 = vmatprep.subr.mxu1 %v7932_v38 }
 0x56a   :  { %2471 = vmatpush2.msra.mxu0 %v7935_v0  ;;  %2542 = vmatpush2.msra.mxu1 %v7938_v55 }
 0x56b   :  { %2472 = vmatprep.subr.mxu0 %v7941_v24  ;;  %2543 = vmatprep.subr.mxu1 %v7944_v28 }
 0x56c   :  { %2473 = vmatpush2.msra.mxu0 %v7947_v9  ;;  %2544 = vmatpush2.msra.mxu1 %v7950_v30 }
 0x56d   :  { %2474 = vmatprep.subr.mxu0 %v7953_v49  ;;  %2545 = vmatprep.subr.mxu1 %v7956_v39 }
 0x56e   :  { %2475 = vmatpush2.msra.mxu0 %v7959_v36  ;;  %2546 = vmatpush2.msra.mxu1 %v7962_v50 }
 0x56f   :  { %2476 = vmatprep.subr.mxu0 %v7965_v44  ;;  %2547 = vmatprep.subr.mxu1 %v7968_v18 }
 0x570   :  { %2477 = vmatpush2.msra.mxu0 %v7971_v26  ;;  %2548 = vmatpush2.msra.mxu1 %v7974_v10 }
 0x571   :  { %2478 = vmatprep.subr.mxu0 %v7977_v57  ;;  %2549 = vmatprep.subr.mxu1 %v7980_v15 }
 0x572   :  { %2479 = vmatpush2.msra.mxu0 %v7983_v14  ;;  %2550 = vmatpush2.msra.mxu1 %v7986_v5 }
 0x573   :  { %2480 = vmatprep.subr.mxu0 %v7989_v52  ;;  %2551 = vmatprep.subr.mxu1 %v7992_v54 }
 0x574   :  { %2481 = vmatpush2.msra.mxu0 %v7995_v2  ;;  %2552 = vmatpush2.msra.mxu1 %v7998_v48 }
 0x575   :  { %2482 = vmatprep.subr.mxu0 %v8001_v3  ;;  %2553 = vmatprep.subr.mxu1 %v8004_v6  ;;  %v8019_v3 = vld [vmem:[#allocation3 + $0x560] sm:$0xff]  ;;  %v8022_v6 = vld [vmem:[#allocation3 + $0x570] sm:$0xff] }
 0x576   :  { %2483 = vmatpush2.msra.mxu0 %v8007_v1  ;;  %2554 = vmatpush2.msra.mxu1 %v8010_v63  ;;  %10692 = vst [vmem:[#allocation40_spill] sm:$0xff] %v8019_v3  ;;  %10693 = vst [vmem:[#allocation41_spill] sm:$0xff] %v8022_v6  ;;  %v8025_v1 = vld [vmem:[#allocation3 + $0x528] sm:$0xff]  ;;  %v8028_v63 = vld [vmem:[#allocation3 + $0x538] sm:$0xff] }
 0x577   :  { %2484 = vmatprep.subr.mxu0 %v8013_v58  ;;  %2555 = vmatprep.subr.mxu1 %v8016_v27  ;;  %10694 = vst [vmem:[#allocation42_spill] sm:$0xff] %v8025_v1  ;;  %10695 = vst [vmem:[#allocation43_spill] sm:$0xff] %v8028_v63  ;;  %v8031_v58 = vld [vmem:[#allocation3 + $0x520] sm:$0xff]  ;;  %v8034_v27 = vld [vmem:[#allocation3 + $0x530] sm:$0xff] }
 0x578   :  { %2485 = vmatpush2.msra.mxu0 %v8019_v3  ;;  %2556 = vmatpush2.msra.mxu1 %v8022_v6  ;;  %10696 = vst [vmem:[#allocation44_spill] sm:$0xff] %v8034_v27  ;;  %v8037_v3 = vld [vmem:[#allocation3 + $0x4e8] sm:$0xff]  ;;  %v8040_v6 = vld [vmem:[#allocation3 + $0x4f8] sm:$0xff] }
 0x579   :  { %2486 = vmatprep.subr.mxu0 %v8025_v1  ;;  %2557 = vmatprep.subr.mxu1 %v8028_v63  ;;  %10697 = vst [vmem:[#allocation45_spill] sm:$0xff] %v8037_v3  ;;  %10698 = vst [vmem:[#allocation46_spill] sm:$0xff] %v8040_v6  ;;  %v8043_v1 = vld [vmem:[#allocation3 + $0x4e0] sm:$0xff]  ;;  %v8046_v63 = vld [vmem:[#allocation3 + $0x4f0] sm:$0xff] }
 0x57a   :  { %2487 = vmatpush2.msra.mxu0 %v8031_v58  ;;  %2558 = vmatpush2.msra.mxu1 %v8034_v27  ;;  %10699 = vst [vmem:[#allocation47_spill] sm:$0xff] %v8043_v1  ;;  %10700 = vst [vmem:[#allocation48_spill] sm:$0xff] %v8046_v63  ;;  %v8051_v27 = vld [vmem:[#allocation3 + $0x488] sm:$0xff] }
 0x57b   :  { %2488 = vmatprep.subr.mxu0 %v8037_v3  ;;  %2559 = vmatprep.subr.mxu1 %v8040_v6  ;;  %10701 = vst [vmem:[#allocation49_spill] sm:$0xff] %v8051_v27  ;;  %v8054_v3 = vld [vmem:[#allocation3 + $0x498] sm:$0xff]  ;;  %v8057_v6 = vld [vmem:[#allocation3 + $0x480] sm:$0xff] }
 0x57c   :  { %2489 = vmatpush2.msra.mxu0 %v8043_v1  ;;  %2560 = vmatpush2.msra.mxu1 %v8046_v63  ;;  %10702 = vst [vmem:[#allocation50_spill] sm:$0xff] %v8054_v3  ;;  %10703 = vst [vmem:[#allocation51_spill] sm:$0xff] %v8057_v6  ;;  %v8060_v1 = vld [vmem:[#allocation3 + $0x490] sm:$0xff]  ;;  %v8063_v63 = vld [vmem:[#allocation3 + $0x448] sm:$0xff] }
 0x57d   :  { %2491 = vmatmul.mubr.f32.vlgmr.msra.gmra.mxu0 %v7815_v34  ;;  %2562 = vmatmul.mubr.f32.vlgmr.msra.gmra.mxu1 %v7815_v34  ;;  %10704 = vst [vmem:[#allocation52_spill] sm:$0xff] %v8060_v1  ;;  %10705 = vst [vmem:[#allocation53_spill] sm:$0xff] %v8063_v63  ;;  %v8066_v34 = vld [vmem:[#allocation3 + $0x458] sm:$0xff] }
 0x57e   :  { %2624 = vmatprep.subr.mxu0 %v8051_v27  ;;  %2695 = vmatprep.subr.mxu1 %v8054_v3  ;;  %10706 = vst [vmem:[#allocation54_spill] sm:$0xff] %v8066_v34  ;;  %v8069_v27 = vld [vmem:[#allocation3 + $0x440] sm:$0xff]  ;;  %v8072_v3 = vld [vmem:[#allocation3 + $0x450] sm:$0xff] }
 0x57f   :  { %2625 = vmatpush1.msra.mxu0 %v8057_v6  ;;  %2696 = vmatpush1.msra.mxu1 %v8060_v1  ;;  %10707 = vst [vmem:[#allocation55_spill] sm:$0xff] %v8069_v27  ;;  %10708 = vst [vmem:[#allocation56_spill] sm:$0xff] %v8072_v3  ;;  %v8075_v6 = vld [vmem:[#allocation3 + $0x408] sm:$0xff]  ;;  %v8078_v1 = vld [vmem:[#allocation3 + $0x418] sm:$0xff] }
 0x580   :  { %2626 = vmatprep.subr.mxu0 %v8063_v63  ;;  %2697 = vmatprep.subr.mxu1 %v8066_v34  ;;  %10709 = vst [vmem:[#allocation57_spill] sm:$0xff] %v8075_v6  ;;  %10710 = vst [vmem:[#allocation58_spill] sm:$0xff] %v8078_v1  ;;  %v8081_v63 = vld [vmem:[#allocation3 + $0x400] sm:$0xff]  ;;  %v8084_v34 = vld [vmem:[#allocation3 + $0x410] sm:$0xff] }
 0x581   :  { %2627 = vmatpush1.msra.mxu0 %v8069_v27  ;;  %2698 = vmatpush1.msra.mxu1 %v8072_v3  ;;  %10711 = vst [vmem:[#allocation59_spill] sm:$0xff] %v8081_v63  ;;  %10712 = vst [vmem:[#allocation60_spill] sm:$0xff] %v8084_v34  ;;  %v8087_v27 = vld [vmem:[#allocation3 + $0x3c8] sm:$0xff]  ;;  %v8090_v3 = vld [vmem:[#allocation3 + $0x3d8] sm:$0xff] }
 0x582   :  { %2628 = vmatprep.subr.mxu0 %v8075_v6  ;;  %2699 = vmatprep.subr.mxu1 %v8078_v1  ;;  %10713 = vst [vmem:[#allocation61_spill] sm:$0xff] %v8087_v27  ;;  %10714 = vst [vmem:[#allocation62_spill] sm:$0xff] %v8090_v3  ;;  %v8093_v6 = vld [vmem:[#allocation3 + $0x3c0] sm:$0xff]  ;;  %v8096_v1 = vld [vmem:[#allocation3 + $0x3d0] sm:$0xff] }
 0x583   :  { %2629 = vmatpush1.msra.mxu0 %v8081_v63  ;;  %2700 = vmatpush1.msra.mxu1 %v8084_v34  ;;  %10715 = vst [vmem:[#allocation63_spill] sm:$0xff] %v8093_v6  ;;  %10716 = vst [vmem:[#allocation64_spill] sm:$0xff] %v8096_v1  ;;  %v8099_v63 = vld [vmem:[#allocation3 + $0x388] sm:$0xff]  ;;  %v8102_v34 = vld [vmem:[#allocation3 + $0x398] sm:$0xff] }
 0x584   :  { %2630 = vmatprep.subr.mxu0 %v8087_v27  ;;  %2701 = vmatprep.subr.mxu1 %v8090_v3  ;;  %10717 = vst [vmem:[#allocation65_spill] sm:$0xff] %v8099_v63  ;;  %10718 = vst [vmem:[#allocation66_spill] sm:$0xff] %v8102_v34  ;;  %v8105_v27 = vld [vmem:[#allocation3 + $0x380] sm:$0xff]  ;;  %v8108_v3 = vld [vmem:[#allocation3 + $0x390] sm:$0xff] }
 0x585   :  { %2631 = vmatpush1.msra.mxu0 %v8093_v6  ;;  %2702 = vmatpush1.msra.mxu1 %v8096_v1  ;;  %10719 = vst [vmem:[#allocation67_spill] sm:$0xff] %v8105_v27  ;;  %10720 = vst [vmem:[#allocation68_spill] sm:$0xff] %v8108_v3  ;;  %v8111_v6 = vld [vmem:[#allocation3 + $0x348] sm:$0xff]  ;;  %v8114_v1 = vld [vmem:[#allocation3 + $0x358] sm:$0xff] }
 0x586   :  { %2632 = vmatprep.subr.mxu0 %v8099_v63  ;;  %2703 = vmatprep.subr.mxu1 %v8102_v34  ;;  %10721 = vst [vmem:[#allocation69_spill] sm:$0xff] %v8111_v6  ;;  %10722 = vst [vmem:[#allocation70_spill] sm:$0xff] %v8114_v1  ;;  %v8117_v63 = vld [vmem:[#allocation3 + $0x340] sm:$0xff]  ;;  %v8120_v34 = vld [vmem:[#allocation3 + $0x350] sm:$0xff] }
 0x587   :  { %2633 = vmatpush1.msra.mxu0 %v8105_v27  ;;  %2704 = vmatpush1.msra.mxu1 %v8108_v3  ;;  %10723 = vst [vmem:[#allocation71_spill] sm:$0xff] %v8117_v63  ;;  %10724 = vst [vmem:[#allocation72_spill] sm:$0xff] %v8120_v34  ;;  %v8123_v27 = vld [vmem:[#allocation3 + $0x308] sm:$0xff]  ;;  %v8126_v3 = vld [vmem:[#allocation3 + $0x318] sm:$0xff] }
 0x588   :  { %2634 = vmatprep.subr.mxu0 %v8111_v6  ;;  %2705 = vmatprep.subr.mxu1 %v8114_v1  ;;  %10725 = vst [vmem:[#allocation73_spill] sm:$0xff] %v8123_v27  ;;  %10726 = vst [vmem:[#allocation74_spill] sm:$0xff] %v8126_v3  ;;  %v8129_v6 = vld [vmem:[#allocation3 + $0x300] sm:$0xff]  ;;  %v8132_v1 = vld [vmem:[#allocation3 + $0x310] sm:$0xff] }
 0x589   :  { %2635 = vmatpush1.msra.mxu0 %v8117_v63  ;;  %2706 = vmatpush1.msra.mxu1 %v8120_v34  ;;  %10727 = vst [vmem:[#allocation75_spill] sm:$0xff] %v8129_v6  ;;  %10728 = vst [vmem:[#allocation76_spill] sm:$0xff] %v8132_v1  ;;  %v8135_v63 = vld [vmem:[#allocation3 + $0x2c8] sm:$0xff]  ;;  %v8138_v34 = vld [vmem:[#allocation3 + $0x2d8] sm:$0xff] }
 0x58a   :  { %2636 = vmatprep.subr.mxu0 %v8123_v27  ;;  %2707 = vmatprep.subr.mxu1 %v8126_v3  ;;  %10729 = vst [vmem:[#allocation77_spill] sm:$0xff] %v8135_v63  ;;  %10730 = vst [vmem:[#allocation78_spill] sm:$0xff] %v8138_v34  ;;  %v8141_v27 = vld [vmem:[#allocation3 + $0x2c0] sm:$0xff]  ;;  %v8144_v3 = vld [vmem:[#allocation3 + $0x2d0] sm:$0xff] }
 0x58b   :  { %2637 = vmatpush1.msra.mxu0 %v8129_v6  ;;  %2708 = vmatpush1.msra.mxu1 %v8132_v1  ;;  %10731 = vst [vmem:[#allocation79_spill] sm:$0xff] %v8141_v27  ;;  %10732 = vst [vmem:[#allocation80_spill] sm:$0xff] %v8144_v3  ;;  %v8147_v6 = vld [vmem:[#allocation3 + $0x288] sm:$0xff]  ;;  %v8150_v1 = vld [vmem:[#allocation3 + $0x298] sm:$0xff] }
 0x58c   :  { %2638 = vmatprep.subr.mxu0 %v8135_v63  ;;  %2709 = vmatprep.subr.mxu1 %v8138_v34  ;;  %10733 = vst [vmem:[#allocation81_spill] sm:$0xff] %v8147_v6  ;;  %10734 = vst [vmem:[#allocation82_spill] sm:$0xff] %v8150_v1  ;;  %v8153_v63 = vld [vmem:[#allocation3 + $0x280] sm:$0xff]  ;;  %v8156_v34 = vld [vmem:[#allocation3 + $0x290] sm:$0xff] }
 0x58d   :  { %2639 = vmatpush1.msra.mxu0 %v8141_v27  ;;  %2710 = vmatpush1.msra.mxu1 %v8144_v3  ;;  %10735 = vst [vmem:[#allocation83_spill] sm:$0xff] %v8153_v63  ;;  %10736 = vst [vmem:[#allocation84_spill] sm:$0xff] %v8156_v34  ;;  %v8159_v27 = vld [vmem:[#allocation3 + $0x248] sm:$0xff]  ;;  %v8162_v3 = vld [vmem:[#allocation3 + $0x258] sm:$0xff] }
 0x58e   :  { %2640 = vmatprep.subr.mxu0 %v8147_v6  ;;  %2711 = vmatprep.subr.mxu1 %v8150_v1  ;;  %10737 = vst [vmem:[#allocation85_spill] sm:$0xff] %v8159_v27  ;;  %10738 = vst [vmem:[#allocation86_spill] sm:$0xff] %v8162_v3  ;;  %v8165_v6 = vld [vmem:[#allocation3 + $0x240] sm:$0xff]  ;;  %v8168_v1 = vld [vmem:[#allocation3 + $0x250] sm:$0xff] }
 0x58f   :  { %2641 = vmatpush1.msra.mxu0 %v8153_v63  ;;  %2712 = vmatpush1.msra.mxu1 %v8156_v34  ;;  %10739 = vst [vmem:[#allocation89_spill] sm:$0xff] %v8165_v6  ;;  %10740 = vst [vmem:[#allocation90_spill] sm:$0xff] %v8168_v1  ;;  %v8171_v63 = vld [vmem:[#allocation3 + $0x208] sm:$0xff]  ;;  %v8174_v34 = vld [vmem:[#allocation3 + $0x218] sm:$0xff] }
 0x590   :  { %2642 = vmatprep.subr.mxu0 %v8159_v27  ;;  %2713 = vmatprep.subr.mxu1 %v8162_v3  ;;  %10741 = vst [vmem:[#allocation91_spill] sm:$0xff] %v8171_v63  ;;  %10742 = vst [vmem:[#allocation92_spill] sm:$0xff] %v8174_v34  ;;  %v8177_v27 = vld [vmem:[#allocation3 + $0x200] sm:$0xff]  ;;  %v8180_v3 = vld [vmem:[#allocation3 + $0x210] sm:$0xff] }
 0x591   :  { %2643 = vmatpush1.msra.mxu0 %v8165_v6  ;;  %2714 = vmatpush1.msra.mxu1 %v8168_v1  ;;  %10743 = vst [vmem:[#allocation95_spill] sm:$0xff] %v8177_v27  ;;  %10744 = vst [vmem:[#allocation96_spill] sm:$0xff] %v8180_v3  ;;  %v8183_v6 = vld [vmem:[#allocation3 + $0x1c8] sm:$0xff]  ;;  %v8186_v1 = vld [vmem:[#allocation3 + $0x1d8] sm:$0xff] }
 0x592   :  { %2644 = vmatprep.subr.mxu0 %v8171_v63  ;;  %2715 = vmatprep.subr.mxu1 %v8174_v34  ;;  %10745 = vst [vmem:[#allocation97_spill] sm:$0xff] %v8183_v6  ;;  %10746 = vst [vmem:[#allocation98_spill] sm:$0xff] %v8186_v1  ;;  %v8189_v63 = vld [vmem:[#allocation3 + $0x1c0] sm:$0xff]  ;;  %v8192_v34 = vld [vmem:[#allocation3 + $0x1d0] sm:$0xff] }
 0x593   :  { %2645 = vmatpush1.msra.mxu0 %v8177_v27  ;;  %2716 = vmatpush1.msra.mxu1 %v8180_v3  ;;  %10747 = vst [vmem:[#allocation101_spill] sm:$0xff] %v8189_v63  ;;  %10748 = vst [vmem:[#allocation102_spill] sm:$0xff] %v8192_v34  ;;  %v8195_v27 = vld [vmem:[#allocation3 + $0x188] sm:$0xff]  ;;  %v8198_v3 = vld [vmem:[#allocation3 + $0x198] sm:$0xff] }
 0x594   :  { %2646 = vmatprep.subr.mxu0 %v8183_v6  ;;  %2717 = vmatprep.subr.mxu1 %v8186_v1  ;;  %10749 = vst [vmem:[#allocation103_spill] sm:$0xff] %v8195_v27  ;;  %10750 = vst [vmem:[#allocation104_spill] sm:$0xff] %v8198_v3  ;;  %v8201_v6 = vld [vmem:[#allocation3 + $0x180] sm:$0xff]  ;;  %v8204_v1 = vld [vmem:[#allocation3 + $0x190] sm:$0xff] }
 0x595   :  { %2647 = vmatpush1.msra.mxu0 %v8189_v63  ;;  %2718 = vmatpush1.msra.mxu1 %v8192_v34  ;;  %10751 = vst [vmem:[#allocation107_spill] sm:$0xff] %v8201_v6  ;;  %10752 = vst [vmem:[#allocation108_spill] sm:$0xff] %v8204_v1  ;;  %v8207_v63 = vld [vmem:[#allocation3 + $0x148] sm:$0xff]  ;;  %v8210_v34 = vld [vmem:[#allocation3 + $0x158] sm:$0xff] }
 0x596   :  { %2648 = vmatprep.subr.mxu0 %v8195_v27  ;;  %2719 = vmatprep.subr.mxu1 %v8198_v3  ;;  %10753 = vst [vmem:[#allocation109_spill] sm:$0xff] %v8207_v63  ;;  %10754 = vst [vmem:[#allocation110_spill] sm:$0xff] %v8210_v34  ;;  %v8213_v27 = vld [vmem:[#allocation3 + $0x140] sm:$0xff]  ;;  %v8216_v3 = vld [vmem:[#allocation3 + $0x150] sm:$0xff] }
 0x597   :  { %2649 = vmatpush1.msra.mxu0 %v8201_v6  ;;  %2720 = vmatpush1.msra.mxu1 %v8204_v1  ;;  %10755 = vst [vmem:[#allocation113_spill] sm:$0xff] %v8213_v27  ;;  %10756 = vst [vmem:[#allocation114_spill] sm:$0xff] %v8216_v3  ;;  %v8219_v6 = vld [vmem:[#allocation3 + $0x108] sm:$0xff]  ;;  %v8222_v1 = vld [vmem:[#allocation3 + $0x118] sm:$0xff] }
 0x598   :  { %2650 = vmatprep.subr.mxu0 %v8207_v63  ;;  %2721 = vmatprep.subr.mxu1 %v8210_v34  ;;  %10757 = vst [vmem:[#allocation115_spill] sm:$0xff] %v8219_v6  ;;  %10758 = vst [vmem:[#allocation116_spill] sm:$0xff] %v8222_v1  ;;  %v8225_v63 = vld [vmem:[#allocation3 + $0x100] sm:$0xff]  ;;  %v8228_v34 = vld [vmem:[#allocation3 + $0x110] sm:$0xff] }
 0x599   :  { %2651 = vmatpush1.msra.mxu0 %v8213_v27  ;;  %2722 = vmatpush1.msra.mxu1 %v8216_v3  ;;  %10759 = vst [vmem:[#allocation119_spill] sm:$0xff] %v8225_v63  ;;  %10760 = vst [vmem:[#allocation120_spill] sm:$0xff] %v8228_v34  ;;  %v8231_v27 = vld [vmem:[#allocation3 + $0xc8] sm:$0xff]  ;;  %v8234_v3 = vld [vmem:[#allocation3 + $0xd8] sm:$0xff] }
 0x59a   :  { %2652 = vmatprep.subr.mxu0 %v8219_v6  ;;  %2723 = vmatprep.subr.mxu1 %v8222_v1  ;;  %10761 = vst [vmem:[#allocation121_spill] sm:$0xff] %v8231_v27  ;;  %10762 = vst [vmem:[#allocation122_spill] sm:$0xff] %v8234_v3  ;;  %v8237_v6 = vld [vmem:[#allocation3 + $0xc0] sm:$0xff]  ;;  %v8240_v1 = vld [vmem:[#allocation3 + $0xd0] sm:$0xff] }
 0x59b   :  { %2653 = vmatpush1.msra.mxu0 %v8225_v63  ;;  %2724 = vmatpush1.msra.mxu1 %v8228_v34  ;;  %10763 = vst [vmem:[#allocation125_spill] sm:$0xff] %v8237_v6  ;;  %10764 = vst [vmem:[#allocation126_spill] sm:$0xff] %v8240_v1  ;;  %v8243_v63 = vld [vmem:[#allocation3 + $0x888] sm:$0xff]  ;;  %v8246_v34 = vld [vmem:[#allocation3 + $0x898] sm:$0xff] }
 0x59c   :  { %2654 = vmatprep.subr.mxu0 %v8231_v27  ;;  %2725 = vmatprep.subr.mxu1 %v8234_v3  ;;  %10765 = vst [vmem:[#allocation127_spill] sm:$0xff] %v8243_v63  ;;  %10766 = vst [vmem:[#allocation128_spill] sm:$0xff] %v8246_v34  ;;  %v8249_v27 = vld [vmem:[#allocation3 + $0x880] sm:$0xff]  ;;  %v8252_v3 = vld [vmem:[#allocation3 + $0x890] sm:$0xff] }
 0x59d   :  { %2655 = vmatpush1.msra.mxu0 %v8237_v6  ;;  %2726 = vmatpush1.msra.mxu1 %v8240_v1  ;;  %10767 = vst [vmem:[#allocation131_spill] sm:$0xff] %v8249_v27  ;;  %10768 = vst [vmem:[#allocation132_spill] sm:$0xff] %v8252_v3  ;;  %v8255_v6 = vld [vmem:[#allocation3 + $0x848] sm:$0xff]  ;;  %v8258_v1 = vld [vmem:[#allocation3 + $0x858] sm:$0xff] }
 0x59e   :  { %2656 = vmatprep.subr.mxu0 %v8243_v63  ;;  %2727 = vmatprep.subr.mxu1 %v8246_v34  ;;  %10769 = vst [vmem:[#allocation133_spill] sm:$0xff] %v8255_v6  ;;  %10770 = vst [vmem:[#allocation134_spill] sm:$0xff] %v8258_v1  ;;  %v8261_v63 = vld [vmem:[#allocation3 + $0x840] sm:$0xff]  ;;  %v8264_v34 = vld [vmem:[#allocation3 + $0x850] sm:$0xff] }
 0x59f   :  { %2657 = vmatpush2.msra.mxu0 %v8249_v27  ;;  %2728 = vmatpush2.msra.mxu1 %v8252_v3  ;;  %10771 = vst [vmem:[#allocation137_spill] sm:$0xff] %v8261_v63  ;;  %10772 = vst [vmem:[#allocation138_spill] sm:$0xff] %v8264_v34  ;;  %v8267_v27 = vld [vmem:[#allocation3 + $0x808] sm:$0xff]  ;;  %v8270_v3 = vld [vmem:[#allocation3 + $0x818] sm:$0xff] }
 0x5a0   :  { %2658 = vmatprep.subr.mxu0 %v8255_v6  ;;  %2729 = vmatprep.subr.mxu1 %v8258_v1  ;;  %10773 = vst [vmem:[#allocation139_spill] sm:$0xff] %v8267_v27  ;;  %10774 = vst [vmem:[#allocation140_spill] sm:$0xff] %v8270_v3  ;;  %v8273_v6 = vld [vmem:[#allocation3 + $0x800] sm:$0xff]  ;;  %v8276_v1 = vld [vmem:[#allocation3 + $0x810] sm:$0xff] }
 0x5a1   :  { %2659 = vmatpush2.msra.mxu0 %v8261_v63  ;;  %2730 = vmatpush2.msra.mxu1 %v8264_v34  ;;  %10775 = vst [vmem:[#allocation143_spill] sm:$0xff] %v8273_v6  ;;  %10776 = vst [vmem:[#allocation144_spill] sm:$0xff] %v8276_v1  ;;  %v8279_v63 = vld [vmem:[#allocation3 + $0x7c8] sm:$0xff]  ;;  %v8282_v34 = vld [vmem:[#allocation3 + $0x7d8] sm:$0xff] }
 0x5a2   :  { %2660 = vmatprep.subr.mxu0 %v8267_v27  ;;  %2731 = vmatprep.subr.mxu1 %v8270_v3  ;;  %10777 = vst [vmem:[#allocation145_spill] sm:$0xff] %v8279_v63  ;;  %10778 = vst [vmem:[#allocation146_spill] sm:$0xff] %v8282_v34  ;;  %v8285_v27 = vld [vmem:[#allocation3 + $0x7c0] sm:$0xff]  ;;  %v8288_v3 = vld [vmem:[#allocation3 + $0x7d0] sm:$0xff] }
 0x5a3   :  { %2661 = vmatpush2.msra.mxu0 %v8273_v6  ;;  %2732 = vmatpush2.msra.mxu1 %v8276_v1  ;;  %10779 = vst [vmem:[#allocation149_spill] sm:$0xff] %v8285_v27  ;;  %10780 = vst [vmem:[#allocation150_spill] sm:$0xff] %v8288_v3  ;;  %v8291_v6 = vld [vmem:[#allocation3 + $0x788] sm:$0xff]  ;;  %v8294_v1 = vld [vmem:[#allocation3 + $0x798] sm:$0xff] }
 0x5a4   :  { %2662 = vmatprep.subr.mxu0 %v8279_v63  ;;  %2733 = vmatprep.subr.mxu1 %v8282_v34  ;;  %10781 = vst [vmem:[#allocation151_spill] sm:$0xff] %v8291_v6  ;;  %10782 = vst [vmem:[#allocation152_spill] sm:$0xff] %v8294_v1  ;;  %v8297_v63 = vld [vmem:[#allocation3 + $0x780] sm:$0xff]  ;;  %v8300_v34 = vld [vmem:[#allocation3 + $0x790] sm:$0xff] }
 0x5a5   :  { %2663 = vmatpush2.msra.mxu0 %v8285_v27  ;;  %2734 = vmatpush2.msra.mxu1 %v8288_v3  ;;  %10783 = vst [vmem:[#allocation155_spill] sm:$0xff] %v8297_v63  ;;  %10784 = vst [vmem:[#allocation156_spill] sm:$0xff] %v8300_v34  ;;  %v8303_v27 = vld [vmem:[#allocation3 + $0x748] sm:$0xff]  ;;  %v8306_v3 = vld [vmem:[#allocation3 + $0x758] sm:$0xff] }
 0x5a6   :  { %2664 = vmatprep.subr.mxu0 %v8291_v6  ;;  %2735 = vmatprep.subr.mxu1 %v8294_v1  ;;  %10785 = vst [vmem:[#allocation157_spill] sm:$0xff] %v8303_v27  ;;  %10786 = vst [vmem:[#allocation158_spill] sm:$0xff] %v8306_v3  ;;  %v8309_v6 = vld [vmem:[#allocation3 + $0x740] sm:$0xff]  ;;  %v8312_v1 = vld [vmem:[#allocation3 + $0x750] sm:$0xff] }
 0x5a7   :  { %2665 = vmatpush2.msra.mxu0 %v8297_v63  ;;  %2736 = vmatpush2.msra.mxu1 %v8300_v34  ;;  %10787 = vst [vmem:[#allocation161_spill] sm:$0xff] %v8309_v6  ;;  %10788 = vst [vmem:[#allocation162_spill] sm:$0xff] %v8312_v1  ;;  %v8315_v63 = vld [vmem:[#allocation3 + $0x708] sm:$0xff]  ;;  %v8318_v34 = vld [vmem:[#allocation3 + $0x718] sm:$0xff] }
 0x5a8   :  { %2666 = vmatprep.subr.mxu0 %v8303_v27  ;;  %2737 = vmatprep.subr.mxu1 %v8306_v3  ;;  %10789 = vst [vmem:[#allocation87_spill] sm:$0xff] %v8315_v63  ;;  %10790 = vst [vmem:[#allocation88_spill] sm:$0xff] %v8318_v34  ;;  %v8321_v27 = vld [vmem:[#allocation3 + $0x700] sm:$0xff]  ;;  %v8324_v3 = vld [vmem:[#allocation3 + $0x710] sm:$0xff] }
 0x5a9   :  { %2667 = vmatpush2.msra.mxu0 %v8309_v6  ;;  %2738 = vmatpush2.msra.mxu1 %v8312_v1  ;;  %10791 = vst [vmem:[#allocation93_spill] sm:$0xff] %v8321_v27  ;;  %10792 = vst [vmem:[#allocation94_spill] sm:$0xff] %v8324_v3  ;;  %v8327_v6 = vld [vmem:[#allocation3 + $0x6c8] sm:$0xff]  ;;  %v8330_v1 = vld [vmem:[#allocation3 + $0x6d8] sm:$0xff] }
 0x5aa   :  { %2668 = vmatprep.subr.mxu0 %v8315_v63  ;;  %2739 = vmatprep.subr.mxu1 %v8318_v34  ;;  %v8333_v63 = vld [vmem:[#allocation3 + $0x6c0] sm:$0xff]  ;;  %v8336_v34 = vld [vmem:[#allocation3 + $0x6d0] sm:$0xff] }
 0x5ab   :  { %2669 = vmatpush2.msra.mxu0 %v8321_v27  ;;  %2740 = vmatpush2.msra.mxu1 %v8324_v3  ;;  %10793 = vst [vmem:[#allocation192_spill] sm:$0xff] %v8333_v63  ;;  %10794 = vst [vmem:[#allocation193_spill] sm:$0xff] %v8336_v34  ;;  %v8339_v27 = vld [vmem:[#allocation3 + $0x688] sm:$0xff]  ;;  %v8342_v3 = vld [vmem:[#allocation3 + $0x698] sm:$0xff] }
 0x5ac   :  { %2670 = vmatprep.subr.mxu0 %v8327_v6  ;;  %2741 = vmatprep.subr.mxu1 %v8330_v1  ;;  %10795 = vst [vmem:[#allocation194_spill] sm:$0xff] %v8339_v27  ;;  %10796 = vst [vmem:[#allocation195_spill] sm:$0xff] %v8342_v3 }
 0x5ad   :  { %2671 = vmatpush2.msra.mxu0 %v8333_v63  ;;  %2742 = vmatpush2.msra.mxu1 %v8336_v34  ;;  %v10816_v34 = vld [vmem:[#allocation173_spill] sm:$0xff] }
 0x5ae   :  { %2672 = vmatprep.subr.mxu0 %v8339_v27  ;;  %2743 = vmatprep.subr.mxu1 %v8342_v3 }
 0x5af   :  { %2673 = vmatpush2.msra.mxu0 %v7699_v43  ;;  %2744 = vmatpush2.msra.mxu1 %v7702_v46  ;;  %v10797_v43 = vld [vmem:[#allocation28_spill] sm:$0xff]  ;;  %v10798_v46 = vld [vmem:[#allocation29_spill] sm:$0xff] }
 0x5b0   :  { %2674 = vmatprep.subr.mxu0 %v7705_v45  ;;  %2745 = vmatprep.subr.mxu1 %v7708_v62  ;;  %v10799_v45 = vld [vmem:[#allocation30_spill] sm:$0xff]  ;;  %v10800_v62 = vld [vmem:[#allocation31_spill] sm:$0xff] }
 0x5b1   :  { %2675 = vmatpush2.msra.mxu0 %v7711_v4  ;;  %2746 = vmatpush2.msra.mxu1 %v7714_v53  ;;  %v10801_v4 = vld [vmem:[#allocation32_spill] sm:$0xff]  ;;  %v10802_v53 = vld [vmem:[#allocation33_spill] sm:$0xff] }
 0x5b2   :  { %2676 = vmatprep.subr.mxu0 %v7717_v59  ;;  %2747 = vmatprep.subr.mxu1 %v7720_v51  ;;  %v10803_v59 = vld [vmem:[#allocation34_spill] sm:$0xff]  ;;  %v10804_v51 = vld [vmem:[#allocation35_spill] sm:$0xff] }
 0x5b3   :  { %2677 = vmatpush2.msra.mxu0 %v7723_v20  ;;  %2748 = vmatpush2.msra.mxu1 %v7726_v17  ;;  %v10805_v20 = vld [vmem:[#allocation36_spill] sm:$0xff]  ;;  %v10806_v17 = vld [vmem:[#allocation37_spill] sm:$0xff] }
 0x5b4   :  { %2678 = vmatprep.subr.mxu0 %v7729_v16  ;;  %2749 = vmatprep.subr.mxu1 %v7732_v19  ;;  %v10807_v16 = vld [vmem:[#allocation99_spill] sm:$0xff]  ;;  %v10808_v19 = vld [vmem:[#allocation100_spill] sm:$0xff] }
 0x5b5   :  { %2679 = vmatpush2.msra.mxu0 %v7735_v21  ;;  %2750 = vmatpush2.msra.mxu1 %v7738_v22  ;;  %v10809_v21 = vld [vmem:[#allocation105_spill] sm:$0xff]  ;;  %v10810_v22 = vld [vmem:[#allocation106_spill] sm:$0xff] }
 0x5b6   :  { %2680 = vmatprep.subr.mxu0 %v7741_v23  ;;  %2751 = vmatprep.subr.mxu1 %v7744_v61 }
 0x5b7   :  { %2681 = vmatpush2.msra.mxu0 %v7747_v42  ;;  %2752 = vmatpush2.msra.mxu1 %v7750_v8  ;;  %v10811_v8 = vld [vmem:[#allocation123_spill] sm:$0xff] }
 0x5b8   :  { %2682 = vmatprep.subr.mxu0 %v10797_v43  ;;  %2753 = vmatprep.subr.mxu1 %v10798_v46  ;;  %v10812_v46 = vld [vmem:[#allocation124_spill] sm:$0xff] }
 0x5b9   :  { %2683 = vmatpush2.msra.mxu0 %v10799_v45  ;;  %2754 = vmatpush2.msra.mxu1 %v10800_v62 }
 0x5ba   :  { %2684 = vmatprep.subr.mxu0 %v10801_v4  ;;  %2755 = vmatprep.subr.mxu1 %v10802_v53  ;;  %v10813_v4 = vld [vmem:[#allocation129_spill] sm:$0xff] }
 0x5bb   :  { %2685 = vmatpush2.msra.mxu0 %v10803_v59  ;;  %2756 = vmatpush2.msra.mxu1 %v10804_v51  ;;  %v10814_v51 = vld [vmem:[#allocation130_spill] sm:$0xff] }
 0x5bc   :  { %2686 = vmatprep.subr.mxu0 %v10805_v20  ;;  %2757 = vmatprep.subr.mxu1 %v10806_v17 }
 0x5bd   :  { %2687 = vmatpush2.msra.mxu0 %v10807_v16  ;;  %2758 = vmatpush2.msra.mxu1 %v10808_v19 }
 0x5be   :  { %2766 = vmatprep.subr.mxu0 %v10809_v21  ;;  %2837 = vmatprep.subr.mxu1 %v10810_v22 }
 0x5fc   :  { %v2350_v23 = vpop.f32.mrf.mxu0  ;;  %v2421_v61 = vpop.f32.mrf.mxu1 }
 0x5fd   :  { %v2351_v43 = vadd.f32 %v2350_v23, %v10811_v8  ;;  %v2422_v45 = vadd.f32 %v2421_v61, %v10812_v46  ;;  %v10815_v46 = vld [vmem:[#allocation189_spill] sm:$0xff] }
 0x5fe   :  { %v2352_v42 = vpop.f32.mrf.mxu0  ;;  %v2423_v62 = vpop.f32.mrf.mxu1 }
 0x5ff   :  { %v2353_v53 = vadd.f32 %v2352_v42, %v10813_v4  ;;  %v3908_v59 = vmul.f32 -1.442695, %v2351_v43  ;;  %v2424_v20 = vadd.f32 %v2423_v62, %v10814_v51  ;;  %v3910_v17 = vmul.f32 -1.442695, %v2422_v45  ;;  %v10817_v43 = vld [vmem:[#allocation190_spill] sm:$0xff]  ;;  %v10819_v45 = vld [vmem:[#allocation191_spill] sm:$0xff] }
 0x600   :  { %v717_v42 = vadd.f32 %v10816_v34, %v10815_v46  ;;  %v10818_v4 = vld [vmem:[#allocation174_spill] sm:$0xff] }
 0x601   :  { %v3909_v16 = vmul.f32 -1.442695, %v2353_v53  ;;  %4158 = vpow2.f32 %v3908_v59  ;;  %v3911_v19 = vmul.f32 -1.442695, %v2424_v20  ;;  %v830_v62 = vadd.f32 %v10818_v4, %v10817_v43  ;;  %v10820_v53 = vld [vmem:[#allocation175_spill] sm:$0xff] }
 0x602   :  { %4160 = vpow2.f32 %v3910_v17  ;;  %v719_v59 = vadd.f32 %v10820_v53, %v10819_v45 }
 0x603   :  { %4162 = vpow2.f32 %v3909_v16  ;;  %v10821_v16 = vld [vmem:[#allocation176_spill] sm:$0xff] }
 0x604   :  { %4164 = vpow2.f32 %v3911_v19  ;;  %v832_v19 = vadd.f32 %v10821_v16, %v6229_v33 }
 0x60e   :  { %v4159_v21 = vpop.eup %4158 }
 0x60f   :  { %v4161_v22 = vpop.eup %4160  ;;  %v2574_v27 = vadd.f32 1.0, %v4159_v21 }
 0x610   :  { %v4163_v3 = vpop.eup %4162  ;;  %v2586_v8 = vadd.f32 1.0, %v4161_v22 }
 0x611   :  { %v4165_v23 = vpop.eup %4164  ;;  %v2575_v61 = vadd.f32 1.0, %v4163_v3  ;;  %4166 = vrcp.f32 %v2574_v27 }
 0x612   :  { %v2587_v51 = vadd.f32 1.0, %v4165_v23  ;;  %4168 = vrcp.f32 %v2586_v8 }
 0x613   :  { %4170 = vrcp.f32 %v2575_v61 }
 0x61e   :  { %v4167_v27 = vpop.eup %4166 }
 0x61f   :  { %v4169_v23 = vpop.eup %4168 }
 0x620   :  { %v4171_v45 = vpop.eup %4170  ;;  %v2606_v8 = vmul.f32 %v4169_v23, %v7808_v25  ;;  %v8416_v23 = vld [vmem:[#allocation3 + $0x470] sm:$0xff] }
 0x63d   :  { %v2492_v20 = vpop.f32.mrf.mxu0  ;;  %v2563_v17 = vpop.f32.mrf.mxu1 }
 0x63e   :  { %v2493_v21 = vadd.f32 %v2492_v20, %v717_v42  ;;  %v2564_v22 = vadd.f32 %v2563_v17, %v830_v62 }
 0x63f   :  { %v2494_v3 = vpop.f32.mrf.mxu0  ;;  %v2565_v63 = vpop.f32.mrf.mxu1 }
 0x640   :  { %v3912_v34 = vmul.f32 -1.442695, %v2493_v21  ;;  %4172 = vtanh.f32 %v2564_v22  ;;  %v2495_v46 = vadd.f32 %v2494_v3, %v719_v59  ;;  %v2566_v4 = vadd.f32 %v2565_v63, %v832_v19 }
 0x641   :  { %4174 = vrcp.f32 %v2587_v51 }
 0x642   :  { %4176 = vpow2.f32 %v3912_v34  ;;  %v3913_v53 = vmul.f32 -1.442695, %v2495_v46 }
 0x643   :  { %4178 = vtanh.f32 %v2566_v4  ;;  %v8407_v4 = vld [vmem:[#allocation3 + $0x468] sm:$0xff] }
 0x644   :  { %4180 = vpow2.f32 %v3913_v53  ;;  %v8410_v53 = vld [vmem:[#allocation3 + $0x478] sm:$0xff] }
 0x64d   :  { %v4173_v43 = vpop.eup %4172 }
 0x64e   :  { %v4175_v16 = vpop.eup %4174  ;;  %v2608_v42 = vmul.f32 %v4173_v43, %v4167_v27  ;;  %v8413_v27 = vld [vmem:[#allocation3 + $0x460] sm:$0xff] }
 0x64f   :  { %v4177_v61 = vpop.eup %4176  ;;  %v2607_v63 = vmul.f32 %v4175_v16, %v7812_v47  ;;  %v8401_v47 = vld [vmem:[#allocation3 + $0x4a0] sm:$0xff]  ;;  %v8419_v16 = vld [vmem:[#allocation3 + $0x428] sm:$0xff] }
 0x650   :  { %v4179_v62 = vpop.eup %4178  ;;  %v2598_v20 = vadd.f32 1.0, %v4177_v61  ;;  %v8390_v17 = vadd.f32 %v2608_v42, %v2606_v8  ;;  %v8422_v8 = vld [vmem:[#allocation3 + $0x438] sm:$0xff]  ;;  %v8425_v42 = vld [vmem:[#allocation3 + $0x420] sm:$0xff]  ;;  %v8428_v61 = vld [vmem:[#allocation3 + $0x430] sm:$0xff] }
 0x651   :  { %v4181_v59 = vpop.eup %4180  ;;  %v2609_v51 = vmul.f32 %v4179_v62, %v4171_v45  ;;  %v8404_v45 = vld [vmem:[#allocation3 + $0x4b0] sm:$0xff]  ;;  %v8431_v62 = vld [vmem:[#allocation3 + $0x3e8] sm:$0xff] }
 0x652   :  { %4182 = vrcp.f32 %v2598_v20  ;;  %v2599_v46 = vadd.f32 1.0, %v4181_v59  ;;  %v8434_v20 = vld [vmem:[#allocation3 + $0x3f8] sm:$0xff]  ;;  %v8437_v59 = vld [vmem:[#allocation3 + $0x3e0] sm:$0xff] }
 0x653   :  { %4184 = vtanh.f32 %v8390_v17  ;;  %v8394_v19 = vadd.f32 %v2609_v51, %v2607_v63  ;;  %v8440_v63 = vld [vmem:[#allocation3 + $0x3f0] sm:$0xff]  ;;  %v8443_v51 = vld [vmem:[#allocation3 + $0x3a8] sm:$0xff] }
 0x654   :  { %4186 = vrcp.f32 %v2599_v46  ;;  %v8446_v46 = vld [vmem:[#allocation3 + $0x3b8] sm:$0xff] }
 0x655   :  { %4188 = vtanh.f32 %v8394_v19  ;;  %10822 = vst [vmem:[#allocation196_spill] sm:$0xff] %v8446_v46 }
 0x65f   :  { %v4183_v25 = vpop.eup %4182 }
 0x660   :  { %v4185_v43 = vpop.eup %4184 }
 0x661   :  { %v4187_v21 = vpop.eup %4186  ;;  %v8397_v34 = vmul.f32 %v4185_v43, %v4183_v25  ;;  %v8449_v25 = vld [vmem:[#allocation3 + $0x3a0] sm:$0xff]  ;;  %v8452_v43 = vld [vmem:[#allocation3 + $0x3b0] sm:$0xff] }
 0x662   :  { %v4189_v22 = vpop.eup %4188  ;;  %10823 = vst [vmem:[#allocation197_spill] sm:$0xff] %v8449_v25  ;;  %10824 = vst [vmem:[#allocation198_spill] sm:$0xff] %v8452_v43 }
 0x663   :  { %v2615_v3 = vmul.f32 %v4189_v22, %v4187_v21  ;;  %v8455_v21 = vld [vmem:[#allocation3 + $0x368] sm:$0xff]  ;;  %v8458_v22 = vld [vmem:[#allocation3 + $0x378] sm:$0xff] }
 0x664   :  { %10825 = vst [vmem:[#allocation199_spill] sm:$0xff] %v8455_v21  ;;  %10826 = vst [vmem:[#allocation200_spill] sm:$0xff] %v8458_v22 }
 0x665   :  { %2688 = vmatprep.mubr.f32.mxu0 %v2615_v3  ;;  %2759 = vmatprep.mubr.f32.mxu1 %v2615_v3 }
 0x666   :  { %2689 = vmatmul.mubr.f32.vlgmr.msra.gmra.mxu0 %v8397_v34  ;;  %2760 = vmatmul.mubr.f32.vlgmr.msra.gmra.mxu1 %v8397_v34 }
 0x667   :  { %2767 = vmatpush1.msra.mxu0 %v8401_v47  ;;  %2838 = vmatpush1.msra.mxu1 %v8404_v45 }
 0x668   :  { %2768 = vmatprep.subr.mxu0 %v8407_v4  ;;  %2830 = vmatprep.mubr.f32.mxu0 %v2615_v3 }
 0x669   :  { %2839 = vmatprep.subr.mxu1 %v8410_v53  ;;  %2901 = vmatprep.mubr.f32.mxu1 %v2615_v3  ;;  %v8461_v3 = vld [vmem:[#allocation3 + $0x360] sm:$0xff] }
 0x66a   :  { %2769 = vmatpush1.msra.mxu0 %v8413_v27  ;;  %2840 = vmatpush1.msra.mxu1 %v8416_v23  ;;  %10827 = vst [vmem:[#allocation111_spill] sm:$0xff] %v8461_v3 }
 0x66b   :  { %2770 = vmatprep.subr.mxu0 %v8419_v16  ;;  %2841 = vmatprep.subr.mxu1 %v8422_v8 }
 0x66c   :  { %2771 = vmatpush1.msra.mxu0 %v8425_v42  ;;  %2842 = vmatpush1.msra.mxu1 %v8428_v61 }
 0x66d   :  { %2772 = vmatprep.subr.mxu0 %v8431_v62  ;;  %2843 = vmatprep.subr.mxu1 %v8434_v20 }
 0x66e   :  { %2773 = vmatpush1.msra.mxu0 %v8437_v59  ;;  %2844 = vmatpush1.msra.mxu1 %v8440_v63 }
 0x66f   :  { %2774 = vmatprep.subr.mxu0 %v8443_v51  ;;  %2845 = vmatprep.subr.mxu1 %v8446_v46  ;;  %v8464_v46 = vld [vmem:[#allocation3 + $0x370] sm:$0xff] }
 0x670   :  { %2775 = vmatpush1.msra.mxu0 %v8449_v25  ;;  %2846 = vmatpush1.msra.mxu1 %v8452_v43  ;;  %10828 = vst [vmem:[#allocation112_spill] sm:$0xff] %v8464_v46  ;;  %v8467_v25 = vld [vmem:[#allocation3 + $0x328] sm:$0xff]  ;;  %v8470_v43 = vld [vmem:[#allocation3 + $0x338] sm:$0xff] }
 0x671   :  { %2776 = vmatprep.subr.mxu0 %v8455_v21  ;;  %2847 = vmatprep.subr.mxu1 %v8458_v22  ;;  %10829 = vst [vmem:[#allocation117_spill] sm:$0xff] %v8467_v25  ;;  %10830 = vst [vmem:[#allocation118_spill] sm:$0xff] %v8470_v43  ;;  %v8473_v21 = vld [vmem:[#allocation3 + $0x320] sm:$0xff]  ;;  %v8476_v22 = vld [vmem:[#allocation3 + $0x330] sm:$0xff] }
 0x672   :  { %2777 = vmatpush1.msra.mxu0 %v8461_v3  ;;  %2848 = vmatpush1.msra.mxu1 %v8464_v46  ;;  %10831 = vst [vmem:[#allocation169_spill] sm:$0xff] %v8473_v21  ;;  %10832 = vst [vmem:[#allocation170_spill] sm:$0xff] %v8476_v22  ;;  %v8479_v3 = vld [vmem:[#allocation3 + $0x2e8] sm:$0xff]  ;;  %v8482_v46 = vld [vmem:[#allocation3 + $0x2f8] sm:$0xff] }
 0x673   :  { %2778 = vmatprep.subr.mxu0 %v8467_v25  ;;  %2849 = vmatprep.subr.mxu1 %v8470_v43  ;;  %10833 = vst [vmem:[#allocation171_spill] sm:$0xff] %v8479_v3  ;;  %10834 = vst [vmem:[#allocation172_spill] sm:$0xff] %v8482_v46  ;;  %v8485_v25 = vld [vmem:[#allocation3 + $0x2e0] sm:$0xff]  ;;  %v8488_v43 = vld [vmem:[#allocation3 + $0x2f0] sm:$0xff] }
 0x674   :  { %2779 = vmatpush1.msra.mxu0 %v8473_v21  ;;  %2850 = vmatpush1.msra.mxu1 %v8476_v22  ;;  %10835 = vst [vmem:[#allocation201_spill] sm:$0xff] %v8485_v25  ;;  %10836 = vst [vmem:[#allocation202_spill] sm:$0xff] %v8488_v43  ;;  %v8491_v21 = vld [vmem:[#allocation3 + $0x2a8] sm:$0xff]  ;;  %v8494_v22 = vld [vmem:[#allocation3 + $0x2b8] sm:$0xff] }
 0x675   :  { %2780 = vmatprep.subr.mxu0 %v8479_v3  ;;  %2851 = vmatprep.subr.mxu1 %v8482_v46  ;;  %10837 = vst [vmem:[#allocation203_spill] sm:$0xff] %v8491_v21  ;;  %10838 = vst [vmem:[#allocation204_spill] sm:$0xff] %v8494_v22  ;;  %v8497_v3 = vld [vmem:[#allocation3 + $0x2a0] sm:$0xff]  ;;  %v8500_v46 = vld [vmem:[#allocation3 + $0x2b0] sm:$0xff] }
 0x676   :  { %2781 = vmatpush1.msra.mxu0 %v8485_v25  ;;  %2852 = vmatpush1.msra.mxu1 %v8488_v43  ;;  %10839 = vst [vmem:[#allocation205_spill] sm:$0xff] %v8497_v3  ;;  %10840 = vst [vmem:[#allocation206_spill] sm:$0xff] %v8500_v46  ;;  %v8503_v25 = vld [vmem:[#allocation3 + $0x268] sm:$0xff]  ;;  %v8506_v43 = vld [vmem:[#allocation3 + $0x278] sm:$0xff] }
 0x677   :  { %2782 = vmatprep.subr.mxu0 %v8491_v21  ;;  %2853 = vmatprep.subr.mxu1 %v8494_v22  ;;  %10841 = vst [vmem:[#allocation207_spill] sm:$0xff] %v8503_v25  ;;  %10842 = vst [vmem:[#allocation208_spill] sm:$0xff] %v8506_v43  ;;  %v8509_v21 = vld [vmem:[#allocation3 + $0x260] sm:$0xff]  ;;  %v8512_v22 = vld [vmem:[#allocation3 + $0x270] sm:$0xff] }
 0x678   :  { %2783 = vmatpush1.msra.mxu0 %v8497_v3  ;;  %2854 = vmatpush1.msra.mxu1 %v8500_v46  ;;  %10843 = vst [vmem:[#allocation209_spill] sm:$0xff] %v8509_v21  ;;  %10844 = vst [vmem:[#allocation210_spill] sm:$0xff] %v8512_v22  ;;  %v8515_v3 = vld [vmem:[#allocation3 + $0x228] sm:$0xff]  ;;  %v8518_v46 = vld [vmem:[#allocation3 + $0x238] sm:$0xff] }
 0x679   :  { %2784 = vmatprep.subr.mxu0 %v8503_v25  ;;  %2855 = vmatprep.subr.mxu1 %v8506_v43  ;;  %10845 = vst [vmem:[#allocation211_spill] sm:$0xff] %v8515_v3  ;;  %10846 = vst [vmem:[#allocation212_spill] sm:$0xff] %v8518_v46  ;;  %v8521_v25 = vld [vmem:[#allocation3 + $0x220] sm:$0xff]  ;;  %v8524_v43 = vld [vmem:[#allocation3 + $0x230] sm:$0xff] }
 0x67a   :  { %2785 = vmatpush1.msra.mxu0 %v8509_v21  ;;  %2856 = vmatpush1.msra.mxu1 %v8512_v22  ;;  %10847 = vst [vmem:[#allocation213_spill] sm:$0xff] %v8521_v25  ;;  %10848 = vst [vmem:[#allocation214_spill] sm:$0xff] %v8524_v43  ;;  %v8527_v21 = vld [vmem:[#allocation3 + $0x1e8] sm:$0xff]  ;;  %v8530_v22 = vld [vmem:[#allocation3 + $0x1f8] sm:$0xff] }
 0x67b   :  { %2786 = vmatprep.subr.mxu0 %v8515_v3  ;;  %2857 = vmatprep.subr.mxu1 %v8518_v46  ;;  %10849 = vst [vmem:[#allocation215_spill] sm:$0xff] %v8527_v21  ;;  %10850 = vst [vmem:[#allocation216_spill] sm:$0xff] %v8530_v22  ;;  %v8533_v3 = vld [vmem:[#allocation3 + $0x1e0] sm:$0xff]  ;;  %v8536_v46 = vld [vmem:[#allocation3 + $0x1f0] sm:$0xff] }
 0x67c   :  { %2787 = vmatpush1.msra.mxu0 %v8521_v25  ;;  %2858 = vmatpush1.msra.mxu1 %v8524_v43  ;;  %10851 = vst [vmem:[#allocation217_spill] sm:$0xff] %v8533_v3  ;;  %10852 = vst [vmem:[#allocation218_spill] sm:$0xff] %v8536_v46  ;;  %v8539_v25 = vld [vmem:[#allocation3 + $0x1a8] sm:$0xff]  ;;  %v8542_v43 = vld [vmem:[#allocation3 + $0x1b8] sm:$0xff] }
 0x67d   :  { %2788 = vmatprep.subr.mxu0 %v8527_v21  ;;  %2859 = vmatprep.subr.mxu1 %v8530_v22  ;;  %10853 = vst [vmem:[#allocation219_spill] sm:$0xff] %v8539_v25  ;;  %10854 = vst [vmem:[#allocation220_spill] sm:$0xff] %v8542_v43  ;;  %v8545_v21 = vld [vmem:[#allocation3 + $0x1a0] sm:$0xff]  ;;  %v8548_v22 = vld [vmem:[#allocation3 + $0x1b0] sm:$0xff] }
 0x67e   :  { %2789 = vmatpush1.msra.mxu0 %v8533_v3  ;;  %2860 = vmatpush1.msra.mxu1 %v8536_v46  ;;  %10855 = vst [vmem:[#allocation221_spill] sm:$0xff] %v8545_v21  ;;  %10856 = vst [vmem:[#allocation222_spill] sm:$0xff] %v8548_v22  ;;  %v8551_v3 = vld [vmem:[#allocation3 + $0x168] sm:$0xff]  ;;  %v8554_v46 = vld [vmem:[#allocation3 + $0x178] sm:$0xff] }
 0x67f   :  { %2790 = vmatprep.subr.mxu0 %v8539_v25  ;;  %2861 = vmatprep.subr.mxu1 %v8542_v43  ;;  %10857 = vst [vmem:[#allocation223_spill] sm:$0xff] %v8551_v3  ;;  %10858 = vst [vmem:[#allocation224_spill] sm:$0xff] %v8554_v46  ;;  %v8557_v25 = vld [vmem:[#allocation3 + $0x160] sm:$0xff]  ;;  %v8560_v43 = vld [vmem:[#allocation3 + $0x170] sm:$0xff] }
 0x680   :  { %2791 = vmatpush1.msra.mxu0 %v8545_v21  ;;  %2862 = vmatpush1.msra.mxu1 %v8548_v22  ;;  %10859 = vst [vmem:[#allocation225_spill] sm:$0xff] %v8557_v25  ;;  %10860 = vst [vmem:[#allocation226_spill] sm:$0xff] %v8560_v43  ;;  %v8563_v21 = vld [vmem:[#allocation3 + $0x128] sm:$0xff]  ;;  %v8566_v22 = vld [vmem:[#allocation3 + $0x138] sm:$0xff] }
 0x681   :  { %2792 = vmatprep.subr.mxu0 %v8551_v3  ;;  %2863 = vmatprep.subr.mxu1 %v8554_v46  ;;  %10861 = vst [vmem:[#allocation227_spill] sm:$0xff] %v8563_v21  ;;  %10862 = vst [vmem:[#allocation228_spill] sm:$0xff] %v8566_v22  ;;  %v8569_v3 = vld [vmem:[#allocation3 + $0x120] sm:$0xff]  ;;  %v8572_v46 = vld [vmem:[#allocation3 + $0x130] sm:$0xff] }
 0x682   :  { %2793 = vmatpush1.msra.mxu0 %v8557_v25  ;;  %2864 = vmatpush1.msra.mxu1 %v8560_v43  ;;  %10863 = vst [vmem:[#allocation229_spill] sm:$0xff] %v8569_v3  ;;  %10864 = vst [vmem:[#allocation230_spill] sm:$0xff] %v8572_v46  ;;  %v8575_v25 = vld [vmem:[#allocation3 + $0xe8] sm:$0xff]  ;;  %v8578_v43 = vld [vmem:[#allocation3 + $0xf8] sm:$0xff] }
 0x683   :  { %2794 = vmatprep.subr.mxu0 %v8563_v21  ;;  %2865 = vmatprep.subr.mxu1 %v8566_v22  ;;  %10865 = vst [vmem:[#allocation231_spill] sm:$0xff] %v8575_v25  ;;  %10866 = vst [vmem:[#allocation232_spill] sm:$0xff] %v8578_v43  ;;  %v8581_v21 = vld [vmem:[#allocation3 + $0xe0] sm:$0xff]  ;;  %v8584_v22 = vld [vmem:[#allocation3 + $0xf0] sm:$0xff] }
 0x684   :  { %2795 = vmatpush1.msra.mxu0 %v8569_v3  ;;  %2866 = vmatpush1.msra.mxu1 %v8572_v46  ;;  %10867 = vst [vmem:[#allocation233_spill] sm:$0xff] %v8581_v21  ;;  %10868 = vst [vmem:[#allocation234_spill] sm:$0xff] %v8584_v22  ;;  %v8587_v3 = vld [vmem:[#allocation3 + $0x8a8] sm:$0xff]  ;;  %v8590_v46 = vld [vmem:[#allocation3 + $0x8b8] sm:$0xff] }
 0x685   :  { %2796 = vmatprep.subr.mxu0 %v8575_v25  ;;  %2867 = vmatprep.subr.mxu1 %v8578_v43  ;;  %10869 = vst [vmem:[#allocation9_spill] sm:$0xff] %v8587_v3  ;;  %10870 = vst [vmem:[#allocation10_spill] sm:$0xff] %v8590_v46  ;;  %v8593_v25 = vld [vmem:[#allocation3 + $0x8a0] sm:$0xff]  ;;  %v8596_v43 = vld [vmem:[#allocation3 + $0x8b0] sm:$0xff] }
 0x686   :  { %2797 = vmatpush1.msra.mxu0 %v8581_v21  ;;  %2868 = vmatpush1.msra.mxu1 %v8584_v22  ;;  %10871 = vst [vmem:[#allocation11_spill] sm:$0xff] %v8593_v25  ;;  %10872 = vst [vmem:[#allocation12_spill] sm:$0xff] %v8596_v43  ;;  %v8599_v21 = vld [vmem:[#allocation3 + $0x868] sm:$0xff]  ;;  %v8602_v22 = vld [vmem:[#allocation3 + $0x878] sm:$0xff] }
 0x687   :  { %2798 = vmatprep.subr.mxu0 %v8587_v3  ;;  %2869 = vmatprep.subr.mxu1 %v8590_v46  ;;  %10873 = vst [vmem:[#allocation13_spill] sm:$0xff] %v8599_v21  ;;  %10874 = vst [vmem:[#allocation14_spill] sm:$0xff] %v8602_v22  ;;  %v8605_v3 = vld [vmem:[#allocation3 + $0x860] sm:$0xff]  ;;  %v8608_v46 = vld [vmem:[#allocation3 + $0x870] sm:$0xff] }
 0x688   :  { %2799 = vmatpush2.msra.mxu0 %v8593_v25  ;;  %2870 = vmatpush2.msra.mxu1 %v8596_v43  ;;  %v8611_v25 = vld [vmem:[#allocation3 + $0x828] sm:$0xff]  ;;  %v8614_v43 = vld [vmem:[#allocation3 + $0x838] sm:$0xff] }
 0x689   :  { %2800 = vmatprep.subr.mxu0 %v8599_v21  ;;  %2871 = vmatprep.subr.mxu1 %v8602_v22  ;;  %v8617_v21 = vld [vmem:[#allocation3 + $0x820] sm:$0xff]  ;;  %v8620_v22 = vld [vmem:[#allocation3 + $0x830] sm:$0xff] }
 0x68a   :  { %2801 = vmatpush2.msra.mxu0 %v8605_v3  ;;  %2872 = vmatpush2.msra.mxu1 %v8608_v46 }
 0x68b   :  { %2802 = vmatprep.subr.mxu0 %v8611_v25  ;;  %2873 = vmatprep.subr.mxu1 %v8614_v43 }
 0x68c   :  { %2803 = vmatpush2.msra.mxu0 %v8617_v21  ;;  %2874 = vmatpush2.msra.mxu1 %v8620_v22 }
 0x68d   :  { %2804 = vmatprep.subr.mxu0 %v7893_v40  ;;  %2875 = vmatprep.subr.mxu1 %v7896_v32  ;;  %v10875_v40 = vld [vmem:[#allocation165_spill] sm:$0xff]  ;;  %v10876_v32 = vld [vmem:[#allocation166_spill] sm:$0xff] }
 0x68e   :  { %2805 = vmatpush2.msra.mxu0 %v7899_v11  ;;  %2876 = vmatpush2.msra.mxu1 %v7902_v13  ;;  %v10877_v11 = vld [vmem:[#allocation167_spill] sm:$0xff]  ;;  %v10878_v13 = vld [vmem:[#allocation168_spill] sm:$0xff] }
 0x68f   :  { %2806 = vmatprep.subr.mxu0 %v7905_v60  ;;  %2877 = vmatprep.subr.mxu1 %v7908_v35  ;;  %v10879_v60 = vld [vmem:[#allocation38_spill] sm:$0xff]  ;;  %v10880_v35 = vld [vmem:[#allocation39_spill] sm:$0xff] }
 0x690   :  { %2807 = vmatpush2.msra.mxu0 %v7911_v31  ;;  %2878 = vmatpush2.msra.mxu1 %v7914_v7  ;;  %v10881_v31 = vld [vmem:[#allocation40_spill] sm:$0xff]  ;;  %v10882_v7 = vld [vmem:[#allocation41_spill] sm:$0xff] }
 0x691   :  { %2808 = vmatprep.subr.mxu0 %v7917_v56  ;;  %2879 = vmatprep.subr.mxu1 %v7920_v37  ;;  %v10883_v56 = vld [vmem:[#allocation42_spill] sm:$0xff]  ;;  %v10884_v37 = vld [vmem:[#allocation43_spill] sm:$0xff] }
 0x692   :  { %2809 = vmatpush2.msra.mxu0 %v7923_v29  ;;  %2880 = vmatpush2.msra.mxu1 %v7926_v41  ;;  %v10885_v29 = vld [vmem:[#allocation44_spill] sm:$0xff]  ;;  %v10886_v41 = vld [vmem:[#allocation45_spill] sm:$0xff] }
 0x693   :  { %2810 = vmatprep.subr.mxu0 %v7929_v12  ;;  %2881 = vmatprep.subr.mxu1 %v7932_v38  ;;  %v10887_v12 = vld [vmem:[#allocation46_spill] sm:$0xff]  ;;  %v10888_v38 = vld [vmem:[#allocation47_spill] sm:$0xff] }
 0x694   :  { %2811 = vmatpush2.msra.mxu0 %v7935_v0  ;;  %2882 = vmatpush2.msra.mxu1 %v7938_v55  ;;  %v10889_v0 = vld [vmem:[#allocation48_spill] sm:$0xff]  ;;  %v10890_v55 = vld [vmem:[#allocation49_spill] sm:$0xff] }
 0x695   :  { %2812 = vmatprep.subr.mxu0 %v7941_v24  ;;  %2883 = vmatprep.subr.mxu1 %v7944_v28  ;;  %v10891_v24 = vld [vmem:[#allocation50_spill] sm:$0xff]  ;;  %v10892_v28 = vld [vmem:[#allocation51_spill] sm:$0xff] }
 0x696   :  { %2813 = vmatpush2.msra.mxu0 %v7947_v9  ;;  %2884 = vmatpush2.msra.mxu1 %v7950_v30  ;;  %v10893_v9 = vld [vmem:[#allocation52_spill] sm:$0xff]  ;;  %v10894_v30 = vld [vmem:[#allocation53_spill] sm:$0xff] }
 0x697   :  { %2814 = vmatprep.subr.mxu0 %v7953_v49  ;;  %2885 = vmatprep.subr.mxu1 %v7956_v39  ;;  %v10895_v49 = vld [vmem:[#allocation54_spill] sm:$0xff]  ;;  %v10896_v39 = vld [vmem:[#allocation55_spill] sm:$0xff] }
 0x698   :  { %2815 = vmatpush2.msra.mxu0 %v7959_v36  ;;  %2886 = vmatpush2.msra.mxu1 %v7962_v50  ;;  %v10897_v36 = vld [vmem:[#allocation56_spill] sm:$0xff]  ;;  %v10898_v50 = vld [vmem:[#allocation57_spill] sm:$0xff] }
 0x699   :  { %2816 = vmatprep.subr.mxu0 %v7965_v44  ;;  %2887 = vmatprep.subr.mxu1 %v7968_v18  ;;  %v10899_v44 = vld [vmem:[#allocation58_spill] sm:$0xff]  ;;  %v10900_v18 = vld [vmem:[#allocation59_spill] sm:$0xff] }
 0x69a   :  { %2817 = vmatpush2.msra.mxu0 %v7971_v26  ;;  %2888 = vmatpush2.msra.mxu1 %v7974_v10  ;;  %v10901_v26 = vld [vmem:[#allocation60_spill] sm:$0xff]  ;;  %v10902_v10 = vld [vmem:[#allocation61_spill] sm:$0xff] }
 0x69b   :  { %2818 = vmatprep.subr.mxu0 %v7977_v57  ;;  %2889 = vmatprep.subr.mxu1 %v7980_v15  ;;  %v10903_v57 = vld [vmem:[#allocation62_spill] sm:$0xff]  ;;  %v10904_v15 = vld [vmem:[#allocation63_spill] sm:$0xff] }
 0x69c   :  { %2819 = vmatpush2.msra.mxu0 %v7983_v14  ;;  %2890 = vmatpush2.msra.mxu1 %v7986_v5  ;;  %v10905_v14 = vld [vmem:[#allocation64_spill] sm:$0xff]  ;;  %v10906_v5 = vld [vmem:[#allocation65_spill] sm:$0xff] }
 0x69d   :  { %2820 = vmatprep.subr.mxu0 %v7989_v52  ;;  %2891 = vmatprep.subr.mxu1 %v7992_v54  ;;  %v10907_v52 = vld [vmem:[#allocation66_spill] sm:$0xff]  ;;  %v10908_v54 = vld [vmem:[#allocation67_spill] sm:$0xff] }
 0x69e   :  { %2821 = vmatpush2.msra.mxu0 %v7995_v2  ;;  %2892 = vmatpush2.msra.mxu1 %v7998_v48  ;;  %v10909_v2 = vld [vmem:[#allocation68_spill] sm:$0xff]  ;;  %v10910_v48 = vld [vmem:[#allocation69_spill] sm:$0xff] }
 0x69f   :  { %2822 = vmatprep.subr.mxu0 %v10875_v40  ;;  %2893 = vmatprep.subr.mxu1 %v10876_v32  ;;  %v10913_v40 = vld [vmem:[#allocation72_spill] sm:$0xff]  ;;  %v10914_v32 = vld [vmem:[#allocation73_spill] sm:$0xff] }
 0x6a0   :  { %2823 = vmatpush2.msra.mxu0 %v10877_v11  ;;  %2894 = vmatpush2.msra.mxu1 %v10878_v13  ;;  %v10915_v11 = vld [vmem:[#allocation74_spill] sm:$0xff]  ;;  %v10916_v13 = vld [vmem:[#allocation75_spill] sm:$0xff] }
 0x6a1   :  { %2824 = vmatprep.subr.mxu0 %v10879_v60  ;;  %2895 = vmatprep.subr.mxu1 %v10880_v35  ;;  %v10917_v60 = vld [vmem:[#allocation76_spill] sm:$0xff]  ;;  %v10918_v35 = vld [vmem:[#allocation77_spill] sm:$0xff] }
 0x6a2   :  { %2825 = vmatpush2.msra.mxu0 %v10881_v31  ;;  %2896 = vmatpush2.msra.mxu1 %v10882_v7  ;;  %v10919_v31 = vld [vmem:[#allocation78_spill] sm:$0xff]  ;;  %v10920_v7 = vld [vmem:[#allocation79_spill] sm:$0xff] }
 0x6a3   :  { %2826 = vmatprep.subr.mxu0 %v10883_v56  ;;  %2897 = vmatprep.subr.mxu1 %v10884_v37  ;;  %v10921_v56 = vld [vmem:[#allocation80_spill] sm:$0xff]  ;;  %v10922_v37 = vld [vmem:[#allocation81_spill] sm:$0xff] }
 0x6a4   :  { %2827 = vmatpush2.msra.mxu0 %v8031_v58  ;;  %2898 = vmatpush2.msra.mxu1 %v10885_v29  ;;  %v10911_v58 = vld [vmem:[#allocation70_spill] sm:$0xff] }
 0x6a5   :  { %2828 = vmatprep.subr.mxu0 %v10886_v41  ;;  %2899 = vmatprep.subr.mxu1 %v10887_v12  ;;  %v10923_v29 = vld [vmem:[#allocation82_spill] sm:$0xff]  ;;  %v10924_v41 = vld [vmem:[#allocation83_spill] sm:$0xff]  ;;  %v10925_v12 = vld [vmem:[#allocation84_spill] sm:$0xff] }
 0x6a6   :  { %2829 = vmatpush2.msra.mxu0 %v10888_v38  ;;  %2900 = vmatpush2.msra.mxu1 %v10889_v0  ;;  %v10926_v38 = vld [vmem:[#allocation85_spill] sm:$0xff]  ;;  %v10927_v0 = vld [vmem:[#allocation86_spill] sm:$0xff] }
 0x6a7   :  { %2831 = vmatmul.mubr.f32.vlgmr.msra.gmra.mxu0 %v8397_v34  ;;  %2902 = vmatmul.mubr.f32.vlgmr.msra.gmra.mxu1 %v8397_v34  ;;  %v10912_v34 = vld [vmem:[#allocation71_spill] sm:$0xff] }
 0x6a8   :  { %2964 = vmatprep.subr.mxu0 %v10890_v55  ;;  %3035 = vmatprep.subr.mxu1 %v10891_v24  ;;  %v10928_v55 = vld [vmem:[#allocation89_spill] sm:$0xff]  ;;  %v10929_v24 = vld [vmem:[#allocation90_spill] sm:$0xff] }
 0x6a9   :  { %2965 = vmatpush1.msra.mxu0 %v10892_v28  ;;  %3036 = vmatpush1.msra.mxu1 %v10893_v9  ;;  %v10930_v28 = vld [vmem:[#allocation91_spill] sm:$0xff]  ;;  %v10931_v9 = vld [vmem:[#allocation92_spill] sm:$0xff] }
 0x6aa   :  { %2966 = vmatprep.subr.mxu0 %v10894_v30  ;;  %3037 = vmatprep.subr.mxu1 %v10895_v49  ;;  %v10932_v30 = vld [vmem:[#allocation95_spill] sm:$0xff]  ;;  %v10933_v49 = vld [vmem:[#allocation96_spill] sm:$0xff] }
 0x6ab   :  { %2967 = vmatpush1.msra.mxu0 %v10896_v39  ;;  %3038 = vmatpush1.msra.mxu1 %v10897_v36  ;;  %v10934_v39 = vld [vmem:[#allocation97_spill] sm:$0xff]  ;;  %v10935_v36 = vld [vmem:[#allocation98_spill] sm:$0xff] }
 0x6ac   :  { %2968 = vmatprep.subr.mxu0 %v10898_v50  ;;  %3039 = vmatprep.subr.mxu1 %v10899_v44  ;;  %v10936_v50 = vld [vmem:[#allocation101_spill] sm:$0xff]  ;;  %v10937_v44 = vld [vmem:[#allocation102_spill] sm:$0xff] }
 0x6ad   :  { %2969 = vmatpush1.msra.mxu0 %v10900_v18  ;;  %3040 = vmatpush1.msra.mxu1 %v10901_v26  ;;  %v10938_v18 = vld [vmem:[#allocation103_spill] sm:$0xff]  ;;  %v10939_v26 = vld [vmem:[#allocation104_spill] sm:$0xff] }
 0x6ae   :  { %2970 = vmatprep.subr.mxu0 %v10902_v10  ;;  %3041 = vmatprep.subr.mxu1 %v10903_v57  ;;  %v10940_v10 = vld [vmem:[#allocation107_spill] sm:$0xff]  ;;  %v10941_v57 = vld [vmem:[#allocation108_spill] sm:$0xff] }
 0x6af   :  { %2971 = vmatpush1.msra.mxu0 %v10904_v15  ;;  %3042 = vmatpush1.msra.mxu1 %v10905_v14  ;;  %v10942_v15 = vld [vmem:[#allocation109_spill] sm:$0xff]  ;;  %v10943_v14 = vld [vmem:[#allocation110_spill] sm:$0xff] }
 0x6b0   :  { %2972 = vmatprep.subr.mxu0 %v10906_v5  ;;  %3043 = vmatprep.subr.mxu1 %v10907_v52  ;;  %v10944_v5 = vld [vmem:[#allocation113_spill] sm:$0xff]  ;;  %v10945_v52 = vld [vmem:[#allocation114_spill] sm:$0xff] }
 0x6b1   :  { %2973 = vmatpush1.msra.mxu0 %v10908_v54  ;;  %3044 = vmatpush1.msra.mxu1 %v10909_v2  ;;  %v10946_v54 = vld [vmem:[#allocation115_spill] sm:$0xff]  ;;  %v10947_v2 = vld [vmem:[#allocation116_spill] sm:$0xff] }
 0x6b2   :  { %2974 = vmatprep.subr.mxu0 %v10910_v48  ;;  %3045 = vmatprep.subr.mxu1 %v10911_v58  ;;  %v10948_v48 = vld [vmem:[#allocation119_spill] sm:$0xff]  ;;  %v10949_v58 = vld [vmem:[#allocation120_spill] sm:$0xff] }
 0x6b3   :  { %2975 = vmatpush1.msra.mxu0 %v10912_v34  ;;  %3046 = vmatpush1.msra.mxu1 %v10913_v40  ;;  %v10950_v34 = vld [vmem:[#allocation121_spill] sm:$0xff]  ;;  %v10951_v40 = vld [vmem:[#allocation122_spill] sm:$0xff] }
 0x6b4   :  { %2976 = vmatprep.subr.mxu0 %v10914_v32  ;;  %3047 = vmatprep.subr.mxu1 %v10915_v11  ;;  %v10952_v32 = vld [vmem:[#allocation125_spill] sm:$0xff]  ;;  %v10953_v11 = vld [vmem:[#allocation126_spill] sm:$0xff] }
 0x6b5   :  { %2977 = vmatpush1.msra.mxu0 %v10916_v13  ;;  %3048 = vmatpush1.msra.mxu1 %v10917_v60  ;;  %v10954_v13 = vld [vmem:[#allocation127_spill] sm:$0xff]  ;;  %v10955_v60 = vld [vmem:[#allocation128_spill] sm:$0xff] }
 0x6b6   :  { %2978 = vmatprep.subr.mxu0 %v10918_v35  ;;  %3049 = vmatprep.subr.mxu1 %v10919_v31  ;;  %v10956_v35 = vld [vmem:[#allocation131_spill] sm:$0xff]  ;;  %v10957_v31 = vld [vmem:[#allocation132_spill] sm:$0xff] }
 0x6b7   :  { %2979 = vmatpush1.msra.mxu0 %v10920_v7  ;;  %3050 = vmatpush1.msra.mxu1 %v10921_v56  ;;  %v10958_v7 = vld [vmem:[#allocation133_spill] sm:$0xff]  ;;  %v10959_v56 = vld [vmem:[#allocation134_spill] sm:$0xff] }
 0x6b8   :  { %2980 = vmatprep.subr.mxu0 %v10922_v37  ;;  %3051 = vmatprep.subr.mxu1 %v10923_v29  ;;  %v10960_v37 = vld [vmem:[#allocation137_spill] sm:$0xff]  ;;  %v10961_v29 = vld [vmem:[#allocation138_spill] sm:$0xff] }
 0x6b9   :  { %2981 = vmatpush1.msra.mxu0 %v10924_v41  ;;  %3052 = vmatpush1.msra.mxu1 %v10925_v12  ;;  %v10962_v41 = vld [vmem:[#allocation139_spill] sm:$0xff]  ;;  %v10963_v12 = vld [vmem:[#allocation140_spill] sm:$0xff] }
 0x6ba   :  { %2982 = vmatprep.subr.mxu0 %v10926_v38  ;;  %3053 = vmatprep.subr.mxu1 %v10927_v0  ;;  %v10964_v38 = vld [vmem:[#allocation143_spill] sm:$0xff]  ;;  %v10965_v0 = vld [vmem:[#allocation144_spill] sm:$0xff] }
 0x6bb   :  { %2983 = vmatpush1.msra.mxu0 %v10928_v55  ;;  %3054 = vmatpush1.msra.mxu1 %v10929_v24  ;;  %v10966_v55 = vld [vmem:[#allocation145_spill] sm:$0xff]  ;;  %v10967_v24 = vld [vmem:[#allocation146_spill] sm:$0xff] }
 0x6bc   :  { %2984 = vmatprep.subr.mxu0 %v10930_v28  ;;  %3055 = vmatprep.subr.mxu1 %v10931_v9  ;;  %v10968_v28 = vld [vmem:[#allocation149_spill] sm:$0xff]  ;;  %v10969_v9 = vld [vmem:[#allocation150_spill] sm:$0xff] }
 0x6bd   :  { %2985 = vmatpush1.msra.mxu0 %v10932_v30  ;;  %3056 = vmatpush1.msra.mxu1 %v10933_v49  ;;  %v10970_v30 = vld [vmem:[#allocation151_spill] sm:$0xff]  ;;  %v10971_v49 = vld [vmem:[#allocation152_spill] sm:$0xff] }
 0x6be   :  { %2986 = vmatprep.subr.mxu0 %v10934_v39  ;;  %3057 = vmatprep.subr.mxu1 %v10935_v36  ;;  %v10972_v39 = vld [vmem:[#allocation155_spill] sm:$0xff]  ;;  %v10973_v36 = vld [vmem:[#allocation156_spill] sm:$0xff] }
 0x6bf   :  { %2987 = vmatpush1.msra.mxu0 %v10936_v50  ;;  %3058 = vmatpush1.msra.mxu1 %v10937_v44  ;;  %v10974_v50 = vld [vmem:[#allocation157_spill] sm:$0xff]  ;;  %v10975_v44 = vld [vmem:[#allocation158_spill] sm:$0xff] }
 0x6c0   :  { %2988 = vmatprep.subr.mxu0 %v10938_v18  ;;  %3059 = vmatprep.subr.mxu1 %v10939_v26  ;;  %v10976_v18 = vld [vmem:[#allocation161_spill] sm:$0xff]  ;;  %v10977_v26 = vld [vmem:[#allocation162_spill] sm:$0xff] }
 0x6c1   :  { %2989 = vmatpush1.msra.mxu0 %v10940_v10  ;;  %3060 = vmatpush1.msra.mxu1 %v10941_v57  ;;  %v10978_v10 = vld [vmem:[#allocation87_spill] sm:$0xff]  ;;  %v10979_v57 = vld [vmem:[#allocation88_spill] sm:$0xff] }
 0x6c2   :  { %2990 = vmatprep.subr.mxu0 %v10942_v15  ;;  %3061 = vmatprep.subr.mxu1 %v10943_v14  ;;  %v10980_v15 = vld [vmem:[#allocation93_spill] sm:$0xff]  ;;  %v10981_v14 = vld [vmem:[#allocation94_spill] sm:$0xff] }
 0x6c3   :  { %2991 = vmatpush1.msra.mxu0 %v10944_v5  ;;  %3062 = vmatpush1.msra.mxu1 %v10945_v52  ;;  %v10982_v5 = vld [vmem:[#allocation192_spill] sm:$0xff]  ;;  %v10983_v52 = vld [vmem:[#allocation193_spill] sm:$0xff] }
 0x6c4   :  { %2992 = vmatprep.subr.mxu0 %v10946_v54  ;;  %3063 = vmatprep.subr.mxu1 %v10947_v2  ;;  %v10984_v54 = vld [vmem:[#allocation194_spill] sm:$0xff]  ;;  %v10985_v2 = vld [vmem:[#allocation195_spill] sm:$0xff] }
 0x6c5   :  { %2993 = vmatpush1.msra.mxu0 %v10948_v48  ;;  %3064 = vmatpush1.msra.mxu1 %v10949_v58  ;;  %v8775_v48 = vld [vmem:[#allocation3 + $0x680] sm:$0xff]  ;;  %v8778_v58 = vld [vmem:[#allocation3 + $0x690] sm:$0xff] }
 0x6c6   :  { %2994 = vmatprep.subr.mxu0 %v10950_v34  ;;  %3065 = vmatprep.subr.mxu1 %v10951_v40  ;;  %v8781_v34 = vld [vmem:[#allocation3 + $0x648] sm:$0xff]  ;;  %v8790_v40 = vld [vmem:[#allocation3 + $0x650] sm:$0xff] }
 0x6c7   :  { %2995 = vmatpush1.msra.mxu0 %v10952_v32  ;;  %3066 = vmatpush1.msra.mxu1 %v10953_v11  ;;  %v8793_v32 = vld [vmem:[#allocation3 + $0x608] sm:$0xff]  ;;  %v8796_v11 = vld [vmem:[#allocation3 + $0x618] sm:$0xff] }
 0x6c8   :  { %2996 = vmatprep.subr.mxu0 %v10954_v13  ;;  %3067 = vmatprep.subr.mxu1 %v10955_v60  ;;  %v8799_v13 = vld [vmem:[#allocation3 + $0x600] sm:$0xff]  ;;  %v8802_v60 = vld [vmem:[#allocation3 + $0x610] sm:$0xff] }
 0x6c9   :  { %2997 = vmatpush2.msra.mxu0 %v10956_v35  ;;  %3068 = vmatpush2.msra.mxu1 %v10957_v31  ;;  %v8805_v35 = vld [vmem:[#allocation3 + $0x5c8] sm:$0xff]  ;;  %v8808_v31 = vld [vmem:[#allocation3 + $0x5d8] sm:$0xff] }
 0x6ca   :  { %2998 = vmatprep.subr.mxu0 %v10958_v7  ;;  %3069 = vmatprep.subr.mxu1 %v10959_v56  ;;  %v8811_v7 = vld [vmem:[#allocation3 + $0x5c0] sm:$0xff]  ;;  %v8814_v56 = vld [vmem:[#allocation3 + $0x5d0] sm:$0xff] }
 0x6cb   :  { %2999 = vmatpush2.msra.mxu0 %v10960_v37  ;;  %3070 = vmatpush2.msra.mxu1 %v10961_v29  ;;  %v8817_v37 = vld [vmem:[#allocation3 + $0x588] sm:$0xff]  ;;  %v8820_v29 = vld [vmem:[#allocation3 + $0x598] sm:$0xff] }
 0x6cc   :  { %3000 = vmatprep.subr.mxu0 %v10962_v41  ;;  %3071 = vmatprep.subr.mxu1 %v10963_v12  ;;  %v8823_v41 = vld [vmem:[#allocation3 + $0x580] sm:$0xff]  ;;  %v8826_v12 = vld [vmem:[#allocation3 + $0x590] sm:$0xff] }
 0x6cd   :  { %3001 = vmatpush2.msra.mxu0 %v10964_v38  ;;  %3072 = vmatpush2.msra.mxu1 %v10965_v0  ;;  %v8829_v38 = vld [vmem:[#allocation3 + $0x548] sm:$0xff]  ;;  %v8832_v0 = vld [vmem:[#allocation3 + $0x558] sm:$0xff] }
 0x6ce   :  { %3002 = vmatprep.subr.mxu0 %v10966_v55  ;;  %3073 = vmatprep.subr.mxu1 %v10967_v24  ;;  %10986 = vst [vmem:[#allocation15_spill] sm:$0xff] %v8829_v38  ;;  %10987 = vst [vmem:[#allocation16_spill] sm:$0xff] %v8832_v0  ;;  %v8835_v55 = vld [vmem:[#allocation3 + $0x540] sm:$0xff]  ;;  %v8838_v24 = vld [vmem:[#allocation3 + $0x550] sm:$0xff] }
 0x6cf   :  { %3003 = vmatpush2.msra.mxu0 %v10968_v28  ;;  %3074 = vmatpush2.msra.mxu1 %v10969_v9  ;;  %10988 = vst [vmem:[#allocation17_spill] sm:$0xff] %v8835_v55  ;;  %10989 = vst [vmem:[#allocation18_spill] sm:$0xff] %v8838_v24  ;;  %v8841_v28 = vld [vmem:[#allocation3 + $0x508] sm:$0xff]  ;;  %v8844_v9 = vld [vmem:[#allocation3 + $0x518] sm:$0xff] }
 0x6d0   :  { %3004 = vmatprep.subr.mxu0 %v10970_v30  ;;  %3075 = vmatprep.subr.mxu1 %v10971_v49  ;;  %10990 = vst [vmem:[#allocation19_spill] sm:$0xff] %v8841_v28  ;;  %10991 = vst [vmem:[#allocation20_spill] sm:$0xff] %v8844_v9  ;;  %v8847_v30 = vld [vmem:[#allocation3 + $0x500] sm:$0xff]  ;;  %v8850_v49 = vld [vmem:[#allocation3 + $0x510] sm:$0xff] }
 0x6d1   :  { %3005 = vmatpush2.msra.mxu0 %v10972_v39  ;;  %3076 = vmatpush2.msra.mxu1 %v10973_v36  ;;  %10992 = vst [vmem:[#allocation21_spill] sm:$0xff] %v8847_v30  ;;  %10993 = vst [vmem:[#allocation22_spill] sm:$0xff] %v8850_v49  ;;  %v8853_v39 = vld [vmem:[#allocation3 + $0x4c8] sm:$0xff]  ;;  %v8856_v36 = vld [vmem:[#allocation3 + $0x4d8] sm:$0xff] }
 0x6d2   :  { %3006 = vmatprep.subr.mxu0 %v10974_v50  ;;  %3077 = vmatprep.subr.mxu1 %v10975_v44  ;;  %10994 = vst [vmem:[#allocation23_spill] sm:$0xff] %v8853_v39  ;;  %10995 = vst [vmem:[#allocation24_spill] sm:$0xff] %v8856_v36  ;;  %v8859_v50 = vld [vmem:[#allocation3 + $0x4c0] sm:$0xff]  ;;  %v8862_v44 = vld [vmem:[#allocation3 + $0x4d0] sm:$0xff] }
 0x6d3   :  { %3007 = vmatpush2.msra.mxu0 %v10976_v18  ;;  %3078 = vmatpush2.msra.mxu1 %v10977_v26  ;;  %10996 = vst [vmem:[#allocation25_spill] sm:$0xff] %v8859_v50  ;;  %10997 = vst [vmem:[#allocation26_spill] sm:$0xff] %v8862_v44  ;;  %v8865_v18 = vld [vmem:[#allocation3 + $0x4a8] sm:$0xff]  ;;  %v8868_v26 = vld [vmem:[#allocation3 + $0x4b8] sm:$0xff] }
 0x6d4   :  { %3008 = vmatprep.subr.mxu0 %v10978_v10  ;;  %3079 = vmatprep.subr.mxu1 %v10979_v57  ;;  %10998 = vst [vmem:[#allocation27_spill] sm:$0xff] %v8865_v18  ;;  %10999 = vst [vmem:[#allocation28_spill] sm:$0xff] %v8868_v26 }
 0x6d5   :  { %3009 = vmatpush2.msra.mxu0 %v10980_v15  ;;  %3080 = vmatpush2.msra.mxu1 %v10981_v14  ;;  %v11000_v14 = vld [vmem:[#allocation135_spill] sm:$0xff] }
 0x6d6   :  { %3010 = vmatprep.subr.mxu0 %v8327_v6  ;;  %3081 = vmatprep.subr.mxu1 %v8330_v1  ;;  %v8784_v6 = vld [vmem:[#allocation3 + $0x658] sm:$0xff]  ;;  %v8787_v1 = vld [vmem:[#allocation3 + $0x640] sm:$0xff] }
 0x6d7   :  { %3011 = vmatpush2.msra.mxu0 %v10982_v5  ;;  %3082 = vmatpush2.msra.mxu1 %v10983_v52  ;;  %v11001_v52 = vld [vmem:[#allocation136_spill] sm:$0xff] }
 0x6d8   :  { %3012 = vmatprep.subr.mxu0 %v10984_v54  ;;  %3083 = vmatprep.subr.mxu1 %v10985_v2 }
 0x6d9   :  { %3013 = vmatpush2.msra.mxu0 %v8775_v48  ;;  %3084 = vmatpush2.msra.mxu1 %v8778_v58 }
 0x6da   :  { %3014 = vmatprep.subr.mxu0 %v8781_v34  ;;  %3085 = vmatprep.subr.mxu1 %v8784_v6 }
 0x6db   :  { %3015 = vmatpush2.msra.mxu0 %v8787_v1  ;;  %3086 = vmatpush2.msra.mxu1 %v8790_v40 }
 0x6dc   :  { %3016 = vmatprep.subr.mxu0 %v8793_v32  ;;  %3087 = vmatprep.subr.mxu1 %v8796_v11 }
 0x6dd   :  { %3017 = vmatpush2.msra.mxu0 %v8799_v13  ;;  %3088 = vmatpush2.msra.mxu1 %v8802_v60 }
 0x6de   :  { %3018 = vmatprep.subr.mxu0 %v8805_v35  ;;  %3089 = vmatprep.subr.mxu1 %v8808_v31 }
 0x6df   :  { %3019 = vmatpush2.msra.mxu0 %v8811_v7  ;;  %3090 = vmatpush2.msra.mxu1 %v8814_v56 }
 0x6e0   :  { %3020 = vmatprep.subr.mxu0 %v8817_v37  ;;  %3091 = vmatprep.subr.mxu1 %v8820_v29 }
 0x6e1   :  { %3021 = vmatpush2.msra.mxu0 %v8823_v41  ;;  %3092 = vmatpush2.msra.mxu1 %v8826_v12 }
 0x6e2   :  { %3022 = vmatprep.subr.mxu0 %v8829_v38  ;;  %3093 = vmatprep.subr.mxu1 %v8832_v0  ;;  %v11005_v0 = vld [vmem:[#allocation177_spill] sm:$0xff] }
 0x6e3   :  { %3023 = vmatpush2.msra.mxu0 %v8835_v55  ;;  %3094 = vmatpush2.msra.mxu1 %v8838_v24 }
 0x6e4   :  { %3024 = vmatprep.subr.mxu0 %v8841_v28  ;;  %3095 = vmatprep.subr.mxu1 %v8844_v9 }
 0x6e5   :  { %3025 = vmatpush2.msra.mxu0 %v8847_v30  ;;  %3096 = vmatpush2.msra.mxu1 %v8850_v49 }
 0x6e6   :  { %3026 = vmatprep.subr.mxu0 %v8853_v39  ;;  %3097 = vmatprep.subr.mxu1 %v8856_v36 }
 0x6e7   :  { %3027 = vmatpush2.msra.mxu0 %v8859_v50  ;;  %3098 = vmatpush2.msra.mxu1 %v8862_v44  ;;  %v11002_v50 = vld [vmem:[#allocation141_spill] sm:$0xff]  ;;  %v11003_v44 = vld [vmem:[#allocation142_spill] sm:$0xff] }
 0x6e8   :  { %3106 = vmatprep.subr.mxu0 %v8865_v18  ;;  %3177 = vmatprep.subr.mxu1 %v8868_v26 }
 0x726   :  { %v2690_v10 = vpop.f32.mrf.mxu0  ;;  %v2761_v57 = vpop.f32.mrf.mxu1 }
 0x727   :  { %v2691_v5 = vadd.f32 %v2690_v10, %v11000_v14  ;;  %v2762_v54 = vadd.f32 %v2761_v57, %v11001_v52  ;;  %v11004_v52 = vld [vmem:[#allocation189_spill] sm:$0xff] }
 0x728   :  { %v2692_v15 = vpop.f32.mrf.mxu0  ;;  %v2763_v2 = vpop.f32.mrf.mxu1 }
 0x729   :  { %v2693_v36 = vadd.f32 %v2692_v15, %v11002_v50  ;;  %v3914_v39 = vmul.f32 -1.442695, %v2691_v5  ;;  %v2764_v49 = vadd.f32 %v2763_v2, %v11003_v44  ;;  %v3916_v30 = vmul.f32 -1.442695, %v2762_v54  ;;  %v11006_v15 = vld [vmem:[#allocation190_spill] sm:$0xff]  ;;  %v11008_v54 = vld [vmem:[#allocation191_spill] sm:$0xff] }
 0x72a   :  { %v723_v50 = vadd.f32 %v11005_v0, %v11004_v52  ;;  %v11007_v5 = vld [vmem:[#allocation178_spill] sm:$0xff] }
 0x72b   :  { %v3915_v9 = vmul.f32 -1.442695, %v2693_v36  ;;  %4190 = vpow2.f32 %v3914_v39  ;;  %v3917_v18 = vmul.f32 -1.442695, %v2764_v49  ;;  %v836_v44 = vadd.f32 %v11007_v5, %v11006_v15  ;;  %v11009_v36 = vld [vmem:[#allocation179_spill] sm:$0xff] }
 0x72c   :  { %4192 = vpow2.f32 %v3916_v30  ;;  %v725_v39 = vadd.f32 %v11009_v36, %v11008_v54 }
 0x72d   :  { %4194 = vpow2.f32 %v3915_v9 }
 0x72e   :  { %4196 = vpow2.f32 %v3917_v18  ;;  %v11010_v18 = vld [vmem:[#allocation180_spill] sm:$0xff] }
 0x72f   :  { %v838_v2 = vadd.f32 %v11010_v18, %v6229_v33 }
 0x738   :  { %v4191_v26 = vpop.eup %4190 }
 0x739   :  { %v4193_v28 = vpop.eup %4192  ;;  %v2914_v55 = vadd.f32 1.0, %v4191_v26 }
 0x73a   :  { %v4195_v24 = vpop.eup %4194  ;;  %v2926_v14 = vadd.f32 1.0, %v4193_v28 }
 0x73b   :  { %v4197_v10 = vpop.eup %4196  ;;  %v2915_v57 = vadd.f32 1.0, %v4195_v24  ;;  %4198 = vrcp.f32 %v2914_v55 }
 0x73c   :  { %v2927_v30 = vadd.f32 1.0, %v4197_v10  ;;  %4200 = vrcp.f32 %v2926_v14 }
 0x73d   :  { %4202 = vrcp.f32 %v2915_v57 }
 0x748   :  { %v4199_v55 = vpop.eup %4198 }
 0x749   :  { %v4201_v10 = vpop.eup %4200 }
 0x74a   :  { %v4203_v54 = vpop.eup %4202  ;;  %v2946_v14 = vmul.f32 %v4201_v10, %v8390_v17  ;;  %v11031_v10 = vld [vmem:[#allocation208_spill] sm:$0xff] }
 0x767   :  { %v2832_v9 = vpop.f32.mrf.mxu0  ;;  %v2903_v49 = vpop.f32.mrf.mxu1 }
 0x768   :  { %v2833_v26 = vadd.f32 %v2832_v9, %v723_v50  ;;  %v2904_v28 = vadd.f32 %v2903_v49, %v836_v44 }
 0x769   :  { %v2834_v24 = vpop.f32.mrf.mxu0  ;;  %v2905_v38 = vpop.f32.mrf.mxu1 }
 0x76a   :  { %v3918_v0 = vmul.f32 -1.442695, %v2833_v26  ;;  %4204 = vtanh.f32 %v2904_v28  ;;  %v2835_v52 = vadd.f32 %v2834_v24, %v725_v39  ;;  %v2906_v5 = vadd.f32 %v2905_v38, %v838_v2 }
 0x76b   :  { %4206 = vrcp.f32 %v2927_v30 }
 0x76c   :  { %4208 = vpow2.f32 %v3918_v0  ;;  %v3919_v36 = vmul.f32 -1.442695, %v2835_v52 }
 0x76d   :  { %4210 = vtanh.f32 %v2906_v5  ;;  %v11028_v5 = vld [vmem:[#allocation205_spill] sm:$0xff] }
 0x76e   :  { %4212 = vpow2.f32 %v3919_v36  ;;  %v11029_v36 = vld [vmem:[#allocation206_spill] sm:$0xff] }
 0x777   :  { %v4205_v15 = vpop.eup %4204 }
 0x778   :  { %v4207_v18 = vpop.eup %4206  ;;  %v2948_v50 = vmul.f32 %v4205_v15, %v4199_v55  ;;  %v11030_v55 = vld [vmem:[#allocation207_spill] sm:$0xff] }
 0x779   :  { %v4209_v57 = vpop.eup %4208  ;;  %v2947_v38 = vmul.f32 %v4207_v18, %v8394_v19  ;;  %v11011_v19 = vld [vmem:[#allocation196_spill] sm:$0xff]  ;;  %v11032_v18 = vld [vmem:[#allocation209_spill] sm:$0xff] }
 0x77a   :  { %v4211_v44 = vpop.eup %4210  ;;  %v2938_v9 = vadd.f32 1.0, %v4209_v57  ;;  %v8884_v49 = vadd.f32 %v2948_v50, %v2946_v14  ;;  %v11033_v14 = vld [vmem:[#allocation210_spill] sm:$0xff]  ;;  %v11034_v50 = vld [vmem:[#allocation211_spill] sm:$0xff]  ;;  %v11035_v57 = vld [vmem:[#allocation212_spill] sm:$0xff] }
 0x77b   :  { %v4213_v39 = vpop.eup %4212  ;;  %v2949_v30 = vmul.f32 %v4211_v44, %v4203_v54  ;;  %v11027_v54 = vld [vmem:[#allocation204_spill] sm:$0xff]  ;;  %v11036_v44 = vld [vmem:[#allocation213_spill] sm:$0xff] }
 0x77c   :  { %4214 = vrcp.f32 %v2938_v9  ;;  %v2939_v52 = vadd.f32 1.0, %v4213_v39  ;;  %v11037_v9 = vld [vmem:[#allocation214_spill] sm:$0xff]  ;;  %v11038_v39 = vld [vmem:[#allocation215_spill] sm:$0xff] }
 0x77d   :  { %4216 = vtanh.f32 %v8884_v49  ;;  %v8888_v2 = vadd.f32 %v2949_v30, %v2947_v38  ;;  %v11039_v38 = vld [vmem:[#allocation216_spill] sm:$0xff]  ;;  %v11040_v30 = vld [vmem:[#allocation217_spill] sm:$0xff] }
 0x77e   :  { %4218 = vrcp.f32 %v2939_v52  ;;  %v11041_v52 = vld [vmem:[#allocation218_spill] sm:$0xff] }
 0x77f   :  { %4220 = vtanh.f32 %v8888_v2 }
 0x789   :  { %v4215_v17 = vpop.eup %4214 }
 0x78a   :  { %v4217_v15 = vpop.eup %4216 }
 0x78b   :  { %v4219_v26 = vpop.eup %4218  ;;  %v8891_v0 = vmul.f32 %v4217_v15, %v4215_v17  ;;  %v11042_v17 = vld [vmem:[#allocation219_spill] sm:$0xff]  ;;  %v11043_v15 = vld [vmem:[#allocation220_spill] sm:$0xff] }
 0x78c   :  { %v4221_v28 = vpop.eup %4220 }
 0x78d   :  { %v2955_v24 = vmul.f32 %v4221_v28, %v4219_v26  ;;  %v11044_v26 = vld [vmem:[#allocation221_spill] sm:$0xff]  ;;  %v11045_v28 = vld [vmem:[#allocation222_spill] sm:$0xff] }
 0x78f   :  { %3028 = vmatprep.mubr.f32.mxu0 %v2955_v24  ;;  %3099 = vmatprep.mubr.f32.mxu1 %v2955_v24 }
 0x790   :  { %3029 = vmatmul.mubr.f32.vlgmr.msra.gmra.mxu0 %v8891_v0  ;;  %3100 = vmatmul.mubr.f32.vlgmr.msra.gmra.mxu1 %v8891_v0 }
 0x791   :  { %3107 = vmatpush1.msra.mxu0 %v8401_v47  ;;  %3178 = vmatpush1.msra.mxu1 %v8404_v45  ;;  %v11012_v47 = vld [vmem:[#allocation197_spill] sm:$0xff]  ;;  %v11013_v45 = vld [vmem:[#allocation198_spill] sm:$0xff] }
 0x792   :  { %3108 = vmatprep.subr.mxu0 %v8407_v4  ;;  %3170 = vmatprep.mubr.f32.mxu0 %v2955_v24  ;;  %v11014_v4 = vld [vmem:[#allocation199_spill] sm:$0xff] }
 0x793   :  { %3179 = vmatprep.subr.mxu1 %v8410_v53  ;;  %3241 = vmatprep.mubr.f32.mxu1 %v2955_v24  ;;  %v11015_v53 = vld [vmem:[#allocation200_spill] sm:$0xff]  ;;  %v11046_v24 = vld [vmem:[#allocation223_spill] sm:$0xff] }
 0x794   :  { %3109 = vmatpush1.msra.mxu0 %v8413_v27  ;;  %3180 = vmatpush1.msra.mxu1 %v8416_v23  ;;  %v11016_v27 = vld [vmem:[#allocation111_spill] sm:$0xff]  ;;  %v11017_v23 = vld [vmem:[#allocation112_spill] sm:$0xff] }
 0x795   :  { %3110 = vmatprep.subr.mxu0 %v8419_v16  ;;  %3181 = vmatprep.subr.mxu1 %v8422_v8  ;;  %v11018_v16 = vld [vmem:[#allocation117_spill] sm:$0xff]  ;;  %v11019_v8 = vld [vmem:[#allocation118_spill] sm:$0xff] }
 0x796   :  { %3111 = vmatpush1.msra.mxu0 %v8425_v42  ;;  %3182 = vmatpush1.msra.mxu1 %v8428_v61  ;;  %v11020_v42 = vld [vmem:[#allocation169_spill] sm:$0xff]  ;;  %v11021_v61 = vld [vmem:[#allocation170_spill] sm:$0xff] }
 0x797   :  { %3112 = vmatprep.subr.mxu0 %v8431_v62  ;;  %3183 = vmatprep.subr.mxu1 %v8434_v20  ;;  %v11022_v62 = vld [vmem:[#allocation171_spill] sm:$0xff]  ;;  %v11023_v20 = vld [vmem:[#allocation172_spill] sm:$0xff] }
 0x798   :  { %3113 = vmatpush1.msra.mxu0 %v8437_v59  ;;  %3184 = vmatpush1.msra.mxu1 %v8440_v63  ;;  %v11024_v59 = vld [vmem:[#allocation201_spill] sm:$0xff]  ;;  %v11025_v63 = vld [vmem:[#allocation202_spill] sm:$0xff] }
 0x799   :  { %3114 = vmatprep.subr.mxu0 %v8443_v51  ;;  %3185 = vmatprep.subr.mxu1 %v11011_v19  ;;  %v11026_v51 = vld [vmem:[#allocation203_spill] sm:$0xff]  ;;  %v11047_v19 = vld [vmem:[#allocation224_spill] sm:$0xff] }
 0x79a   :  { %3115 = vmatpush1.msra.mxu0 %v11012_v47  ;;  %3186 = vmatpush1.msra.mxu1 %v11013_v45  ;;  %v11048_v47 = vld [vmem:[#allocation225_spill] sm:$0xff]  ;;  %v11049_v45 = vld [vmem:[#allocation226_spill] sm:$0xff] }
 0x79b   :  { %3116 = vmatprep.subr.mxu0 %v11014_v4  ;;  %3187 = vmatprep.subr.mxu1 %v11015_v53  ;;  %v11050_v4 = vld [vmem:[#allocation227_spill] sm:$0xff]  ;;  %v11051_v53 = vld [vmem:[#allocation228_spill] sm:$0xff] }
 0x79c   :  { %3117 = vmatpush1.msra.mxu0 %v11016_v27  ;;  %3188 = vmatpush1.msra.mxu1 %v11017_v23  ;;  %v11052_v27 = vld [vmem:[#allocation229_spill] sm:$0xff]  ;;  %v11053_v23 = vld [vmem:[#allocation230_spill] sm:$0xff] }
 0x79d   :  { %3118 = vmatprep.subr.mxu0 %v11018_v16  ;;  %3189 = vmatprep.subr.mxu1 %v11019_v8  ;;  %v11054_v16 = vld [vmem:[#allocation231_spill] sm:$0xff]  ;;  %v11055_v8 = vld [vmem:[#allocation232_spill] sm:$0xff] }
 0x79e   :  { %3119 = vmatpush1.msra.mxu0 %v11020_v42  ;;  %3190 = vmatpush1.msra.mxu1 %v11021_v61  ;;  %v11056_v42 = vld [vmem:[#allocation233_spill] sm:$0xff]  ;;  %v11057_v61 = vld [vmem:[#allocation234_spill] sm:$0xff] }
 0x79f   :  { %3120 = vmatprep.subr.mxu0 %v11022_v62  ;;  %3191 = vmatprep.subr.mxu1 %v11023_v20  ;;  %v11058_v62 = vld [vmem:[#allocation9_spill] sm:$0xff]  ;;  %v11059_v20 = vld [vmem:[#allocation10_spill] sm:$0xff] }
 0x7a0   :  { %3121 = vmatpush1.msra.mxu0 %v11024_v59  ;;  %3192 = vmatpush1.msra.mxu1 %v11025_v63  ;;  %v11060_v59 = vld [vmem:[#allocation11_spill] sm:$0xff]  ;;  %v11061_v63 = vld [vmem:[#allocation12_spill] sm:$0xff] }
 0x7a1   :  { %3122 = vmatprep.subr.mxu0 %v11026_v51  ;;  %3193 = vmatprep.subr.mxu1 %v11027_v54  ;;  %v11062_v51 = vld [vmem:[#allocation13_spill] sm:$0xff]  ;;  %v11063_v54 = vld [vmem:[#allocation14_spill] sm:$0xff] }
 0x7a2   :  { %3123 = vmatpush1.msra.mxu0 %v11028_v5  ;;  %3194 = vmatpush1.msra.mxu1 %v11029_v36  ;;  %v8969_v5 = vld [vmem:[#allocation3 + $0x7e8] sm:$0xff]  ;;  %v8972_v36 = vld [vmem:[#allocation3 + $0x7f8] sm:$0xff] }
 0x7a3   :  { %3124 = vmatprep.subr.mxu0 %v11030_v55  ;;  %3195 = vmatprep.subr.mxu1 %v11031_v10  ;;  %v8975_v55 = vld [vmem:[#allocation3 + $0x7e0] sm:$0xff]  ;;  %v8996_v10 = vld [vmem:[#allocation3 + $0x778] sm:$0xff] }
 0x7a4   :  { %3125 = vmatpush1.msra.mxu0 %v11032_v18  ;;  %3196 = vmatpush1.msra.mxu1 %v11033_v14  ;;  %v8999_v18 = vld [vmem:[#allocation3 + $0x760] sm:$0xff]  ;;  %v9002_v14 = vld [vmem:[#allocation3 + $0x770] sm:$0xff] }
 0x7a5   :  { %3126 = vmatprep.subr.mxu0 %v11034_v50  ;;  %3197 = vmatprep.subr.mxu1 %v11035_v57  ;;  %v9005_v50 = vld [vmem:[#allocation3 + $0x728] sm:$0xff]  ;;  %v9008_v57 = vld [vmem:[#allocation3 + $0x738] sm:$0xff] }
 0x7a6   :  { %3127 = vmatpush1.msra.mxu0 %v11036_v44  ;;  %3198 = vmatpush1.msra.mxu1 %v11037_v9  ;;  %v9011_v44 = vld [vmem:[#allocation3 + $0x720] sm:$0xff]  ;;  %v9014_v9 = vld [vmem:[#allocation3 + $0x730] sm:$0xff] }
 0x7a7   :  { %3128 = vmatprep.subr.mxu0 %v11038_v39  ;;  %3199 = vmatprep.subr.mxu1 %v11039_v38  ;;  %v9017_v39 = vld [vmem:[#allocation3 + $0x6e8] sm:$0xff]  ;;  %v9020_v38 = vld [vmem:[#allocation3 + $0x6f8] sm:$0xff] }
 0x7a8   :  { %3129 = vmatpush1.msra.mxu0 %v11040_v30  ;;  %3200 = vmatpush1.msra.mxu1 %v11041_v52  ;;  %v9023_v30 = vld [vmem:[#allocation3 + $0x6e0] sm:$0xff]  ;;  %v9026_v52 = vld [vmem:[#allocation3 + $0x6f0] sm:$0xff] }
 0x7a9   :  { %3130 = vmatprep.subr.mxu0 %v11042_v17  ;;  %3201 = vmatprep.subr.mxu1 %v11043_v15  ;;  %v9029_v17 = vld [vmem:[#allocation3 + $0x6a8] sm:$0xff]  ;;  %v9032_v15 = vld [vmem:[#allocation3 + $0x6b8] sm:$0xff] }
 0x7aa   :  { %3131 = vmatpush1.msra.mxu0 %v11044_v26  ;;  %3202 = vmatpush1.msra.mxu1 %v11045_v28  ;;  %v9035_v26 = vld [vmem:[#allocation3 + $0x6a0] sm:$0xff]  ;;  %v9038_v28 = vld [vmem:[#allocation3 + $0x6b0] sm:$0xff] }
 0x7ab   :  { %3132 = vmatprep.subr.mxu0 %v11046_v24  ;;  %3203 = vmatprep.subr.mxu1 %v11047_v19  ;;  %v9041_v24 = vld [vmem:[#allocation3 + $0x668] sm:$0xff]  ;;  %v9044_v19 = vld [vmem:[#allocation3 + $0x678] sm:$0xff] }
 0x7ac   :  { %3133 = vmatpush1.msra.mxu0 %v11048_v47  ;;  %3204 = vmatpush1.msra.mxu1 %v11049_v45  ;;  %v9047_v47 = vld [vmem:[#allocation3 + $0x660] sm:$0xff]  ;;  %v9050_v45 = vld [vmem:[#allocation3 + $0x670] sm:$0xff] }
 0x7ad   :  { %3134 = vmatprep.subr.mxu0 %v11050_v4  ;;  %3205 = vmatprep.subr.mxu1 %v11051_v53  ;;  %v9053_v4 = vld [vmem:[#allocation3 + $0x628] sm:$0xff]  ;;  %v9056_v53 = vld [vmem:[#allocation3 + $0x638] sm:$0xff] }
 0x7ae   :  { %3135 = vmatpush1.msra.mxu0 %v11052_v27  ;;  %3206 = vmatpush1.msra.mxu1 %v11053_v23  ;;  %v9059_v27 = vld [vmem:[#allocation3 + $0x620] sm:$0xff]  ;;  %v9062_v23 = vld [vmem:[#allocation3 + $0x630] sm:$0xff] }
 0x7af   :  { %3136 = vmatprep.subr.mxu0 %v11054_v16  ;;  %3207 = vmatprep.subr.mxu1 %v11055_v8  ;;  %v9065_v16 = vld [vmem:[#allocation3 + $0x5e8] sm:$0xff]  ;;  %v9068_v8 = vld [vmem:[#allocation3 + $0x5f8] sm:$0xff] }
 0x7b0   :  { %3137 = vmatpush1.msra.mxu0 %v11056_v42  ;;  %3208 = vmatpush1.msra.mxu1 %v11057_v61  ;;  %11064 = vst [vmem:[#allocation29_spill] sm:$0xff] %v9065_v16  ;;  %11065 = vst [vmem:[#allocation30_spill] sm:$0xff] %v9068_v8  ;;  %v9071_v42 = vld [vmem:[#allocation3 + $0x5e0] sm:$0xff]  ;;  %v9074_v61 = vld [vmem:[#allocation3 + $0x5f0] sm:$0xff] }
 0x7b1   :  { %3138 = vmatprep.subr.mxu0 %v11058_v62  ;;  %3209 = vmatprep.subr.mxu1 %v11059_v20  ;;  %11066 = vst [vmem:[#allocation31_spill] sm:$0xff] %v9071_v42  ;;  %11067 = vst [vmem:[#allocation32_spill] sm:$0xff] %v9074_v61  ;;  %v9077_v62 = vld [vmem:[#allocation3 + $0x5a8] sm:$0xff]  ;;  %v9080_v20 = vld [vmem:[#allocation3 + $0x5b8] sm:$0xff] }
 0x7b2   :  { %3139 = vmatpush2.msra.mxu0 %v11060_v59  ;;  %3210 = vmatpush2.msra.mxu1 %v11061_v63  ;;  %11068 = vst [vmem:[#allocation33_spill] sm:$0xff] %v9077_v62  ;;  %11069 = vst [vmem:[#allocation34_spill] sm:$0xff] %v9080_v20  ;;  %v9083_v59 = vld [vmem:[#allocation3 + $0x5a0] sm:$0xff]  ;;  %v9086_v63 = vld [vmem:[#allocation3 + $0x5b0] sm:$0xff] }
 0x7b3   :  { %3140 = vmatprep.subr.mxu0 %v11062_v51  ;;  %3211 = vmatprep.subr.mxu1 %v11063_v54  ;;  %11070 = vst [vmem:[#allocation35_spill] sm:$0xff] %v9083_v59  ;;  %11071 = vst [vmem:[#allocation36_spill] sm:$0xff] %v9086_v63  ;;  %v9089_v51 = vld [vmem:[#allocation3 + $0x568] sm:$0xff]  ;;  %v9092_v54 = vld [vmem:[#allocation3 + $0x578] sm:$0xff] }
 0x7b4   :  { %3141 = vmatpush2.msra.mxu0 %v8605_v3  ;;  %3212 = vmatpush2.msra.mxu1 %v8608_v46  ;;  %v8978_v46 = vld [vmem:[#allocation3 + $0x7f0] sm:$0xff]  ;;  %v8993_v3 = vld [vmem:[#allocation3 + $0x768] sm:$0xff]  ;;  %11072 = vst [vmem:[#allocation37_spill] sm:$0xff] %v9089_v51  ;;  %11073 = vst [vmem:[#allocation99_spill] sm:$0xff] %v9092_v54 }
 0x7b5   :  { %3142 = vmatprep.subr.mxu0 %v8611_v25  ;;  %3213 = vmatprep.subr.mxu1 %v8614_v43  ;;  %v8981_v25 = vld [vmem:[#allocation3 + $0x7a8] sm:$0xff]  ;;  %v8984_v43 = vld [vmem:[#allocation3 + $0x7b8] sm:$0xff] }
 0x7b6   :  { %3143 = vmatpush2.msra.mxu0 %v8617_v21  ;;  %3214 = vmatpush2.msra.mxu1 %v8620_v22  ;;  %v8987_v21 = vld [vmem:[#allocation3 + $0x7a0] sm:$0xff]  ;;  %v8990_v22 = vld [vmem:[#allocation3 + $0x7b0] sm:$0xff] }
 0x7b7   :  { %3144 = vmatprep.subr.mxu0 %v8969_v5  ;;  %3215 = vmatprep.subr.mxu1 %v8972_v36 }
 0x7b8   :  { %3145 = vmatpush2.msra.mxu0 %v8975_v55  ;;  %3216 = vmatpush2.msra.mxu1 %v8978_v46 }
 0x7b9   :  { %3146 = vmatprep.subr.mxu0 %v8981_v25  ;;  %3217 = vmatprep.subr.mxu1 %v8984_v43 }
 0x7ba   :  { %3147 = vmatpush2.msra.mxu0 %v8987_v21  ;;  %3218 = vmatpush2.msra.mxu1 %v8990_v22 }
 0x7bb   :  { %3148 = vmatprep.subr.mxu0 %v8993_v3  ;;  %3219 = vmatprep.subr.mxu1 %v8996_v10 }
 0x7bc   :  { %3149 = vmatpush2.msra.mxu0 %v8999_v18  ;;  %3220 = vmatpush2.msra.mxu1 %v9002_v14 }
 0x7bd   :  { %3150 = vmatprep.subr.mxu0 %v9005_v50  ;;  %3221 = vmatprep.subr.mxu1 %v9008_v57 }
 0x7be   :  { %3151 = vmatpush2.msra.mxu0 %v9011_v44  ;;  %3222 = vmatpush2.msra.mxu1 %v9014_v9 }
 0x7bf   :  { %3152 = vmatprep.subr.mxu0 %v9017_v39  ;;  %3223 = vmatprep.subr.mxu1 %v9020_v38 }
 0x7c0   :  { %3153 = vmatpush2.msra.mxu0 %v9023_v30  ;;  %3224 = vmatpush2.msra.mxu1 %v9026_v52 }
 0x7c1   :  { %3154 = vmatprep.subr.mxu0 %v9029_v17  ;;  %3225 = vmatprep.subr.mxu1 %v9032_v15 }
 0x7c2   :  { %3155 = vmatpush2.msra.mxu0 %v9035_v26  ;;  %3226 = vmatpush2.msra.mxu1 %v9038_v28 }
 0x7c3   :  { %3156 = vmatprep.subr.mxu0 %v9041_v24  ;;  %3227 = vmatprep.subr.mxu1 %v9044_v19 }
 0x7c4   :  { %3157 = vmatpush2.msra.mxu0 %v9047_v47  ;;  %3228 = vmatpush2.msra.mxu1 %v9050_v45 }
 0x7c5   :  { %3158 = vmatprep.subr.mxu0 %v9053_v4  ;;  %3229 = vmatprep.subr.mxu1 %v9056_v53 }
 0x7c6   :  { %3159 = vmatpush2.msra.mxu0 %v9059_v27  ;;  %3230 = vmatpush2.msra.mxu1 %v9062_v23 }
 0x7c7   :  { %3160 = vmatprep.subr.mxu0 %v9065_v16  ;;  %3231 = vmatprep.subr.mxu1 %v9068_v8  ;;  %v5065_v8 = vld [vmem:[#allocation3 + $0x450] sm:$0xff]  ;;  %v5067_v16 = vld [vmem:[#allocation3 + $0x418] sm:$0xff] }
 0x7c8   :  { %3161 = vmatpush2.msra.mxu0 %v9071_v42  ;;  %3232 = vmatpush2.msra.mxu1 %v9074_v61  ;;  %v5061_v61 = vld [vmem:[#allocation3 + $0x490] sm:$0xff]  ;;  %v5063_v42 = vld [vmem:[#allocation3 + $0x458] sm:$0xff] }
 0x7c9   :  { %3162 = vmatprep.subr.mxu0 %v9077_v62  ;;  %3233 = vmatprep.subr.mxu1 %v9080_v20  ;;  %v9095_v62 = vld [vmem:[#allocation3 + $0x560] sm:$0xff]  ;;  %v9098_v20 = vld [vmem:[#allocation3 + $0x570] sm:$0xff] }
 0x7ca   :  { %3163 = vmatpush2.msra.mxu0 %v9083_v59  ;;  %3234 = vmatpush2.msra.mxu1 %v9086_v63  ;;  %11074 = vst [vmem:[#allocation100_spill] sm:$0xff] %v9095_v62  ;;  %11075 = vst [vmem:[#allocation105_spill] sm:$0xff] %v9098_v20  ;;  %v9101_v59 = vld [vmem:[#allocation3 + $0x528] sm:$0xff]  ;;  %v9104_v63 = vld [vmem:[#allocation3 + $0x538] sm:$0xff] }
 0x7cb   :  { %3164 = vmatprep.subr.mxu0 %v9089_v51  ;;  %3235 = vmatprep.subr.mxu1 %v9092_v54  ;;  %11076 = vst [vmem:[#allocation106_spill] sm:$0xff] %v9101_v59  ;;  %11077 = vst [vmem:[#allocation123_spill] sm:$0xff] %v9104_v63  ;;  %v9107_v51 = vld [vmem:[#allocation3 + $0x520] sm:$0xff]  ;;  %v9110_v54 = vld [vmem:[#allocation3 + $0x530] sm:$0xff] }
 0x7cc   :  { %3165 = vmatpush2.msra.mxu0 %v9095_v62  ;;  %3236 = vmatpush2.msra.mxu1 %v9098_v20  ;;  %11078 = vst [vmem:[#allocation124_spill] sm:$0xff] %v9107_v51  ;;  %11079 = vst [vmem:[#allocation129_spill] sm:$0xff] %v9110_v54  ;;  %v9113_v62 = vld [vmem:[#allocation3 + $0x4e8] sm:$0xff]  ;;  %v9116_v20 = vld [vmem:[#allocation3 + $0x4f8] sm:$0xff] }
 0x7cd   :  { %3166 = vmatprep.subr.mxu0 %v9101_v59  ;;  %3237 = vmatprep.subr.mxu1 %v9104_v63  ;;  %11080 = vst [vmem:[#allocation130_spill] sm:$0xff] %v9113_v62  ;;  %11081 = vst [vmem:[#allocation173_spill] sm:$0xff] %v9116_v20  ;;  %v9119_v59 = vld [vmem:[#allocation3 + $0x4e0] sm:$0xff]  ;;  %v9122_v63 = vld [vmem:[#allocation3 + $0x4f0] sm:$0xff] }
 0x7ce   :  { %3167 = vmatpush2.msra.mxu0 %v9107_v51  ;;  %3238 = vmatpush2.msra.mxu1 %v9110_v54  ;;  %11082 = vst [vmem:[#allocation174_spill] sm:$0xff] %v9119_v59  ;;  %11083 = vst [vmem:[#allocation175_spill] sm:$0xff] %v9122_v63  ;;  %v5058_v54 = vld [vmem:[#allocation3 + $0x488] sm:$0xff]  ;;  %v5059_v51 = vld [vmem:[#allocation3 + $0x498] sm:$0xff] }
 0x7cf   :  { %3168 = vmatprep.subr.mxu0 %v9113_v62  ;;  %3239 = vmatprep.subr.mxu1 %v9116_v20  ;;  %v5060_v62 = vld [vmem:[#allocation3 + $0x480] sm:$0xff]  ;;  %v5062_v20 = vld [vmem:[#allocation3 + $0x448] sm:$0xff] }
 0x7d0   :  { %3169 = vmatpush2.msra.mxu0 %v9119_v59  ;;  %3240 = vmatpush2.msra.mxu1 %v9122_v63  ;;  %v5064_v59 = vld [vmem:[#allocation3 + $0x440] sm:$0xff]  ;;  %v5066_v63 = vld [vmem:[#allocation3 + $0x408] sm:$0xff] }
 0x7d1   :  { %3171 = vmatmul.mubr.f32.vlgmr.msra.gmra.mxu0 %v8891_v0  ;;  %3242 = vmatmul.mubr.f32.vlgmr.msra.gmra.mxu1 %v8891_v0  ;;  %v5068_v0 = vld [vmem:[#allocation3 + $0x400] sm:$0xff] }
 0x7d2   :  { %3304 = vmatprep.subr.mxu0 %v5058_v54  ;;  %3375 = vmatprep.subr.mxu1 %v5059_v51  ;;  %v5069_v54 = vld [vmem:[#allocation3 + $0x410] sm:$0xff]  ;;  %v5070_v51 = vld [vmem:[#allocation3 + $0x3c8] sm:$0xff] }
 0x7d3   :  { %3305 = vmatpush1.msra.mxu0 %v5060_v62  ;;  %3376 = vmatpush1.msra.mxu1 %v5061_v61  ;;  %v5071_v62 = vld [vmem:[#allocation3 + $0x3d8] sm:$0xff]  ;;  %v5072_v61 = vld [vmem:[#allocation3 + $0x3c0] sm:$0xff] }
 0x7d4   :  { %3306 = vmatprep.subr.mxu0 %v5062_v20  ;;  %3377 = vmatprep.subr.mxu1 %v5063_v42  ;;  %v5073_v20 = vld [vmem:[#allocation3 + $0x3d0] sm:$0xff]  ;;  %v5074_v42 = vld [vmem:[#allocation3 + $0x388] sm:$0xff] }
 0x7d5   :  { %3307 = vmatpush1.msra.mxu0 %v5064_v59  ;;  %3378 = vmatpush1.msra.mxu1 %v5065_v8  ;;  %v5075_v59 = vld [vmem:[#allocation3 + $0x398] sm:$0xff]  ;;  %v5076_v8 = vld [vmem:[#allocation3 + $0x380] sm:$0xff] }
 0x7d6   :  { %3308 = vmatprep.subr.mxu0 %v5066_v63  ;;  %3379 = vmatprep.subr.mxu1 %v5067_v16  ;;  %v5077_v63 = vld [vmem:[#allocation3 + $0x390] sm:$0xff]  ;;  %v5078_v16 = vld [vmem:[#allocation3 + $0x348] sm:$0xff] }
 0x7d7   :  { %3309 = vmatpush1.msra.mxu0 %v5068_v0  ;;  %3380 = vmatpush1.msra.mxu1 %v5069_v54  ;;  %v5079_v0 = vld [vmem:[#allocation3 + $0x358] sm:$0xff]  ;;  %v5080_v54 = vld [vmem:[#allocation3 + $0x340] sm:$0xff] }
 0x7d8   :  { %3310 = vmatprep.subr.mxu0 %v5070_v51  ;;  %3381 = vmatprep.subr.mxu1 %v5071_v62  ;;  %v5081_v51 = vld [vmem:[#allocation3 + $0x350] sm:$0xff]  ;;  %v5082_v62 = vld [vmem:[#allocation3 + $0x308] sm:$0xff] }
 0x7d9   :  { %3311 = vmatpush1.msra.mxu0 %v5072_v61  ;;  %3382 = vmatpush1.msra.mxu1 %v5073_v20  ;;  %v5083_v61 = vld [vmem:[#allocation3 + $0x318] sm:$0xff]  ;;  %v5084_v20 = vld [vmem:[#allocation3 + $0x300] sm:$0xff] }
 0x7da   :  { %3312 = vmatprep.subr.mxu0 %v5074_v42  ;;  %3383 = vmatprep.subr.mxu1 %v5075_v59  ;;  %v5085_v42 = vld [vmem:[#allocation3 + $0x310] sm:$0xff]  ;;  %v5086_v59 = vld [vmem:[#allocation3 + $0x2c8] sm:$0xff] }
 0x7db   :  { %3313 = vmatpush1.msra.mxu0 %v5076_v8  ;;  %3384 = vmatpush1.msra.mxu1 %v5077_v63  ;;  %v5087_v8 = vld [vmem:[#allocation3 + $0x2d8] sm:$0xff]  ;;  %v5088_v63 = vld [vmem:[#allocation3 + $0x2c0] sm:$0xff] }
 0x7dc   :  { %3314 = vmatprep.subr.mxu0 %v5078_v16  ;;  %3385 = vmatprep.subr.mxu1 %v5079_v0  ;;  %v5089_v16 = vld [vmem:[#allocation3 + $0x2d0] sm:$0xff]  ;;  %v5090_v0 = vld [vmem:[#allocation3 + $0x288] sm:$0xff] }
 0x7dd   :  { %3315 = vmatpush1.msra.mxu0 %v5080_v54  ;;  %3386 = vmatpush1.msra.mxu1 %v5081_v51  ;;  %v5091_v54 = vld [vmem:[#allocation3 + $0x298] sm:$0xff]  ;;  %v5092_v51 = vld [vmem:[#allocation3 + $0x280] sm:$0xff] }
 0x7de   :  { %3316 = vmatprep.subr.mxu0 %v5082_v62  ;;  %3387 = vmatprep.subr.mxu1 %v5083_v61  ;;  %v5093_v62 = vld [vmem:[#allocation3 + $0x290] sm:$0xff]  ;;  %v5094_v61 = vld [vmem:[#allocation3 + $0x248] sm:$0xff] }
 0x7df   :  { %3317 = vmatpush1.msra.mxu0 %v5084_v20  ;;  %3388 = vmatpush1.msra.mxu1 %v5085_v42  ;;  %v5095_v20 = vld [vmem:[#allocation3 + $0x258] sm:$0xff]  ;;  %v5096_v42 = vld [vmem:[#allocation3 + $0x240] sm:$0xff] }
 0x7e0   :  { %3318 = vmatprep.subr.mxu0 %v5086_v59  ;;  %3389 = vmatprep.subr.mxu1 %v5087_v8  ;;  %v5097_v59 = vld [vmem:[#allocation3 + $0x250] sm:$0xff]  ;;  %v5098_v8 = vld [vmem:[#allocation3 + $0x208] sm:$0xff] }
 0x7e1   :  { %3319 = vmatpush1.msra.mxu0 %v5088_v63  ;;  %3390 = vmatpush1.msra.mxu1 %v5089_v16  ;;  %v5099_v63 = vld [vmem:[#allocation3 + $0x218] sm:$0xff]  ;;  %v5100_v16 = vld [vmem:[#allocation3 + $0x200] sm:$0xff] }
 0x7e2   :  { %3320 = vmatprep.subr.mxu0 %v5090_v0  ;;  %3391 = vmatprep.subr.mxu1 %v5091_v54  ;;  %v5101_v0 = vld [vmem:[#allocation3 + $0x210] sm:$0xff]  ;;  %v5102_v54 = vld [vmem:[#allocation3 + $0x1c8] sm:$0xff] }
 0x7e3   :  { %3321 = vmatpush1.msra.mxu0 %v5092_v51  ;;  %3392 = vmatpush1.msra.mxu1 %v5093_v62  ;;  %v5103_v51 = vld [vmem:[#allocation3 + $0x1d8] sm:$0xff]  ;;  %v5104_v62 = vld [vmem:[#allocation3 + $0x1c0] sm:$0xff] }
 0x7e4   :  { %3322 = vmatprep.subr.mxu0 %v5094_v61  ;;  %3393 = vmatprep.subr.mxu1 %v5095_v20  ;;  %v5105_v61 = vld [vmem:[#allocation3 + $0x1d0] sm:$0xff]  ;;  %v5106_v20 = vld [vmem:[#allocation3 + $0x188] sm:$0xff] }
 0x7e5   :  { %3323 = vmatpush1.msra.mxu0 %v5096_v42  ;;  %3394 = vmatpush1.msra.mxu1 %v5097_v59  ;;  %v5107_v42 = vld [vmem:[#allocation3 + $0x198] sm:$0xff]  ;;  %v5108_v59 = vld [vmem:[#allocation3 + $0x180] sm:$0xff] }
 0x7e6   :  { %3324 = vmatprep.subr.mxu0 %v5098_v8  ;;  %3395 = vmatprep.subr.mxu1 %v5099_v63  ;;  %v5109_v8 = vld [vmem:[#allocation3 + $0x190] sm:$0xff]  ;;  %v5110_v63 = vld [vmem:[#allocation3 + $0x148] sm:$0xff] }
 0x7e7   :  { %3325 = vmatpush1.msra.mxu0 %v5100_v16  ;;  %3396 = vmatpush1.msra.mxu1 %v5101_v0  ;;  %v5111_v16 = vld [vmem:[#allocation3 + $0x158] sm:$0xff]  ;;  %v5112_v0 = vld [vmem:[#allocation3 + $0x140] sm:$0xff] }
 0x7e8   :  { %3326 = vmatprep.subr.mxu0 %v5102_v54  ;;  %3397 = vmatprep.subr.mxu1 %v5103_v51  ;;  %v5113_v54 = vld [vmem:[#allocation3 + $0x150] sm:$0xff]  ;;  %v5114_v51 = vld [vmem:[#allocation3 + $0x108] sm:$0xff] }
 0x7e9   :  { %3327 = vmatpush1.msra.mxu0 %v5104_v62  ;;  %3398 = vmatpush1.msra.mxu1 %v5105_v61  ;;  %v5115_v62 = vld [vmem:[#allocation3 + $0x118] sm:$0xff]  ;;  %v5116_v61 = vld [vmem:[#allocation3 + $0x100] sm:$0xff] }
 0x7ea   :  { %3328 = vmatprep.subr.mxu0 %v5106_v20  ;;  %3399 = vmatprep.subr.mxu1 %v5107_v42  ;;  %v5117_v20 = vld [vmem:[#allocation3 + $0x110] sm:$0xff]  ;;  %v5118_v42 = vld [vmem:[#allocation3 + $0xc8] sm:$0xff] }
 0x7eb   :  { %3329 = vmatpush1.msra.mxu0 %v5108_v59  ;;  %3400 = vmatpush1.msra.mxu1 %v5109_v8  ;;  %v5119_v59 = vld [vmem:[#allocation3 + $0xd8] sm:$0xff]  ;;  %v5120_v8 = vld [vmem:[#allocation3 + $0xc0] sm:$0xff] }
 0x7ec   :  { %3330 = vmatprep.subr.mxu0 %v5110_v63  ;;  %3401 = vmatprep.subr.mxu1 %v5111_v16  ;;  %v5121_v63 = vld [vmem:[#allocation3 + $0xd0] sm:$0xff]  ;;  %v5122_v16 = vld [vmem:[#allocation3 + $0x888] sm:$0xff] }
 0x7ed   :  { %3331 = vmatpush1.msra.mxu0 %v5112_v0  ;;  %3402 = vmatpush1.msra.mxu1 %v5113_v54  ;;  %v5123_v0 = vld [vmem:[#allocation3 + $0x898] sm:$0xff]  ;;  %v5124_v54 = vld [vmem:[#allocation3 + $0x880] sm:$0xff] }
 0x7ee   :  { %3332 = vmatprep.subr.mxu0 %v5114_v51  ;;  %3403 = vmatprep.subr.mxu1 %v5115_v62  ;;  %v5125_v51 = vld [vmem:[#allocation3 + $0x890] sm:$0xff]  ;;  %v5126_v62 = vld [vmem:[#allocation3 + $0x848] sm:$0xff] }
 0x7ef   :  { %3333 = vmatpush1.msra.mxu0 %v5116_v61  ;;  %3404 = vmatpush1.msra.mxu1 %v5117_v20  ;;  %v5127_v61 = vld [vmem:[#allocation3 + $0x858] sm:$0xff]  ;;  %v5128_v20 = vld [vmem:[#allocation3 + $0x840] sm:$0xff] }
 0x7f0   :  { %3334 = vmatprep.subr.mxu0 %v5118_v42  ;;  %3405 = vmatprep.subr.mxu1 %v5119_v59  ;;  %v5129_v42 = vld [vmem:[#allocation3 + $0x850] sm:$0xff]  ;;  %v5130_v59 = vld [vmem:[#allocation3 + $0x808] sm:$0xff] }
 0x7f1   :  { %3335 = vmatpush1.msra.mxu0 %v5120_v8  ;;  %3406 = vmatpush1.msra.mxu1 %v5121_v63  ;;  %v5131_v8 = vld [vmem:[#allocation3 + $0x818] sm:$0xff]  ;;  %v5132_v63 = vld [vmem:[#allocation3 + $0x800] sm:$0xff] }
 0x7f2   :  { %3336 = vmatprep.subr.mxu0 %v5122_v16  ;;  %3407 = vmatprep.subr.mxu1 %v5123_v0  ;;  %v5133_v16 = vld [vmem:[#allocation3 + $0x810] sm:$0xff]  ;;  %v5134_v0 = vld [vmem:[#allocation3 + $0x7c8] sm:$0xff] }
 0x7f3   :  { %3337 = vmatpush2.msra.mxu0 %v5124_v54  ;;  %3408 = vmatpush2.msra.mxu1 %v5125_v51  ;;  %v5135_v54 = vld [vmem:[#allocation3 + $0x7d8] sm:$0xff]  ;;  %v5136_v51 = vld [vmem:[#allocation3 + $0x7c0] sm:$0xff] }
 0x7f4   :  { %3338 = vmatprep.subr.mxu0 %v5126_v62  ;;  %3409 = vmatprep.subr.mxu1 %v5127_v61  ;;  %v5137_v62 = vld [vmem:[#allocation3 + $0x7d0] sm:$0xff]  ;;  %v5138_v61 = vld [vmem:[#allocation3 + $0x788] sm:$0xff] }
 0x7f5   :  { %3339 = vmatpush2.msra.mxu0 %v5128_v20  ;;  %3410 = vmatpush2.msra.mxu1 %v5129_v42  ;;  %v5139_v20 = vld [vmem:[#allocation3 + $0x798] sm:$0xff]  ;;  %v5140_v42 = vld [vmem:[#allocation3 + $0x780] sm:$0xff] }
 0x7f6   :  { %3340 = vmatprep.subr.mxu0 %v5130_v59  ;;  %3411 = vmatprep.subr.mxu1 %v5131_v8  ;;  %v5141_v59 = vld [vmem:[#allocation3 + $0x790] sm:$0xff]  ;;  %v5142_v8 = vld [vmem:[#allocation3 + $0x748] sm:$0xff] }
 0x7f7   :  { %3341 = vmatpush2.msra.mxu0 %v5132_v63  ;;  %3412 = vmatpush2.msra.mxu1 %v5133_v16  ;;  %v5143_v63 = vld [vmem:[#allocation3 + $0x758] sm:$0xff]  ;;  %v5144_v16 = vld [vmem:[#allocation3 + $0x740] sm:$0xff] }
 0x7f8   :  { %3342 = vmatprep.subr.mxu0 %v5134_v0  ;;  %3413 = vmatprep.subr.mxu1 %v5135_v54  ;;  %v5145_v0 = vld [vmem:[#allocation3 + $0x750] sm:$0xff]  ;;  %v5146_v54 = vld [vmem:[#allocation3 + $0x708] sm:$0xff] }
 0x7f9   :  { %3343 = vmatpush2.msra.mxu0 %v5136_v51  ;;  %3414 = vmatpush2.msra.mxu1 %v5137_v62  ;;  %v5147_v51 = vld [vmem:[#allocation3 + $0x718] sm:$0xff]  ;;  %v5148_v62 = vld [vmem:[#allocation3 + $0x700] sm:$0xff] }
 0x7fa   :  { %3344 = vmatprep.subr.mxu0 %v5138_v61  ;;  %3415 = vmatprep.subr.mxu1 %v5139_v20  ;;  %v5149_v61 = vld [vmem:[#allocation3 + $0x710] sm:$0xff]  ;;  %v5150_v20 = vld [vmem:[#allocation3 + $0x6c8] sm:$0xff] }
 0x7fb   :  { %3345 = vmatpush2.msra.mxu0 %v5140_v42  ;;  %3416 = vmatpush2.msra.mxu1 %v5141_v59  ;;  %v5151_v42 = vld [vmem:[#allocation3 + $0x6d8] sm:$0xff]  ;;  %v5152_v59 = vld [vmem:[#allocation3 + $0x6c0] sm:$0xff] }
 0x7fc   :  { %3346 = vmatprep.subr.mxu0 %v5142_v8  ;;  %3417 = vmatprep.subr.mxu1 %v5143_v63  ;;  %v5153_v8 = vld [vmem:[#allocation3 + $0x6d0] sm:$0xff]  ;;  %v5154_v63 = vld [vmem:[#allocation3 + $0x688] sm:$0xff] }
 0x7fd   :  { %3347 = vmatpush2.msra.mxu0 %v5144_v16  ;;  %3418 = vmatpush2.msra.mxu1 %v5145_v0  ;;  %v5155_v16 = vld [vmem:[#allocation3 + $0x698] sm:$0xff] }
 0x7fe   :  { %3348 = vmatprep.subr.mxu0 %v5146_v54  ;;  %3419 = vmatprep.subr.mxu1 %v5147_v51  ;;  %v11099_v54 = vld [vmem:[#allocation148_spill] sm:$0xff] }
 0x7ff   :  { %3349 = vmatpush2.msra.mxu0 %v5148_v62  ;;  %3420 = vmatpush2.msra.mxu1 %v5149_v61  ;;  %v11100_v61 = vld [vmem:[#allocation153_spill] sm:$0xff] }
 0x800   :  { %3350 = vmatprep.subr.mxu0 %v5150_v20  ;;  %3421 = vmatprep.subr.mxu1 %v5151_v42 }
 0x801   :  { %3351 = vmatpush2.msra.mxu0 %v5152_v59  ;;  %3422 = vmatpush2.msra.mxu1 %v5153_v8  ;;  %v11101_v59 = vld [vmem:[#allocation154_spill] sm:$0xff] }
 0x802   :  { %3352 = vmatprep.subr.mxu0 %v5154_v63  ;;  %3423 = vmatprep.subr.mxu1 %v5155_v16 }
 0x803   :  { %3353 = vmatpush2.msra.mxu0 %v8775_v48  ;;  %3424 = vmatpush2.msra.mxu1 %v8778_v58  ;;  %v11084_v48 = vld [vmem:[#allocation15_spill] sm:$0xff]  ;;  %v11085_v58 = vld [vmem:[#allocation16_spill] sm:$0xff] }
 0x804   :  { %3354 = vmatprep.subr.mxu0 %v8781_v34  ;;  %3425 = vmatprep.subr.mxu1 %v8784_v6  ;;  %v11086_v34 = vld [vmem:[#allocation17_spill] sm:$0xff]  ;;  %v11087_v6 = vld [vmem:[#allocation18_spill] sm:$0xff] }
 0x805   :  { %3355 = vmatpush2.msra.mxu0 %v8787_v1  ;;  %3426 = vmatpush2.msra.mxu1 %v8790_v40  ;;  %v11088_v1 = vld [vmem:[#allocation19_spill] sm:$0xff]  ;;  %v11089_v40 = vld [vmem:[#allocation20_spill] sm:$0xff] }
 0x806   :  { %3356 = vmatprep.subr.mxu0 %v8793_v32  ;;  %3427 = vmatprep.subr.mxu1 %v8796_v11  ;;  %v11090_v32 = vld [vmem:[#allocation21_spill] sm:$0xff]  ;;  %v11091_v11 = vld [vmem:[#allocation22_spill] sm:$0xff] }
 0x807   :  { %3357 = vmatpush2.msra.mxu0 %v8799_v13  ;;  %3428 = vmatpush2.msra.mxu1 %v8802_v60  ;;  %v11092_v13 = vld [vmem:[#allocation23_spill] sm:$0xff]  ;;  %v11093_v60 = vld [vmem:[#allocation24_spill] sm:$0xff] }
 0x808   :  { %3358 = vmatprep.subr.mxu0 %v8805_v35  ;;  %3429 = vmatprep.subr.mxu1 %v8808_v31  ;;  %v11094_v35 = vld [vmem:[#allocation25_spill] sm:$0xff]  ;;  %v11095_v31 = vld [vmem:[#allocation26_spill] sm:$0xff] }
 0x809   :  { %3359 = vmatpush2.msra.mxu0 %v8811_v7  ;;  %3430 = vmatpush2.msra.mxu1 %v8814_v56  ;;  %v11096_v7 = vld [vmem:[#allocation27_spill] sm:$0xff]  ;;  %v11097_v56 = vld [vmem:[#allocation28_spill] sm:$0xff] }
 0x80a   :  { %3360 = vmatprep.subr.mxu0 %v8817_v37  ;;  %3431 = vmatprep.subr.mxu1 %v8820_v29 }
 0x80b   :  { %3361 = vmatpush2.msra.mxu0 %v8823_v41  ;;  %3432 = vmatpush2.msra.mxu1 %v8826_v12  ;;  %v11098_v12 = vld [vmem:[#allocation147_spill] sm:$0xff] }
 0x80c   :  { %3362 = vmatprep.subr.mxu0 %v11084_v48  ;;  %3433 = vmatprep.subr.mxu1 %v11085_v58 }
 0x80d   :  { %3363 = vmatpush2.msra.mxu0 %v11086_v34  ;;  %3434 = vmatpush2.msra.mxu1 %v11087_v6 }
 0x80e   :  { %3364 = vmatprep.subr.mxu0 %v11088_v1  ;;  %3435 = vmatprep.subr.mxu1 %v11089_v40 }
 0x80f   :  { %3365 = vmatpush2.msra.mxu0 %v11090_v32  ;;  %3436 = vmatpush2.msra.mxu1 %v11091_v11 }
 0x810   :  { %3366 = vmatprep.subr.mxu0 %v11092_v13  ;;  %3437 = vmatprep.subr.mxu1 %v11093_v60  ;;  %v11102_v13 = vld [vmem:[#allocation189_spill] sm:$0xff] }
 0x811   :  { %3367 = vmatpush2.msra.mxu0 %v11094_v35  ;;  %3438 = vmatpush2.msra.mxu1 %v11095_v31  ;;  %v11103_v60 = vld [vmem:[#allocation181_spill] sm:$0xff]  ;;  %v11104_v31 = vld [vmem:[#allocation190_spill] sm:$0xff] }
 0x812   :  { %3446 = vmatprep.subr.mxu0 %v11096_v7  ;;  %3517 = vmatprep.subr.mxu1 %v11097_v56  ;;  %v729_v35 = vadd.f32 %v11103_v60, %v11102_v13  ;;  %v11105_v7 = vld [vmem:[#allocation182_spill] sm:$0xff] }
 0x813   :  { %v842_v56 = vadd.f32 %v11105_v7, %v11104_v31 }
 0x850   :  { %v3030_v37 = vpop.f32.mrf.mxu0  ;;  %v3101_v29 = vpop.f32.mrf.mxu1 }
 0x851   :  { %v3031_v0 = vadd.f32 %v3030_v37, %v11098_v12  ;;  %v3102_v51 = vadd.f32 %v3101_v29, %v11099_v54  ;;  %v11106_v37 = vld [vmem:[#allocation191_spill] sm:$0xff] }
 0x852   :  { %v3032_v41 = vpop.f32.mrf.mxu0  ;;  %v3103_v62 = vpop.f32.mrf.mxu1  ;;  %v11107_v29 = vld [vmem:[#allocation183_spill] sm:$0xff] }
 0x853   :  { %v3033_v20 = vadd.f32 %v3032_v41, %v11100_v61  ;;  %v3920_v42 = vmul.f32 -1.442695, %v3031_v0  ;;  %v3104_v8 = vadd.f32 %v3103_v62, %v11101_v59  ;;  %v3922_v63 = vmul.f32 -1.442695, %v3102_v51  ;;  %v11108_v51 = vld [vmem:[#allocation184_spill] sm:$0xff] }
 0x854   :  { %v731_v41 = vadd.f32 %v11107_v29, %v11106_v37  ;;  %v844_v62 = vadd.f32 %v11108_v51, %v6229_v33 }
 0x855   :  { %v3921_v16 = vmul.f32 -1.442695, %v3033_v20  ;;  %4222 = vpow2.f32 %v3920_v42  ;;  %v3923_v48 = vmul.f32 -1.442695, %v3104_v8 }
 0x856   :  { %4224 = vpow2.f32 %v3922_v63 }
 0x857   :  { %4226 = vpow2.f32 %v3921_v16 }
 0x858   :  { %4228 = vpow2.f32 %v3923_v48 }
 0x862   :  { %v4223_v58 = vpop.eup %4222 }
 0x863   :  { %v4225_v34 = vpop.eup %4224  ;;  %v3254_v1 = vadd.f32 1.0, %v4223_v58 }
 0x864   :  { %v4227_v6 = vpop.eup %4226  ;;  %v3266_v32 = vadd.f32 1.0, %v4225_v34 }
 0x865   :  { %v4229_v40 = vpop.eup %4228  ;;  %v3255_v11 = vadd.f32 1.0, %v4227_v6  ;;  %4230 = vrcp.f32 %v3254_v1 }
 0x866   :  { %v3267_v12 = vadd.f32 1.0, %v4229_v40  ;;  %4232 = vrcp.f32 %v3266_v32 }
 0x867   :  { %4234 = vrcp.f32 %v3255_v11 }
 0x872   :  { %v4231_v58 = vpop.eup %4230 }
 0x873   :  { %v4233_v34 = vpop.eup %4232 }
 0x874   :  { %v4235_v6 = vpop.eup %4234  ;;  %v3286_v32 = vmul.f32 %v4233_v34, %v8884_v49  ;;  %v5163_v34 = vld [vmem:[#allocation3 + $0x438] sm:$0xff] }
 0x891   :  { %v3172_v0 = vpop.f32.mrf.mxu0  ;;  %v3243_v54 = vpop.f32.mrf.mxu1 }
 0x892   :  { %v3173_v61 = vadd.f32 %v3172_v0, %v729_v35  ;;  %v3244_v20 = vadd.f32 %v3243_v54, %v842_v56 }
 0x893   :  { %v3174_v42 = vpop.f32.mrf.mxu0  ;;  %v3245_v59 = vpop.f32.mrf.mxu1 }
 0x894   :  { %v3924_v8 = vmul.f32 -1.442695, %v3173_v61  ;;  %4236 = vtanh.f32 %v3244_v20  ;;  %v3175_v63 = vadd.f32 %v3174_v42, %v731_v41  ;;  %v3246_v16 = vadd.f32 %v3245_v59, %v844_v62  ;;  %v5157_v59 = vld [vmem:[#allocation3 + $0x4b0] sm:$0xff] }
 0x895   :  { %4238 = vrcp.f32 %v3267_v12 }
 0x896   :  { %4240 = vpow2.f32 %v3924_v8  ;;  %v3925_v48 = vmul.f32 -1.442695, %v3175_v63  ;;  %v5158_v8 = vld [vmem:[#allocation3 + $0x468] sm:$0xff]  ;;  %v5159_v63 = vld [vmem:[#allocation3 + $0x478] sm:$0xff] }
 0x897   :  { %4242 = vtanh.f32 %v3246_v16  ;;  %v5160_v16 = vld [vmem:[#allocation3 + $0x460] sm:$0xff] }
 0x898   :  { %4244 = vpow2.f32 %v3925_v48  ;;  %v5161_v48 = vld [vmem:[#allocation3 + $0x470] sm:$0xff] }
 0x8a1   :  { %v4237_v1 = vpop.eup %4236 }
 0x8a2   :  { %v4239_v40 = vpop.eup %4238  ;;  %v3288_v60 = vmul.f32 %v4237_v1, %v4231_v58  ;;  %v5162_v58 = vld [vmem:[#allocation3 + $0x428] sm:$0xff]  ;;  %v5165_v1 = vld [vmem:[#allocation3 + $0x430] sm:$0xff] }
 0x8a3   :  { %v4241_v11 = vpop.eup %4240  ;;  %v3287_v41 = vmul.f32 %v4239_v40, %v8888_v2  ;;  %v5156_v2 = vld [vmem:[#allocation3 + $0x4a0] sm:$0xff]  ;;  %v5166_v40 = vld [vmem:[#allocation3 + $0x3e8] sm:$0xff] }
 0x8a4   :  { %v4243_v35 = vpop.eup %4242  ;;  %v3278_v7 = vadd.f32 1.0, %v4241_v11  ;;  %v9172_v56 = vadd.f32 %v3288_v60, %v3286_v32  ;;  %v5167_v32 = vld [vmem:[#allocation3 + $0x3f8] sm:$0xff]  ;;  %v5168_v60 = vld [vmem:[#allocation3 + $0x3e0] sm:$0xff]  ;;  %v5169_v11 = vld [vmem:[#allocation3 + $0x3f0] sm:$0xff] }
 0x8a5   :  { %v4245_v29 = vpop.eup %4244  ;;  %v3289_v12 = vmul.f32 %v4243_v35, %v4235_v6  ;;  %v5164_v6 = vld [vmem:[#allocation3 + $0x420] sm:$0xff]  ;;  %v5170_v35 = vld [vmem:[#allocation3 + $0x3a8] sm:$0xff] }
 0x8a6   :  { %4246 = vrcp.f32 %v3278_v7  ;;  %v3279_v0 = vadd.f32 1.0, %v4245_v29  ;;  %v5171_v7 = vld [vmem:[#allocation3 + $0x3b8] sm:$0xff]  ;;  %v5172_v29 = vld [vmem:[#allocation3 + $0x3a0] sm:$0xff] }
 0x8a7   :  { %4248 = vtanh.f32 %v9172_v56  ;;  %v9176_v54 = vadd.f32 %v3289_v12, %v3287_v41  ;;  %v5173_v41 = vld [vmem:[#allocation3 + $0x3b0] sm:$0xff]  ;;  %v5174_v12 = vld [vmem:[#allocation3 + $0x368] sm:$0xff] }
 0x8a8   :  { %4250 = vrcp.f32 %v3279_v0  ;;  %v5175_v0 = vld [vmem:[#allocation3 + $0x378] sm:$0xff] }
 0x8a9   :  { %4252 = vtanh.f32 %v9176_v54 }
 0x8b3   :  { %v4247_v49 = vpop.eup %4246 }
 0x8b4   :  { %v4249_v51 = vpop.eup %4248 }
 0x8b5   :  { %v4251_v62 = vpop.eup %4250  ;;  %v9179_v42 = vmul.f32 %v4249_v51, %v4247_v49  ;;  %v5176_v49 = vld [vmem:[#allocation3 + $0x360] sm:$0xff]  ;;  %v5177_v51 = vld [vmem:[#allocation3 + $0x370] sm:$0xff] }
 0x8b6   :  { %v4253_v61 = vpop.eup %4252 }
 0x8b7   :  { %v3295_v20 = vmul.f32 %v4253_v61, %v4251_v62  ;;  %v5178_v62 = vld [vmem:[#allocation3 + $0x328] sm:$0xff]  ;;  %v5179_v61 = vld [vmem:[#allocation3 + $0x338] sm:$0xff] }
 0x8b9   :  { %3368 = vmatprep.mubr.f32.mxu0 %v3295_v20  ;;  %3439 = vmatprep.mubr.f32.mxu1 %v3295_v20 }
 0x8ba   :  { %3369 = vmatmul.mubr.f32.vlgmr.msra.gmra.mxu0 %v9179_v42  ;;  %3440 = vmatmul.mubr.f32.vlgmr.msra.gmra.mxu1 %v9179_v42 }
 0x8bb   :  { %3447 = vmatpush1.msra.mxu0 %v5156_v2  ;;  %3518 = vmatpush1.msra.mxu1 %v5157_v59  ;;  %v5181_v2 = vld [vmem:[#allocation3 + $0x330] sm:$0xff]  ;;  %v5182_v59 = vld [vmem:[#allocation3 + $0x2e8] sm:$0xff] }
 0x8bc   :  { %3448 = vmatprep.subr.mxu0 %v5158_v8  ;;  %3510 = vmatprep.mubr.f32.mxu0 %v3295_v20  ;;  %v5183_v8 = vld [vmem:[#allocation3 + $0x2f8] sm:$0xff] }
 0x8bd   :  { %3519 = vmatprep.subr.mxu1 %v5159_v63  ;;  %3581 = vmatprep.mubr.f32.mxu1 %v3295_v20  ;;  %v5180_v20 = vld [vmem:[#allocation3 + $0x320] sm:$0xff] }
 0x8be   :  { %3449 = vmatpush1.msra.mxu0 %v5160_v16  ;;  %3520 = vmatpush1.msra.mxu1 %v5161_v48  ;;  %v5184_v63 = vld [vmem:[#allocation3 + $0x2e0] sm:$0xff]  ;;  %v5185_v16 = vld [vmem:[#allocation3 + $0x2f0] sm:$0xff]  ;;  %v5186_v48 = vld [vmem:[#allocation3 + $0x2a8] sm:$0xff] }
 0x8bf   :  { %3450 = vmatprep.subr.mxu0 %v5162_v58  ;;  %3521 = vmatprep.subr.mxu1 %v5163_v34  ;;  %v5187_v58 = vld [vmem:[#allocation3 + $0x2b8] sm:$0xff]  ;;  %v5188_v34 = vld [vmem:[#allocation3 + $0x2a0] sm:$0xff] }
 0x8c0   :  { %3451 = vmatpush1.msra.mxu0 %v5164_v6  ;;  %3522 = vmatpush1.msra.mxu1 %v5165_v1  ;;  %v5189_v6 = vld [vmem:[#allocation3 + $0x2b0] sm:$0xff]  ;;  %v5190_v1 = vld [vmem:[#allocation3 + $0x268] sm:$0xff] }
 0x8c1   :  { %3452 = vmatprep.subr.mxu0 %v5166_v40  ;;  %3523 = vmatprep.subr.mxu1 %v5167_v32  ;;  %v5191_v40 = vld [vmem:[#allocation3 + $0x278] sm:$0xff]  ;;  %v5192_v32 = vld [vmem:[#allocation3 + $0x260] sm:$0xff] }
 0x8c2   :  { %3453 = vmatpush1.msra.mxu0 %v5168_v60  ;;  %3524 = vmatpush1.msra.mxu1 %v5169_v11  ;;  %v5193_v60 = vld [vmem:[#allocation3 + $0x270] sm:$0xff]  ;;  %v5194_v11 = vld [vmem:[#allocation3 + $0x228] sm:$0xff] }
 0x8c3   :  { %3454 = vmatprep.subr.mxu0 %v5170_v35  ;;  %3525 = vmatprep.subr.mxu1 %v5171_v7  ;;  %v5195_v35 = vld [vmem:[#allocation3 + $0x238] sm:$0xff]  ;;  %v5196_v7 = vld [vmem:[#allocation3 + $0x220] sm:$0xff] }
 0x8c4   :  { %3455 = vmatpush1.msra.mxu0 %v5172_v29  ;;  %3526 = vmatpush1.msra.mxu1 %v5173_v41  ;;  %v5197_v29 = vld [vmem:[#allocation3 + $0x230] sm:$0xff]  ;;  %v5198_v41 = vld [vmem:[#allocation3 + $0x1e8] sm:$0xff] }
 0x8c5   :  { %3456 = vmatprep.subr.mxu0 %v5174_v12  ;;  %3527 = vmatprep.subr.mxu1 %v5175_v0  ;;  %v5199_v12 = vld [vmem:[#allocation3 + $0x1f8] sm:$0xff]  ;;  %v5200_v0 = vld [vmem:[#allocation3 + $0x1e0] sm:$0xff] }
 0x8c6   :  { %3457 = vmatpush1.msra.mxu0 %v5176_v49  ;;  %3528 = vmatpush1.msra.mxu1 %v5177_v51  ;;  %v5201_v49 = vld [vmem:[#allocation3 + $0x1f0] sm:$0xff]  ;;  %v5202_v51 = vld [vmem:[#allocation3 + $0x1a8] sm:$0xff] }
 0x8c7   :  { %3458 = vmatprep.subr.mxu0 %v5178_v62  ;;  %3529 = vmatprep.subr.mxu1 %v5179_v61  ;;  %v5203_v62 = vld [vmem:[#allocation3 + $0x1b8] sm:$0xff]  ;;  %v5204_v61 = vld [vmem:[#allocation3 + $0x1a0] sm:$0xff] }
 0x8c8   :  { %3459 = vmatpush1.msra.mxu0 %v5180_v20  ;;  %3530 = vmatpush1.msra.mxu1 %v5181_v2  ;;  %v5205_v20 = vld [vmem:[#allocation3 + $0x1b0] sm:$0xff]  ;;  %v5206_v2 = vld [vmem:[#allocation3 + $0x168] sm:$0xff] }
 0x8c9   :  { %3460 = vmatprep.subr.mxu0 %v5182_v59  ;;  %3531 = vmatprep.subr.mxu1 %v5183_v8  ;;  %v5207_v59 = vld [vmem:[#allocation3 + $0x178] sm:$0xff]  ;;  %v5208_v8 = vld [vmem:[#allocation3 + $0x160] sm:$0xff] }
 0x8ca   :  { %3461 = vmatpush1.msra.mxu0 %v5184_v63  ;;  %3532 = vmatpush1.msra.mxu1 %v5185_v16  ;;  %v5209_v63 = vld [vmem:[#allocation3 + $0x170] sm:$0xff]  ;;  %v5210_v16 = vld [vmem:[#allocation3 + $0x128] sm:$0xff] }
 0x8cb   :  { %3462 = vmatprep.subr.mxu0 %v5186_v48  ;;  %3533 = vmatprep.subr.mxu1 %v5187_v58  ;;  %v5211_v48 = vld [vmem:[#allocation3 + $0x138] sm:$0xff]  ;;  %v5212_v58 = vld [vmem:[#allocation3 + $0x120] sm:$0xff] }
 0x8cc   :  { %3463 = vmatpush1.msra.mxu0 %v5188_v34  ;;  %3534 = vmatpush1.msra.mxu1 %v5189_v6  ;;  %v5213_v34 = vld [vmem:[#allocation3 + $0x130] sm:$0xff]  ;;  %v5214_v6 = vld [vmem:[#allocation3 + $0xe8] sm:$0xff] }
 0x8cd   :  { %3464 = vmatprep.subr.mxu0 %v5190_v1  ;;  %3535 = vmatprep.subr.mxu1 %v5191_v40  ;;  %v5215_v1 = vld [vmem:[#allocation3 + $0xf8] sm:$0xff]  ;;  %v5216_v40 = vld [vmem:[#allocation3 + $0xe0] sm:$0xff] }
 0x8ce   :  { %3465 = vmatpush1.msra.mxu0 %v5192_v32  ;;  %3536 = vmatpush1.msra.mxu1 %v5193_v60  ;;  %v5217_v32 = vld [vmem:[#allocation3 + $0xf0] sm:$0xff]  ;;  %v5218_v60 = vld [vmem:[#allocation3 + $0x8a8] sm:$0xff] }
 0x8cf   :  { %3466 = vmatprep.subr.mxu0 %v5194_v11  ;;  %3537 = vmatprep.subr.mxu1 %v5195_v35  ;;  %v5219_v11 = vld [vmem:[#allocation3 + $0x8b8] sm:$0xff]  ;;  %v5220_v35 = vld [vmem:[#allocation3 + $0x8a0] sm:$0xff] }
 0x8d0   :  { %3467 = vmatpush1.msra.mxu0 %v5196_v7  ;;  %3538 = vmatpush1.msra.mxu1 %v5197_v29  ;;  %v5221_v7 = vld [vmem:[#allocation3 + $0x8b0] sm:$0xff]  ;;  %v5222_v29 = vld [vmem:[#allocation3 + $0x868] sm:$0xff] }
 0x8d1   :  { %3468 = vmatprep.subr.mxu0 %v5198_v41  ;;  %3539 = vmatprep.subr.mxu1 %v5199_v12  ;;  %v5223_v41 = vld [vmem:[#allocation3 + $0x878] sm:$0xff]  ;;  %v5224_v12 = vld [vmem:[#allocation3 + $0x860] sm:$0xff] }
 0x8d2   :  { %3469 = vmatpush1.msra.mxu0 %v5200_v0  ;;  %3540 = vmatpush1.msra.mxu1 %v5201_v49  ;;  %v5225_v0 = vld [vmem:[#allocation3 + $0x870] sm:$0xff]  ;;  %v5226_v49 = vld [vmem:[#allocation3 + $0x828] sm:$0xff] }
 0x8d3   :  { %3470 = vmatprep.subr.mxu0 %v5202_v51  ;;  %3541 = vmatprep.subr.mxu1 %v5203_v62  ;;  %v5227_v51 = vld [vmem:[#allocation3 + $0x838] sm:$0xff]  ;;  %v5228_v62 = vld [vmem:[#allocation3 + $0x820] sm:$0xff] }
 0x8d4   :  { %3471 = vmatpush1.msra.mxu0 %v5204_v61  ;;  %3542 = vmatpush1.msra.mxu1 %v5205_v20  ;;  %v5229_v61 = vld [vmem:[#allocation3 + $0x830] sm:$0xff]  ;;  %v3661_v20 = vld [vmem:[#allocation5 + $0xc8] sm:$0xff] }
 0x8d5   :  { %3472 = vmatprep.subr.mxu0 %v5206_v2  ;;  %3543 = vmatprep.subr.mxu1 %v5207_v59  ;;  %v3645_v2 = vld [vmem:[#allocation5 + $0x48] sm:$0xff]  ;;  %v3660_v59 = vld [vmem:[#allocation5 + $0xc0] sm:$0xff] }
 0x8d6   :  { %3473 = vmatpush1.msra.mxu0 %v5208_v8  ;;  %3544 = vmatpush1.msra.mxu1 %v5209_v63  ;;  %v3644_v8 = vld [vmem:[#allocation5 + $0x40] sm:$0xff]  ;;  %v3659_v63 = vld [vmem:[#allocation5 + $0xb8] sm:$0xff] }
 0x8d7   :  { %3474 = vmatprep.subr.mxu0 %v5210_v16  ;;  %3545 = vmatprep.subr.mxu1 %v5211_v48  ;;  %v3643_v16 = vld [vmem:[#allocation5 + $0x38] sm:$0xff]  ;;  %v3658_v48 = vld [vmem:[#allocation5 + $0xb0] sm:$0xff] }
 0x8d8   :  { %3475 = vmatpush1.msra.mxu0 %v5212_v58  ;;  %3546 = vmatpush1.msra.mxu1 %v5213_v34  ;;  %v3642_v58 = vld [vmem:[#allocation5 + $0x30] sm:$0xff]  ;;  %v3657_v34 = vld [vmem:[#allocation5 + $0xa8] sm:$0xff] }
 0x8d9   :  { %3476 = vmatprep.subr.mxu0 %v5214_v6  ;;  %3547 = vmatprep.subr.mxu1 %v5215_v1  ;;  %v3641_v6 = vld [vmem:[#allocation5 + $0x28] sm:$0xff]  ;;  %v3656_v1 = vld [vmem:[#allocation5 + $0xa0] sm:$0xff] }
 0x8da   :  { %3477 = vmatpush1.msra.mxu0 %v5216_v40  ;;  %3548 = vmatpush1.msra.mxu1 %v5217_v32  ;;  %v3640_v40 = vld [vmem:[#allocation5 + $0x20] sm:$0xff]  ;;  %v3655_v32 = vld [vmem:[#allocation5 + $0x98] sm:$0xff] }
 0x8db   :  { %3478 = vmatprep.subr.mxu0 %v5218_v60  ;;  %3549 = vmatprep.subr.mxu1 %v5219_v11  ;;  %v3639_v60 = vld [vmem:[#allocation5 + $0x18] sm:$0xff]  ;;  %v3654_v11 = vld [vmem:[#allocation5 + $0x90] sm:$0xff] }
 0x8dc   :  { %3479 = vmatpush2.msra.mxu0 %v5220_v35  ;;  %3550 = vmatpush2.msra.mxu1 %v5221_v7  ;;  %v3638_v35 = vld [vmem:[#allocation5 + $0x10] sm:$0xff]  ;;  %v3653_v7 = vld [vmem:[#allocation5 + $0x88] sm:$0xff] }
 0x8dd   :  { %3480 = vmatprep.subr.mxu0 %v5222_v29  ;;  %3551 = vmatprep.subr.mxu1 %v5223_v41  ;;  %v3637_v29 = vld [vmem:[#allocation5 + $0x8] sm:$0xff]  ;;  %v3652_v41 = vld [vmem:[#allocation5 + $0x80] sm:$0xff] }
 0x8de   :  { %3481 = vmatpush2.msra.mxu0 %v5224_v12  ;;  %3552 = vmatpush2.msra.mxu1 %v5225_v0  ;;  %v3636_v12 = vld [vmem:[#allocation5] sm:$0xff]  ;;  %v3683_v0 = vld [vmem:[#allocation5 + $0x178] sm:$0xff] }
 0x8df   :  { %3482 = vmatprep.subr.mxu0 %v5226_v49  ;;  %3553 = vmatprep.subr.mxu1 %v5227_v51  ;;  %v3682_v49 = vld [vmem:[#allocation5 + $0x170] sm:$0xff]  ;;  %v3681_v51 = vld [vmem:[#allocation5 + $0x168] sm:$0xff] }
 0x8e0   :  { %3483 = vmatpush2.msra.mxu0 %v5228_v62  ;;  %3554 = vmatpush2.msra.mxu1 %v5229_v61  ;;  %v3680_v62 = vld [vmem:[#allocation5 + $0x160] sm:$0xff]  ;;  %v3679_v61 = vld [vmem:[#allocation5 + $0x158] sm:$0xff] }
 0x8e1   :  { %3484 = vmatprep.subr.mxu0 %v8969_v5  ;;  %3555 = vmatprep.subr.mxu1 %v8972_v36  ;;  %v11109_v5 = vld [vmem:[#allocation29_spill] sm:$0xff]  ;;  %v11110_v36 = vld [vmem:[#allocation30_spill] sm:$0xff] }
 0x8e2   :  { %3485 = vmatpush2.msra.mxu0 %v8975_v55  ;;  %3556 = vmatpush2.msra.mxu1 %v8978_v46  ;;  %v11111_v55 = vld [vmem:[#allocation31_spill] sm:$0xff]  ;;  %v11112_v46 = vld [vmem:[#allocation32_spill] sm:$0xff] }
 0x8e3   :  { %3486 = vmatprep.subr.mxu0 %v8981_v25  ;;  %3557 = vmatprep.subr.mxu1 %v8984_v43  ;;  %v11113_v25 = vld [vmem:[#allocation33_spill] sm:$0xff]  ;;  %v11114_v43 = vld [vmem:[#allocation34_spill] sm:$0xff] }
 0x8e4   :  { %3487 = vmatpush2.msra.mxu0 %v8987_v21  ;;  %3558 = vmatpush2.msra.mxu1 %v8990_v22  ;;  %v11115_v21 = vld [vmem:[#allocation35_spill] sm:$0xff]  ;;  %v11116_v22 = vld [vmem:[#allocation36_spill] sm:$0xff] }
 0x8e5   :  { %3488 = vmatprep.subr.mxu0 %v8993_v3  ;;  %3559 = vmatprep.subr.mxu1 %v8996_v10  ;;  %v11117_v3 = vld [vmem:[#allocation37_spill] sm:$0xff]  ;;  %v11118_v10 = vld [vmem:[#allocation99_spill] sm:$0xff] }
 0x8e6   :  { %3489 = vmatpush2.msra.mxu0 %v8999_v18  ;;  %3560 = vmatpush2.msra.mxu1 %v9002_v14  ;;  %v11119_v18 = vld [vmem:[#allocation100_spill] sm:$0xff]  ;;  %v11120_v14 = vld [vmem:[#allocation105_spill] sm:$0xff] }
 0x8e7   :  { %3490 = vmatprep.subr.mxu0 %v9005_v50  ;;  %3561 = vmatprep.subr.mxu1 %v9008_v57  ;;  %v11121_v50 = vld [vmem:[#allocation106_spill] sm:$0xff]  ;;  %v11122_v57 = vld [vmem:[#allocation123_spill] sm:$0xff] }
 0x8e8   :  { %3491 = vmatpush2.msra.mxu0 %v9011_v44  ;;  %3562 = vmatpush2.msra.mxu1 %v9014_v9  ;;  %v11123_v44 = vld [vmem:[#allocation124_spill] sm:$0xff]  ;;  %v11124_v9 = vld [vmem:[#allocation129_spill] sm:$0xff] }
 0x8e9   :  { %3492 = vmatprep.subr.mxu0 %v9017_v39  ;;  %3563 = vmatprep.subr.mxu1 %v9020_v38  ;;  %v11125_v39 = vld [vmem:[#allocation130_spill] sm:$0xff]  ;;  %v11126_v38 = vld [vmem:[#allocation173_spill] sm:$0xff] }
 0x8ea   :  { %3493 = vmatpush2.msra.mxu0 %v9023_v30  ;;  %3564 = vmatpush2.msra.mxu1 %v9026_v52  ;;  %v11127_v30 = vld [vmem:[#allocation174_spill] sm:$0xff]  ;;  %v11128_v52 = vld [vmem:[#allocation175_spill] sm:$0xff] }
 0x8eb   :  { %3494 = vmatprep.subr.mxu0 %v9029_v17  ;;  %3565 = vmatprep.subr.mxu1 %v9032_v15  ;;  %v11129_v17 = vmov 0.0   ;;  %v3667_v15 = vld [vmem:[#allocation5 + $0xf8] sm:$0xff] }
 0x8ec   :  { %3495 = vmatpush2.msra.mxu0 %v9035_v26  ;;  %3566 = vmatpush2.msra.mxu1 %v9038_v28  ;;  %v3651_v26 = vld [vmem:[#allocation5 + $0x78] sm:$0xff]  ;;  %v3666_v28 = vld [vmem:[#allocation5 + $0xf0] sm:$0xff] }
 0x8ed   :  { %3496 = vmatprep.subr.mxu0 %v9041_v24  ;;  %3567 = vmatprep.subr.mxu1 %v9044_v19  ;;  %v3650_v24 = vld [vmem:[#allocation5 + $0x70] sm:$0xff]  ;;  %v3665_v19 = vld [vmem:[#allocation5 + $0xe8] sm:$0xff] }
 0x8ee   :  { %3497 = vmatpush2.msra.mxu0 %v9047_v47  ;;  %3568 = vmatpush2.msra.mxu1 %v9050_v45  ;;  %v3649_v47 = vld [vmem:[#allocation5 + $0x68] sm:$0xff]  ;;  %v3664_v45 = vld [vmem:[#allocation5 + $0xe0] sm:$0xff] }
 0x8ef   :  { %3498 = vmatprep.subr.mxu0 %v9053_v4  ;;  %3569 = vmatprep.subr.mxu1 %v9056_v53  ;;  %v3648_v4 = vld [vmem:[#allocation5 + $0x60] sm:$0xff]  ;;  %v3663_v53 = vld [vmem:[#allocation5 + $0xd8] sm:$0xff] }
 0x8f0   :  { %3499 = vmatpush2.msra.mxu0 %v9059_v27  ;;  %3570 = vmatpush2.msra.mxu1 %v9062_v23  ;;  %v3647_v27 = vld [vmem:[#allocation5 + $0x58] sm:$0xff]  ;;  %v3662_v23 = vld [vmem:[#allocation5 + $0xd0] sm:$0xff] }
 0x8f1   :  { %3500 = vmatprep.subr.mxu0 %v11109_v5  ;;  %3571 = vmatprep.subr.mxu1 %v11110_v36  ;;  %v3678_v5 = vld [vmem:[#allocation5 + $0x150] sm:$0xff]  ;;  %v3677_v36 = vld [vmem:[#allocation5 + $0x148] sm:$0xff] }
 0x8f2   :  { %3501 = vmatpush2.msra.mxu0 %v11111_v55  ;;  %3572 = vmatpush2.msra.mxu1 %v11112_v46  ;;  %v3676_v55 = vld [vmem:[#allocation5 + $0x140] sm:$0xff]  ;;  %v3675_v46 = vld [vmem:[#allocation5 + $0x138] sm:$0xff] }
 0x8f3   :  { %3502 = vmatprep.subr.mxu0 %v11113_v25  ;;  %3573 = vmatprep.subr.mxu1 %v11114_v43  ;;  %v3674_v25 = vld [vmem:[#allocation5 + $0x130] sm:$0xff]  ;;  %v3673_v43 = vld [vmem:[#allocation5 + $0x128] sm:$0xff] }
 0x8f4   :  { %3503 = vmatpush2.msra.mxu0 %v11115_v21  ;;  %3574 = vmatpush2.msra.mxu1 %v11116_v22 }
 0x8f5   :  { %3504 = vmatprep.subr.mxu0 %v11117_v3  ;;  %3575 = vmatprep.subr.mxu1 %v11118_v10  ;;  %v11130_v10 = vld [vmem:[#allocation159_spill] sm:$0xff] }
 0x8f6   :  { %3505 = vmatpush2.msra.mxu0 %v11119_v18  ;;  %3576 = vmatpush2.msra.mxu1 %v11120_v14  ;;  %v11131_v14 = vld [vmem:[#allocation160_spill] sm:$0xff] }
 0x8f7   :  { %3506 = vmatprep.subr.mxu0 %v11121_v50  ;;  %3577 = vmatprep.subr.mxu1 %v11122_v57 }
 0x8f8   :  { %3507 = vmatpush2.msra.mxu0 %v11123_v44  ;;  %3578 = vmatpush2.msra.mxu1 %v11124_v9  ;;  %v11132_v44 = vld [vmem:[#allocation163_spill] sm:$0xff] }
 0x8f9   :  { %3508 = vmatprep.subr.mxu0 %v11125_v39  ;;  %3579 = vmatprep.subr.mxu1 %v11126_v38  ;;  %v11133_v38 = vld [vmem:[#allocation164_spill] sm:$0xff] }
 0x8fa   :  { %3509 = vmatpush2.msra.mxu0 %v11127_v30  ;;  %3580 = vmatpush2.msra.mxu1 %v11128_v52 }
 0x8fb   :  { %3511 = vmatmul.mubr.f32.vlgmr.msra.gmra.mxu0 %v9179_v42  ;;  %3582 = vmatmul.mubr.f32.vlgmr.msra.gmra.mxu1 %v9179_v42  ;;  %v3646_v42 = vld [vmem:[#allocation5 + $0x50] sm:$0xff] }
 0x8fc   :  { %3987 = vmatprep.subr.mxu1 %v11129_v17  ;;  %3935 = vmatprep.subr.mxu0 %v3667_v15 }
 0x8fd   :  { %3936 = vmatpush3.msra.mxu0 %v3651_v26  ;;  %3988 = vmatpush3.msra.mxu1 %v3683_v0 }
 0x8fe   :  { %3937 = vmatprep.subr.mxu0 %v3666_v28  ;;  %3989 = vmatprep.subr.mxu1 %v11129_v17 }
 0x8ff   :  { %3938 = vmatpush3.msra.mxu0 %v3650_v24  ;;  %3990 = vmatpush3.msra.mxu1 %v3682_v49 }
 0x900   :  { %3939 = vmatprep.subr.mxu0 %v3665_v19  ;;  %3991 = vmatprep.subr.mxu1 %v11129_v17 }
 0x901   :  { %3940 = vmatpush3.msra.mxu0 %v3649_v47  ;;  %3992 = vmatpush3.msra.mxu1 %v3681_v51 }
 0x902   :  { %3941 = vmatprep.subr.mxu0 %v3664_v45  ;;  %3993 = vmatprep.subr.mxu1 %v11129_v17 }
 0x903   :  { %3942 = vmatpush3.msra.mxu0 %v3648_v4  ;;  %3994 = vmatpush3.msra.mxu1 %v3680_v62 }
 0x904   :  { %3943 = vmatprep.subr.mxu0 %v3663_v53  ;;  %3995 = vmatprep.subr.mxu1 %v11129_v17 }
 0x905   :  { %3944 = vmatpush3.msra.mxu0 %v3647_v27  ;;  %3996 = vmatpush3.msra.mxu1 %v3679_v61  ;;  %v11134_v27 = vld [vmem:[#allocation185_spill] sm:$0xff] }
 0x906   :  { %3945 = vmatprep.subr.mxu0 %v3662_v23  ;;  %3997 = vmatprep.subr.mxu1 %v11129_v17  ;;  %v735_v23 = vadd.f32 %v11134_v27, %v11102_v13 }
 0x907   :  { %3946 = vmatpush3.msra.mxu0 %v3646_v42  ;;  %3998 = vmatpush3.msra.mxu1 %v3678_v5  ;;  %v11135_v42 = vld [vmem:[#allocation186_spill] sm:$0xff] }
 0x908   :  { %3947 = vmatprep.subr.mxu0 %v3661_v20  ;;  %3999 = vmatprep.subr.mxu1 %v11129_v17  ;;  %v848_v20 = vadd.f32 %v11135_v42, %v11104_v31 }
 0x909   :  { %3948 = vmatpush3.msra.mxu0 %v3645_v2  ;;  %4000 = vmatpush3.msra.mxu1 %v3677_v36  ;;  %v11136_v2 = vld [vmem:[#allocation187_spill] sm:$0xff] }
 0x90a   :  { %3949 = vmatprep.subr.mxu0 %v3660_v59  ;;  %4001 = vmatprep.subr.mxu1 %v11129_v17  ;;  %v737_v59 = vadd.f32 %v11136_v2, %v11106_v37 }
 0x90b   :  { %3950 = vmatpush3.msra.mxu0 %v3644_v8  ;;  %4002 = vmatpush3.msra.mxu1 %v3676_v55 }
 0x90c   :  { %3951 = vmatprep.subr.mxu0 %v3659_v63  ;;  %4003 = vmatprep.subr.mxu1 %v11129_v17 }
 0x90d   :  { %3952 = vmatpush3.msra.mxu0 %v3643_v16  ;;  %4004 = vmatpush3.msra.mxu1 %v3675_v46 }
 0x90e   :  { %3953 = vmatprep.subr.mxu0 %v3658_v48  ;;  %4005 = vmatprep.subr.mxu1 %v11129_v17  ;;  %v11137_v48 = vld [vmem:[#allocation188_spill] sm:$0xff] }
 0x90f   :  { %3954 = vmatpush3.msra.mxu0 %v3642_v58  ;;  %4006 = vmatpush3.msra.mxu1 %v3674_v25  ;;  %v850_v58 = vadd.f32 %v11137_v48, %v6229_v33 }
 0x910   :  { %3955 = vmatprep.subr.mxu0 %v3657_v34  ;;  %4007 = vmatprep.subr.mxu1 %v11129_v17 }
 0x911   :  { %3956 = vmatpush3.msra.mxu0 %v3641_v6  ;;  %4008 = vmatpush3.msra.mxu1 %v3673_v43 }
 0x912   :  { %3957 = vmatprep.subr.mxu0 %v3656_v1  ;;  %4009 = vmatprep.subr.mxu1 %v11129_v17 }
 0x913   :  { %3958 = vmatpush3.msra.mxu0 %v3640_v40  ;;  %4019 = vmatprep.mubr.msk.f32.mxu1 %vm5281_vm1, %v11129_v17 }
 0x914   :  { %3959 = vmatprep.subr.mxu0 %v3655_v32 }
 0x915   :  { %3960 = vmatpush3.msra.mxu0 %v3639_v60 }
 0x916   :  { %3961 = vmatprep.subr.mxu0 %v3654_v11 }
 0x917   :  { %3962 = vmatpush3.msra.mxu0 %v3638_v35 }
 0x918   :  { %3963 = vmatprep.subr.mxu0 %v3653_v7 }
 0x919   :  { %3964 = vmatpush3.msra.mxu0 %v3637_v29 }
 0x91a   :  { %3965 = vmatprep.subr.mxu0 %v3652_v41 }
 0x91b   :  { %3966 = vmatpush3.msra.mxu0 %v3636_v12 }
 0x97a   :  { %v3370_v21 = vpop.f32.mrf.mxu0  ;;  %v3441_v22 = vpop.f32.mrf.mxu1 }
 0x97b   :  { %v3371_v18 = vadd.f32 %v3370_v21, %v11130_v10  ;;  %v3442_v50 = vadd.f32 %v3441_v22, %v11131_v14  ;;  %v3670_v10 = vld [vmem:[#allocation5 + $0x110] sm:$0xff]  ;;  %v3668_v14 = vld [vmem:[#allocation5 + $0x100] sm:$0xff] }
 0x97c   :  { %v3372_v3 = vpop.f32.mrf.mxu0  ;;  %v3443_v57 = vpop.f32.mrf.mxu1 }
 0x97d   :  { %v3373_v9 = vadd.f32 %v3372_v3, %v11132_v44  ;;  %v3926_v39 = vmul.f32 -1.442695, %v3371_v18  ;;  %v3444_v30 = vadd.f32 %v3443_v57, %v11133_v38  ;;  %v3928_v52 = vmul.f32 -1.442695, %v3442_v50  ;;  %v3672_v3 = vld [vmem:[#allocation5 + $0x120] sm:$0xff]  ;;  %v3669_v18 = vld [vmem:[#allocation5 + $0x108] sm:$0xff] }
 0x97e   :  { %4010 = vmatpush3.msra.mxu1 %v3672_v3  ;;  %v3932_v57 = vld [vmem:[#allocation5 + $0x180] ss:$0 sm:$0xff] }
 0x97f   :  { %v3927_v15 = vmul.f32 -1.442695, %v3373_v9  ;;  %4254 = vpow2.f32 %v3926_v39  ;;  %v3929_v26 = vmul.f32 -1.442695, %v3444_v30  ;;  %4011 = vmatprep.subr.mxu1 %v11129_v17  ;;  %v3933_v30 = vld [vmem:[#allocation5 + $0x188] ss:$0 sm:$0xff] }
 0x980   :  { %4256 = vpow2.f32 %v3928_v52 }
 0x981   :  { %4258 = vpow2.f32 %v3927_v15 }
 0x982   :  { %4260 = vpow2.f32 %v3929_v26 }
 0x98c   :  { %v4255_v28 = vpop.eup %4254 }
 0x98d   :  { %v4257_v24 = vpop.eup %4256  ;;  %v3594_v47 = vadd.f32 1.0, %v4255_v28 }
 0x98e   :  { %v4259_v19 = vpop.eup %4258  ;;  %v3606_v4 = vadd.f32 1.0, %v4257_v24 }
 0x98f   :  { %v4261_v45 = vpop.eup %4260  ;;  %v3595_v53 = vadd.f32 1.0, %v4259_v19  ;;  %4262 = vrcp.f32 %v3594_v47  ;;  %v11138_v47 = vlaneseq }
 0x990   :  { %v3607_v8 = vadd.f32 1.0, %v4261_v45  ;;  %4264 = vrcp.f32 %v3606_v4 }
 0x991   :  { %4266 = vrcp.f32 %v3595_v53  ;;  %v3836_v45 = vand.u32 127, %v11138_v47 }
 0x993   :  { %vm3837_vm2 = vcmp.eq.s32.totalorder %v3836_v45, 1 }
 0x99c   :  { %v4263_v60 = vpop.eup %4262 }
 0x99d   :  { %v4265_v11 = vpop.eup %4264 }
 0x99e   :  { %v4267_v35 = vpop.eup %4266  ;;  %v3626_v29 = vmul.f32 %v4265_v11, %v9172_v56 }
 0x9bb   :  { %v3512_v63 = vpop.f32.mrf.mxu0  ;;  %v3583_v16 = vpop.f32.mrf.mxu1 }
 0x9bc   :  { %v3513_v34 = vadd.f32 %v3512_v63, %v735_v23  ;;  %v3584_v6 = vadd.f32 %v3583_v16, %v848_v20 }
 0x9bd   :  { %v3514_v1 = vpop.f32.mrf.mxu0  ;;  %v3585_v40 = vpop.f32.mrf.mxu1 }
 0x9be   :  { %v3930_v13 = vmul.f32 -1.442695, %v3513_v34  ;;  %4268 = vtanh.f32 %v3584_v6  ;;  %v3515_v32 = vadd.f32 %v3514_v1, %v737_v59  ;;  %v3586_v31 = vadd.f32 %v3585_v40, %v850_v58 }
 0x9bf   :  { %4270 = vrcp.f32 %v3607_v8 }
 0x9c0   :  { %4272 = vpow2.f32 %v3930_v13  ;;  %v3931_v37 = vmul.f32 -1.442695, %v3515_v32 }
 0x9c1   :  { %4274 = vtanh.f32 %v3586_v31 }
 0x9c2   :  { %4276 = vpow2.f32 %v3931_v37 }
 0x9cb   :  { %v4269_v7 = vpop.eup %4268 }
 0x9cc   :  { %v4271_v33 = vpop.eup %4270  ;;  %v3628_v41 = vmul.f32 %v4269_v7, %v4263_v60 }
 0x9cd   :  { %v4273_v12 = vpop.eup %4272  ;;  %v3627_v61 = vmul.f32 %v4271_v33, %v9176_v54  ;;  %v3671_v54 = vld [vmem:[#allocation5 + $0x118] sm:$0xff] }
 0x9ce   :  { %v4275_v0 = vpop.eup %4274  ;;  %v3618_v49 = vadd.f32 1.0, %v4273_v12  ;;  %v3630_v51 = vadd.f32 %v3628_v41, %v3626_v29  ;;  %4012 = vmatpush3.msra.mxu1 %v3671_v54 }
 0x9cf   :  { %v4277_v62 = vpop.eup %4276  ;;  %v3629_v5 = vmul.f32 %v4275_v0, %v4267_v35  ;;  %4013 = vmatprep.subr.mxu1 %v11129_v17 }
 0x9d0   :  { %4278 = vrcp.f32 %v3618_v49  ;;  %v3619_v36 = vadd.f32 1.0, %v4277_v62  ;;  %4014 = vmatpush3.msra.mxu1 %v3670_v10 }
 0x9d1   :  { %4280 = vtanh.f32 %v3630_v51  ;;  %v3631_v55 = vadd.f32 %v3629_v5, %v3627_v61  ;;  %4015 = vmatprep.subr.mxu1 %v11129_v17 }
 0x9d2   :  { %4282 = vrcp.f32 %v3619_v36  ;;  %4016 = vmatpush3.msra.mxu1 %v3669_v18 }
 0x9d3   :  { %4284 = vtanh.f32 %v3631_v55  ;;  %4017 = vmatprep.subr.mxu1 %v11129_v17 }
 0x9d4   :  { %4018 = vmatpush3.msra.mxu1 %v3668_v14 }
 0x9dd   :  { %v4279_v46 = vpop.eup %4278 }
 0x9de   :  { %v4281_v25 = vpop.eup %4280 }
 0x9df   :  { %v4283_v43 = vpop.eup %4282  ;;  %v3634_v21 = vmul.f32 %v4281_v25, %v4279_v46 }
 0x9e0   :  { %v4285_v56 = vpop.eup %4284 }
 0x9e1   :  { %v3635_v22 = vmul.f32 %v4285_v56, %v4283_v43 }
 0x9e3   :  { %3754 = vmatprep.mubr.f32.mxu0 %v3635_v22 }
 0x9e4   :  { %3755 = vmatmul.mubr.f32.vlgmr.msra.gmra.mxu0 %v3634_v21 }
 0xaa4   :  { %v3967_v50 = vpop.f32.mrf.mxu0 }
 0xaa6   :  { %v3968_v44 = vpop.f32.mrf.mxu0 }
 0xaa7   :  { %v3969_v9 = vadd.f32 %v3968_v44, %v3967_v50 }
 0xaa9   :  { %v3757_v39 = vadd.f32 %v3969_v9, %v3932_v57 }
 0xaab   :  { %v3760_v38 = vmax.f32 %v3757_v39, 0.0 }
 0xaad   :  { %4020 = vmatmul.mubr.f32.vlgmr.msra.gmra.mxu1 %v3760_v38 }
 0xb6d   :  { %v3831_v52 = vpop.f32.mrf.mxu1 }
 0xb6e   :  { %v3832_v15 = vadd.f32 %v3933_v30, %v3831_v52 }
 0xb6f   :  { %v4021_v26 = vpop.f32.mrf.mxu1 }
 0xb70   :  { %v3934_v28 = vmul.f32 -1.442695, %v3832_v15 }
 0xb72   :  { %4286 = vpow2.f32 %v3934_v28 }
 0xb7f   :  { %v4287_v24 = vpop.eup %4286 }
 0xb80   :  { %v3841_v19 = vadd.f32 1.0, %v4287_v24 }
 0xb82   :  { %4288 = vrcp.f32 %v3841_v19 }
 0xb8f   :  { %v4289_v17 = vpop.eup %4288 }
 0xb90   :  { %v3844_v4 = vsel %vm3837_vm2, %v4289_v17, %v3832_v15 }
 0xb91   :  { %3845 = vst [vmem:[%s9275_s3] sm:$0xff] %v3844_v4 }
 0xb92   :  { %3850 = vsyncpa [#allocation4], 1 }
 0xb93   :  { %3851 = vsyncpa [#allocation6], 1 }

</bundles_post_ra>
